<compile_context>
chip_gen: v7x
topology: tpu7x:2x2x1
jax: 0.10.0
libtpu: 0.0.40
codegen_flags: <defaults>
</compile_context>

<pallas_src>
import functools

import jax
import jax.numpy as jnp
from jax.experimental import pallas as pl
from jax.experimental.pallas import tpu as pltpu

# ----------------------------- configuration (opt) --------------------------
D_F = 32            # opt['feature_dim']
D_H = 32            # opt['hidden_dim']
N_SU = 24           # opt['source_user_num']  (shared users => == target_user_num)
N_TU = 24           # opt['target_user_num']
N_SI = 40           # opt['source_item_num']
N_TI = 56           # opt['target_item_num']
GNN_LAYERS = 2      # opt['GNN']  (GNN_LAYERS-1 DGCN layers + 1 Last layer)
LEAKY = 0.1         # opt['leakey']
CONDI_WEIGHT = 0.1
CONDI_NON_WEIGHT = 0.1
CONDI_CONDI_WEIGHT = 0.1


# ----------------------------- fused forward kernel -------------------------
def _drlcdr_kernel(
    # inputs
    s_uv_ref, s_vu_ref, t_uv_ref, t_vu_ref,
    s_user_ref, t_user_ref, s_item_ref, t_item_ref,
    s_share_ref, t_share_ref,
    wg_ref, bg_ref, wu_ref, bu_ref,
    # outputs
    s_luser_ref, s_litem_ref, t_luser_ref, t_litem_ref,
    kld_total_ref, s_condi_ref, t_condi_ref, st_kld_ref,
    *, idx):
    """Entire DRLCDR forward (eval mode) in one VMEM-resident kernel."""
    f32 = jnp.float32

    # ---- small building blocks ---------------------------------------------
    def mm_w(x, w):
        # feature-dim contraction (K = D_F = 32): bf16 operands, f32 accumulate.
        return jnp.dot(x.astype(jnp.bfloat16), w, preferred_element_type=f32)

    def mm_adj(adj, h):
        # graph aggregation (K = #users/#items, multiples of 8): keep f32.
        return jnp.dot(adj, h, preferred_element_type=f32)

    def leaky(y):
        return jnp.where(y >= 0.0, y, LEAKY * y)

    def gcn(i, x, adj):
        # leaky_relu(adj @ (x @ W) + b): both matmuls fused, h never hits HBM.
        h = mm_w(x, wg_ref[i])
        return leaky(mm_adj(adj, h) + bg_ref[i])

    def union(i, h, x, relu=False):
        # Linear over concat([h, x], -1) WITHOUT materializing the concat:
        # split W into the h-half and the x-half.
        w = wu_ref[i]                                   # (2*D_F, D_F) bf16
        y = mm_w(h, w[:D_F, :]) + mm_w(x, w[D_F:, :]) + bu_ref[i]
        return jnp.maximum(y, 0.0) if relu else y

    def softplus(x):                                     # stable, exp/log only
        return jnp.maximum(x, 0.0) + jnp.log(1.0 + jnp.exp(-jnp.abs(x)))

    def kld_gauss(mu1, logs1, mu2, logs2):               # -> (1, 1) f32
        s1 = jnp.exp(0.1 + 0.9 * softplus(logs1))
        s2 = jnp.exp(0.1 + 0.9 * softplus(logs2))
        kl = (jnp.log(s2 / s1)
              + (s1 * s1 + (mu1 - mu2) ** 2) / (2.0 * s2 * s2) - 0.5)
        per_row = jnp.sum(kl, axis=1, keepdims=True)      # (n, 1)
        return jnp.sum(per_row, axis=0, keepdims=True) / kl.shape[0]

    # ---- DGCN / VBGE towers -------------------------------------------------
    def dgcn_full(t, ufea, vfea, UV, VU):
        user_ho = gcn(t["gc1"], ufea, VU)
        item_ho = gcn(t["gc2"], vfea, UV)
        user_ho = gcn(t["gc3"], user_ho, UV)
        item_ho = gcn(t["gc4"], item_ho, VU)
        user = union(t["user_union"], user_ho, ufea, relu=True)
        item = union(t["item_union"], item_ho, vfea, relu=True)
        return user, item

    def dgcn_user(t, ufea, UV, VU):
        user_ho = gcn(t["gc1"], ufea, VU)
        user_ho = gcn(t["gc3"], user_ho, UV)
        return union(t["user_union"], user_ho, ufea, relu=True)

    def vbge_full(t, ufea, vfea, UV, VU):
        u, v = ufea, vfea
        for dt in t["dgcn"]:
            u, v = dgcn_full(dt, u, v, UV, VU)
        lt = t["last"]
        user_ho = gcn(lt["gc1"], u, VU)
        item_ho = gcn(lt["gc2"], v, UV)
        u_mean = gcn(lt["gc3_mean"], user_ho, UV)
        i_mean = gcn(lt["gc4_mean"], item_ho, VU)
        u_mean = union(lt["user_union_mean"], u_mean, u)
        i_mean = union(lt["item_union_mean"], i_mean, v)
        # eval-mode reparameterization: sampled_z = mean (logstd heads dead here)
        return u_mean, i_mean

    def vbge_user_share(t, ufea, UV, VU):
        u = ufea
        for dt in t["dgcn"]:
            u = dgcn_user(dt, u, UV, VU)
        lt = t["last"]
        user_ho = gcn(lt["gc1"], u, VU)
        mean_ho = gcn(lt["gc3_mean"], user_ho, UV)
        logstd_ho = gcn(lt["gc3_logstd"], user_ho, UV)
        mean = union(lt["user_union_mean"], mean_ho, u)
        logstd = union(lt["user_union_logstd"], logstd_ho, u)
        return mean, logstd

    def cond_half(t, ufea, UV, VU, cond):
        u = ufea
        for dt in t["dgcn"]:
            u = dgcn_user(dt, u, UV, VU)
        lt = t["last"]
        user_ho = gcn(lt["gc1"], u, VU)
        mean_ho = gcn(lt["gc3_mean"], user_ho, UV)
        logstd_ho = gcn(lt["gc3_logstd"], user_ho, UV)
        mean = union(lt["user_union_mean"], mean_ho, cond)
        logstd = union(lt["user_union_logstd"], logstd_ho, cond)
        return mean, logstd

    # ---- forward pass -------------------------------------------------------
    s_uv, s_vu = s_uv_ref[...], s_vu_ref[...]
    t_uv, t_vu = t_uv_ref[...], t_vu_ref[...]
    s_user, t_user = s_user_ref[...], t_user_ref[...]
    s_item, t_item = s_item_ref[...], t_item_ref[...]
    s_share, t_share = s_share_ref[...], t_share_ref[...]

    s_spec_user, s_spec_item = vbge_full(
        idx["source_specific"], s_user, s_item, s_uv, s_vu)
    t_spec_user, t_spec_item = vbge_full(
        idx["target_specific"], t_user, t_item, t_uv, t_vu)

    s_user_mean, s_user_sigma = vbge_user_share(idx["source_sp"], s_user, s_uv, s_vu)
    t_user_mean, t_user_sigma = vbge_user_share(idx["target_sp"], t_user, t_uv, t_vu)

    cs_mean, cs_sigma = cond_half(idx["cond_source"], s_share, s_uv, s_vu, s_spec_user)
    ct_mean, ct_sigma = cond_half(idx["cond_target"], t_share, t_uv, t_vu, t_spec_user)

    # reparameters() in eval mode: sampled_z = mean; KLD against N(0, 1).
    cs_kld = kld_gauss(cs_mean, cs_sigma,
                       jnp.zeros_like(cs_mean), jnp.ones_like(cs_sigma))
    ct_kld = kld_gauss(ct_mean, ct_sigma,
                       jnp.zeros_like(ct_mean), jnp.ones_like(ct_sigma))

    s_condi = kld_gauss(cs_mean, cs_sigma, s_user_mean, s_user_sigma)
    t_condi = kld_gauss(ct_mean, ct_sigma, t_user_mean, t_user_sigma)
    st_kld = -kld_gauss(cs_mean, cs_sigma, ct_mean, ct_sigma)

    s_luser_ref[...] = (cs_mean + s_spec_user).astype(s_luser_ref.dtype)
    t_luser_ref[...] = (ct_mean + t_spec_user).astype(t_luser_ref.dtype)
    s_litem_ref[...] = s_spec_item.astype(s_litem_ref.dtype)
    t_litem_ref[...] = t_spec_item.astype(t_litem_ref.dtype)

    # Sign convention follows the reference: st_kld is already the negated KLD,
    # and the inter-loss is subtracted (double negation intentional).
    total = (CONDI_WEIGHT * (cs_kld + ct_kld)
             + CONDI_NON_WEIGHT * (s_condi + t_condi)
             - CONDI_CONDI_WEIGHT * st_kld)
    kld_total_ref[...] = total.astype(kld_total_ref.dtype)
    s_condi_ref[...] = s_condi.astype(s_condi_ref.dtype)
    t_condi_ref[...] = t_condi.astype(t_condi_ref.dtype)
    st_kld_ref[...] = st_kld.astype(st_kld_ref.dtype)


def build_forward(idx):
    """Specialize the fused kernel on the static parameter-stack index tree."""
    kernel = functools.partial(_drlcdr_kernel, idx=idx)
    vmem = pl.BlockSpec(memory_space=pltpu.MemorySpace.VMEM)

    def forward(packed, source_UV, source_VU, target_UV, target_VU):
        n_su, n_si = source_UV.shape
        n_tu, n_ti = target_UV.shape
        d_f = packed["source_user"].shape[1]
        outs = pl.pallas_call(
            kernel,
            out_shape=(
                jax.ShapeDtypeStruct((n_su, d_f), jnp.float32),  # source_learn_user
                jax.ShapeDtypeStruct((n_si, d_f), jnp.float32),  # source_specific_item
                jax.ShapeDtypeStruct((n_tu, d_f), jnp.float32),  # target_learn_user
                jax.ShapeDtypeStruct((n_ti, d_f), jnp.float32),  # target_specific_item
                jax.ShapeDtypeStruct((1, 1), jnp.float32),       # total kld loss
                jax.ShapeDtypeStruct((1, 1), jnp.float32),       # source_condi_kld
                jax.ShapeDtypeStruct((1, 1), jnp.float32),       # target_condi_kld
                jax.ShapeDtypeStruct((1, 1), jnp.float32),       # source_target_kld
            ),
            in_specs=[vmem] * 14,
            out_specs=(vmem,) * 8,
        )(source_UV, source_VU, target_UV, target_VU,
          packed["source_user"], packed["target_user"],
          packed["source_item"], packed["target_item"],
          packed["source_user_share"], packed["target_user_share"],
          packed["wg"], packed["bg"], packed["wu"], packed["bu"])

        s_lu, s_li, t_lu, t_li, kld_tot, s_c, t_c, st = outs
        save_kld = jnp.concatenate(
            [s_c.reshape(1), t_c.reshape(1), st.reshape(1)], axis=0)
        return s_lu, s_li, t_lu, t_li, kld_tot[0, 0], save_kld

    return jax.jit(forward)


# ----------------------------- parameter packing -----------------------------
def pack_params(params):
    """Pack every layer used by the eval-mode forward into stacked arrays.

    Returns (packed_arrays, idx); idx mirrors the tower structure with static
    stack indices that the kernel uses to slice the packs.
    """
    assert D_F == D_H, "packed layout assumes feature_dim == hidden_dim"
    g_w, g_b, u_w, u_b = [], [], [], []

    def add_g(layer):
        g_w.append(layer["w"]); g_b.append(layer["b"])
        return len(g_w) - 1

    def add_u(layer):
        u_w.append(layer["w"]); u_b.append(layer["b"])
        return len(u_w) - 1

    def pack_vbge(vp, kind):
        out = {"dgcn": [], "last": {}}
        for dp in vp["dgcn"]:
            if kind == "full":
                layer = {n: add_g(dp[n]) for n in ("gc1", "gc2", "gc3", "gc4")}
                layer["user_union"] = add_u(dp["user_union"])
                layer["item_union"] = add_u(dp["item_union"])
            else:
                layer = {n: add_g(dp[n]) for n in ("gc1", "gc3")}
                layer["user_union"] = add_u(dp["user_union"])
            out["dgcn"].append(layer)
        lp = vp["last"]
        if kind == "full":
            # eval mode: logstd heads of the specific towers never reach the
            # outputs (sampled_z = mean), so they are neither packed nor run.
            for n in ("gc1", "gc2", "gc3_mean", "gc4_mean"):
                out["last"][n] = add_g(lp[n])
            for n in ("user_union_mean", "item_union_mean"):
                out["last"][n] = add_u(lp[n])
        else:
            for n in ("gc1", "gc3_mean", "gc3_logstd"):
                out["last"][n] = add_g(lp[n])
            for n in ("user_union_mean", "user_union_logstd"):
                out["last"][n] = add_u(lp[n])
        return out

    idx = {
        "source_specific": pack_vbge(params["source_specific_GNN"], "full"),
        "target_specific": pack_vbge(params["target_specific_GNN"], "full"),
        "source_sp": pack_vbge(params["source_sp_GNN"], "user"),
        "target_sp": pack_vbge(params["target_sp_GNN"], "user"),
        "cond_source": pack_vbge(params["Conditional_GNN"]["source"], "user"),
        "cond_target": pack_vbge(params["Conditional_GNN"]["target"], "user"),
    }

    packed = {
        # bf16 weights: v6e/v7x MXU-native operands; f32 accumulation in-kernel.
        "wg": jnp.stack(g_w).astype(jnp.bfloat16),              # (NG, D_F, D_F)
        "bg": jnp.stack(g_b)[:, None, :].astype(jnp.float32),   # (NG, 1, D_F)
        "wu": jnp.stack(u_w).astype(jnp.bfloat16),              # (NU, 2*D_F, D_F)
        "bu": jnp.stack(u_b)[:, None, :].astype(jnp.float32),   # (NU, 1, D_F)
        "source_user": params["source_user_embedding"],
        "target_user": params["target_user_embedding"],
        "source_item": params["source_item_embedding"],
        "target_item": params["target_item_embedding"],
        "source_user_share": params["source_user_embedding_share"],
        "target_user_share": params["target_user_embedding_share"],
    }
    return packed, idx


# ----------------------------- parameter init --------------------------------
def _uniform(key, shape, scale):
    return jax.random.uniform(key, shape, jnp.float32, -scale, scale)


def init_gcn(key, nin, nout):
    k1, k2 = jax.random.split(key)
    s = 1.0 / float(nout) ** 0.5
    return {"w": _uniform(k1, (nin, nout), s), "b": _uniform(k2, (nout,), s)}


def init_linear(key, nin, nout):
    k1, k2 = jax.random.split(key)
    s = 1.0 / float(nin) ** 0.5
    return {"w": _uniform(k1, (nin, nout), s), "b": _uniform(k2, (nout,), s)}


def init_dgcn(key):
    ks = jax.random.split(key, 6)
    return {
        "gc1": init_gcn(ks[0], D_F, D_H),
        "gc2": init_gcn(ks[1], D_F, D_H),
        "gc3": init_gcn(ks[2], D_H, D_F),
        "gc4": init_gcn(ks[3], D_H, D_F),
        "user_union": init_linear(ks[4], 2 * D_F, D_F),
        "item_union": init_linear(ks[5], 2 * D_F, D_F),
    }


def init_last(key):
    ks = jax.random.split(key, 10)
    return {
        "gc1": init_gcn(ks[0], D_F, D_H),
        "gc2": init_gcn(ks[1], D_F, D_H),
        "gc3_mean": init_gcn(ks[2], D_H, D_F),
        "gc3_logstd": init_gcn(ks[3], D_H, D_F),
        "gc4_mean": init_gcn(ks[4], D_H, D_F),
        "gc4_logstd": init_gcn(ks[5], D_H, D_F),
        "user_union_mean": init_linear(ks[6], 2 * D_F, D_F),
        "user_union_logstd": init_linear(ks[7], 2 * D_F, D_F),
        "item_union_mean": init_linear(ks[8], 2 * D_F, D_F),
        "item_union_logstd": init_linear(ks[9], 2 * D_F, D_F),
    }


def init_vbge(key):
    ks = jax.random.split(key, GNN_LAYERS)
    return {"dgcn": [init_dgcn(k) for k in ks[:-1]], "last": init_last(ks[-1])}


def init_drlcdr(key):
    ks = jax.random.split(key, 14)
    emb = lambda k, n: 0.1 * jax.random.normal(k, (n, D_F), jnp.float32)
    return {
        "source_user_embedding": emb(ks[0], N_SU),
        "target_user_embedding": emb(ks[1], N_TU),
        "source_item_embedding": emb(ks[2], N_SI),
        "target_item_embedding": emb(ks[3], N_TI),
        "source_user_embedding_share": emb(ks[4], N_SU),
        "target_user_embedding_share": emb(ks[5], N_TU),
        "source_specific_GNN": init_vbge(ks[6]),
        "source_sp_GNN": init_vbge(ks[7]),
        "target_specific_GNN": init_vbge(ks[8]),
        "target_sp_GNN": init_vbge(ks[9]),
        "Conditional_GNN": {"source": init_vbge(ks[10]), "target": init_vbge(ks[11])},
        # declared in __init__ but unused in forward (kept for parity):
        "share_mean": init_linear(ks[12], 2 * D_F, D_F),
        "share_sigma": init_linear(ks[13], 2 * D_F, D_F),
    }


def make_adj(key, n_rows, n_cols):
    m = (jax.random.uniform(key, (n_rows, n_cols)) < 0.3).astype(jnp.float32)
    deg = jnp.clip(m.sum(axis=1, keepdims=True), 1.0, None)
    return m / deg


# ----------------------------- main ------------------------------------------
if __name__ == "__main__":
    root = jax.random.PRNGKey(0)
    k_par, k_adj = jax.random.split(root)

    params = init_drlcdr(k_par)
    packed, idx = pack_params(params)
    forward = build_forward(idx)

    # row-normalized dense bipartite adjacency (torch.spmm surrogate)
    k1, k2, k3, k4 = jax.random.split(k_adj, 4)
    source_UV = make_adj(k1, N_SU, N_SI)            # user -> item
    source_VU = make_adj(k2, N_SI, N_SU)            # item -> user
    target_UV = make_adj(k3, N_TU, N_TI)
    target_VU = make_adj(k4, N_TI, N_TU)

    outs = forward(packed, source_UV, source_VU, target_UV, target_VU)
    outs = jax.block_until_ready(outs)

    src_user, src_item, tgt_user, tgt_item, kld_loss, save_kld = outs
    assert src_user.shape == (N_SU, D_F)
    assert src_item.shape == (N_SI, D_F)
    assert tgt_user.shape == (N_TU, D_F)
    assert tgt_item.shape == (N_TI, D_F)
    assert save_kld.shape == (3,)
    assert all(bool(jnp.all(jnp.isfinite(o))) for o in
               (src_user, src_item, tgt_user, tgt_item, kld_loss, save_kld))

    print("KERNEL_OK")
</pallas_src>

<mosaic_0001>
module attributes {stable_mosaic.version = 11 : i64} {
  func.func @_drlcdr_kernel(%arg0: memref<24x40xf32, #tpu.memory_space<vmem>>, %arg1: memref<40x24xf32, #tpu.memory_space<vmem>>, %arg2: memref<24x56xf32, #tpu.memory_space<vmem>>, %arg3: memref<56x24xf32, #tpu.memory_space<vmem>>, %arg4: memref<24x32xf32, #tpu.memory_space<vmem>>, %arg5: memref<24x32xf32, #tpu.memory_space<vmem>>, %arg6: memref<40x32xf32, #tpu.memory_space<vmem>>, %arg7: memref<56x32xf32, #tpu.memory_space<vmem>>, %arg8: memref<24x32xf32, #tpu.memory_space<vmem>>, %arg9: memref<24x32xf32, #tpu.memory_space<vmem>>, %arg10: memref<36x32x32xbf16, #tpu.memory_space<vmem>>, %arg11: memref<36x1x32xf32, #tpu.memory_space<vmem>>, %arg12: memref<20x64x32xbf16, #tpu.memory_space<vmem>>, %arg13: memref<20x1x32xf32, #tpu.memory_space<vmem>>, %arg14: memref<24x32xf32, #tpu.memory_space<vmem>>, %arg15: memref<40x32xf32, #tpu.memory_space<vmem>>, %arg16: memref<24x32xf32, #tpu.memory_space<vmem>>, %arg17: memref<56x32xf32, #tpu.memory_space<vmem>>, %arg18: memref<1x1xf32, #tpu.memory_space<vmem>>, %arg19: memref<1x1xf32, #tpu.memory_space<vmem>>, %arg20: memref<1x1xf32, #tpu.memory_space<vmem>>, %arg21: memref<1x1xf32, #tpu.memory_space<vmem>>) attributes {dimension_semantics = [], scalar_prefetch = 0 : i64, scratch_operands = 0 : i64, tpu.core_type = #tpu.core_type<tc>} {
    %c0 = arith.constant 0 : index
    %c0_0 = arith.constant 0 : index
    %0 = vector.load %arg0[%c0, %c0_0] : memref<24x40xf32, #tpu.memory_space<vmem>>, vector<24x40xf32>
    %c0_1 = arith.constant 0 : index
    %c0_2 = arith.constant 0 : index
    %1 = vector.load %arg1[%c0_1, %c0_2] : memref<40x24xf32, #tpu.memory_space<vmem>>, vector<40x24xf32>
    %c0_3 = arith.constant 0 : index
    %c0_4 = arith.constant 0 : index
    %2 = vector.load %arg2[%c0_3, %c0_4] : memref<24x56xf32, #tpu.memory_space<vmem>>, vector<24x56xf32>
    %c0_5 = arith.constant 0 : index
    %c0_6 = arith.constant 0 : index
    %3 = vector.load %arg3[%c0_5, %c0_6] : memref<56x24xf32, #tpu.memory_space<vmem>>, vector<56x24xf32>
    %c0_7 = arith.constant 0 : index
    %c0_8 = arith.constant 0 : index
    %4 = vector.load %arg4[%c0_7, %c0_8] : memref<24x32xf32, #tpu.memory_space<vmem>>, vector<24x32xf32>
    %c0_9 = arith.constant 0 : index
    %c0_10 = arith.constant 0 : index
    %5 = vector.load %arg5[%c0_9, %c0_10] : memref<24x32xf32, #tpu.memory_space<vmem>>, vector<24x32xf32>
    %c0_11 = arith.constant 0 : index
    %c0_12 = arith.constant 0 : index
    %6 = vector.load %arg6[%c0_11, %c0_12] : memref<40x32xf32, #tpu.memory_space<vmem>>, vector<40x32xf32>
    %c0_13 = arith.constant 0 : index
    %c0_14 = arith.constant 0 : index
    %7 = vector.load %arg7[%c0_13, %c0_14] : memref<56x32xf32, #tpu.memory_space<vmem>>, vector<56x32xf32>
    %c0_15 = arith.constant 0 : index
    %c0_16 = arith.constant 0 : index
    %8 = vector.load %arg8[%c0_15, %c0_16] : memref<24x32xf32, #tpu.memory_space<vmem>>, vector<24x32xf32>
    %c0_17 = arith.constant 0 : index
    %c0_18 = arith.constant 0 : index
    %9 = vector.load %arg9[%c0_17, %c0_18] : memref<24x32xf32, #tpu.memory_space<vmem>>, vector<24x32xf32>
    %c0_19 = arith.constant 0 : index
    %c0_20 = arith.constant 0 : index
    %c0_21 = arith.constant 0 : index
    %10 = vector.load %arg10[%c0_19, %c0_20, %c0_21] : memref<36x32x32xbf16, #tpu.memory_space<vmem>>, vector<1x32x32xbf16>
    %11 = vector.shape_cast %10 : vector<1x32x32xbf16> to vector<32x32xbf16>
    %12 = arith.truncf %4 : vector<24x32xf32> to vector<24x32xbf16>
    %cst = arith.constant dense<0.000000e+00> : vector<24x32xf32>
    %13 = tpu.matmul %12, %11, %cst {dimension_numbers = #tpu.dot_dimension_numbers<[1], [0], [0], [1], [0, 0, 1, 1], [], []>} : vector<24x32xbf16>, vector<32x32xbf16>, vector<24x32xf32> -> vector<24x32xf32>
    %cst_22 = arith.constant dense<0.000000e+00> : vector<40x32xf32>
    %14 = tpu.matmul %1, %13, %cst_22 {dimension_numbers = #tpu.dot_dimension_numbers<[1], [0], [0], [1], [0, 0, 1, 1], [], []>} : vector<40x24xf32>, vector<24x32xf32>, vector<40x32xf32> -> vector<40x32xf32>
    %c0_23 = arith.constant 0 : index
    %c0_24 = arith.constant 0 : index
    %c0_25 = arith.constant 0 : index
    %15 = vector.load %arg11[%c0_23, %c0_24, %c0_25] : memref<36x1x32xf32, #tpu.memory_space<vmem>>, vector<1x1x32xf32>
    %16 = vector.shape_cast %15 : vector<1x1x32xf32> to vector<1x32xf32>
    %17 = vector.broadcast %16 : vector<1x32xf32> to vector<40x32xf32>
    %18 = arith.addf %14, %17 : vector<40x32xf32>
    %cst_26 = arith.constant 0.000000e+00 : f32
    %19 = vector.broadcast %cst_26 : f32 to vector<40x32xf32>
    %20 = arith.cmpf oge, %18, %19 : vector<40x32xf32>
    %cst_27 = arith.constant 1.000000e-01 : f32
    %21 = vector.broadcast %cst_27 : f32 to vector<40x32xf32>
    %22 = arith.mulf %21, %18 : vector<40x32xf32>
    %23 = arith.select %20, %18, %22 : vector<40x32xi1>, vector<40x32xf32>
    %c1 = arith.constant 1 : index
    %c0_28 = arith.constant 0 : index
    %c0_29 = arith.constant 0 : index
    %24 = vector.load %arg10[%c1, %c0_28, %c0_29] : memref<36x32x32xbf16, #tpu.memory_space<vmem>>, vector<1x32x32xbf16>
    %25 = vector.shape_cast %24 : vector<1x32x32xbf16> to vector<32x32xbf16>
    %26 = arith.truncf %6 : vector<40x32xf32> to vector<40x32xbf16>
    %cst_30 = arith.constant dense<0.000000e+00> : vector<40x32xf32>
    %27 = tpu.matmul %26, %25, %cst_30 {dimension_numbers = #tpu.dot_dimension_numbers<[1], [0], [0], [1], [0, 0, 1, 1], [], []>} : vector<40x32xbf16>, vector<32x32xbf16>, vector<40x32xf32> -> vector<40x32xf32>
    %cst_31 = arith.constant dense<0.000000e+00> : vector<24x32xf32>
    %28 = tpu.matmul %0, %27, %cst_31 {dimension_numbers = #tpu.dot_dimension_numbers<[1], [0], [0], [1], [0, 0, 1, 1], [], []>} : vector<24x40xf32>, vector<40x32xf32>, vector<24x32xf32> -> vector<24x32xf32>
    %c1_32 = arith.constant 1 : index
    %c0_33 = arith.constant 0 : index
    %c0_34 = arith.constant 0 : index
    %29 = vector.load %arg11[%c1_32, %c0_33, %c0_34] : memref<36x1x32xf32, #tpu.memory_space<vmem>>, vector<1x1x32xf32>
    %30 = vector.shape_cast %29 : vector<1x1x32xf32> to vector<1x32xf32>
    %31 = vector.broadcast %30 : vector<1x32xf32> to vector<24x32xf32>
    %32 = arith.addf %28, %31 : vector<24x32xf32>
    %cst_35 = arith.constant 0.000000e+00 : f32
    %33 = vector.broadcast %cst_35 : f32 to vector<24x32xf32>
    %34 = arith.cmpf oge, %32, %33 : vector<24x32xf32>
    %cst_36 = arith.constant 1.000000e-01 : f32
    %35 = vector.broadcast %cst_36 : f32 to vector<24x32xf32>
    %36 = arith.mulf %35, %32 : vector<24x32xf32>
    %37 = arith.select %34, %32, %36 : vector<24x32xi1>, vector<24x32xf32>
    %c2 = arith.constant 2 : index
    %c0_37 = arith.constant 0 : index
    %c0_38 = arith.constant 0 : index
    %38 = vector.load %arg10[%c2, %c0_37, %c0_38] : memref<36x32x32xbf16, #tpu.memory_space<vmem>>, vector<1x32x32xbf16>
    %39 = vector.shape_cast %38 : vector<1x32x32xbf16> to vector<32x32xbf16>
    %40 = arith.truncf %23 : vector<40x32xf32> to vector<40x32xbf16>
    %cst_39 = arith.constant dense<0.000000e+00> : vector<40x32xf32>
    %41 = tpu.matmul %40, %39, %cst_39 {dimension_numbers = #tpu.dot_dimension_numbers<[1], [0], [0], [1], [0, 0, 1, 1], [], []>} : vector<40x32xbf16>, vector<32x32xbf16>, vector<40x32xf32> -> vector<40x32xf32>
    %cst_40 = arith.constant dense<0.000000e+00> : vector<24x32xf32>
    %42 = tpu.matmul %0, %41, %cst_40 {dimension_numbers = #tpu.dot_dimension_numbers<[1], [0], [0], [1], [0, 0, 1, 1], [], []>} : vector<24x40xf32>, vector<40x32xf32>, vector<24x32xf32> -> vector<24x32xf32>
    %c2_41 = arith.constant 2 : index
    %c0_42 = arith.constant 0 : index
    %c0_43 = arith.constant 0 : index
    %43 = vector.load %arg11[%c2_41, %c0_42, %c0_43] : memref<36x1x32xf32, #tpu.memory_space<vmem>>, vector<1x1x32xf32>
    %44 = vector.shape_cast %43 : vector<1x1x32xf32> to vector<1x32xf32>
    %45 = vector.broadcast %44 : vector<1x32xf32> to vector<24x32xf32>
    %46 = arith.addf %42, %45 : vector<24x32xf32>
    %cst_44 = arith.constant 0.000000e+00 : f32
    %47 = vector.broadcast %cst_44 : f32 to vector<24x32xf32>
    %48 = arith.cmpf oge, %46, %47 : vector<24x32xf32>
    %cst_45 = arith.constant 1.000000e-01 : f32
    %49 = vector.broadcast %cst_45 : f32 to vector<24x32xf32>
    %50 = arith.mulf %49, %46 : vector<24x32xf32>
    %51 = arith.select %48, %46, %50 : vector<24x32xi1>, vector<24x32xf32>
    %c3 = arith.constant 3 : index
    %c0_46 = arith.constant 0 : index
    %c0_47 = arith.constant 0 : index
    %52 = vector.load %arg10[%c3, %c0_46, %c0_47] : memref<36x32x32xbf16, #tpu.memory_space<vmem>>, vector<1x32x32xbf16>
    %53 = vector.shape_cast %52 : vector<1x32x32xbf16> to vector<32x32xbf16>
    %54 = arith.truncf %37 : vector<24x32xf32> to vector<24x32xbf16>
    %cst_48 = arith.constant dense<0.000000e+00> : vector<24x32xf32>
    %55 = tpu.matmul %54, %53, %cst_48 {dimension_numbers = #tpu.dot_dimension_numbers<[1], [0], [0], [1], [0, 0, 1, 1], [], []>} : vector<24x32xbf16>, vector<32x32xbf16>, vector<24x32xf32> -> vector<24x32xf32>
    %cst_49 = arith.constant dense<0.000000e+00> : vector<40x32xf32>
    %56 = tpu.matmul %1, %55, %cst_49 {dimension_numbers = #tpu.dot_dimension_numbers<[1], [0], [0], [1], [0, 0, 1, 1], [], []>} : vector<40x24xf32>, vector<24x32xf32>, vector<40x32xf32> -> vector<40x32xf32>
    %c3_50 = arith.constant 3 : index
    %c0_51 = arith.constant 0 : index
    %c0_52 = arith.constant 0 : index
    %57 = vector.load %arg11[%c3_50, %c0_51, %c0_52] : memref<36x1x32xf32, #tpu.memory_space<vmem>>, vector<1x1x32xf32>
    %58 = vector.shape_cast %57 : vector<1x1x32xf32> to vector<1x32xf32>
    %59 = vector.broadcast %58 : vector<1x32xf32> to vector<40x32xf32>
    %60 = arith.addf %56, %59 : vector<40x32xf32>
    %cst_53 = arith.constant 0.000000e+00 : f32
    %61 = vector.broadcast %cst_53 : f32 to vector<40x32xf32>
    %62 = arith.cmpf oge, %60, %61 : vector<40x32xf32>
    %cst_54 = arith.constant 1.000000e-01 : f32
    %63 = vector.broadcast %cst_54 : f32 to vector<40x32xf32>
    %64 = arith.mulf %63, %60 : vector<40x32xf32>
    %65 = arith.select %62, %60, %64 : vector<40x32xi1>, vector<40x32xf32>
    %c0_55 = arith.constant 0 : index
    %c0_56 = arith.constant 0 : index
    %c0_57 = arith.constant 0 : index
    %66 = vector.load %arg12[%c0_55, %c0_56, %c0_57] : memref<20x64x32xbf16, #tpu.memory_space<vmem>>, vector<1x64x32xbf16>
    %67 = vector.shape_cast %66 : vector<1x64x32xbf16> to vector<64x32xbf16>
    %68 = vector.extract_strided_slice %67 {offsets = [0, 0], sizes = [32, 32], strides = [1, 1]} : vector<64x32xbf16> to vector<32x32xbf16>
    %69 = arith.truncf %51 : vector<24x32xf32> to vector<24x32xbf16>
    %cst_58 = arith.constant dense<0.000000e+00> : vector<24x32xf32>
    %70 = tpu.matmul %69, %68, %cst_58 {dimension_numbers = #tpu.dot_dimension_numbers<[1], [0], [0], [1], [0, 0, 1, 1], [], []>} : vector<24x32xbf16>, vector<32x32xbf16>, vector<24x32xf32> -> vector<24x32xf32>
    %71 = vector.extract_strided_slice %67 {offsets = [32, 0], sizes = [32, 32], strides = [1, 1]} : vector<64x32xbf16> to vector<32x32xbf16>
    %72 = arith.truncf %4 : vector<24x32xf32> to vector<24x32xbf16>
    %cst_59 = arith.constant dense<0.000000e+00> : vector<24x32xf32>
    %73 = tpu.matmul %72, %71, %cst_59 {dimension_numbers = #tpu.dot_dimension_numbers<[1], [0], [0], [1], [0, 0, 1, 1], [], []>} : vector<24x32xbf16>, vector<32x32xbf16>, vector<24x32xf32> -> vector<24x32xf32>
    %74 = arith.addf %70, %73 : vector<24x32xf32>
    %c0_60 = arith.constant 0 : index
    %c0_61 = arith.constant 0 : index
    %c0_62 = arith.constant 0 : index
    %75 = vector.load %arg13[%c0_60, %c0_61, %c0_62] : memref<20x1x32xf32, #tpu.memory_space<vmem>>, vector<1x1x32xf32>
    %76 = vector.shape_cast %75 : vector<1x1x32xf32> to vector<1x32xf32>
    %77 = vector.broadcast %76 : vector<1x32xf32> to vector<24x32xf32>
    %78 = arith.addf %74, %77 : vector<24x32xf32>
    %cst_63 = arith.constant 0.000000e+00 : f32
    %79 = vector.broadcast %cst_63 : f32 to vector<24x32xf32>
    %80 = arith.maximumf %78, %79 : vector<24x32xf32>
    %c1_64 = arith.constant 1 : index
    %c0_65 = arith.constant 0 : index
    %c0_66 = arith.constant 0 : index
    %81 = vector.load %arg12[%c1_64, %c0_65, %c0_66] : memref<20x64x32xbf16, #tpu.memory_space<vmem>>, vector<1x64x32xbf16>
    %82 = vector.shape_cast %81 : vector<1x64x32xbf16> to vector<64x32xbf16>
    %83 = vector.extract_strided_slice %82 {offsets = [0, 0], sizes = [32, 32], strides = [1, 1]} : vector<64x32xbf16> to vector<32x32xbf16>
    %84 = arith.truncf %65 : vector<40x32xf32> to vector<40x32xbf16>
    %cst_67 = arith.constant dense<0.000000e+00> : vector<40x32xf32>
    %85 = tpu.matmul %84, %83, %cst_67 {dimension_numbers = #tpu.dot_dimension_numbers<[1], [0], [0], [1], [0, 0, 1, 1], [], []>} : vector<40x32xbf16>, vector<32x32xbf16>, vector<40x32xf32> -> vector<40x32xf32>
    %86 = vector.extract_strided_slice %82 {offsets = [32, 0], sizes = [32, 32], strides = [1, 1]} : vector<64x32xbf16> to vector<32x32xbf16>
    %87 = arith.truncf %6 : vector<40x32xf32> to vector<40x32xbf16>
    %cst_68 = arith.constant dense<0.000000e+00> : vector<40x32xf32>
    %88 = tpu.matmul %87, %86, %cst_68 {dimension_numbers = #tpu.dot_dimension_numbers<[1], [0], [0], [1], [0, 0, 1, 1], [], []>} : vector<40x32xbf16>, vector<32x32xbf16>, vector<40x32xf32> -> vector<40x32xf32>
    %89 = arith.addf %85, %88 : vector<40x32xf32>
    %c1_69 = arith.constant 1 : index
    %c0_70 = arith.constant 0 : index
    %c0_71 = arith.constant 0 : index
    %90 = vector.load %arg13[%c1_69, %c0_70, %c0_71] : memref<20x1x32xf32, #tpu.memory_space<vmem>>, vector<1x1x32xf32>
    %91 = vector.shape_cast %90 : vector<1x1x32xf32> to vector<1x32xf32>
    %92 = vector.broadcast %91 : vector<1x32xf32> to vector<40x32xf32>
    %93 = arith.addf %89, %92 : vector<40x32xf32>
    %cst_72 = arith.constant 0.000000e+00 : f32
    %94 = vector.broadcast %cst_72 : f32 to vector<40x32xf32>
    %95 = arith.maximumf %93, %94 : vector<40x32xf32>
    %c4 = arith.constant 4 : index
    %c0_73 = arith.constant 0 : index
    %c0_74 = arith.constant 0 : index
    %96 = vector.load %arg10[%c4, %c0_73, %c0_74] : memref<36x32x32xbf16, #tpu.memory_space<vmem>>, vector<1x32x32xbf16>
    %97 = vector.shape_cast %96 : vector<1x32x32xbf16> to vector<32x32xbf16>
    %98 = arith.truncf %80 : vector<24x32xf32> to vector<24x32xbf16>
    %cst_75 = arith.constant dense<0.000000e+00> : vector<24x32xf32>
    %99 = tpu.matmul %98, %97, %cst_75 {dimension_numbers = #tpu.dot_dimension_numbers<[1], [0], [0], [1], [0, 0, 1, 1], [], []>} : vector<24x32xbf16>, vector<32x32xbf16>, vector<24x32xf32> -> vector<24x32xf32>
    %cst_76 = arith.constant dense<0.000000e+00> : vector<40x32xf32>
    %100 = tpu.matmul %1, %99, %cst_76 {dimension_numbers = #tpu.dot_dimension_numbers<[1], [0], [0], [1], [0, 0, 1, 1], [], []>} : vector<40x24xf32>, vector<24x32xf32>, vector<40x32xf32> -> vector<40x32xf32>
    %c4_77 = arith.constant 4 : index
    %c0_78 = arith.constant 0 : index
    %c0_79 = arith.constant 0 : index
    %101 = vector.load %arg11[%c4_77, %c0_78, %c0_79] : memref<36x1x32xf32, #tpu.memory_space<vmem>>, vector<1x1x32xf32>
    %102 = vector.shape_cast %101 : vector<1x1x32xf32> to vector<1x32xf32>
    %103 = vector.broadcast %102 : vector<1x32xf32> to vector<40x32xf32>
    %104 = arith.addf %100, %103 : vector<40x32xf32>
    %cst_80 = arith.constant 0.000000e+00 : f32
    %105 = vector.broadcast %cst_80 : f32 to vector<40x32xf32>
    %106 = arith.cmpf oge, %104, %105 : vector<40x32xf32>
    %cst_81 = arith.constant 1.000000e-01 : f32
    %107 = vector.broadcast %cst_81 : f32 to vector<40x32xf32>
    %108 = arith.mulf %107, %104 : vector<40x32xf32>
    %109 = arith.select %106, %104, %108 : vector<40x32xi1>, vector<40x32xf32>
    %c5 = arith.constant 5 : index
    %c0_82 = arith.constant 0 : index
    %c0_83 = arith.constant 0 : index
    %110 = vector.load %arg10[%c5, %c0_82, %c0_83] : memref<36x32x32xbf16, #tpu.memory_space<vmem>>, vector<1x32x32xbf16>
    %111 = vector.shape_cast %110 : vector<1x32x32xbf16> to vector<32x32xbf16>
    %112 = arith.truncf %95 : vector<40x32xf32> to vector<40x32xbf16>
    %cst_84 = arith.constant dense<0.000000e+00> : vector<40x32xf32>
    %113 = tpu.matmul %112, %111, %cst_84 {dimension_numbers = #tpu.dot_dimension_numbers<[1], [0], [0], [1], [0, 0, 1, 1], [], []>} : vector<40x32xbf16>, vector<32x32xbf16>, vector<40x32xf32> -> vector<40x32xf32>
    %cst_85 = arith.constant dense<0.000000e+00> : vector<24x32xf32>
    %114 = tpu.matmul %0, %113, %cst_85 {dimension_numbers = #tpu.dot_dimension_numbers<[1], [0], [0], [1], [0, 0, 1, 1], [], []>} : vector<24x40xf32>, vector<40x32xf32>, vector<24x32xf32> -> vector<24x32xf32>
    %c5_86 = arith.constant 5 : index
    %c0_87 = arith.constant 0 : index
    %c0_88 = arith.constant 0 : index
    %115 = vector.load %arg11[%c5_86, %c0_87, %c0_88] : memref<36x1x32xf32, #tpu.memory_space<vmem>>, vector<1x1x32xf32>
    %116 = vector.shape_cast %115 : vector<1x1x32xf32> to vector<1x32xf32>
    %117 = vector.broadcast %116 : vector<1x32xf32> to vector<24x32xf32>
    %118 = arith.addf %114, %117 : vector<24x32xf32>
    %cst_89 = arith.constant 0.000000e+00 : f32
    %119 = vector.broadcast %cst_89 : f32 to vector<24x32xf32>
    %120 = arith.cmpf oge, %118, %119 : vector<24x32xf32>
    %cst_90 = arith.constant 1.000000e-01 : f32
    %121 = vector.broadcast %cst_90 : f32 to vector<24x32xf32>
    %122 = arith.mulf %121, %118 : vector<24x32xf32>
    %123 = arith.select %120, %118, %122 : vector<24x32xi1>, vector<24x32xf32>
    %c6 = arith.constant 6 : index
    %c0_91 = arith.constant 0 : index
    %c0_92 = arith.constant 0 : index
    %124 = vector.load %arg10[%c6, %c0_91, %c0_92] : memref<36x32x32xbf16, #tpu.memory_space<vmem>>, vector<1x32x32xbf16>
    %125 = vector.shape_cast %124 : vector<1x32x32xbf16> to vector<32x32xbf16>
    %126 = arith.truncf %109 : vector<40x32xf32> to vector<40x32xbf16>
    %cst_93 = arith.constant dense<0.000000e+00> : vector<40x32xf32>
    %127 = tpu.matmul %126, %125, %cst_93 {dimension_numbers = #tpu.dot_dimension_numbers<[1], [0], [0], [1], [0, 0, 1, 1], [], []>} : vector<40x32xbf16>, vector<32x32xbf16>, vector<40x32xf32> -> vector<40x32xf32>
    %cst_94 = arith.constant dense<0.000000e+00> : vector<24x32xf32>
    %128 = tpu.matmul %0, %127, %cst_94 {dimension_numbers = #tpu.dot_dimension_numbers<[1], [0], [0], [1], [0, 0, 1, 1], [], []>} : vector<24x40xf32>, vector<40x32xf32>, vector<24x32xf32> -> vector<24x32xf32>
    %c6_95 = arith.constant 6 : index
    %c0_96 = arith.constant 0 : index
    %c0_97 = arith.constant 0 : index
    %129 = vector.load %arg11[%c6_95, %c0_96, %c0_97] : memref<36x1x32xf32, #tpu.memory_space<vmem>>, vector<1x1x32xf32>
    %130 = vector.shape_cast %129 : vector<1x1x32xf32> to vector<1x32xf32>
    %131 = vector.broadcast %130 : vector<1x32xf32> to vector<24x32xf32>
    %132 = arith.addf %128, %131 : vector<24x32xf32>
    %cst_98 = arith.constant 0.000000e+00 : f32
    %133 = vector.broadcast %cst_98 : f32 to vector<24x32xf32>
    %134 = arith.cmpf oge, %132, %133 : vector<24x32xf32>
    %cst_99 = arith.constant 1.000000e-01 : f32
    %135 = vector.broadcast %cst_99 : f32 to vector<24x32xf32>
    %136 = arith.mulf %135, %132 : vector<24x32xf32>
    %137 = arith.select %134, %132, %136 : vector<24x32xi1>, vector<24x32xf32>
    %c7 = arith.constant 7 : index
    %c0_100 = arith.constant 0 : index
    %c0_101 = arith.constant 0 : index
    %138 = vector.load %arg10[%c7, %c0_100, %c0_101] : memref<36x32x32xbf16, #tpu.memory_space<vmem>>, vector<1x32x32xbf16>
    %139 = vector.shape_cast %138 : vector<1x32x32xbf16> to vector<32x32xbf16>
    %140 = arith.truncf %123 : vector<24x32xf32> to vector<24x32xbf16>
    %cst_102 = arith.constant dense<0.000000e+00> : vector<24x32xf32>
    %141 = tpu.matmul %140, %139, %cst_102 {dimension_numbers = #tpu.dot_dimension_numbers<[1], [0], [0], [1], [0, 0, 1, 1], [], []>} : vector<24x32xbf16>, vector<32x32xbf16>, vector<24x32xf32> -> vector<24x32xf32>
    %cst_103 = arith.constant dense<0.000000e+00> : vector<40x32xf32>
    %142 = tpu.matmul %1, %141, %cst_103 {dimension_numbers = #tpu.dot_dimension_numbers<[1], [0], [0], [1], [0, 0, 1, 1], [], []>} : vector<40x24xf32>, vector<24x32xf32>, vector<40x32xf32> -> vector<40x32xf32>
    %c7_104 = arith.constant 7 : index
    %c0_105 = arith.constant 0 : index
    %c0_106 = arith.constant 0 : index
    %143 = vector.load %arg11[%c7_104, %c0_105, %c0_106] : memref<36x1x32xf32, #tpu.memory_space<vmem>>, vector<1x1x32xf32>
    %144 = vector.shape_cast %143 : vector<1x1x32xf32> to vector<1x32xf32>
    %145 = vector.broadcast %144 : vector<1x32xf32> to vector<40x32xf32>
    %146 = arith.addf %142, %145 : vector<40x32xf32>
    %cst_107 = arith.constant 0.000000e+00 : f32
    %147 = vector.broadcast %cst_107 : f32 to vector<40x32xf32>
    %148 = arith.cmpf oge, %146, %147 : vector<40x32xf32>
    %cst_108 = arith.constant 1.000000e-01 : f32
    %149 = vector.broadcast %cst_108 : f32 to vector<40x32xf32>
    %150 = arith.mulf %149, %146 : vector<40x32xf32>
    %151 = arith.select %148, %146, %150 : vector<40x32xi1>, vector<40x32xf32>
    %c2_109 = arith.constant 2 : index
    %c0_110 = arith.constant 0 : index
    %c0_111 = arith.constant 0 : index
    %152 = vector.load %arg12[%c2_109, %c0_110, %c0_111] : memref<20x64x32xbf16, #tpu.memory_space<vmem>>, vector<1x64x32xbf16>
    %153 = vector.shape_cast %152 : vector<1x64x32xbf16> to vector<64x32xbf16>
    %154 = vector.extract_strided_slice %153 {offsets = [0, 0], sizes = [32, 32], strides = [1, 1]} : vector<64x32xbf16> to vector<32x32xbf16>
    %155 = arith.truncf %137 : vector<24x32xf32> to vector<24x32xbf16>
    %cst_112 = arith.constant dense<0.000000e+00> : vector<24x32xf32>
    %156 = tpu.matmul %155, %154, %cst_112 {dimension_numbers = #tpu.dot_dimension_numbers<[1], [0], [0], [1], [0, 0, 1, 1], [], []>} : vector<24x32xbf16>, vector<32x32xbf16>, vector<24x32xf32> -> vector<24x32xf32>
    %157 = vector.extract_strided_slice %153 {offsets = [32, 0], sizes = [32, 32], strides = [1, 1]} : vector<64x32xbf16> to vector<32x32xbf16>
    %158 = arith.truncf %80 : vector<24x32xf32> to vector<24x32xbf16>
    %cst_113 = arith.constant dense<0.000000e+00> : vector<24x32xf32>
    %159 = tpu.matmul %158, %157, %cst_113 {dimension_numbers = #tpu.dot_dimension_numbers<[1], [0], [0], [1], [0, 0, 1, 1], [], []>} : vector<24x32xbf16>, vector<32x32xbf16>, vector<24x32xf32> -> vector<24x32xf32>
    %160 = arith.addf %156, %159 : vector<24x32xf32>
    %c2_114 = arith.constant 2 : index
    %c0_115 = arith.constant 0 : index
    %c0_116 = arith.constant 0 : index
    %161 = vector.load %arg13[%c2_114, %c0_115, %c0_116] : memref<20x1x32xf32, #tpu.memory_space<vmem>>, vector<1x1x32xf32>
    %162 = vector.shape_cast %161 : vector<1x1x32xf32> to vector<1x32xf32>
    %163 = vector.broadcast %162 : vector<1x32xf32> to vector<24x32xf32>
    %164 = arith.addf %160, %163 : vector<24x32xf32>
    %c3_117 = arith.constant 3 : index
    %c0_118 = arith.constant 0 : index
    %c0_119 = arith.constant 0 : index
    %165 = vector.load %arg12[%c3_117, %c0_118, %c0_119] : memref<20x64x32xbf16, #tpu.memory_space<vmem>>, vector<1x64x32xbf16>
    %166 = vector.shape_cast %165 : vector<1x64x32xbf16> to vector<64x32xbf16>
    %167 = vector.extract_strided_slice %166 {offsets = [0, 0], sizes = [32, 32], strides = [1, 1]} : vector<64x32xbf16> to vector<32x32xbf16>
    %168 = arith.truncf %151 : vector<40x32xf32> to vector<40x32xbf16>
    %cst_120 = arith.constant dense<0.000000e+00> : vector<40x32xf32>
    %169 = tpu.matmul %168, %167, %cst_120 {dimension_numbers = #tpu.dot_dimension_numbers<[1], [0], [0], [1], [0, 0, 1, 1], [], []>} : vector<40x32xbf16>, vector<32x32xbf16>, vector<40x32xf32> -> vector<40x32xf32>
    %170 = vector.extract_strided_slice %166 {offsets = [32, 0], sizes = [32, 32], strides = [1, 1]} : vector<64x32xbf16> to vector<32x32xbf16>
    %171 = arith.truncf %95 : vector<40x32xf32> to vector<40x32xbf16>
    %cst_121 = arith.constant dense<0.000000e+00> : vector<40x32xf32>
    %172 = tpu.matmul %171, %170, %cst_121 {dimension_numbers = #tpu.dot_dimension_numbers<[1], [0], [0], [1], [0, 0, 1, 1], [], []>} : vector<40x32xbf16>, vector<32x32xbf16>, vector<40x32xf32> -> vector<40x32xf32>
    %173 = arith.addf %169, %172 : vector<40x32xf32>
    %c3_122 = arith.constant 3 : index
    %c0_123 = arith.constant 0 : index
    %c0_124 = arith.constant 0 : index
    %174 = vector.load %arg13[%c3_122, %c0_123, %c0_124] : memref<20x1x32xf32, #tpu.memory_space<vmem>>, vector<1x1x32xf32>
    %175 = vector.shape_cast %174 : vector<1x1x32xf32> to vector<1x32xf32>
    %176 = vector.broadcast %175 : vector<1x32xf32> to vector<40x32xf32>
    %177 = arith.addf %173, %176 : vector<40x32xf32>
    %c8 = arith.constant 8 : index
    %c0_125 = arith.constant 0 : index
    %c0_126 = arith.constant 0 : index
    %178 = vector.load %arg10[%c8, %c0_125, %c0_126] : memref<36x32x32xbf16, #tpu.memory_space<vmem>>, vector<1x32x32xbf16>
    %179 = vector.shape_cast %178 : vector<1x32x32xbf16> to vector<32x32xbf16>
    %180 = arith.truncf %5 : vector<24x32xf32> to vector<24x32xbf16>
    %cst_127 = arith.constant dense<0.000000e+00> : vector<24x32xf32>
    %181 = tpu.matmul %180, %179, %cst_127 {dimension_numbers = #tpu.dot_dimension_numbers<[1], [0], [0], [1], [0, 0, 1, 1], [], []>} : vector<24x32xbf16>, vector<32x32xbf16>, vector<24x32xf32> -> vector<24x32xf32>
    %cst_128 = arith.constant dense<0.000000e+00> : vector<56x32xf32>
    %182 = tpu.matmul %3, %181, %cst_128 {dimension_numbers = #tpu.dot_dimension_numbers<[1], [0], [0], [1], [0, 0, 1, 1], [], []>} : vector<56x24xf32>, vector<24x32xf32>, vector<56x32xf32> -> vector<56x32xf32>
    %c8_129 = arith.constant 8 : index
    %c0_130 = arith.constant 0 : index
    %c0_131 = arith.constant 0 : index
    %183 = vector.load %arg11[%c8_129, %c0_130, %c0_131] : memref<36x1x32xf32, #tpu.memory_space<vmem>>, vector<1x1x32xf32>
    %184 = vector.shape_cast %183 : vector<1x1x32xf32> to vector<1x32xf32>
    %185 = vector.broadcast %184 : vector<1x32xf32> to vector<56x32xf32>
    %186 = arith.addf %182, %185 : vector<56x32xf32>
    %cst_132 = arith.constant 0.000000e+00 : f32
    %187 = vector.broadcast %cst_132 : f32 to vector<56x32xf32>
    %188 = arith.cmpf oge, %186, %187 : vector<56x32xf32>
    %cst_133 = arith.constant 1.000000e-01 : f32
    %189 = vector.broadcast %cst_133 : f32 to vector<56x32xf32>
    %190 = arith.mulf %189, %186 : vector<56x32xf32>
    %191 = arith.select %188, %186, %190 : vector<56x32xi1>, vector<56x32xf32>
    %c9 = arith.constant 9 : index
    %c0_134 = arith.constant 0 : index
    %c0_135 = arith.constant 0 : index
    %192 = vector.load %arg10[%c9, %c0_134, %c0_135] : memref<36x32x32xbf16, #tpu.memory_space<vmem>>, vector<1x32x32xbf16>
    %193 = vector.shape_cast %192 : vector<1x32x32xbf16> to vector<32x32xbf16>
    %194 = arith.truncf %7 : vector<56x32xf32> to vector<56x32xbf16>
    %cst_136 = arith.constant dense<0.000000e+00> : vector<56x32xf32>
    %195 = tpu.matmul %194, %193, %cst_136 {dimension_numbers = #tpu.dot_dimension_numbers<[1], [0], [0], [1], [0, 0, 1, 1], [], []>} : vector<56x32xbf16>, vector<32x32xbf16>, vector<56x32xf32> -> vector<56x32xf32>
    %cst_137 = arith.constant dense<0.000000e+00> : vector<24x32xf32>
    %196 = tpu.matmul %2, %195, %cst_137 {dimension_numbers = #tpu.dot_dimension_numbers<[1], [0], [0], [1], [0, 0, 1, 1], [], []>} : vector<24x56xf32>, vector<56x32xf32>, vector<24x32xf32> -> vector<24x32xf32>
    %c9_138 = arith.constant 9 : index
    %c0_139 = arith.constant 0 : index
    %c0_140 = arith.constant 0 : index
    %197 = vector.load %arg11[%c9_138, %c0_139, %c0_140] : memref<36x1x32xf32, #tpu.memory_space<vmem>>, vector<1x1x32xf32>
    %198 = vector.shape_cast %197 : vector<1x1x32xf32> to vector<1x32xf32>
    %199 = vector.broadcast %198 : vector<1x32xf32> to vector<24x32xf32>
    %200 = arith.addf %196, %199 : vector<24x32xf32>
    %cst_141 = arith.constant 0.000000e+00 : f32
    %201 = vector.broadcast %cst_141 : f32 to vector<24x32xf32>
    %202 = arith.cmpf oge, %200, %201 : vector<24x32xf32>
    %cst_142 = arith.constant 1.000000e-01 : f32
    %203 = vector.broadcast %cst_142 : f32 to vector<24x32xf32>
    %204 = arith.mulf %203, %200 : vector<24x32xf32>
    %205 = arith.select %202, %200, %204 : vector<24x32xi1>, vector<24x32xf32>
    %c10 = arith.constant 10 : index
    %c0_143 = arith.constant 0 : index
    %c0_144 = arith.constant 0 : index
    %206 = vector.load %arg10[%c10, %c0_143, %c0_144] : memref<36x32x32xbf16, #tpu.memory_space<vmem>>, vector<1x32x32xbf16>
    %207 = vector.shape_cast %206 : vector<1x32x32xbf16> to vector<32x32xbf16>
    %208 = arith.truncf %191 : vector<56x32xf32> to vector<56x32xbf16>
    %cst_145 = arith.constant dense<0.000000e+00> : vector<56x32xf32>
    %209 = tpu.matmul %208, %207, %cst_145 {dimension_numbers = #tpu.dot_dimension_numbers<[1], [0], [0], [1], [0, 0, 1, 1], [], []>} : vector<56x32xbf16>, vector<32x32xbf16>, vector<56x32xf32> -> vector<56x32xf32>
    %cst_146 = arith.constant dense<0.000000e+00> : vector<24x32xf32>
    %210 = tpu.matmul %2, %209, %cst_146 {dimension_numbers = #tpu.dot_dimension_numbers<[1], [0], [0], [1], [0, 0, 1, 1], [], []>} : vector<24x56xf32>, vector<56x32xf32>, vector<24x32xf32> -> vector<24x32xf32>
    %c10_147 = arith.constant 10 : index
    %c0_148 = arith.constant 0 : index
    %c0_149 = arith.constant 0 : index
    %211 = vector.load %arg11[%c10_147, %c0_148, %c0_149] : memref<36x1x32xf32, #tpu.memory_space<vmem>>, vector<1x1x32xf32>
    %212 = vector.shape_cast %211 : vector<1x1x32xf32> to vector<1x32xf32>
    %213 = vector.broadcast %212 : vector<1x32xf32> to vector<24x32xf32>
    %214 = arith.addf %210, %213 : vector<24x32xf32>
    %cst_150 = arith.constant 0.000000e+00 : f32
    %215 = vector.broadcast %cst_150 : f32 to vector<24x32xf32>
    %216 = arith.cmpf oge, %214, %215 : vector<24x32xf32>
    %cst_151 = arith.constant 1.000000e-01 : f32
    %217 = vector.broadcast %cst_151 : f32 to vector<24x32xf32>
    %218 = arith.mulf %217, %214 : vector<24x32xf32>
    %219 = arith.select %216, %214, %218 : vector<24x32xi1>, vector<24x32xf32>
    %c11 = arith.constant 11 : index
    %c0_152 = arith.constant 0 : index
    %c0_153 = arith.constant 0 : index
    %220 = vector.load %arg10[%c11, %c0_152, %c0_153] : memref<36x32x32xbf16, #tpu.memory_space<vmem>>, vector<1x32x32xbf16>
    %221 = vector.shape_cast %220 : vector<1x32x32xbf16> to vector<32x32xbf16>
    %222 = arith.truncf %205 : vector<24x32xf32> to vector<24x32xbf16>
    %cst_154 = arith.constant dense<0.000000e+00> : vector<24x32xf32>
    %223 = tpu.matmul %222, %221, %cst_154 {dimension_numbers = #tpu.dot_dimension_numbers<[1], [0], [0], [1], [0, 0, 1, 1], [], []>} : vector<24x32xbf16>, vector<32x32xbf16>, vector<24x32xf32> -> vector<24x32xf32>
    %cst_155 = arith.constant dense<0.000000e+00> : vector<56x32xf32>
    %224 = tpu.matmul %3, %223, %cst_155 {dimension_numbers = #tpu.dot_dimension_numbers<[1], [0], [0], [1], [0, 0, 1, 1], [], []>} : vector<56x24xf32>, vector<24x32xf32>, vector<56x32xf32> -> vector<56x32xf32>
    %c11_156 = arith.constant 11 : index
    %c0_157 = arith.constant 0 : index
    %c0_158 = arith.constant 0 : index
    %225 = vector.load %arg11[%c11_156, %c0_157, %c0_158] : memref<36x1x32xf32, #tpu.memory_space<vmem>>, vector<1x1x32xf32>
    %226 = vector.shape_cast %225 : vector<1x1x32xf32> to vector<1x32xf32>
    %227 = vector.broadcast %226 : vector<1x32xf32> to vector<56x32xf32>
    %228 = arith.addf %224, %227 : vector<56x32xf32>
    %cst_159 = arith.constant 0.000000e+00 : f32
    %229 = vector.broadcast %cst_159 : f32 to vector<56x32xf32>
    %230 = arith.cmpf oge, %228, %229 : vector<56x32xf32>
    %cst_160 = arith.constant 1.000000e-01 : f32
    %231 = vector.broadcast %cst_160 : f32 to vector<56x32xf32>
    %232 = arith.mulf %231, %228 : vector<56x32xf32>
    %233 = arith.select %230, %228, %232 : vector<56x32xi1>, vector<56x32xf32>
    %c4_161 = arith.constant 4 : index
    %c0_162 = arith.constant 0 : index
    %c0_163 = arith.constant 0 : index
    %234 = vector.load %arg12[%c4_161, %c0_162, %c0_163] : memref<20x64x32xbf16, #tpu.memory_space<vmem>>, vector<1x64x32xbf16>
    %235 = vector.shape_cast %234 : vector<1x64x32xbf16> to vector<64x32xbf16>
    %236 = vector.extract_strided_slice %235 {offsets = [0, 0], sizes = [32, 32], strides = [1, 1]} : vector<64x32xbf16> to vector<32x32xbf16>
    %237 = arith.truncf %219 : vector<24x32xf32> to vector<24x32xbf16>
    %cst_164 = arith.constant dense<0.000000e+00> : vector<24x32xf32>
    %238 = tpu.matmul %237, %236, %cst_164 {dimension_numbers = #tpu.dot_dimension_numbers<[1], [0], [0], [1], [0, 0, 1, 1], [], []>} : vector<24x32xbf16>, vector<32x32xbf16>, vector<24x32xf32> -> vector<24x32xf32>
    %239 = vector.extract_strided_slice %235 {offsets = [32, 0], sizes = [32, 32], strides = [1, 1]} : vector<64x32xbf16> to vector<32x32xbf16>
    %240 = arith.truncf %5 : vector<24x32xf32> to vector<24x32xbf16>
    %cst_165 = arith.constant dense<0.000000e+00> : vector<24x32xf32>
    %241 = tpu.matmul %240, %239, %cst_165 {dimension_numbers = #tpu.dot_dimension_numbers<[1], [0], [0], [1], [0, 0, 1, 1], [], []>} : vector<24x32xbf16>, vector<32x32xbf16>, vector<24x32xf32> -> vector<24x32xf32>
    %242 = arith.addf %238, %241 : vector<24x32xf32>
    %c4_166 = arith.constant 4 : index
    %c0_167 = arith.constant 0 : index
    %c0_168 = arith.constant 0 : index
    %243 = vector.load %arg13[%c4_166, %c0_167, %c0_168] : memref<20x1x32xf32, #tpu.memory_space<vmem>>, vector<1x1x32xf32>
    %244 = vector.shape_cast %243 : vector<1x1x32xf32> to vector<1x32xf32>
    %245 = vector.broadcast %244 : vector<1x32xf32> to vector<24x32xf32>
    %246 = arith.addf %242, %245 : vector<24x32xf32>
    %cst_169 = arith.constant 0.000000e+00 : f32
    %247 = vector.broadcast %cst_169 : f32 to vector<24x32xf32>
    %248 = arith.maximumf %246, %247 : vector<24x32xf32>
    %c5_170 = arith.constant 5 : index
    %c0_171 = arith.constant 0 : index
    %c0_172 = arith.constant 0 : index
    %249 = vector.load %arg12[%c5_170, %c0_171, %c0_172] : memref<20x64x32xbf16, #tpu.memory_space<vmem>>, vector<1x64x32xbf16>
    %250 = vector.shape_cast %249 : vector<1x64x32xbf16> to vector<64x32xbf16>
    %251 = vector.extract_strided_slice %250 {offsets = [0, 0], sizes = [32, 32], strides = [1, 1]} : vector<64x32xbf16> to vector<32x32xbf16>
    %252 = arith.truncf %233 : vector<56x32xf32> to vector<56x32xbf16>
    %cst_173 = arith.constant dense<0.000000e+00> : vector<56x32xf32>
    %253 = tpu.matmul %252, %251, %cst_173 {dimension_numbers = #tpu.dot_dimension_numbers<[1], [0], [0], [1], [0, 0, 1, 1], [], []>} : vector<56x32xbf16>, vector<32x32xbf16>, vector<56x32xf32> -> vector<56x32xf32>
    %254 = vector.extract_strided_slice %250 {offsets = [32, 0], sizes = [32, 32], strides = [1, 1]} : vector<64x32xbf16> to vector<32x32xbf16>
    %255 = arith.truncf %7 : vector<56x32xf32> to vector<56x32xbf16>
    %cst_174 = arith.constant dense<0.000000e+00> : vector<56x32xf32>
    %256 = tpu.matmul %255, %254, %cst_174 {dimension_numbers = #tpu.dot_dimension_numbers<[1], [0], [0], [1], [0, 0, 1, 1], [], []>} : vector<56x32xbf16>, vector<32x32xbf16>, vector<56x32xf32> -> vector<56x32xf32>
    %257 = arith.addf %253, %256 : vector<56x32xf32>
    %c5_175 = arith.constant 5 : index
    %c0_176 = arith.constant 0 : index
    %c0_177 = arith.constant 0 : index
    %258 = vector.load %arg13[%c5_175, %c0_176, %c0_177] : memref<20x1x32xf32, #tpu.memory_space<vmem>>, vector<1x1x32xf32>
    %259 = vector.shape_cast %258 : vector<1x1x32xf32> to vector<1x32xf32>
    %260 = vector.broadcast %259 : vector<1x32xf32> to vector<56x32xf32>
    %261 = arith.addf %257, %260 : vector<56x32xf32>
    %cst_178 = arith.constant 0.000000e+00 : f32
    %262 = vector.broadcast %cst_178 : f32 to vector<56x32xf32>
    %263 = arith.maximumf %261, %262 : vector<56x32xf32>
    %c12 = arith.constant 12 : index
    %c0_179 = arith.constant 0 : index
    %c0_180 = arith.constant 0 : index
    %264 = vector.load %arg10[%c12, %c0_179, %c0_180] : memref<36x32x32xbf16, #tpu.memory_space<vmem>>, vector<1x32x32xbf16>
    %265 = vector.shape_cast %264 : vector<1x32x32xbf16> to vector<32x32xbf16>
    %266 = arith.truncf %248 : vector<24x32xf32> to vector<24x32xbf16>
    %cst_181 = arith.constant dense<0.000000e+00> : vector<24x32xf32>
    %267 = tpu.matmul %266, %265, %cst_181 {dimension_numbers = #tpu.dot_dimension_numbers<[1], [0], [0], [1], [0, 0, 1, 1], [], []>} : vector<24x32xbf16>, vector<32x32xbf16>, vector<24x32xf32> -> vector<24x32xf32>
    %cst_182 = arith.constant dense<0.000000e+00> : vector<56x32xf32>
    %268 = tpu.matmul %3, %267, %cst_182 {dimension_numbers = #tpu.dot_dimension_numbers<[1], [0], [0], [1], [0, 0, 1, 1], [], []>} : vector<56x24xf32>, vector<24x32xf32>, vector<56x32xf32> -> vector<56x32xf32>
    %c12_183 = arith.constant 12 : index
    %c0_184 = arith.constant 0 : index
    %c0_185 = arith.constant 0 : index
    %269 = vector.load %arg11[%c12_183, %c0_184, %c0_185] : memref<36x1x32xf32, #tpu.memory_space<vmem>>, vector<1x1x32xf32>
    %270 = vector.shape_cast %269 : vector<1x1x32xf32> to vector<1x32xf32>
    %271 = vector.broadcast %270 : vector<1x32xf32> to vector<56x32xf32>
    %272 = arith.addf %268, %271 : vector<56x32xf32>
    %cst_186 = arith.constant 0.000000e+00 : f32
    %273 = vector.broadcast %cst_186 : f32 to vector<56x32xf32>
    %274 = arith.cmpf oge, %272, %273 : vector<56x32xf32>
    %cst_187 = arith.constant 1.000000e-01 : f32
    %275 = vector.broadcast %cst_187 : f32 to vector<56x32xf32>
    %276 = arith.mulf %275, %272 : vector<56x32xf32>
    %277 = arith.select %274, %272, %276 : vector<56x32xi1>, vector<56x32xf32>
    %c13 = arith.constant 13 : index
    %c0_188 = arith.constant 0 : index
    %c0_189 = arith.constant 0 : index
    %278 = vector.load %arg10[%c13, %c0_188, %c0_189] : memref<36x32x32xbf16, #tpu.memory_space<vmem>>, vector<1x32x32xbf16>
    %279 = vector.shape_cast %278 : vector<1x32x32xbf16> to vector<32x32xbf16>
    %280 = arith.truncf %263 : vector<56x32xf32> to vector<56x32xbf16>
    %cst_190 = arith.constant dense<0.000000e+00> : vector<56x32xf32>
    %281 = tpu.matmul %280, %279, %cst_190 {dimension_numbers = #tpu.dot_dimension_numbers<[1], [0], [0], [1], [0, 0, 1, 1], [], []>} : vector<56x32xbf16>, vector<32x32xbf16>, vector<56x32xf32> -> vector<56x32xf32>
    %cst_191 = arith.constant dense<0.000000e+00> : vector<24x32xf32>
    %282 = tpu.matmul %2, %281, %cst_191 {dimension_numbers = #tpu.dot_dimension_numbers<[1], [0], [0], [1], [0, 0, 1, 1], [], []>} : vector<24x56xf32>, vector<56x32xf32>, vector<24x32xf32> -> vector<24x32xf32>
    %c13_192 = arith.constant 13 : index
    %c0_193 = arith.constant 0 : index
    %c0_194 = arith.constant 0 : index
    %283 = vector.load %arg11[%c13_192, %c0_193, %c0_194] : memref<36x1x32xf32, #tpu.memory_space<vmem>>, vector<1x1x32xf32>
    %284 = vector.shape_cast %283 : vector<1x1x32xf32> to vector<1x32xf32>
    %285 = vector.broadcast %284 : vector<1x32xf32> to vector<24x32xf32>
    %286 = arith.addf %282, %285 : vector<24x32xf32>
    %cst_195 = arith.constant 0.000000e+00 : f32
    %287 = vector.broadcast %cst_195 : f32 to vector<24x32xf32>
    %288 = arith.cmpf oge, %286, %287 : vector<24x32xf32>
    %cst_196 = arith.constant 1.000000e-01 : f32
    %289 = vector.broadcast %cst_196 : f32 to vector<24x32xf32>
    %290 = arith.mulf %289, %286 : vector<24x32xf32>
    %291 = arith.select %288, %286, %290 : vector<24x32xi1>, vector<24x32xf32>
    %c14 = arith.constant 14 : index
    %c0_197 = arith.constant 0 : index
    %c0_198 = arith.constant 0 : index
    %292 = vector.load %arg10[%c14, %c0_197, %c0_198] : memref<36x32x32xbf16, #tpu.memory_space<vmem>>, vector<1x32x32xbf16>
    %293 = vector.shape_cast %292 : vector<1x32x32xbf16> to vector<32x32xbf16>
    %294 = arith.truncf %277 : vector<56x32xf32> to vector<56x32xbf16>
    %cst_199 = arith.constant dense<0.000000e+00> : vector<56x32xf32>
    %295 = tpu.matmul %294, %293, %cst_199 {dimension_numbers = #tpu.dot_dimension_numbers<[1], [0], [0], [1], [0, 0, 1, 1], [], []>} : vector<56x32xbf16>, vector<32x32xbf16>, vector<56x32xf32> -> vector<56x32xf32>
    %cst_200 = arith.constant dense<0.000000e+00> : vector<24x32xf32>
    %296 = tpu.matmul %2, %295, %cst_200 {dimension_numbers = #tpu.dot_dimension_numbers<[1], [0], [0], [1], [0, 0, 1, 1], [], []>} : vector<24x56xf32>, vector<56x32xf32>, vector<24x32xf32> -> vector<24x32xf32>
    %c14_201 = arith.constant 14 : index
    %c0_202 = arith.constant 0 : index
    %c0_203 = arith.constant 0 : index
    %297 = vector.load %arg11[%c14_201, %c0_202, %c0_203] : memref<36x1x32xf32, #tpu.memory_space<vmem>>, vector<1x1x32xf32>
    %298 = vector.shape_cast %297 : vector<1x1x32xf32> to vector<1x32xf32>
    %299 = vector.broadcast %298 : vector<1x32xf32> to vector<24x32xf32>
    %300 = arith.addf %296, %299 : vector<24x32xf32>
    %cst_204 = arith.constant 0.000000e+00 : f32
    %301 = vector.broadcast %cst_204 : f32 to vector<24x32xf32>
    %302 = arith.cmpf oge, %300, %301 : vector<24x32xf32>
    %cst_205 = arith.constant 1.000000e-01 : f32
    %303 = vector.broadcast %cst_205 : f32 to vector<24x32xf32>
    %304 = arith.mulf %303, %300 : vector<24x32xf32>
    %305 = arith.select %302, %300, %304 : vector<24x32xi1>, vector<24x32xf32>
    %c15 = arith.constant 15 : index
    %c0_206 = arith.constant 0 : index
    %c0_207 = arith.constant 0 : index
    %306 = vector.load %arg10[%c15, %c0_206, %c0_207] : memref<36x32x32xbf16, #tpu.memory_space<vmem>>, vector<1x32x32xbf16>
    %307 = vector.shape_cast %306 : vector<1x32x32xbf16> to vector<32x32xbf16>
    %308 = arith.truncf %291 : vector<24x32xf32> to vector<24x32xbf16>
    %cst_208 = arith.constant dense<0.000000e+00> : vector<24x32xf32>
    %309 = tpu.matmul %308, %307, %cst_208 {dimension_numbers = #tpu.dot_dimension_numbers<[1], [0], [0], [1], [0, 0, 1, 1], [], []>} : vector<24x32xbf16>, vector<32x32xbf16>, vector<24x32xf32> -> vector<24x32xf32>
    %cst_209 = arith.constant dense<0.000000e+00> : vector<56x32xf32>
    %310 = tpu.matmul %3, %309, %cst_209 {dimension_numbers = #tpu.dot_dimension_numbers<[1], [0], [0], [1], [0, 0, 1, 1], [], []>} : vector<56x24xf32>, vector<24x32xf32>, vector<56x32xf32> -> vector<56x32xf32>
    %c15_210 = arith.constant 15 : index
    %c0_211 = arith.constant 0 : index
    %c0_212 = arith.constant 0 : index
    %311 = vector.load %arg11[%c15_210, %c0_211, %c0_212] : memref<36x1x32xf32, #tpu.memory_space<vmem>>, vector<1x1x32xf32>
    %312 = vector.shape_cast %311 : vector<1x1x32xf32> to vector<1x32xf32>
    %313 = vector.broadcast %312 : vector<1x32xf32> to vector<56x32xf32>
    %314 = arith.addf %310, %313 : vector<56x32xf32>
    %cst_213 = arith.constant 0.000000e+00 : f32
    %315 = vector.broadcast %cst_213 : f32 to vector<56x32xf32>
    %316 = arith.cmpf oge, %314, %315 : vector<56x32xf32>
    %cst_214 = arith.constant 1.000000e-01 : f32
    %317 = vector.broadcast %cst_214 : f32 to vector<56x32xf32>
    %318 = arith.mulf %317, %314 : vector<56x32xf32>
    %319 = arith.select %316, %314, %318 : vector<56x32xi1>, vector<56x32xf32>
    %c6_215 = arith.constant 6 : index
    %c0_216 = arith.constant 0 : index
    %c0_217 = arith.constant 0 : index
    %320 = vector.load %arg12[%c6_215, %c0_216, %c0_217] : memref<20x64x32xbf16, #tpu.memory_space<vmem>>, vector<1x64x32xbf16>
    %321 = vector.shape_cast %320 : vector<1x64x32xbf16> to vector<64x32xbf16>
    %322 = vector.extract_strided_slice %321 {offsets = [0, 0], sizes = [32, 32], strides = [1, 1]} : vector<64x32xbf16> to vector<32x32xbf16>
    %323 = arith.truncf %305 : vector<24x32xf32> to vector<24x32xbf16>
    %cst_218 = arith.constant dense<0.000000e+00> : vector<24x32xf32>
    %324 = tpu.matmul %323, %322, %cst_218 {dimension_numbers = #tpu.dot_dimension_numbers<[1], [0], [0], [1], [0, 0, 1, 1], [], []>} : vector<24x32xbf16>, vector<32x32xbf16>, vector<24x32xf32> -> vector<24x32xf32>
    %325 = vector.extract_strided_slice %321 {offsets = [32, 0], sizes = [32, 32], strides = [1, 1]} : vector<64x32xbf16> to vector<32x32xbf16>
    %326 = arith.truncf %248 : vector<24x32xf32> to vector<24x32xbf16>
    %cst_219 = arith.constant dense<0.000000e+00> : vector<24x32xf32>
    %327 = tpu.matmul %326, %325, %cst_219 {dimension_numbers = #tpu.dot_dimension_numbers<[1], [0], [0], [1], [0, 0, 1, 1], [], []>} : vector<24x32xbf16>, vector<32x32xbf16>, vector<24x32xf32> -> vector<24x32xf32>
    %328 = arith.addf %324, %327 : vector<24x32xf32>
    %c6_220 = arith.constant 6 : index
    %c0_221 = arith.constant 0 : index
    %c0_222 = arith.constant 0 : index
    %329 = vector.load %arg13[%c6_220, %c0_221, %c0_222] : memref<20x1x32xf32, #tpu.memory_space<vmem>>, vector<1x1x32xf32>
    %330 = vector.shape_cast %329 : vector<1x1x32xf32> to vector<1x32xf32>
    %331 = vector.broadcast %330 : vector<1x32xf32> to vector<24x32xf32>
    %332 = arith.addf %328, %331 : vector<24x32xf32>
    %c7_223 = arith.constant 7 : index
    %c0_224 = arith.constant 0 : index
    %c0_225 = arith.constant 0 : index
    %333 = vector.load %arg12[%c7_223, %c0_224, %c0_225] : memref<20x64x32xbf16, #tpu.memory_space<vmem>>, vector<1x64x32xbf16>
    %334 = vector.shape_cast %333 : vector<1x64x32xbf16> to vector<64x32xbf16>
    %335 = vector.extract_strided_slice %334 {offsets = [0, 0], sizes = [32, 32], strides = [1, 1]} : vector<64x32xbf16> to vector<32x32xbf16>
    %336 = arith.truncf %319 : vector<56x32xf32> to vector<56x32xbf16>
    %cst_226 = arith.constant dense<0.000000e+00> : vector<56x32xf32>
    %337 = tpu.matmul %336, %335, %cst_226 {dimension_numbers = #tpu.dot_dimension_numbers<[1], [0], [0], [1], [0, 0, 1, 1], [], []>} : vector<56x32xbf16>, vector<32x32xbf16>, vector<56x32xf32> -> vector<56x32xf32>
    %338 = vector.extract_strided_slice %334 {offsets = [32, 0], sizes = [32, 32], strides = [1, 1]} : vector<64x32xbf16> to vector<32x32xbf16>
    %339 = arith.truncf %263 : vector<56x32xf32> to vector<56x32xbf16>
    %cst_227 = arith.constant dense<0.000000e+00> : vector<56x32xf32>
    %340 = tpu.matmul %339, %338, %cst_227 {dimension_numbers = #tpu.dot_dimension_numbers<[1], [0], [0], [1], [0, 0, 1, 1], [], []>} : vector<56x32xbf16>, vector<32x32xbf16>, vector<56x32xf32> -> vector<56x32xf32>
    %341 = arith.addf %337, %340 : vector<56x32xf32>
    %c7_228 = arith.constant 7 : index
    %c0_229 = arith.constant 0 : index
    %c0_230 = arith.constant 0 : index
    %342 = vector.load %arg13[%c7_228, %c0_229, %c0_230] : memref<20x1x32xf32, #tpu.memory_space<vmem>>, vector<1x1x32xf32>
    %343 = vector.shape_cast %342 : vector<1x1x32xf32> to vector<1x32xf32>
    %344 = vector.broadcast %343 : vector<1x32xf32> to vector<56x32xf32>
    %345 = arith.addf %341, %344 : vector<56x32xf32>
    %c16 = arith.constant 16 : index
    %c0_231 = arith.constant 0 : index
    %c0_232 = arith.constant 0 : index
    %346 = vector.load %arg10[%c16, %c0_231, %c0_232] : memref<36x32x32xbf16, #tpu.memory_space<vmem>>, vector<1x32x32xbf16>
    %347 = vector.shape_cast %346 : vector<1x32x32xbf16> to vector<32x32xbf16>
    %348 = arith.truncf %4 : vector<24x32xf32> to vector<24x32xbf16>
    %cst_233 = arith.constant dense<0.000000e+00> : vector<24x32xf32>
    %349 = tpu.matmul %348, %347, %cst_233 {dimension_numbers = #tpu.dot_dimension_numbers<[1], [0], [0], [1], [0, 0, 1, 1], [], []>} : vector<24x32xbf16>, vector<32x32xbf16>, vector<24x32xf32> -> vector<24x32xf32>
    %cst_234 = arith.constant dense<0.000000e+00> : vector<40x32xf32>
    %350 = tpu.matmul %1, %349, %cst_234 {dimension_numbers = #tpu.dot_dimension_numbers<[1], [0], [0], [1], [0, 0, 1, 1], [], []>} : vector<40x24xf32>, vector<24x32xf32>, vector<40x32xf32> -> vector<40x32xf32>
    %c16_235 = arith.constant 16 : index
    %c0_236 = arith.constant 0 : index
    %c0_237 = arith.constant 0 : index
    %351 = vector.load %arg11[%c16_235, %c0_236, %c0_237] : memref<36x1x32xf32, #tpu.memory_space<vmem>>, vector<1x1x32xf32>
    %352 = vector.shape_cast %351 : vector<1x1x32xf32> to vector<1x32xf32>
    %353 = vector.broadcast %352 : vector<1x32xf32> to vector<40x32xf32>
    %354 = arith.addf %350, %353 : vector<40x32xf32>
    %cst_238 = arith.constant 0.000000e+00 : f32
    %355 = vector.broadcast %cst_238 : f32 to vector<40x32xf32>
    %356 = arith.cmpf oge, %354, %355 : vector<40x32xf32>
    %cst_239 = arith.constant 1.000000e-01 : f32
    %357 = vector.broadcast %cst_239 : f32 to vector<40x32xf32>
    %358 = arith.mulf %357, %354 : vector<40x32xf32>
    %359 = arith.select %356, %354, %358 : vector<40x32xi1>, vector<40x32xf32>
    %c17 = arith.constant 17 : index
    %c0_240 = arith.constant 0 : index
    %c0_241 = arith.constant 0 : index
    %360 = vector.load %arg10[%c17, %c0_240, %c0_241] : memref<36x32x32xbf16, #tpu.memory_space<vmem>>, vector<1x32x32xbf16>
    %361 = vector.shape_cast %360 : vector<1x32x32xbf16> to vector<32x32xbf16>
    %362 = arith.truncf %359 : vector<40x32xf32> to vector<40x32xbf16>
    %cst_242 = arith.constant dense<0.000000e+00> : vector<40x32xf32>
    %363 = tpu.matmul %362, %361, %cst_242 {dimension_numbers = #tpu.dot_dimension_numbers<[1], [0], [0], [1], [0, 0, 1, 1], [], []>} : vector<40x32xbf16>, vector<32x32xbf16>, vector<40x32xf32> -> vector<40x32xf32>
    %cst_243 = arith.constant dense<0.000000e+00> : vector<24x32xf32>
    %364 = tpu.matmul %0, %363, %cst_243 {dimension_numbers = #tpu.dot_dimension_numbers<[1], [0], [0], [1], [0, 0, 1, 1], [], []>} : vector<24x40xf32>, vector<40x32xf32>, vector<24x32xf32> -> vector<24x32xf32>
    %c17_244 = arith.constant 17 : index
    %c0_245 = arith.constant 0 : index
    %c0_246 = arith.constant 0 : index
    %365 = vector.load %arg11[%c17_244, %c0_245, %c0_246] : memref<36x1x32xf32, #tpu.memory_space<vmem>>, vector<1x1x32xf32>
    %366 = vector.shape_cast %365 : vector<1x1x32xf32> to vector<1x32xf32>
    %367 = vector.broadcast %366 : vector<1x32xf32> to vector<24x32xf32>
    %368 = arith.addf %364, %367 : vector<24x32xf32>
    %cst_247 = arith.constant 0.000000e+00 : f32
    %369 = vector.broadcast %cst_247 : f32 to vector<24x32xf32>
    %370 = arith.cmpf oge, %368, %369 : vector<24x32xf32>
    %cst_248 = arith.constant 1.000000e-01 : f32
    %371 = vector.broadcast %cst_248 : f32 to vector<24x32xf32>
    %372 = arith.mulf %371, %368 : vector<24x32xf32>
    %373 = arith.select %370, %368, %372 : vector<24x32xi1>, vector<24x32xf32>
    %c8_249 = arith.constant 8 : index
    %c0_250 = arith.constant 0 : index
    %c0_251 = arith.constant 0 : index
    %374 = vector.load %arg12[%c8_249, %c0_250, %c0_251] : memref<20x64x32xbf16, #tpu.memory_space<vmem>>, vector<1x64x32xbf16>
    %375 = vector.shape_cast %374 : vector<1x64x32xbf16> to vector<64x32xbf16>
    %376 = vector.extract_strided_slice %375 {offsets = [0, 0], sizes = [32, 32], strides = [1, 1]} : vector<64x32xbf16> to vector<32x32xbf16>
    %377 = arith.truncf %373 : vector<24x32xf32> to vector<24x32xbf16>
    %cst_252 = arith.constant dense<0.000000e+00> : vector<24x32xf32>
    %378 = tpu.matmul %377, %376, %cst_252 {dimension_numbers = #tpu.dot_dimension_numbers<[1], [0], [0], [1], [0, 0, 1, 1], [], []>} : vector<24x32xbf16>, vector<32x32xbf16>, vector<24x32xf32> -> vector<24x32xf32>
    %379 = vector.extract_strided_slice %375 {offsets = [32, 0], sizes = [32, 32], strides = [1, 1]} : vector<64x32xbf16> to vector<32x32xbf16>
    %380 = arith.truncf %4 : vector<24x32xf32> to vector<24x32xbf16>
    %cst_253 = arith.constant dense<0.000000e+00> : vector<24x32xf32>
    %381 = tpu.matmul %380, %379, %cst_253 {dimension_numbers = #tpu.dot_dimension_numbers<[1], [0], [0], [1], [0, 0, 1, 1], [], []>} : vector<24x32xbf16>, vector<32x32xbf16>, vector<24x32xf32> -> vector<24x32xf32>
    %382 = arith.addf %378, %381 : vector<24x32xf32>
    %c8_254 = arith.constant 8 : index
    %c0_255 = arith.constant 0 : index
    %c0_256 = arith.constant 0 : index
    %383 = vector.load %arg13[%c8_254, %c0_255, %c0_256] : memref<20x1x32xf32, #tpu.memory_space<vmem>>, vector<1x1x32xf32>
    %384 = vector.shape_cast %383 : vector<1x1x32xf32> to vector<1x32xf32>
    %385 = vector.broadcast %384 : vector<1x32xf32> to vector<24x32xf32>
    %386 = arith.addf %382, %385 : vector<24x32xf32>
    %cst_257 = arith.constant 0.000000e+00 : f32
    %387 = vector.broadcast %cst_257 : f32 to vector<24x32xf32>
    %388 = arith.maximumf %386, %387 : vector<24x32xf32>
    %c18 = arith.constant 18 : index
    %c0_258 = arith.constant 0 : index
    %c0_259 = arith.constant 0 : index
    %389 = vector.load %arg10[%c18, %c0_258, %c0_259] : memref<36x32x32xbf16, #tpu.memory_space<vmem>>, vector<1x32x32xbf16>
    %390 = vector.shape_cast %389 : vector<1x32x32xbf16> to vector<32x32xbf16>
    %391 = arith.truncf %388 : vector<24x32xf32> to vector<24x32xbf16>
    %cst_260 = arith.constant dense<0.000000e+00> : vector<24x32xf32>
    %392 = tpu.matmul %391, %390, %cst_260 {dimension_numbers = #tpu.dot_dimension_numbers<[1], [0], [0], [1], [0, 0, 1, 1], [], []>} : vector<24x32xbf16>, vector<32x32xbf16>, vector<24x32xf32> -> vector<24x32xf32>
    %cst_261 = arith.constant dense<0.000000e+00> : vector<40x32xf32>
    %393 = tpu.matmul %1, %392, %cst_261 {dimension_numbers = #tpu.dot_dimension_numbers<[1], [0], [0], [1], [0, 0, 1, 1], [], []>} : vector<40x24xf32>, vector<24x32xf32>, vector<40x32xf32> -> vector<40x32xf32>
    %c18_262 = arith.constant 18 : index
    %c0_263 = arith.constant 0 : index
    %c0_264 = arith.constant 0 : index
    %394 = vector.load %arg11[%c18_262, %c0_263, %c0_264] : memref<36x1x32xf32, #tpu.memory_space<vmem>>, vector<1x1x32xf32>
    %395 = vector.shape_cast %394 : vector<1x1x32xf32> to vector<1x32xf32>
    %396 = vector.broadcast %395 : vector<1x32xf32> to vector<40x32xf32>
    %397 = arith.addf %393, %396 : vector<40x32xf32>
    %cst_265 = arith.constant 0.000000e+00 : f32
    %398 = vector.broadcast %cst_265 : f32 to vector<40x32xf32>
    %399 = arith.cmpf oge, %397, %398 : vector<40x32xf32>
    %cst_266 = arith.constant 1.000000e-01 : f32
    %400 = vector.broadcast %cst_266 : f32 to vector<40x32xf32>
    %401 = arith.mulf %400, %397 : vector<40x32xf32>
    %402 = arith.select %399, %397, %401 : vector<40x32xi1>, vector<40x32xf32>
    %c19 = arith.constant 19 : index
    %c0_267 = arith.constant 0 : index
    %c0_268 = arith.constant 0 : index
    %403 = vector.load %arg10[%c19, %c0_267, %c0_268] : memref<36x32x32xbf16, #tpu.memory_space<vmem>>, vector<1x32x32xbf16>
    %404 = vector.shape_cast %403 : vector<1x32x32xbf16> to vector<32x32xbf16>
    %405 = arith.truncf %402 : vector<40x32xf32> to vector<40x32xbf16>
    %cst_269 = arith.constant dense<0.000000e+00> : vector<40x32xf32>
    %406 = tpu.matmul %405, %404, %cst_269 {dimension_numbers = #tpu.dot_dimension_numbers<[1], [0], [0], [1], [0, 0, 1, 1], [], []>} : vector<40x32xbf16>, vector<32x32xbf16>, vector<40x32xf32> -> vector<40x32xf32>
    %cst_270 = arith.constant dense<0.000000e+00> : vector<24x32xf32>
    %407 = tpu.matmul %0, %406, %cst_270 {dimension_numbers = #tpu.dot_dimension_numbers<[1], [0], [0], [1], [0, 0, 1, 1], [], []>} : vector<24x40xf32>, vector<40x32xf32>, vector<24x32xf32> -> vector<24x32xf32>
    %c19_271 = arith.constant 19 : index
    %c0_272 = arith.constant 0 : index
    %c0_273 = arith.constant 0 : index
    %408 = vector.load %arg11[%c19_271, %c0_272, %c0_273] : memref<36x1x32xf32, #tpu.memory_space<vmem>>, vector<1x1x32xf32>
    %409 = vector.shape_cast %408 : vector<1x1x32xf32> to vector<1x32xf32>
    %410 = vector.broadcast %409 : vector<1x32xf32> to vector<24x32xf32>
    %411 = arith.addf %407, %410 : vector<24x32xf32>
    %cst_274 = arith.constant 0.000000e+00 : f32
    %412 = vector.broadcast %cst_274 : f32 to vector<24x32xf32>
    %413 = arith.cmpf oge, %411, %412 : vector<24x32xf32>
    %cst_275 = arith.constant 1.000000e-01 : f32
    %414 = vector.broadcast %cst_275 : f32 to vector<24x32xf32>
    %415 = arith.mulf %414, %411 : vector<24x32xf32>
    %416 = arith.select %413, %411, %415 : vector<24x32xi1>, vector<24x32xf32>
    %c20 = arith.constant 20 : index
    %c0_276 = arith.constant 0 : index
    %c0_277 = arith.constant 0 : index
    %417 = vector.load %arg10[%c20, %c0_276, %c0_277] : memref<36x32x32xbf16, #tpu.memory_space<vmem>>, vector<1x32x32xbf16>
    %418 = vector.shape_cast %417 : vector<1x32x32xbf16> to vector<32x32xbf16>
    %419 = arith.truncf %402 : vector<40x32xf32> to vector<40x32xbf16>
    %cst_278 = arith.constant dense<0.000000e+00> : vector<40x32xf32>
    %420 = tpu.matmul %419, %418, %cst_278 {dimension_numbers = #tpu.dot_dimension_numbers<[1], [0], [0], [1], [0, 0, 1, 1], [], []>} : vector<40x32xbf16>, vector<32x32xbf16>, vector<40x32xf32> -> vector<40x32xf32>
    %cst_279 = arith.constant dense<0.000000e+00> : vector<24x32xf32>
    %421 = tpu.matmul %0, %420, %cst_279 {dimension_numbers = #tpu.dot_dimension_numbers<[1], [0], [0], [1], [0, 0, 1, 1], [], []>} : vector<24x40xf32>, vector<40x32xf32>, vector<24x32xf32> -> vector<24x32xf32>
    %c20_280 = arith.constant 20 : index
    %c0_281 = arith.constant 0 : index
    %c0_282 = arith.constant 0 : index
    %422 = vector.load %arg11[%c20_280, %c0_281, %c0_282] : memref<36x1x32xf32, #tpu.memory_space<vmem>>, vector<1x1x32xf32>
    %423 = vector.shape_cast %422 : vector<1x1x32xf32> to vector<1x32xf32>
    %424 = vector.broadcast %423 : vector<1x32xf32> to vector<24x32xf32>
    %425 = arith.addf %421, %424 : vector<24x32xf32>
    %cst_283 = arith.constant 0.000000e+00 : f32
    %426 = vector.broadcast %cst_283 : f32 to vector<24x32xf32>
    %427 = arith.cmpf oge, %425, %426 : vector<24x32xf32>
    %cst_284 = arith.constant 1.000000e-01 : f32
    %428 = vector.broadcast %cst_284 : f32 to vector<24x32xf32>
    %429 = arith.mulf %428, %425 : vector<24x32xf32>
    %430 = arith.select %427, %425, %429 : vector<24x32xi1>, vector<24x32xf32>
    %c9_285 = arith.constant 9 : index
    %c0_286 = arith.constant 0 : index
    %c0_287 = arith.constant 0 : index
    %431 = vector.load %arg12[%c9_285, %c0_286, %c0_287] : memref<20x64x32xbf16, #tpu.memory_space<vmem>>, vector<1x64x32xbf16>
    %432 = vector.shape_cast %431 : vector<1x64x32xbf16> to vector<64x32xbf16>
    %433 = vector.extract_strided_slice %432 {offsets = [0, 0], sizes = [32, 32], strides = [1, 1]} : vector<64x32xbf16> to vector<32x32xbf16>
    %434 = arith.truncf %416 : vector<24x32xf32> to vector<24x32xbf16>
    %cst_288 = arith.constant dense<0.000000e+00> : vector<24x32xf32>
    %435 = tpu.matmul %434, %433, %cst_288 {dimension_numbers = #tpu.dot_dimension_numbers<[1], [0], [0], [1], [0, 0, 1, 1], [], []>} : vector<24x32xbf16>, vector<32x32xbf16>, vector<24x32xf32> -> vector<24x32xf32>
    %436 = vector.extract_strided_slice %432 {offsets = [32, 0], sizes = [32, 32], strides = [1, 1]} : vector<64x32xbf16> to vector<32x32xbf16>
    %437 = arith.truncf %388 : vector<24x32xf32> to vector<24x32xbf16>
    %cst_289 = arith.constant dense<0.000000e+00> : vector<24x32xf32>
    %438 = tpu.matmul %437, %436, %cst_289 {dimension_numbers = #tpu.dot_dimension_numbers<[1], [0], [0], [1], [0, 0, 1, 1], [], []>} : vector<24x32xbf16>, vector<32x32xbf16>, vector<24x32xf32> -> vector<24x32xf32>
    %439 = arith.addf %435, %438 : vector<24x32xf32>
    %c9_290 = arith.constant 9 : index
    %c0_291 = arith.constant 0 : index
    %c0_292 = arith.constant 0 : index
    %440 = vector.load %arg13[%c9_290, %c0_291, %c0_292] : memref<20x1x32xf32, #tpu.memory_space<vmem>>, vector<1x1x32xf32>
    %441 = vector.shape_cast %440 : vector<1x1x32xf32> to vector<1x32xf32>
    %442 = vector.broadcast %441 : vector<1x32xf32> to vector<24x32xf32>
    %443 = arith.addf %439, %442 : vector<24x32xf32>
    %c10_293 = arith.constant 10 : index
    %c0_294 = arith.constant 0 : index
    %c0_295 = arith.constant 0 : index
    %444 = vector.load %arg12[%c10_293, %c0_294, %c0_295] : memref<20x64x32xbf16, #tpu.memory_space<vmem>>, vector<1x64x32xbf16>
    %445 = vector.shape_cast %444 : vector<1x64x32xbf16> to vector<64x32xbf16>
    %446 = vector.extract_strided_slice %445 {offsets = [0, 0], sizes = [32, 32], strides = [1, 1]} : vector<64x32xbf16> to vector<32x32xbf16>
    %447 = arith.truncf %430 : vector<24x32xf32> to vector<24x32xbf16>
    %cst_296 = arith.constant dense<0.000000e+00> : vector<24x32xf32>
    %448 = tpu.matmul %447, %446, %cst_296 {dimension_numbers = #tpu.dot_dimension_numbers<[1], [0], [0], [1], [0, 0, 1, 1], [], []>} : vector<24x32xbf16>, vector<32x32xbf16>, vector<24x32xf32> -> vector<24x32xf32>
    %449 = vector.extract_strided_slice %445 {offsets = [32, 0], sizes = [32, 32], strides = [1, 1]} : vector<64x32xbf16> to vector<32x32xbf16>
    %450 = arith.truncf %388 : vector<24x32xf32> to vector<24x32xbf16>
    %cst_297 = arith.constant dense<0.000000e+00> : vector<24x32xf32>
    %451 = tpu.matmul %450, %449, %cst_297 {dimension_numbers = #tpu.dot_dimension_numbers<[1], [0], [0], [1], [0, 0, 1, 1], [], []>} : vector<24x32xbf16>, vector<32x32xbf16>, vector<24x32xf32> -> vector<24x32xf32>
    %452 = arith.addf %448, %451 : vector<24x32xf32>
    %c10_298 = arith.constant 10 : index
    %c0_299 = arith.constant 0 : index
    %c0_300 = arith.constant 0 : index
    %453 = vector.load %arg13[%c10_298, %c0_299, %c0_300] : memref<20x1x32xf32, #tpu.memory_space<vmem>>, vector<1x1x32xf32>
    %454 = vector.shape_cast %453 : vector<1x1x32xf32> to vector<1x32xf32>
    %455 = vector.broadcast %454 : vector<1x32xf32> to vector<24x32xf32>
    %456 = arith.addf %452, %455 : vector<24x32xf32>
    %c21 = arith.constant 21 : index
    %c0_301 = arith.constant 0 : index
    %c0_302 = arith.constant 0 : index
    %457 = vector.load %arg10[%c21, %c0_301, %c0_302] : memref<36x32x32xbf16, #tpu.memory_space<vmem>>, vector<1x32x32xbf16>
    %458 = vector.shape_cast %457 : vector<1x32x32xbf16> to vector<32x32xbf16>
    %459 = arith.truncf %5 : vector<24x32xf32> to vector<24x32xbf16>
    %cst_303 = arith.constant dense<0.000000e+00> : vector<24x32xf32>
    %460 = tpu.matmul %459, %458, %cst_303 {dimension_numbers = #tpu.dot_dimension_numbers<[1], [0], [0], [1], [0, 0, 1, 1], [], []>} : vector<24x32xbf16>, vector<32x32xbf16>, vector<24x32xf32> -> vector<24x32xf32>
    %cst_304 = arith.constant dense<0.000000e+00> : vector<56x32xf32>
    %461 = tpu.matmul %3, %460, %cst_304 {dimension_numbers = #tpu.dot_dimension_numbers<[1], [0], [0], [1], [0, 0, 1, 1], [], []>} : vector<56x24xf32>, vector<24x32xf32>, vector<56x32xf32> -> vector<56x32xf32>
    %c21_305 = arith.constant 21 : index
    %c0_306 = arith.constant 0 : index
    %c0_307 = arith.constant 0 : index
    %462 = vector.load %arg11[%c21_305, %c0_306, %c0_307] : memref<36x1x32xf32, #tpu.memory_space<vmem>>, vector<1x1x32xf32>
    %463 = vector.shape_cast %462 : vector<1x1x32xf32> to vector<1x32xf32>
    %464 = vector.broadcast %463 : vector<1x32xf32> to vector<56x32xf32>
    %465 = arith.addf %461, %464 : vector<56x32xf32>
    %cst_308 = arith.constant 0.000000e+00 : f32
    %466 = vector.broadcast %cst_308 : f32 to vector<56x32xf32>
    %467 = arith.cmpf oge, %465, %466 : vector<56x32xf32>
    %cst_309 = arith.constant 1.000000e-01 : f32
    %468 = vector.broadcast %cst_309 : f32 to vector<56x32xf32>
    %469 = arith.mulf %468, %465 : vector<56x32xf32>
    %470 = arith.select %467, %465, %469 : vector<56x32xi1>, vector<56x32xf32>
    %c22 = arith.constant 22 : index
    %c0_310 = arith.constant 0 : index
    %c0_311 = arith.constant 0 : index
    %471 = vector.load %arg10[%c22, %c0_310, %c0_311] : memref<36x32x32xbf16, #tpu.memory_space<vmem>>, vector<1x32x32xbf16>
    %472 = vector.shape_cast %471 : vector<1x32x32xbf16> to vector<32x32xbf16>
    %473 = arith.truncf %470 : vector<56x32xf32> to vector<56x32xbf16>
    %cst_312 = arith.constant dense<0.000000e+00> : vector<56x32xf32>
    %474 = tpu.matmul %473, %472, %cst_312 {dimension_numbers = #tpu.dot_dimension_numbers<[1], [0], [0], [1], [0, 0, 1, 1], [], []>} : vector<56x32xbf16>, vector<32x32xbf16>, vector<56x32xf32> -> vector<56x32xf32>
    %cst_313 = arith.constant dense<0.000000e+00> : vector<24x32xf32>
    %475 = tpu.matmul %2, %474, %cst_313 {dimension_numbers = #tpu.dot_dimension_numbers<[1], [0], [0], [1], [0, 0, 1, 1], [], []>} : vector<24x56xf32>, vector<56x32xf32>, vector<24x32xf32> -> vector<24x32xf32>
    %c22_314 = arith.constant 22 : index
    %c0_315 = arith.constant 0 : index
    %c0_316 = arith.constant 0 : index
    %476 = vector.load %arg11[%c22_314, %c0_315, %c0_316] : memref<36x1x32xf32, #tpu.memory_space<vmem>>, vector<1x1x32xf32>
    %477 = vector.shape_cast %476 : vector<1x1x32xf32> to vector<1x32xf32>
    %478 = vector.broadcast %477 : vector<1x32xf32> to vector<24x32xf32>
    %479 = arith.addf %475, %478 : vector<24x32xf32>
    %cst_317 = arith.constant 0.000000e+00 : f32
    %480 = vector.broadcast %cst_317 : f32 to vector<24x32xf32>
    %481 = arith.cmpf oge, %479, %480 : vector<24x32xf32>
    %cst_318 = arith.constant 1.000000e-01 : f32
    %482 = vector.broadcast %cst_318 : f32 to vector<24x32xf32>
    %483 = arith.mulf %482, %479 : vector<24x32xf32>
    %484 = arith.select %481, %479, %483 : vector<24x32xi1>, vector<24x32xf32>
    %c11_319 = arith.constant 11 : index
    %c0_320 = arith.constant 0 : index
    %c0_321 = arith.constant 0 : index
    %485 = vector.load %arg12[%c11_319, %c0_320, %c0_321] : memref<20x64x32xbf16, #tpu.memory_space<vmem>>, vector<1x64x32xbf16>
    %486 = vector.shape_cast %485 : vector<1x64x32xbf16> to vector<64x32xbf16>
    %487 = vector.extract_strided_slice %486 {offsets = [0, 0], sizes = [32, 32], strides = [1, 1]} : vector<64x32xbf16> to vector<32x32xbf16>
    %488 = arith.truncf %484 : vector<24x32xf32> to vector<24x32xbf16>
    %cst_322 = arith.constant dense<0.000000e+00> : vector<24x32xf32>
    %489 = tpu.matmul %488, %487, %cst_322 {dimension_numbers = #tpu.dot_dimension_numbers<[1], [0], [0], [1], [0, 0, 1, 1], [], []>} : vector<24x32xbf16>, vector<32x32xbf16>, vector<24x32xf32> -> vector<24x32xf32>
    %490 = vector.extract_strided_slice %486 {offsets = [32, 0], sizes = [32, 32], strides = [1, 1]} : vector<64x32xbf16> to vector<32x32xbf16>
    %491 = arith.truncf %5 : vector<24x32xf32> to vector<24x32xbf16>
    %cst_323 = arith.constant dense<0.000000e+00> : vector<24x32xf32>
    %492 = tpu.matmul %491, %490, %cst_323 {dimension_numbers = #tpu.dot_dimension_numbers<[1], [0], [0], [1], [0, 0, 1, 1], [], []>} : vector<24x32xbf16>, vector<32x32xbf16>, vector<24x32xf32> -> vector<24x32xf32>
    %493 = arith.addf %489, %492 : vector<24x32xf32>
    %c11_324 = arith.constant 11 : index
    %c0_325 = arith.constant 0 : index
    %c0_326 = arith.constant 0 : index
    %494 = vector.load %arg13[%c11_324, %c0_325, %c0_326] : memref<20x1x32xf32, #tpu.memory_space<vmem>>, vector<1x1x32xf32>
    %495 = vector.shape_cast %494 : vector<1x1x32xf32> to vector<1x32xf32>
    %496 = vector.broadcast %495 : vector<1x32xf32> to vector<24x32xf32>
    %497 = arith.addf %493, %496 : vector<24x32xf32>
    %cst_327 = arith.constant 0.000000e+00 : f32
    %498 = vector.broadcast %cst_327 : f32 to vector<24x32xf32>
    %499 = arith.maximumf %497, %498 : vector<24x32xf32>
    %c23 = arith.constant 23 : index
    %c0_328 = arith.constant 0 : index
    %c0_329 = arith.constant 0 : index
    %500 = vector.load %arg10[%c23, %c0_328, %c0_329] : memref<36x32x32xbf16, #tpu.memory_space<vmem>>, vector<1x32x32xbf16>
    %501 = vector.shape_cast %500 : vector<1x32x32xbf16> to vector<32x32xbf16>
    %502 = arith.truncf %499 : vector<24x32xf32> to vector<24x32xbf16>
    %cst_330 = arith.constant dense<0.000000e+00> : vector<24x32xf32>
    %503 = tpu.matmul %502, %501, %cst_330 {dimension_numbers = #tpu.dot_dimension_numbers<[1], [0], [0], [1], [0, 0, 1, 1], [], []>} : vector<24x32xbf16>, vector<32x32xbf16>, vector<24x32xf32> -> vector<24x32xf32>
    %cst_331 = arith.constant dense<0.000000e+00> : vector<56x32xf32>
    %504 = tpu.matmul %3, %503, %cst_331 {dimension_numbers = #tpu.dot_dimension_numbers<[1], [0], [0], [1], [0, 0, 1, 1], [], []>} : vector<56x24xf32>, vector<24x32xf32>, vector<56x32xf32> -> vector<56x32xf32>
    %c23_332 = arith.constant 23 : index
    %c0_333 = arith.constant 0 : index
    %c0_334 = arith.constant 0 : index
    %505 = vector.load %arg11[%c23_332, %c0_333, %c0_334] : memref<36x1x32xf32, #tpu.memory_space<vmem>>, vector<1x1x32xf32>
    %506 = vector.shape_cast %505 : vector<1x1x32xf32> to vector<1x32xf32>
    %507 = vector.broadcast %506 : vector<1x32xf32> to vector<56x32xf32>
    %508 = arith.addf %504, %507 : vector<56x32xf32>
    %cst_335 = arith.constant 0.000000e+00 : f32
    %509 = vector.broadcast %cst_335 : f32 to vector<56x32xf32>
    %510 = arith.cmpf oge, %508, %509 : vector<56x32xf32>
    %cst_336 = arith.constant 1.000000e-01 : f32
    %511 = vector.broadcast %cst_336 : f32 to vector<56x32xf32>
    %512 = arith.mulf %511, %508 : vector<56x32xf32>
    %513 = arith.select %510, %508, %512 : vector<56x32xi1>, vector<56x32xf32>
    %c24 = arith.constant 24 : index
    %c0_337 = arith.constant 0 : index
    %c0_338 = arith.constant 0 : index
    %514 = vector.load %arg10[%c24, %c0_337, %c0_338] : memref<36x32x32xbf16, #tpu.memory_space<vmem>>, vector<1x32x32xbf16>
    %515 = vector.shape_cast %514 : vector<1x32x32xbf16> to vector<32x32xbf16>
    %516 = arith.truncf %513 : vector<56x32xf32> to vector<56x32xbf16>
    %cst_339 = arith.constant dense<0.000000e+00> : vector<56x32xf32>
    %517 = tpu.matmul %516, %515, %cst_339 {dimension_numbers = #tpu.dot_dimension_numbers<[1], [0], [0], [1], [0, 0, 1, 1], [], []>} : vector<56x32xbf16>, vector<32x32xbf16>, vector<56x32xf32> -> vector<56x32xf32>
    %cst_340 = arith.constant dense<0.000000e+00> : vector<24x32xf32>
    %518 = tpu.matmul %2, %517, %cst_340 {dimension_numbers = #tpu.dot_dimension_numbers<[1], [0], [0], [1], [0, 0, 1, 1], [], []>} : vector<24x56xf32>, vector<56x32xf32>, vector<24x32xf32> -> vector<24x32xf32>
    %c24_341 = arith.constant 24 : index
    %c0_342 = arith.constant 0 : index
    %c0_343 = arith.constant 0 : index
    %519 = vector.load %arg11[%c24_341, %c0_342, %c0_343] : memref<36x1x32xf32, #tpu.memory_space<vmem>>, vector<1x1x32xf32>
    %520 = vector.shape_cast %519 : vector<1x1x32xf32> to vector<1x32xf32>
    %521 = vector.broadcast %520 : vector<1x32xf32> to vector<24x32xf32>
    %522 = arith.addf %518, %521 : vector<24x32xf32>
    %cst_344 = arith.constant 0.000000e+00 : f32
    %523 = vector.broadcast %cst_344 : f32 to vector<24x32xf32>
    %524 = arith.cmpf oge, %522, %523 : vector<24x32xf32>
    %cst_345 = arith.constant 1.000000e-01 : f32
    %525 = vector.broadcast %cst_345 : f32 to vector<24x32xf32>
    %526 = arith.mulf %525, %522 : vector<24x32xf32>
    %527 = arith.select %524, %522, %526 : vector<24x32xi1>, vector<24x32xf32>
    %c25 = arith.constant 25 : index
    %c0_346 = arith.constant 0 : index
    %c0_347 = arith.constant 0 : index
    %528 = vector.load %arg10[%c25, %c0_346, %c0_347] : memref<36x32x32xbf16, #tpu.memory_space<vmem>>, vector<1x32x32xbf16>
    %529 = vector.shape_cast %528 : vector<1x32x32xbf16> to vector<32x32xbf16>
    %530 = arith.truncf %513 : vector<56x32xf32> to vector<56x32xbf16>
    %cst_348 = arith.constant dense<0.000000e+00> : vector<56x32xf32>
    %531 = tpu.matmul %530, %529, %cst_348 {dimension_numbers = #tpu.dot_dimension_numbers<[1], [0], [0], [1], [0, 0, 1, 1], [], []>} : vector<56x32xbf16>, vector<32x32xbf16>, vector<56x32xf32> -> vector<56x32xf32>
    %cst_349 = arith.constant dense<0.000000e+00> : vector<24x32xf32>
    %532 = tpu.matmul %2, %531, %cst_349 {dimension_numbers = #tpu.dot_dimension_numbers<[1], [0], [0], [1], [0, 0, 1, 1], [], []>} : vector<24x56xf32>, vector<56x32xf32>, vector<24x32xf32> -> vector<24x32xf32>
    %c25_350 = arith.constant 25 : index
    %c0_351 = arith.constant 0 : index
    %c0_352 = arith.constant 0 : index
    %533 = vector.load %arg11[%c25_350, %c0_351, %c0_352] : memref<36x1x32xf32, #tpu.memory_space<vmem>>, vector<1x1x32xf32>
    %534 = vector.shape_cast %533 : vector<1x1x32xf32> to vector<1x32xf32>
    %535 = vector.broadcast %534 : vector<1x32xf32> to vector<24x32xf32>
    %536 = arith.addf %532, %535 : vector<24x32xf32>
    %cst_353 = arith.constant 0.000000e+00 : f32
    %537 = vector.broadcast %cst_353 : f32 to vector<24x32xf32>
    %538 = arith.cmpf oge, %536, %537 : vector<24x32xf32>
    %cst_354 = arith.constant 1.000000e-01 : f32
    %539 = vector.broadcast %cst_354 : f32 to vector<24x32xf32>
    %540 = arith.mulf %539, %536 : vector<24x32xf32>
    %541 = arith.select %538, %536, %540 : vector<24x32xi1>, vector<24x32xf32>
    %c12_355 = arith.constant 12 : index
    %c0_356 = arith.constant 0 : index
    %c0_357 = arith.constant 0 : index
    %542 = vector.load %arg12[%c12_355, %c0_356, %c0_357] : memref<20x64x32xbf16, #tpu.memory_space<vmem>>, vector<1x64x32xbf16>
    %543 = vector.shape_cast %542 : vector<1x64x32xbf16> to vector<64x32xbf16>
    %544 = vector.extract_strided_slice %543 {offsets = [0, 0], sizes = [32, 32], strides = [1, 1]} : vector<64x32xbf16> to vector<32x32xbf16>
    %545 = arith.truncf %527 : vector<24x32xf32> to vector<24x32xbf16>
    %cst_358 = arith.constant dense<0.000000e+00> : vector<24x32xf32>
    %546 = tpu.matmul %545, %544, %cst_358 {dimension_numbers = #tpu.dot_dimension_numbers<[1], [0], [0], [1], [0, 0, 1, 1], [], []>} : vector<24x32xbf16>, vector<32x32xbf16>, vector<24x32xf32> -> vector<24x32xf32>
    %547 = vector.extract_strided_slice %543 {offsets = [32, 0], sizes = [32, 32], strides = [1, 1]} : vector<64x32xbf16> to vector<32x32xbf16>
    %548 = arith.truncf %499 : vector<24x32xf32> to vector<24x32xbf16>
    %cst_359 = arith.constant dense<0.000000e+00> : vector<24x32xf32>
    %549 = tpu.matmul %548, %547, %cst_359 {dimension_numbers = #tpu.dot_dimension_numbers<[1], [0], [0], [1], [0, 0, 1, 1], [], []>} : vector<24x32xbf16>, vector<32x32xbf16>, vector<24x32xf32> -> vector<24x32xf32>
    %550 = arith.addf %546, %549 : vector<24x32xf32>
    %c12_360 = arith.constant 12 : index
    %c0_361 = arith.constant 0 : index
    %c0_362 = arith.constant 0 : index
    %551 = vector.load %arg13[%c12_360, %c0_361, %c0_362] : memref<20x1x32xf32, #tpu.memory_space<vmem>>, vector<1x1x32xf32>
    %552 = vector.shape_cast %551 : vector<1x1x32xf32> to vector<1x32xf32>
    %553 = vector.broadcast %552 : vector<1x32xf32> to vector<24x32xf32>
    %554 = arith.addf %550, %553 : vector<24x32xf32>
    %c13_363 = arith.constant 13 : index
    %c0_364 = arith.constant 0 : index
    %c0_365 = arith.constant 0 : index
    %555 = vector.load %arg12[%c13_363, %c0_364, %c0_365] : memref<20x64x32xbf16, #tpu.memory_space<vmem>>, vector<1x64x32xbf16>
    %556 = vector.shape_cast %555 : vector<1x64x32xbf16> to vector<64x32xbf16>
    %557 = vector.extract_strided_slice %556 {offsets = [0, 0], sizes = [32, 32], strides = [1, 1]} : vector<64x32xbf16> to vector<32x32xbf16>
    %558 = arith.truncf %541 : vector<24x32xf32> to vector<24x32xbf16>
    %cst_366 = arith.constant dense<0.000000e+00> : vector<24x32xf32>
    %559 = tpu.matmul %558, %557, %cst_366 {dimension_numbers = #tpu.dot_dimension_numbers<[1], [0], [0], [1], [0, 0, 1, 1], [], []>} : vector<24x32xbf16>, vector<32x32xbf16>, vector<24x32xf32> -> vector<24x32xf32>
    %560 = vector.extract_strided_slice %556 {offsets = [32, 0], sizes = [32, 32], strides = [1, 1]} : vector<64x32xbf16> to vector<32x32xbf16>
    %561 = arith.truncf %499 : vector<24x32xf32> to vector<24x32xbf16>
    %cst_367 = arith.constant dense<0.000000e+00> : vector<24x32xf32>
    %562 = tpu.matmul %561, %560, %cst_367 {dimension_numbers = #tpu.dot_dimension_numbers<[1], [0], [0], [1], [0, 0, 1, 1], [], []>} : vector<24x32xbf16>, vector<32x32xbf16>, vector<24x32xf32> -> vector<24x32xf32>
    %563 = arith.addf %559, %562 : vector<24x32xf32>
    %c13_368 = arith.constant 13 : index
    %c0_369 = arith.constant 0 : index
    %c0_370 = arith.constant 0 : index
    %564 = vector.load %arg13[%c13_368, %c0_369, %c0_370] : memref<20x1x32xf32, #tpu.memory_space<vmem>>, vector<1x1x32xf32>
    %565 = vector.shape_cast %564 : vector<1x1x32xf32> to vector<1x32xf32>
    %566 = vector.broadcast %565 : vector<1x32xf32> to vector<24x32xf32>
    %567 = arith.addf %563, %566 : vector<24x32xf32>
    %c26 = arith.constant 26 : index
    %c0_371 = arith.constant 0 : index
    %c0_372 = arith.constant 0 : index
    %568 = vector.load %arg10[%c26, %c0_371, %c0_372] : memref<36x32x32xbf16, #tpu.memory_space<vmem>>, vector<1x32x32xbf16>
    %569 = vector.shape_cast %568 : vector<1x32x32xbf16> to vector<32x32xbf16>
    %570 = arith.truncf %8 : vector<24x32xf32> to vector<24x32xbf16>
    %cst_373 = arith.constant dense<0.000000e+00> : vector<24x32xf32>
    %571 = tpu.matmul %570, %569, %cst_373 {dimension_numbers = #tpu.dot_dimension_numbers<[1], [0], [0], [1], [0, 0, 1, 1], [], []>} : vector<24x32xbf16>, vector<32x32xbf16>, vector<24x32xf32> -> vector<24x32xf32>
    %cst_374 = arith.constant dense<0.000000e+00> : vector<40x32xf32>
    %572 = tpu.matmul %1, %571, %cst_374 {dimension_numbers = #tpu.dot_dimension_numbers<[1], [0], [0], [1], [0, 0, 1, 1], [], []>} : vector<40x24xf32>, vector<24x32xf32>, vector<40x32xf32> -> vector<40x32xf32>
    %c26_375 = arith.constant 26 : index
    %c0_376 = arith.constant 0 : index
    %c0_377 = arith.constant 0 : index
    %573 = vector.load %arg11[%c26_375, %c0_376, %c0_377] : memref<36x1x32xf32, #tpu.memory_space<vmem>>, vector<1x1x32xf32>
    %574 = vector.shape_cast %573 : vector<1x1x32xf32> to vector<1x32xf32>
    %575 = vector.broadcast %574 : vector<1x32xf32> to vector<40x32xf32>
    %576 = arith.addf %572, %575 : vector<40x32xf32>
    %cst_378 = arith.constant 0.000000e+00 : f32
    %577 = vector.broadcast %cst_378 : f32 to vector<40x32xf32>
    %578 = arith.cmpf oge, %576, %577 : vector<40x32xf32>
    %cst_379 = arith.constant 1.000000e-01 : f32
    %579 = vector.broadcast %cst_379 : f32 to vector<40x32xf32>
    %580 = arith.mulf %579, %576 : vector<40x32xf32>
    %581 = arith.select %578, %576, %580 : vector<40x32xi1>, vector<40x32xf32>
    %c27 = arith.constant 27 : index
    %c0_380 = arith.constant 0 : index
    %c0_381 = arith.constant 0 : index
    %582 = vector.load %arg10[%c27, %c0_380, %c0_381] : memref<36x32x32xbf16, #tpu.memory_space<vmem>>, vector<1x32x32xbf16>
    %583 = vector.shape_cast %582 : vector<1x32x32xbf16> to vector<32x32xbf16>
    %584 = arith.truncf %581 : vector<40x32xf32> to vector<40x32xbf16>
    %cst_382 = arith.constant dense<0.000000e+00> : vector<40x32xf32>
    %585 = tpu.matmul %584, %583, %cst_382 {dimension_numbers = #tpu.dot_dimension_numbers<[1], [0], [0], [1], [0, 0, 1, 1], [], []>} : vector<40x32xbf16>, vector<32x32xbf16>, vector<40x32xf32> -> vector<40x32xf32>
    %cst_383 = arith.constant dense<0.000000e+00> : vector<24x32xf32>
    %586 = tpu.matmul %0, %585, %cst_383 {dimension_numbers = #tpu.dot_dimension_numbers<[1], [0], [0], [1], [0, 0, 1, 1], [], []>} : vector<24x40xf32>, vector<40x32xf32>, vector<24x32xf32> -> vector<24x32xf32>
    %c27_384 = arith.constant 27 : index
    %c0_385 = arith.constant 0 : index
    %c0_386 = arith.constant 0 : index
    %587 = vector.load %arg11[%c27_384, %c0_385, %c0_386] : memref<36x1x32xf32, #tpu.memory_space<vmem>>, vector<1x1x32xf32>
    %588 = vector.shape_cast %587 : vector<1x1x32xf32> to vector<1x32xf32>
    %589 = vector.broadcast %588 : vector<1x32xf32> to vector<24x32xf32>
    %590 = arith.addf %586, %589 : vector<24x32xf32>
    %cst_387 = arith.constant 0.000000e+00 : f32
    %591 = vector.broadcast %cst_387 : f32 to vector<24x32xf32>
    %592 = arith.cmpf oge, %590, %591 : vector<24x32xf32>
    %cst_388 = arith.constant 1.000000e-01 : f32
    %593 = vector.broadcast %cst_388 : f32 to vector<24x32xf32>
    %594 = arith.mulf %593, %590 : vector<24x32xf32>
    %595 = arith.select %592, %590, %594 : vector<24x32xi1>, vector<24x32xf32>
    %c14_389 = arith.constant 14 : index
    %c0_390 = arith.constant 0 : index
    %c0_391 = arith.constant 0 : index
    %596 = vector.load %arg12[%c14_389, %c0_390, %c0_391] : memref<20x64x32xbf16, #tpu.memory_space<vmem>>, vector<1x64x32xbf16>
    %597 = vector.shape_cast %596 : vector<1x64x32xbf16> to vector<64x32xbf16>
    %598 = vector.extract_strided_slice %597 {offsets = [0, 0], sizes = [32, 32], strides = [1, 1]} : vector<64x32xbf16> to vector<32x32xbf16>
    %599 = arith.truncf %595 : vector<24x32xf32> to vector<24x32xbf16>
    %cst_392 = arith.constant dense<0.000000e+00> : vector<24x32xf32>
    %600 = tpu.matmul %599, %598, %cst_392 {dimension_numbers = #tpu.dot_dimension_numbers<[1], [0], [0], [1], [0, 0, 1, 1], [], []>} : vector<24x32xbf16>, vector<32x32xbf16>, vector<24x32xf32> -> vector<24x32xf32>
    %601 = vector.extract_strided_slice %597 {offsets = [32, 0], sizes = [32, 32], strides = [1, 1]} : vector<64x32xbf16> to vector<32x32xbf16>
    %602 = arith.truncf %8 : vector<24x32xf32> to vector<24x32xbf16>
    %cst_393 = arith.constant dense<0.000000e+00> : vector<24x32xf32>
    %603 = tpu.matmul %602, %601, %cst_393 {dimension_numbers = #tpu.dot_dimension_numbers<[1], [0], [0], [1], [0, 0, 1, 1], [], []>} : vector<24x32xbf16>, vector<32x32xbf16>, vector<24x32xf32> -> vector<24x32xf32>
    %604 = arith.addf %600, %603 : vector<24x32xf32>
    %c14_394 = arith.constant 14 : index
    %c0_395 = arith.constant 0 : index
    %c0_396 = arith.constant 0 : index
    %605 = vector.load %arg13[%c14_394, %c0_395, %c0_396] : memref<20x1x32xf32, #tpu.memory_space<vmem>>, vector<1x1x32xf32>
    %606 = vector.shape_cast %605 : vector<1x1x32xf32> to vector<1x32xf32>
    %607 = vector.broadcast %606 : vector<1x32xf32> to vector<24x32xf32>
    %608 = arith.addf %604, %607 : vector<24x32xf32>
    %cst_397 = arith.constant 0.000000e+00 : f32
    %609 = vector.broadcast %cst_397 : f32 to vector<24x32xf32>
    %610 = arith.maximumf %608, %609 : vector<24x32xf32>
    %c28 = arith.constant 28 : index
    %c0_398 = arith.constant 0 : index
    %c0_399 = arith.constant 0 : index
    %611 = vector.load %arg10[%c28, %c0_398, %c0_399] : memref<36x32x32xbf16, #tpu.memory_space<vmem>>, vector<1x32x32xbf16>
    %612 = vector.shape_cast %611 : vector<1x32x32xbf16> to vector<32x32xbf16>
    %613 = arith.truncf %610 : vector<24x32xf32> to vector<24x32xbf16>
    %cst_400 = arith.constant dense<0.000000e+00> : vector<24x32xf32>
    %614 = tpu.matmul %613, %612, %cst_400 {dimension_numbers = #tpu.dot_dimension_numbers<[1], [0], [0], [1], [0, 0, 1, 1], [], []>} : vector<24x32xbf16>, vector<32x32xbf16>, vector<24x32xf32> -> vector<24x32xf32>
    %cst_401 = arith.constant dense<0.000000e+00> : vector<40x32xf32>
    %615 = tpu.matmul %1, %614, %cst_401 {dimension_numbers = #tpu.dot_dimension_numbers<[1], [0], [0], [1], [0, 0, 1, 1], [], []>} : vector<40x24xf32>, vector<24x32xf32>, vector<40x32xf32> -> vector<40x32xf32>
    %c28_402 = arith.constant 28 : index
    %c0_403 = arith.constant 0 : index
    %c0_404 = arith.constant 0 : index
    %616 = vector.load %arg11[%c28_402, %c0_403, %c0_404] : memref<36x1x32xf32, #tpu.memory_space<vmem>>, vector<1x1x32xf32>
    %617 = vector.shape_cast %616 : vector<1x1x32xf32> to vector<1x32xf32>
    %618 = vector.broadcast %617 : vector<1x32xf32> to vector<40x32xf32>
    %619 = arith.addf %615, %618 : vector<40x32xf32>
    %cst_405 = arith.constant 0.000000e+00 : f32
    %620 = vector.broadcast %cst_405 : f32 to vector<40x32xf32>
    %621 = arith.cmpf oge, %619, %620 : vector<40x32xf32>
    %cst_406 = arith.constant 1.000000e-01 : f32
    %622 = vector.broadcast %cst_406 : f32 to vector<40x32xf32>
    %623 = arith.mulf %622, %619 : vector<40x32xf32>
    %624 = arith.select %621, %619, %623 : vector<40x32xi1>, vector<40x32xf32>
    %c29 = arith.constant 29 : index
    %c0_407 = arith.constant 0 : index
    %c0_408 = arith.constant 0 : index
    %625 = vector.load %arg10[%c29, %c0_407, %c0_408] : memref<36x32x32xbf16, #tpu.memory_space<vmem>>, vector<1x32x32xbf16>
    %626 = vector.shape_cast %625 : vector<1x32x32xbf16> to vector<32x32xbf16>
    %627 = arith.truncf %624 : vector<40x32xf32> to vector<40x32xbf16>
    %cst_409 = arith.constant dense<0.000000e+00> : vector<40x32xf32>
    %628 = tpu.matmul %627, %626, %cst_409 {dimension_numbers = #tpu.dot_dimension_numbers<[1], [0], [0], [1], [0, 0, 1, 1], [], []>} : vector<40x32xbf16>, vector<32x32xbf16>, vector<40x32xf32> -> vector<40x32xf32>
    %cst_410 = arith.constant dense<0.000000e+00> : vector<24x32xf32>
    %629 = tpu.matmul %0, %628, %cst_410 {dimension_numbers = #tpu.dot_dimension_numbers<[1], [0], [0], [1], [0, 0, 1, 1], [], []>} : vector<24x40xf32>, vector<40x32xf32>, vector<24x32xf32> -> vector<24x32xf32>
    %c29_411 = arith.constant 29 : index
    %c0_412 = arith.constant 0 : index
    %c0_413 = arith.constant 0 : index
    %630 = vector.load %arg11[%c29_411, %c0_412, %c0_413] : memref<36x1x32xf32, #tpu.memory_space<vmem>>, vector<1x1x32xf32>
    %631 = vector.shape_cast %630 : vector<1x1x32xf32> to vector<1x32xf32>
    %632 = vector.broadcast %631 : vector<1x32xf32> to vector<24x32xf32>
    %633 = arith.addf %629, %632 : vector<24x32xf32>
    %cst_414 = arith.constant 0.000000e+00 : f32
    %634 = vector.broadcast %cst_414 : f32 to vector<24x32xf32>
    %635 = arith.cmpf oge, %633, %634 : vector<24x32xf32>
    %cst_415 = arith.constant 1.000000e-01 : f32
    %636 = vector.broadcast %cst_415 : f32 to vector<24x32xf32>
    %637 = arith.mulf %636, %633 : vector<24x32xf32>
    %638 = arith.select %635, %633, %637 : vector<24x32xi1>, vector<24x32xf32>
    %c30 = arith.constant 30 : index
    %c0_416 = arith.constant 0 : index
    %c0_417 = arith.constant 0 : index
    %639 = vector.load %arg10[%c30, %c0_416, %c0_417] : memref<36x32x32xbf16, #tpu.memory_space<vmem>>, vector<1x32x32xbf16>
    %640 = vector.shape_cast %639 : vector<1x32x32xbf16> to vector<32x32xbf16>
    %641 = arith.truncf %624 : vector<40x32xf32> to vector<40x32xbf16>
    %cst_418 = arith.constant dense<0.000000e+00> : vector<40x32xf32>
    %642 = tpu.matmul %641, %640, %cst_418 {dimension_numbers = #tpu.dot_dimension_numbers<[1], [0], [0], [1], [0, 0, 1, 1], [], []>} : vector<40x32xbf16>, vector<32x32xbf16>, vector<40x32xf32> -> vector<40x32xf32>
    %cst_419 = arith.constant dense<0.000000e+00> : vector<24x32xf32>
    %643 = tpu.matmul %0, %642, %cst_419 {dimension_numbers = #tpu.dot_dimension_numbers<[1], [0], [0], [1], [0, 0, 1, 1], [], []>} : vector<24x40xf32>, vector<40x32xf32>, vector<24x32xf32> -> vector<24x32xf32>
    %c30_420 = arith.constant 30 : index
    %c0_421 = arith.constant 0 : index
    %c0_422 = arith.constant 0 : index
    %644 = vector.load %arg11[%c30_420, %c0_421, %c0_422] : memref<36x1x32xf32, #tpu.memory_space<vmem>>, vector<1x1x32xf32>
    %645 = vector.shape_cast %644 : vector<1x1x32xf32> to vector<1x32xf32>
    %646 = vector.broadcast %645 : vector<1x32xf32> to vector<24x32xf32>
    %647 = arith.addf %643, %646 : vector<24x32xf32>
    %cst_423 = arith.constant 0.000000e+00 : f32
    %648 = vector.broadcast %cst_423 : f32 to vector<24x32xf32>
    %649 = arith.cmpf oge, %647, %648 : vector<24x32xf32>
    %cst_424 = arith.constant 1.000000e-01 : f32
    %650 = vector.broadcast %cst_424 : f32 to vector<24x32xf32>
    %651 = arith.mulf %650, %647 : vector<24x32xf32>
    %652 = arith.select %649, %647, %651 : vector<24x32xi1>, vector<24x32xf32>
    %c15_425 = arith.constant 15 : index
    %c0_426 = arith.constant 0 : index
    %c0_427 = arith.constant 0 : index
    %653 = vector.load %arg12[%c15_425, %c0_426, %c0_427] : memref<20x64x32xbf16, #tpu.memory_space<vmem>>, vector<1x64x32xbf16>
    %654 = vector.shape_cast %653 : vector<1x64x32xbf16> to vector<64x32xbf16>
    %655 = vector.extract_strided_slice %654 {offsets = [0, 0], sizes = [32, 32], strides = [1, 1]} : vector<64x32xbf16> to vector<32x32xbf16>
    %656 = arith.truncf %638 : vector<24x32xf32> to vector<24x32xbf16>
    %cst_428 = arith.constant dense<0.000000e+00> : vector<24x32xf32>
    %657 = tpu.matmul %656, %655, %cst_428 {dimension_numbers = #tpu.dot_dimension_numbers<[1], [0], [0], [1], [0, 0, 1, 1], [], []>} : vector<24x32xbf16>, vector<32x32xbf16>, vector<24x32xf32> -> vector<24x32xf32>
    %658 = vector.extract_strided_slice %654 {offsets = [32, 0], sizes = [32, 32], strides = [1, 1]} : vector<64x32xbf16> to vector<32x32xbf16>
    %659 = arith.truncf %164 : vector<24x32xf32> to vector<24x32xbf16>
    %cst_429 = arith.constant dense<0.000000e+00> : vector<24x32xf32>
    %660 = tpu.matmul %659, %658, %cst_429 {dimension_numbers = #tpu.dot_dimension_numbers<[1], [0], [0], [1], [0, 0, 1, 1], [], []>} : vector<24x32xbf16>, vector<32x32xbf16>, vector<24x32xf32> -> vector<24x32xf32>
    %661 = arith.addf %657, %660 : vector<24x32xf32>
    %c15_430 = arith.constant 15 : index
    %c0_431 = arith.constant 0 : index
    %c0_432 = arith.constant 0 : index
    %662 = vector.load %arg13[%c15_430, %c0_431, %c0_432] : memref<20x1x32xf32, #tpu.memory_space<vmem>>, vector<1x1x32xf32>
    %663 = vector.shape_cast %662 : vector<1x1x32xf32> to vector<1x32xf32>
    %664 = vector.broadcast %663 : vector<1x32xf32> to vector<24x32xf32>
    %665 = arith.addf %661, %664 : vector<24x32xf32>
    %c16_433 = arith.constant 16 : index
    %c0_434 = arith.constant 0 : index
    %c0_435 = arith.constant 0 : index
    %666 = vector.load %arg12[%c16_433, %c0_434, %c0_435] : memref<20x64x32xbf16, #tpu.memory_space<vmem>>, vector<1x64x32xbf16>
    %667 = vector.shape_cast %666 : vector<1x64x32xbf16> to vector<64x32xbf16>
    %668 = vector.extract_strided_slice %667 {offsets = [0, 0], sizes = [32, 32], strides = [1, 1]} : vector<64x32xbf16> to vector<32x32xbf16>
    %669 = arith.truncf %652 : vector<24x32xf32> to vector<24x32xbf16>
    %cst_436 = arith.constant dense<0.000000e+00> : vector<24x32xf32>
    %670 = tpu.matmul %669, %668, %cst_436 {dimension_numbers = #tpu.dot_dimension_numbers<[1], [0], [0], [1], [0, 0, 1, 1], [], []>} : vector<24x32xbf16>, vector<32x32xbf16>, vector<24x32xf32> -> vector<24x32xf32>
    %671 = vector.extract_strided_slice %667 {offsets = [32, 0], sizes = [32, 32], strides = [1, 1]} : vector<64x32xbf16> to vector<32x32xbf16>
    %672 = arith.truncf %164 : vector<24x32xf32> to vector<24x32xbf16>
    %cst_437 = arith.constant dense<0.000000e+00> : vector<24x32xf32>
    %673 = tpu.matmul %672, %671, %cst_437 {dimension_numbers = #tpu.dot_dimension_numbers<[1], [0], [0], [1], [0, 0, 1, 1], [], []>} : vector<24x32xbf16>, vector<32x32xbf16>, vector<24x32xf32> -> vector<24x32xf32>
    %674 = arith.addf %670, %673 : vector<24x32xf32>
    %c16_438 = arith.constant 16 : index
    %c0_439 = arith.constant 0 : index
    %c0_440 = arith.constant 0 : index
    %675 = vector.load %arg13[%c16_438, %c0_439, %c0_440] : memref<20x1x32xf32, #tpu.memory_space<vmem>>, vector<1x1x32xf32>
    %676 = vector.shape_cast %675 : vector<1x1x32xf32> to vector<1x32xf32>
    %677 = vector.broadcast %676 : vector<1x32xf32> to vector<24x32xf32>
    %678 = arith.addf %674, %677 : vector<24x32xf32>
    %c31 = arith.constant 31 : index
    %c0_441 = arith.constant 0 : index
    %c0_442 = arith.constant 0 : index
    %679 = vector.load %arg10[%c31, %c0_441, %c0_442] : memref<36x32x32xbf16, #tpu.memory_space<vmem>>, vector<1x32x32xbf16>
    %680 = vector.shape_cast %679 : vector<1x32x32xbf16> to vector<32x32xbf16>
    %681 = arith.truncf %9 : vector<24x32xf32> to vector<24x32xbf16>
    %cst_443 = arith.constant dense<0.000000e+00> : vector<24x32xf32>
    %682 = tpu.matmul %681, %680, %cst_443 {dimension_numbers = #tpu.dot_dimension_numbers<[1], [0], [0], [1], [0, 0, 1, 1], [], []>} : vector<24x32xbf16>, vector<32x32xbf16>, vector<24x32xf32> -> vector<24x32xf32>
    %cst_444 = arith.constant dense<0.000000e+00> : vector<56x32xf32>
    %683 = tpu.matmul %3, %682, %cst_444 {dimension_numbers = #tpu.dot_dimension_numbers<[1], [0], [0], [1], [0, 0, 1, 1], [], []>} : vector<56x24xf32>, vector<24x32xf32>, vector<56x32xf32> -> vector<56x32xf32>
    %c31_445 = arith.constant 31 : index
    %c0_446 = arith.constant 0 : index
    %c0_447 = arith.constant 0 : index
    %684 = vector.load %arg11[%c31_445, %c0_446, %c0_447] : memref<36x1x32xf32, #tpu.memory_space<vmem>>, vector<1x1x32xf32>
    %685 = vector.shape_cast %684 : vector<1x1x32xf32> to vector<1x32xf32>
    %686 = vector.broadcast %685 : vector<1x32xf32> to vector<56x32xf32>
    %687 = arith.addf %683, %686 : vector<56x32xf32>
    %cst_448 = arith.constant 0.000000e+00 : f32
    %688 = vector.broadcast %cst_448 : f32 to vector<56x32xf32>
    %689 = arith.cmpf oge, %687, %688 : vector<56x32xf32>
    %cst_449 = arith.constant 1.000000e-01 : f32
    %690 = vector.broadcast %cst_449 : f32 to vector<56x32xf32>
    %691 = arith.mulf %690, %687 : vector<56x32xf32>
    %692 = arith.select %689, %687, %691 : vector<56x32xi1>, vector<56x32xf32>
    %c32 = arith.constant 32 : index
    %c0_450 = arith.constant 0 : index
    %c0_451 = arith.constant 0 : index
    %693 = vector.load %arg10[%c32, %c0_450, %c0_451] : memref<36x32x32xbf16, #tpu.memory_space<vmem>>, vector<1x32x32xbf16>
    %694 = vector.shape_cast %693 : vector<1x32x32xbf16> to vector<32x32xbf16>
    %695 = arith.truncf %692 : vector<56x32xf32> to vector<56x32xbf16>
    %cst_452 = arith.constant dense<0.000000e+00> : vector<56x32xf32>
    %696 = tpu.matmul %695, %694, %cst_452 {dimension_numbers = #tpu.dot_dimension_numbers<[1], [0], [0], [1], [0, 0, 1, 1], [], []>} : vector<56x32xbf16>, vector<32x32xbf16>, vector<56x32xf32> -> vector<56x32xf32>
    %cst_453 = arith.constant dense<0.000000e+00> : vector<24x32xf32>
    %697 = tpu.matmul %2, %696, %cst_453 {dimension_numbers = #tpu.dot_dimension_numbers<[1], [0], [0], [1], [0, 0, 1, 1], [], []>} : vector<24x56xf32>, vector<56x32xf32>, vector<24x32xf32> -> vector<24x32xf32>
    %c32_454 = arith.constant 32 : index
    %c0_455 = arith.constant 0 : index
    %c0_456 = arith.constant 0 : index
    %698 = vector.load %arg11[%c32_454, %c0_455, %c0_456] : memref<36x1x32xf32, #tpu.memory_space<vmem>>, vector<1x1x32xf32>
    %699 = vector.shape_cast %698 : vector<1x1x32xf32> to vector<1x32xf32>
    %700 = vector.broadcast %699 : vector<1x32xf32> to vector<24x32xf32>
    %701 = arith.addf %697, %700 : vector<24x32xf32>
    %cst_457 = arith.constant 0.000000e+00 : f32
    %702 = vector.broadcast %cst_457 : f32 to vector<24x32xf32>
    %703 = arith.cmpf oge, %701, %702 : vector<24x32xf32>
    %cst_458 = arith.constant 1.000000e-01 : f32
    %704 = vector.broadcast %cst_458 : f32 to vector<24x32xf32>
    %705 = arith.mulf %704, %701 : vector<24x32xf32>
    %706 = arith.select %703, %701, %705 : vector<24x32xi1>, vector<24x32xf32>
    %c17_459 = arith.constant 17 : index
    %c0_460 = arith.constant 0 : index
    %c0_461 = arith.constant 0 : index
    %707 = vector.load %arg12[%c17_459, %c0_460, %c0_461] : memref<20x64x32xbf16, #tpu.memory_space<vmem>>, vector<1x64x32xbf16>
    %708 = vector.shape_cast %707 : vector<1x64x32xbf16> to vector<64x32xbf16>
    %709 = vector.extract_strided_slice %708 {offsets = [0, 0], sizes = [32, 32], strides = [1, 1]} : vector<64x32xbf16> to vector<32x32xbf16>
    %710 = arith.truncf %706 : vector<24x32xf32> to vector<24x32xbf16>
    %cst_462 = arith.constant dense<0.000000e+00> : vector<24x32xf32>
    %711 = tpu.matmul %710, %709, %cst_462 {dimension_numbers = #tpu.dot_dimension_numbers<[1], [0], [0], [1], [0, 0, 1, 1], [], []>} : vector<24x32xbf16>, vector<32x32xbf16>, vector<24x32xf32> -> vector<24x32xf32>
    %712 = vector.extract_strided_slice %708 {offsets = [32, 0], sizes = [32, 32], strides = [1, 1]} : vector<64x32xbf16> to vector<32x32xbf16>
    %713 = arith.truncf %9 : vector<24x32xf32> to vector<24x32xbf16>
    %cst_463 = arith.constant dense<0.000000e+00> : vector<24x32xf32>
    %714 = tpu.matmul %713, %712, %cst_463 {dimension_numbers = #tpu.dot_dimension_numbers<[1], [0], [0], [1], [0, 0, 1, 1], [], []>} : vector<24x32xbf16>, vector<32x32xbf16>, vector<24x32xf32> -> vector<24x32xf32>
    %715 = arith.addf %711, %714 : vector<24x32xf32>
    %c17_464 = arith.constant 17 : index
    %c0_465 = arith.constant 0 : index
    %c0_466 = arith.constant 0 : index
    %716 = vector.load %arg13[%c17_464, %c0_465, %c0_466] : memref<20x1x32xf32, #tpu.memory_space<vmem>>, vector<1x1x32xf32>
    %717 = vector.shape_cast %716 : vector<1x1x32xf32> to vector<1x32xf32>
    %718 = vector.broadcast %717 : vector<1x32xf32> to vector<24x32xf32>
    %719 = arith.addf %715, %718 : vector<24x32xf32>
    %cst_467 = arith.constant 0.000000e+00 : f32
    %720 = vector.broadcast %cst_467 : f32 to vector<24x32xf32>
    %721 = arith.maximumf %719, %720 : vector<24x32xf32>
    %c33 = arith.constant 33 : index
    %c0_468 = arith.constant 0 : index
    %c0_469 = arith.constant 0 : index
    %722 = vector.load %arg10[%c33, %c0_468, %c0_469] : memref<36x32x32xbf16, #tpu.memory_space<vmem>>, vector<1x32x32xbf16>
    %723 = vector.shape_cast %722 : vector<1x32x32xbf16> to vector<32x32xbf16>
    %724 = arith.truncf %721 : vector<24x32xf32> to vector<24x32xbf16>
    %cst_470 = arith.constant dense<0.000000e+00> : vector<24x32xf32>
    %725 = tpu.matmul %724, %723, %cst_470 {dimension_numbers = #tpu.dot_dimension_numbers<[1], [0], [0], [1], [0, 0, 1, 1], [], []>} : vector<24x32xbf16>, vector<32x32xbf16>, vector<24x32xf32> -> vector<24x32xf32>
    %cst_471 = arith.constant dense<0.000000e+00> : vector<56x32xf32>
    %726 = tpu.matmul %3, %725, %cst_471 {dimension_numbers = #tpu.dot_dimension_numbers<[1], [0], [0], [1], [0, 0, 1, 1], [], []>} : vector<56x24xf32>, vector<24x32xf32>, vector<56x32xf32> -> vector<56x32xf32>
    %c33_472 = arith.constant 33 : index
    %c0_473 = arith.constant 0 : index
    %c0_474 = arith.constant 0 : index
    %727 = vector.load %arg11[%c33_472, %c0_473, %c0_474] : memref<36x1x32xf32, #tpu.memory_space<vmem>>, vector<1x1x32xf32>
    %728 = vector.shape_cast %727 : vector<1x1x32xf32> to vector<1x32xf32>
    %729 = vector.broadcast %728 : vector<1x32xf32> to vector<56x32xf32>
    %730 = arith.addf %726, %729 : vector<56x32xf32>
    %cst_475 = arith.constant 0.000000e+00 : f32
    %731 = vector.broadcast %cst_475 : f32 to vector<56x32xf32>
    %732 = arith.cmpf oge, %730, %731 : vector<56x32xf32>
    %cst_476 = arith.constant 1.000000e-01 : f32
    %733 = vector.broadcast %cst_476 : f32 to vector<56x32xf32>
    %734 = arith.mulf %733, %730 : vector<56x32xf32>
    %735 = arith.select %732, %730, %734 : vector<56x32xi1>, vector<56x32xf32>
    %c34 = arith.constant 34 : index
    %c0_477 = arith.constant 0 : index
    %c0_478 = arith.constant 0 : index
    %736 = vector.load %arg10[%c34, %c0_477, %c0_478] : memref<36x32x32xbf16, #tpu.memory_space<vmem>>, vector<1x32x32xbf16>
    %737 = vector.shape_cast %736 : vector<1x32x32xbf16> to vector<32x32xbf16>
    %738 = arith.truncf %735 : vector<56x32xf32> to vector<56x32xbf16>
    %cst_479 = arith.constant dense<0.000000e+00> : vector<56x32xf32>
    %739 = tpu.matmul %738, %737, %cst_479 {dimension_numbers = #tpu.dot_dimension_numbers<[1], [0], [0], [1], [0, 0, 1, 1], [], []>} : vector<56x32xbf16>, vector<32x32xbf16>, vector<56x32xf32> -> vector<56x32xf32>
    %cst_480 = arith.constant dense<0.000000e+00> : vector<24x32xf32>
    %740 = tpu.matmul %2, %739, %cst_480 {dimension_numbers = #tpu.dot_dimension_numbers<[1], [0], [0], [1], [0, 0, 1, 1], [], []>} : vector<24x56xf32>, vector<56x32xf32>, vector<24x32xf32> -> vector<24x32xf32>
    %c34_481 = arith.constant 34 : index
    %c0_482 = arith.constant 0 : index
    %c0_483 = arith.constant 0 : index
    %741 = vector.load %arg11[%c34_481, %c0_482, %c0_483] : memref<36x1x32xf32, #tpu.memory_space<vmem>>, vector<1x1x32xf32>
    %742 = vector.shape_cast %741 : vector<1x1x32xf32> to vector<1x32xf32>
    %743 = vector.broadcast %742 : vector<1x32xf32> to vector<24x32xf32>
    %744 = arith.addf %740, %743 : vector<24x32xf32>
    %cst_484 = arith.constant 0.000000e+00 : f32
    %745 = vector.broadcast %cst_484 : f32 to vector<24x32xf32>
    %746 = arith.cmpf oge, %744, %745 : vector<24x32xf32>
    %cst_485 = arith.constant 1.000000e-01 : f32
    %747 = vector.broadcast %cst_485 : f32 to vector<24x32xf32>
    %748 = arith.mulf %747, %744 : vector<24x32xf32>
    %749 = arith.select %746, %744, %748 : vector<24x32xi1>, vector<24x32xf32>
    %c35 = arith.constant 35 : index
    %c0_486 = arith.constant 0 : index
    %c0_487 = arith.constant 0 : index
    %750 = vector.load %arg10[%c35, %c0_486, %c0_487] : memref<36x32x32xbf16, #tpu.memory_space<vmem>>, vector<1x32x32xbf16>
    %751 = vector.shape_cast %750 : vector<1x32x32xbf16> to vector<32x32xbf16>
    %752 = arith.truncf %735 : vector<56x32xf32> to vector<56x32xbf16>
    %cst_488 = arith.constant dense<0.000000e+00> : vector<56x32xf32>
    %753 = tpu.matmul %752, %751, %cst_488 {dimension_numbers = #tpu.dot_dimension_numbers<[1], [0], [0], [1], [0, 0, 1, 1], [], []>} : vector<56x32xbf16>, vector<32x32xbf16>, vector<56x32xf32> -> vector<56x32xf32>
    %cst_489 = arith.constant dense<0.000000e+00> : vector<24x32xf32>
    %754 = tpu.matmul %2, %753, %cst_489 {dimension_numbers = #tpu.dot_dimension_numbers<[1], [0], [0], [1], [0, 0, 1, 1], [], []>} : vector<24x56xf32>, vector<56x32xf32>, vector<24x32xf32> -> vector<24x32xf32>
    %c35_490 = arith.constant 35 : index
    %c0_491 = arith.constant 0 : index
    %c0_492 = arith.constant 0 : index
    %755 = vector.load %arg11[%c35_490, %c0_491, %c0_492] : memref<36x1x32xf32, #tpu.memory_space<vmem>>, vector<1x1x32xf32>
    %756 = vector.shape_cast %755 : vector<1x1x32xf32> to vector<1x32xf32>
    %757 = vector.broadcast %756 : vector<1x32xf32> to vector<24x32xf32>
    %758 = arith.addf %754, %757 : vector<24x32xf32>
    %cst_493 = arith.constant 0.000000e+00 : f32
    %759 = vector.broadcast %cst_493 : f32 to vector<24x32xf32>
    %760 = arith.cmpf oge, %758, %759 : vector<24x32xf32>
    %cst_494 = arith.constant 1.000000e-01 : f32
    %761 = vector.broadcast %cst_494 : f32 to vector<24x32xf32>
    %762 = arith.mulf %761, %758 : vector<24x32xf32>
    %763 = arith.select %760, %758, %762 : vector<24x32xi1>, vector<24x32xf32>
    %c18_495 = arith.constant 18 : index
    %c0_496 = arith.constant 0 : index
    %c0_497 = arith.constant 0 : index
    %764 = vector.load %arg12[%c18_495, %c0_496, %c0_497] : memref<20x64x32xbf16, #tpu.memory_space<vmem>>, vector<1x64x32xbf16>
    %765 = vector.shape_cast %764 : vector<1x64x32xbf16> to vector<64x32xbf16>
    %766 = vector.extract_strided_slice %765 {offsets = [0, 0], sizes = [32, 32], strides = [1, 1]} : vector<64x32xbf16> to vector<32x32xbf16>
    %767 = arith.truncf %749 : vector<24x32xf32> to vector<24x32xbf16>
    %cst_498 = arith.constant dense<0.000000e+00> : vector<24x32xf32>
    %768 = tpu.matmul %767, %766, %cst_498 {dimension_numbers = #tpu.dot_dimension_numbers<[1], [0], [0], [1], [0, 0, 1, 1], [], []>} : vector<24x32xbf16>, vector<32x32xbf16>, vector<24x32xf32> -> vector<24x32xf32>
    %769 = vector.extract_strided_slice %765 {offsets = [32, 0], sizes = [32, 32], strides = [1, 1]} : vector<64x32xbf16> to vector<32x32xbf16>
    %770 = arith.truncf %332 : vector<24x32xf32> to vector<24x32xbf16>
    %cst_499 = arith.constant dense<0.000000e+00> : vector<24x32xf32>
    %771 = tpu.matmul %770, %769, %cst_499 {dimension_numbers = #tpu.dot_dimension_numbers<[1], [0], [0], [1], [0, 0, 1, 1], [], []>} : vector<24x32xbf16>, vector<32x32xbf16>, vector<24x32xf32> -> vector<24x32xf32>
    %772 = arith.addf %768, %771 : vector<24x32xf32>
    %c18_500 = arith.constant 18 : index
    %c0_501 = arith.constant 0 : index
    %c0_502 = arith.constant 0 : index
    %773 = vector.load %arg13[%c18_500, %c0_501, %c0_502] : memref<20x1x32xf32, #tpu.memory_space<vmem>>, vector<1x1x32xf32>
    %774 = vector.shape_cast %773 : vector<1x1x32xf32> to vector<1x32xf32>
    %775 = vector.broadcast %774 : vector<1x32xf32> to vector<24x32xf32>
    %776 = arith.addf %772, %775 : vector<24x32xf32>
    %c19_503 = arith.constant 19 : index
    %c0_504 = arith.constant 0 : index
    %c0_505 = arith.constant 0 : index
    %777 = vector.load %arg12[%c19_503, %c0_504, %c0_505] : memref<20x64x32xbf16, #tpu.memory_space<vmem>>, vector<1x64x32xbf16>
    %778 = vector.shape_cast %777 : vector<1x64x32xbf16> to vector<64x32xbf16>
    %779 = vector.extract_strided_slice %778 {offsets = [0, 0], sizes = [32, 32], strides = [1, 1]} : vector<64x32xbf16> to vector<32x32xbf16>
    %780 = arith.truncf %763 : vector<24x32xf32> to vector<24x32xbf16>
    %cst_506 = arith.constant dense<0.000000e+00> : vector<24x32xf32>
    %781 = tpu.matmul %780, %779, %cst_506 {dimension_numbers = #tpu.dot_dimension_numbers<[1], [0], [0], [1], [0, 0, 1, 1], [], []>} : vector<24x32xbf16>, vector<32x32xbf16>, vector<24x32xf32> -> vector<24x32xf32>
    %782 = vector.extract_strided_slice %778 {offsets = [32, 0], sizes = [32, 32], strides = [1, 1]} : vector<64x32xbf16> to vector<32x32xbf16>
    %783 = arith.truncf %332 : vector<24x32xf32> to vector<24x32xbf16>
    %cst_507 = arith.constant dense<0.000000e+00> : vector<24x32xf32>
    %784 = tpu.matmul %783, %782, %cst_507 {dimension_numbers = #tpu.dot_dimension_numbers<[1], [0], [0], [1], [0, 0, 1, 1], [], []>} : vector<24x32xbf16>, vector<32x32xbf16>, vector<24x32xf32> -> vector<24x32xf32>
    %785 = arith.addf %781, %784 : vector<24x32xf32>
    %c19_508 = arith.constant 19 : index
    %c0_509 = arith.constant 0 : index
    %c0_510 = arith.constant 0 : index
    %786 = vector.load %arg13[%c19_508, %c0_509, %c0_510] : memref<20x1x32xf32, #tpu.memory_space<vmem>>, vector<1x1x32xf32>
    %787 = vector.shape_cast %786 : vector<1x1x32xf32> to vector<1x32xf32>
    %788 = vector.broadcast %787 : vector<1x32xf32> to vector<24x32xf32>
    %789 = arith.addf %785, %788 : vector<24x32xf32>
    %cst_511 = arith.constant 0.000000e+00 : f32
    %790 = vector.broadcast %cst_511 : f32 to vector<24x32xf32>
    %cst_512 = arith.constant 1.000000e+00 : f32
    %791 = vector.broadcast %cst_512 : f32 to vector<24x32xf32>
    %cst_513 = arith.constant 0.000000e+00 : f32
    %792 = vector.broadcast %cst_513 : f32 to vector<24x32xf32>
    %793 = arith.maximumf %678, %792 : vector<24x32xf32>
    %794 = math.absf %678 : vector<24x32xf32>
    %cst_514 = arith.constant 0.000000e+00 : f32
    %795 = vector.broadcast %cst_514 : f32 to vector<24x32xf32>
    %796 = arith.subf %795, %794 : vector<24x32xf32>
    %797 = math.exp %796 : vector<24x32xf32>
    %cst_515 = arith.constant 1.000000e+00 : f32
    %798 = vector.broadcast %cst_515 : f32 to vector<24x32xf32>
    %799 = arith.addf %798, %797 : vector<24x32xf32>
    %800 = math.log %799 : vector<24x32xf32>
    %801 = arith.addf %793, %800 : vector<24x32xf32>
    %cst_516 = arith.constant 0.899999976 : f32
    %802 = vector.broadcast %cst_516 : f32 to vector<24x32xf32>
    %803 = arith.mulf %802, %801 : vector<24x32xf32>
    %cst_517 = arith.constant 1.000000e-01 : f32
    %804 = vector.broadcast %cst_517 : f32 to vector<24x32xf32>
    %805 = arith.addf %804, %803 : vector<24x32xf32>
    %806 = math.exp %805 : vector<24x32xf32>
    %cst_518 = arith.constant 0.000000e+00 : f32
    %807 = vector.broadcast %cst_518 : f32 to vector<24x32xf32>
    %808 = arith.maximumf %791, %807 : vector<24x32xf32>
    %809 = math.absf %791 : vector<24x32xf32>
    %cst_519 = arith.constant 0.000000e+00 : f32
    %810 = vector.broadcast %cst_519 : f32 to vector<24x32xf32>
    %811 = arith.subf %810, %809 : vector<24x32xf32>
    %812 = math.exp %811 : vector<24x32xf32>
    %cst_520 = arith.constant 1.000000e+00 : f32
    %813 = vector.broadcast %cst_520 : f32 to vector<24x32xf32>
    %814 = arith.addf %813, %812 : vector<24x32xf32>
    %815 = math.log %814 : vector<24x32xf32>
    %816 = arith.addf %808, %815 : vector<24x32xf32>
    %cst_521 = arith.constant 0.899999976 : f32
    %817 = vector.broadcast %cst_521 : f32 to vector<24x32xf32>
    %818 = arith.mulf %817, %816 : vector<24x32xf32>
    %cst_522 = arith.constant 1.000000e-01 : f32
    %819 = vector.broadcast %cst_522 : f32 to vector<24x32xf32>
    %820 = arith.addf %819, %818 : vector<24x32xf32>
    %821 = math.exp %820 : vector<24x32xf32>
    %822 = arith.divf %821, %806 : vector<24x32xf32>
    %823 = math.log %822 : vector<24x32xf32>
    %824 = arith.mulf %806, %806 : vector<24x32xf32>
    %825 = arith.subf %665, %790 : vector<24x32xf32>
    %826 = arith.mulf %825, %825 : vector<24x32xf32>
    %827 = arith.addf %824, %826 : vector<24x32xf32>
    %cst_523 = arith.constant 2.000000e+00 : f32
    %828 = vector.broadcast %cst_523 : f32 to vector<24x32xf32>
    %829 = arith.mulf %828, %821 : vector<24x32xf32>
    %830 = arith.mulf %829, %821 : vector<24x32xf32>
    %831 = arith.divf %827, %830 : vector<24x32xf32>
    %832 = arith.addf %823, %831 : vector<24x32xf32>
    %cst_524 = arith.constant 5.000000e-01 : f32
    %833 = vector.broadcast %cst_524 : f32 to vector<24x32xf32>
    %834 = arith.subf %832, %833 : vector<24x32xf32>
    %cst_525 = arith.constant dense<0.000000e+00> : vector<24xf32>
    %835 = vector.multi_reduction <add>, %834, %cst_525 [1] : vector<24x32xf32> to vector<24xf32>
    %836 = vector.shape_cast %835 : vector<24xf32> to vector<24x1xf32>
    %cst_526 = arith.constant dense<0.000000e+00> : vector<1xf32>
    %837 = vector.multi_reduction <add>, %836, %cst_526 [0] : vector<24x1xf32> to vector<1xf32>
    %838 = vector.shape_cast %837 : vector<1xf32> to vector<1x1xf32>
    %cst_527 = arith.constant 2.400000e+01 : f32
    %839 = vector.broadcast %cst_527 : f32 to vector<1x1xf32>
    %840 = arith.divf %838, %839 : vector<1x1xf32>
    %cst_528 = arith.constant 0.000000e+00 : f32
    %841 = vector.broadcast %cst_528 : f32 to vector<24x32xf32>
    %cst_529 = arith.constant 1.000000e+00 : f32
    %842 = vector.broadcast %cst_529 : f32 to vector<24x32xf32>
    %cst_530 = arith.constant 0.000000e+00 : f32
    %843 = vector.broadcast %cst_530 : f32 to vector<24x32xf32>
    %844 = arith.maximumf %789, %843 : vector<24x32xf32>
    %845 = math.absf %789 : vector<24x32xf32>
    %cst_531 = arith.constant 0.000000e+00 : f32
    %846 = vector.broadcast %cst_531 : f32 to vector<24x32xf32>
    %847 = arith.subf %846, %845 : vector<24x32xf32>
    %848 = math.exp %847 : vector<24x32xf32>
    %cst_532 = arith.constant 1.000000e+00 : f32
    %849 = vector.broadcast %cst_532 : f32 to vector<24x32xf32>
    %850 = arith.addf %849, %848 : vector<24x32xf32>
    %851 = math.log %850 : vector<24x32xf32>
    %852 = arith.addf %844, %851 : vector<24x32xf32>
    %cst_533 = arith.constant 0.899999976 : f32
    %853 = vector.broadcast %cst_533 : f32 to vector<24x32xf32>
    %854 = arith.mulf %853, %852 : vector<24x32xf32>
    %cst_534 = arith.constant 1.000000e-01 : f32
    %855 = vector.broadcast %cst_534 : f32 to vector<24x32xf32>
    %856 = arith.addf %855, %854 : vector<24x32xf32>
    %857 = math.exp %856 : vector<24x32xf32>
    %cst_535 = arith.constant 0.000000e+00 : f32
    %858 = vector.broadcast %cst_535 : f32 to vector<24x32xf32>
    %859 = arith.maximumf %842, %858 : vector<24x32xf32>
    %860 = math.absf %842 : vector<24x32xf32>
    %cst_536 = arith.constant 0.000000e+00 : f32
    %861 = vector.broadcast %cst_536 : f32 to vector<24x32xf32>
    %862 = arith.subf %861, %860 : vector<24x32xf32>
    %863 = math.exp %862 : vector<24x32xf32>
    %cst_537 = arith.constant 1.000000e+00 : f32
    %864 = vector.broadcast %cst_537 : f32 to vector<24x32xf32>
    %865 = arith.addf %864, %863 : vector<24x32xf32>
    %866 = math.log %865 : vector<24x32xf32>
    %867 = arith.addf %859, %866 : vector<24x32xf32>
    %cst_538 = arith.constant 0.899999976 : f32
    %868 = vector.broadcast %cst_538 : f32 to vector<24x32xf32>
    %869 = arith.mulf %868, %867 : vector<24x32xf32>
    %cst_539 = arith.constant 1.000000e-01 : f32
    %870 = vector.broadcast %cst_539 : f32 to vector<24x32xf32>
    %871 = arith.addf %870, %869 : vector<24x32xf32>
    %872 = math.exp %871 : vector<24x32xf32>
    %873 = arith.divf %872, %857 : vector<24x32xf32>
    %874 = math.log %873 : vector<24x32xf32>
    %875 = arith.mulf %857, %857 : vector<24x32xf32>
    %876 = arith.subf %776, %841 : vector<24x32xf32>
    %877 = arith.mulf %876, %876 : vector<24x32xf32>
    %878 = arith.addf %875, %877 : vector<24x32xf32>
    %cst_540 = arith.constant 2.000000e+00 : f32
    %879 = vector.broadcast %cst_540 : f32 to vector<24x32xf32>
    %880 = arith.mulf %879, %872 : vector<24x32xf32>
    %881 = arith.mulf %880, %872 : vector<24x32xf32>
    %882 = arith.divf %878, %881 : vector<24x32xf32>
    %883 = arith.addf %874, %882 : vector<24x32xf32>
    %cst_541 = arith.constant 5.000000e-01 : f32
    %884 = vector.broadcast %cst_541 : f32 to vector<24x32xf32>
    %885 = arith.subf %883, %884 : vector<24x32xf32>
    %cst_542 = arith.constant dense<0.000000e+00> : vector<24xf32>
    %886 = vector.multi_reduction <add>, %885, %cst_542 [1] : vector<24x32xf32> to vector<24xf32>
    %887 = vector.shape_cast %886 : vector<24xf32> to vector<24x1xf32>
    %cst_543 = arith.constant dense<0.000000e+00> : vector<1xf32>
    %888 = vector.multi_reduction <add>, %887, %cst_543 [0] : vector<24x1xf32> to vector<1xf32>
    %889 = vector.shape_cast %888 : vector<1xf32> to vector<1x1xf32>
    %cst_544 = arith.constant 2.400000e+01 : f32
    %890 = vector.broadcast %cst_544 : f32 to vector<1x1xf32>
    %891 = arith.divf %889, %890 : vector<1x1xf32>
    %cst_545 = arith.constant 0.000000e+00 : f32
    %892 = vector.broadcast %cst_545 : f32 to vector<24x32xf32>
    %893 = arith.maximumf %678, %892 : vector<24x32xf32>
    %894 = math.absf %678 : vector<24x32xf32>
    %cst_546 = arith.constant 0.000000e+00 : f32
    %895 = vector.broadcast %cst_546 : f32 to vector<24x32xf32>
    %896 = arith.subf %895, %894 : vector<24x32xf32>
    %897 = math.exp %896 : vector<24x32xf32>
    %cst_547 = arith.constant 1.000000e+00 : f32
    %898 = vector.broadcast %cst_547 : f32 to vector<24x32xf32>
    %899 = arith.addf %898, %897 : vector<24x32xf32>
    %900 = math.log %899 : vector<24x32xf32>
    %901 = arith.addf %893, %900 : vector<24x32xf32>
    %cst_548 = arith.constant 0.899999976 : f32
    %902 = vector.broadcast %cst_548 : f32 to vector<24x32xf32>
    %903 = arith.mulf %902, %901 : vector<24x32xf32>
    %cst_549 = arith.constant 1.000000e-01 : f32
    %904 = vector.broadcast %cst_549 : f32 to vector<24x32xf32>
    %905 = arith.addf %904, %903 : vector<24x32xf32>
    %906 = math.exp %905 : vector<24x32xf32>
    %cst_550 = arith.constant 0.000000e+00 : f32
    %907 = vector.broadcast %cst_550 : f32 to vector<24x32xf32>
    %908 = arith.maximumf %456, %907 : vector<24x32xf32>
    %909 = math.absf %456 : vector<24x32xf32>
    %cst_551 = arith.constant 0.000000e+00 : f32
    %910 = vector.broadcast %cst_551 : f32 to vector<24x32xf32>
    %911 = arith.subf %910, %909 : vector<24x32xf32>
    %912 = math.exp %911 : vector<24x32xf32>
    %cst_552 = arith.constant 1.000000e+00 : f32
    %913 = vector.broadcast %cst_552 : f32 to vector<24x32xf32>
    %914 = arith.addf %913, %912 : vector<24x32xf32>
    %915 = math.log %914 : vector<24x32xf32>
    %916 = arith.addf %908, %915 : vector<24x32xf32>
    %cst_553 = arith.constant 0.899999976 : f32
    %917 = vector.broadcast %cst_553 : f32 to vector<24x32xf32>
    %918 = arith.mulf %917, %916 : vector<24x32xf32>
    %cst_554 = arith.constant 1.000000e-01 : f32
    %919 = vector.broadcast %cst_554 : f32 to vector<24x32xf32>
    %920 = arith.addf %919, %918 : vector<24x32xf32>
    %921 = math.exp %920 : vector<24x32xf32>
    %922 = arith.divf %921, %906 : vector<24x32xf32>
    %923 = math.log %922 : vector<24x32xf32>
    %924 = arith.mulf %906, %906 : vector<24x32xf32>
    %925 = arith.subf %665, %443 : vector<24x32xf32>
    %926 = arith.mulf %925, %925 : vector<24x32xf32>
    %927 = arith.addf %924, %926 : vector<24x32xf32>
    %cst_555 = arith.constant 2.000000e+00 : f32
    %928 = vector.broadcast %cst_555 : f32 to vector<24x32xf32>
    %929 = arith.mulf %928, %921 : vector<24x32xf32>
    %930 = arith.mulf %929, %921 : vector<24x32xf32>
    %931 = arith.divf %927, %930 : vector<24x32xf32>
    %932 = arith.addf %923, %931 : vector<24x32xf32>
    %cst_556 = arith.constant 5.000000e-01 : f32
    %933 = vector.broadcast %cst_556 : f32 to vector<24x32xf32>
    %934 = arith.subf %932, %933 : vector<24x32xf32>
    %cst_557 = arith.constant dense<0.000000e+00> : vector<24xf32>
    %935 = vector.multi_reduction <add>, %934, %cst_557 [1] : vector<24x32xf32> to vector<24xf32>
    %936 = vector.shape_cast %935 : vector<24xf32> to vector<24x1xf32>
    %cst_558 = arith.constant dense<0.000000e+00> : vector<1xf32>
    %937 = vector.multi_reduction <add>, %936, %cst_558 [0] : vector<24x1xf32> to vector<1xf32>
    %938 = vector.shape_cast %937 : vector<1xf32> to vector<1x1xf32>
    %cst_559 = arith.constant 2.400000e+01 : f32
    %939 = vector.broadcast %cst_559 : f32 to vector<1x1xf32>
    %940 = arith.divf %938, %939 : vector<1x1xf32>
    %cst_560 = arith.constant 0.000000e+00 : f32
    %941 = vector.broadcast %cst_560 : f32 to vector<24x32xf32>
    %942 = arith.maximumf %789, %941 : vector<24x32xf32>
    %943 = math.absf %789 : vector<24x32xf32>
    %cst_561 = arith.constant 0.000000e+00 : f32
    %944 = vector.broadcast %cst_561 : f32 to vector<24x32xf32>
    %945 = arith.subf %944, %943 : vector<24x32xf32>
    %946 = math.exp %945 : vector<24x32xf32>
    %cst_562 = arith.constant 1.000000e+00 : f32
    %947 = vector.broadcast %cst_562 : f32 to vector<24x32xf32>
    %948 = arith.addf %947, %946 : vector<24x32xf32>
    %949 = math.log %948 : vector<24x32xf32>
    %950 = arith.addf %942, %949 : vector<24x32xf32>
    %cst_563 = arith.constant 0.899999976 : f32
    %951 = vector.broadcast %cst_563 : f32 to vector<24x32xf32>
    %952 = arith.mulf %951, %950 : vector<24x32xf32>
    %cst_564 = arith.constant 1.000000e-01 : f32
    %953 = vector.broadcast %cst_564 : f32 to vector<24x32xf32>
    %954 = arith.addf %953, %952 : vector<24x32xf32>
    %955 = math.exp %954 : vector<24x32xf32>
    %cst_565 = arith.constant 0.000000e+00 : f32
    %956 = vector.broadcast %cst_565 : f32 to vector<24x32xf32>
    %957 = arith.maximumf %567, %956 : vector<24x32xf32>
    %958 = math.absf %567 : vector<24x32xf32>
    %cst_566 = arith.constant 0.000000e+00 : f32
    %959 = vector.broadcast %cst_566 : f32 to vector<24x32xf32>
    %960 = arith.subf %959, %958 : vector<24x32xf32>
    %961 = math.exp %960 : vector<24x32xf32>
    %cst_567 = arith.constant 1.000000e+00 : f32
    %962 = vector.broadcast %cst_567 : f32 to vector<24x32xf32>
    %963 = arith.addf %962, %961 : vector<24x32xf32>
    %964 = math.log %963 : vector<24x32xf32>
    %965 = arith.addf %957, %964 : vector<24x32xf32>
    %cst_568 = arith.constant 0.899999976 : f32
    %966 = vector.broadcast %cst_568 : f32 to vector<24x32xf32>
    %967 = arith.mulf %966, %965 : vector<24x32xf32>
    %cst_569 = arith.constant 1.000000e-01 : f32
    %968 = vector.broadcast %cst_569 : f32 to vector<24x32xf32>
    %969 = arith.addf %968, %967 : vector<24x32xf32>
    %970 = math.exp %969 : vector<24x32xf32>
    %971 = arith.divf %970, %955 : vector<24x32xf32>
    %972 = math.log %971 : vector<24x32xf32>
    %973 = arith.mulf %955, %955 : vector<24x32xf32>
    %974 = arith.subf %776, %554 : vector<24x32xf32>
    %975 = arith.mulf %974, %974 : vector<24x32xf32>
    %976 = arith.addf %973, %975 : vector<24x32xf32>
    %cst_570 = arith.constant 2.000000e+00 : f32
    %977 = vector.broadcast %cst_570 : f32 to vector<24x32xf32>
    %978 = arith.mulf %977, %970 : vector<24x32xf32>
    %979 = arith.mulf %978, %970 : vector<24x32xf32>
    %980 = arith.divf %976, %979 : vector<24x32xf32>
    %981 = arith.addf %972, %980 : vector<24x32xf32>
    %cst_571 = arith.constant 5.000000e-01 : f32
    %982 = vector.broadcast %cst_571 : f32 to vector<24x32xf32>
    %983 = arith.subf %981, %982 : vector<24x32xf32>
    %cst_572 = arith.constant dense<0.000000e+00> : vector<24xf32>
    %984 = vector.multi_reduction <add>, %983, %cst_572 [1] : vector<24x32xf32> to vector<24xf32>
    %985 = vector.shape_cast %984 : vector<24xf32> to vector<24x1xf32>
    %cst_573 = arith.constant dense<0.000000e+00> : vector<1xf32>
    %986 = vector.multi_reduction <add>, %985, %cst_573 [0] : vector<24x1xf32> to vector<1xf32>
    %987 = vector.shape_cast %986 : vector<1xf32> to vector<1x1xf32>
    %cst_574 = arith.constant 2.400000e+01 : f32
    %988 = vector.broadcast %cst_574 : f32 to vector<1x1xf32>
    %989 = arith.divf %987, %988 : vector<1x1xf32>
    %cst_575 = arith.constant 0.000000e+00 : f32
    %990 = vector.broadcast %cst_575 : f32 to vector<24x32xf32>
    %991 = arith.maximumf %678, %990 : vector<24x32xf32>
    %992 = math.absf %678 : vector<24x32xf32>
    %cst_576 = arith.constant 0.000000e+00 : f32
    %993 = vector.broadcast %cst_576 : f32 to vector<24x32xf32>
    %994 = arith.subf %993, %992 : vector<24x32xf32>
    %995 = math.exp %994 : vector<24x32xf32>
    %cst_577 = arith.constant 1.000000e+00 : f32
    %996 = vector.broadcast %cst_577 : f32 to vector<24x32xf32>
    %997 = arith.addf %996, %995 : vector<24x32xf32>
    %998 = math.log %997 : vector<24x32xf32>
    %999 = arith.addf %991, %998 : vector<24x32xf32>
    %cst_578 = arith.constant 0.899999976 : f32
    %1000 = vector.broadcast %cst_578 : f32 to vector<24x32xf32>
    %1001 = arith.mulf %1000, %999 : vector<24x32xf32>
    %cst_579 = arith.constant 1.000000e-01 : f32
    %1002 = vector.broadcast %cst_579 : f32 to vector<24x32xf32>
    %1003 = arith.addf %1002, %1001 : vector<24x32xf32>
    %1004 = math.exp %1003 : vector<24x32xf32>
    %cst_580 = arith.constant 0.000000e+00 : f32
    %1005 = vector.broadcast %cst_580 : f32 to vector<24x32xf32>
    %1006 = arith.maximumf %789, %1005 : vector<24x32xf32>
    %1007 = math.absf %789 : vector<24x32xf32>
    %cst_581 = arith.constant 0.000000e+00 : f32
    %1008 = vector.broadcast %cst_581 : f32 to vector<24x32xf32>
    %1009 = arith.subf %1008, %1007 : vector<24x32xf32>
    %1010 = math.exp %1009 : vector<24x32xf32>
    %cst_582 = arith.constant 1.000000e+00 : f32
    %1011 = vector.broadcast %cst_582 : f32 to vector<24x32xf32>
    %1012 = arith.addf %1011, %1010 : vector<24x32xf32>
    %1013 = math.log %1012 : vector<24x32xf32>
    %1014 = arith.addf %1006, %1013 : vector<24x32xf32>
    %cst_583 = arith.constant 0.899999976 : f32
    %1015 = vector.broadcast %cst_583 : f32 to vector<24x32xf32>
    %1016 = arith.mulf %1015, %1014 : vector<24x32xf32>
    %cst_584 = arith.constant 1.000000e-01 : f32
    %1017 = vector.broadcast %cst_584 : f32 to vector<24x32xf32>
    %1018 = arith.addf %1017, %1016 : vector<24x32xf32>
    %1019 = math.exp %1018 : vector<24x32xf32>
    %1020 = arith.divf %1019, %1004 : vector<24x32xf32>
    %1021 = math.log %1020 : vector<24x32xf32>
    %1022 = arith.mulf %1004, %1004 : vector<24x32xf32>
    %1023 = arith.subf %665, %776 : vector<24x32xf32>
    %1024 = arith.mulf %1023, %1023 : vector<24x32xf32>
    %1025 = arith.addf %1022, %1024 : vector<24x32xf32>
    %cst_585 = arith.constant 2.000000e+00 : f32
    %1026 = vector.broadcast %cst_585 : f32 to vector<24x32xf32>
    %1027 = arith.mulf %1026, %1019 : vector<24x32xf32>
    %1028 = arith.mulf %1027, %1019 : vector<24x32xf32>
    %1029 = arith.divf %1025, %1028 : vector<24x32xf32>
    %1030 = arith.addf %1021, %1029 : vector<24x32xf32>
    %cst_586 = arith.constant 5.000000e-01 : f32
    %1031 = vector.broadcast %cst_586 : f32 to vector<24x32xf32>
    %1032 = arith.subf %1030, %1031 : vector<24x32xf32>
    %cst_587 = arith.constant dense<0.000000e+00> : vector<24xf32>
    %1033 = vector.multi_reduction <add>, %1032, %cst_587 [1] : vector<24x32xf32> to vector<24xf32>
    %1034 = vector.shape_cast %1033 : vector<24xf32> to vector<24x1xf32>
    %cst_588 = arith.constant dense<0.000000e+00> : vector<1xf32>
    %1035 = vector.multi_reduction <add>, %1034, %cst_588 [0] : vector<24x1xf32> to vector<1xf32>
    %1036 = vector.shape_cast %1035 : vector<1xf32> to vector<1x1xf32>
    %cst_589 = arith.constant 2.400000e+01 : f32
    %1037 = vector.broadcast %cst_589 : f32 to vector<1x1xf32>
    %1038 = arith.divf %1036, %1037 : vector<1x1xf32>
    %cst_590 = arith.constant 0.000000e+00 : f32
    %1039 = vector.broadcast %cst_590 : f32 to vector<1x1xf32>
    %1040 = arith.subf %1039, %1038 : vector<1x1xf32>
    %1041 = arith.addf %665, %164 : vector<24x32xf32>
    %c0_591 = arith.constant 0 : index
    %c0_592 = arith.constant 0 : index
    %1042 = vector.load %arg14[%c0_591, %c0_592] : memref<24x32xf32, #tpu.memory_space<vmem>>, vector<24x32xf32>
    tpu.vector_store %arg14[%c0_591, %c0_592], %1041 {strides = array<i32>} : memref<24x32xf32, #tpu.memory_space<vmem>>, vector<24x32xf32>,
    %1043 = arith.addf %776, %332 : vector<24x32xf32>
    %c0_593 = arith.constant 0 : index
    %c0_594 = arith.constant 0 : index
    %1044 = vector.load %arg16[%c0_593, %c0_594] : memref<24x32xf32, #tpu.memory_space<vmem>>, vector<24x32xf32>
    tpu.vector_store %arg16[%c0_593, %c0_594], %1043 {strides = array<i32>} : memref<24x32xf32, #tpu.memory_space<vmem>>, vector<24x32xf32>,
    %c0_595 = arith.constant 0 : index
    %c0_596 = arith.constant 0 : index
    %1045 = vector.load %arg15[%c0_595, %c0_596] : memref<40x32xf32, #tpu.memory_space<vmem>>, vector<40x32xf32>
    tpu.vector_store %arg15[%c0_595, %c0_596], %177 {strides = array<i32>} : memref<40x32xf32, #tpu.memory_space<vmem>>, vector<40x32xf32>,
    %c0_597 = arith.constant 0 : index
    %c0_598 = arith.constant 0 : index
    %1046 = vector.load %arg17[%c0_597, %c0_598] : memref<56x32xf32, #tpu.memory_space<vmem>>, vector<56x32xf32>
    tpu.vector_store %arg17[%c0_597, %c0_598], %345 {strides = array<i32>} : memref<56x32xf32, #tpu.memory_space<vmem>>, vector<56x32xf32>,
    %1047 = arith.addf %840, %891 : vector<1x1xf32>
    %cst_599 = arith.constant 1.000000e-01 : f32
    %1048 = vector.broadcast %cst_599 : f32 to vector<1x1xf32>
    %1049 = arith.mulf %1048, %1047 : vector<1x1xf32>
    %1050 = arith.addf %940, %989 : vector<1x1xf32>
    %cst_600 = arith.constant 1.000000e-01 : f32
    %1051 = vector.broadcast %cst_600 : f32 to vector<1x1xf32>
    %1052 = arith.mulf %1051, %1050 : vector<1x1xf32>
    %1053 = arith.addf %1049, %1052 : vector<1x1xf32>
    %cst_601 = arith.constant 1.000000e-01 : f32
    %1054 = vector.broadcast %cst_601 : f32 to vector<1x1xf32>
    %1055 = arith.mulf %1054, %1040 : vector<1x1xf32>
    %1056 = arith.subf %1053, %1055 : vector<1x1xf32>
    %c0_602 = arith.constant 0 : index
    %c0_603 = arith.constant 0 : index
    %1057 = vector.load %arg18[%c0_602, %c0_603] : memref<1x1xf32, #tpu.memory_space<vmem>>, vector<1x1xf32>
    tpu.vector_store %arg18[%c0_602, %c0_603], %1056 {strides = array<i32>} : memref<1x1xf32, #tpu.memory_space<vmem>>, vector<1x1xf32>,
    %c0_604 = arith.constant 0 : index
    %c0_605 = arith.constant 0 : index
    %1058 = vector.load %arg19[%c0_604, %c0_605] : memref<1x1xf32, #tpu.memory_space<vmem>>, vector<1x1xf32>
    tpu.vector_store %arg19[%c0_604, %c0_605], %940 {strides = array<i32>} : memref<1x1xf32, #tpu.memory_space<vmem>>, vector<1x1xf32>,
    %c0_606 = arith.constant 0 : index
    %c0_607 = arith.constant 0 : index
    %1059 = vector.load %arg20[%c0_606, %c0_607] : memref<1x1xf32, #tpu.memory_space<vmem>>, vector<1x1xf32>
    tpu.vector_store %arg20[%c0_606, %c0_607], %989 {strides = array<i32>} : memref<1x1xf32, #tpu.memory_space<vmem>>, vector<1x1xf32>,
    %c0_608 = arith.constant 0 : index
    %c0_609 = arith.constant 0 : index
    %1060 = vector.load %arg21[%c0_608, %c0_609] : memref<1x1xf32, #tpu.memory_space<vmem>>, vector<1x1xf32>
    tpu.vector_store %arg21[%c0_608, %c0_609], %1040 {strides = array<i32>} : memref<1x1xf32, #tpu.memory_space<vmem>>, vector<1x1xf32>,
    return
  }
}

</mosaic_0001>

<bundles_post_ra>
// kernel: forward.1
= control target key start
LH: loop header
LB: loop body
LE: loop exit
PB: predicated region body
PF: predicated region fallthrough
CT: control target
= control target key end

     0   :  { %s17285_s0 = inlined_call_operand.vmem [shape: f32[24,40], index: 0, kind: input, shape index: {}]   ;;  %s17286_s1 = inlined_call_operand.vmem [shape: f32[40,24], index: 1, kind: input, shape index: {}]   ;;  %s17287_s2 = inlined_call_operand.vmem [shape: f32[24,56], index: 2, kind: input, shape index: {}]   ;;  %s17288_s3 = inlined_call_operand.vmem [shape: f32[56,24], index: 3, kind: input, shape index: {}]   ;;  %s17289_s4 = inlined_call_operand.vmem [shape: f32[24,32], index: 4, kind: input, shape index: {}]   ;;  %s17290_s5 = inlined_call_operand.vmem [shape: f32[24,32], index: 5, kind: input, shape index: {}]   ;;  %s17291_s6 = inlined_call_operand.vmem [shape: f32[40,32], index: 6, kind: input, shape index: {}]   ;;  %s17292_s7 = inlined_call_operand.vmem [shape: f32[56,32], index: 7, kind: input, shape index: {}]   ;;  %s17293_s8 = inlined_call_operand.vmem [shape: f32[24,32], index: 8, kind: input, shape index: {}]   ;;  %s17294_s9 = inlined_call_operand.vmem [shape: f32[24,32], index: 9, kind: input, shape index: {}]   ;;  %s17295_s10 = inlined_call_operand.vmem [shape: bf16[36,32,32], index: 10, kind: input, shape index: {}]   ;;  %s17296_s11 = inlined_call_operand.vmem [shape: f32[36,1,32], index: 11, kind: input, shape index: {}]   ;;  %s17297_s12 = inlined_call_operand.vmem [shape: bf16[20,64,32], index: 12, kind: input, shape index: {}]   ;;  %s17298_s13 = inlined_call_operand.vmem [shape: f32[20,1,32], index: 13, kind: input, shape index: {}]   ;;  %s17299_s14 = inlined_call_operand.hbm [shape: f32[24,32], index: 14, kind: output, shape index: {0}]   ;;  %s17300_s15 = inlined_call_operand.vmem [shape: f32[40,32], index: 15, kind: output, shape index: {1}]   ;;  %s17301_s16 = inlined_call_operand.hbm [shape: f32[24,32], index: 16, kind: output, shape index: {2}]   ;;  %s17302_s17 = inlined_call_operand.vmem [shape: f32[56,32], index: 17, kind: output, shape index: {3}]   ;;  %s17303_s18 = inlined_call_operand.hbm [shape: f32[1,1], index: 18, kind: output, shape index: {4}]   ;;  %s17304_s19 = inlined_call_operand.hbm [shape: f32[1,1], index: 19, kind: output, shape index: {5}]   ;;  %s17305_s20 = inlined_call_operand.hbm [shape: f32[1,1], index: 20, kind: output, shape index: {6}]   ;;  %s17306_s21 = inlined_call_operand.hbm [shape: f32[1,1], index: 21, kind: output, shape index: {7}]  }
   0x1   :  { %17313 = sst [smem:[#allocation16_spill]] %s17285_s0 }
   0x2   :  { %17314 = sst [smem:[#allocation17_spill]] %s17286_s1 }
   0x3   :  { %17315 = sst [smem:[#allocation18_spill]] %s17287_s2 }
   0x4   :  { %17316 = sst [smem:[#allocation19_spill]] %s17288_s3 }
   0x5   :  { %17317 = sst [smem:[#allocation20_spill]] %s17289_s4 }
   0x6   :  { %17318 = sst [smem:[#allocation21_spill]] %s17290_s5 }
   0x7   :  { %27 = vsyncpa [#allocation3], 0 }
   0x8   :  { %28 = vsyncpa [#allocation5], 0 }
   0x9   :  { %29 = vsyncpa [#allocation8], 0  ;;  %v14019_v0 = vld [vmem:[%s17295_s10] sm:$0xff]   ;;  %v14020_v1 = vld [vmem:[%s17295_s10 + $0x8] sm:$0xff]   ;;  %s17319_s29 = sld [smem:[#allocation20_spill]]  ;;  %vm120_vm0 = vcmask 261120  }
   0xa   :  { %12222 = vmatprep.subr.bf16.mxu0 %v14019_v0  ;;  %vm14493_vm1 = vmmov 0   ;;  %v14494_v6 = vmov 0.0   ;;  %v14021_v8 = vld [vmem:[%s17295_s10 + $0x10] sm:$0xff]   ;;  %v14022_v9 = vld [vmem:[%s17295_s10 + $0x18] sm:$0xff]   ;;  %v84_v10 = vld [vmem:[%s17291_s6] sm:$0xff]  ;;  %v14495_v18 = vmov 0.0|0.0  }
   0xb   :  { %12223 = vmatpush3.bf16.msra.mxu0 %v14019_v0  ;;  %12236 = vmatprep.mubr.msk.f32.mxu1 %vm14493_vm1, %v14494_v6  ;;  %v85_v11 = vld [vmem:[%s17291_s6 + $0x8] sm:$0xff]  ;;  %v86_v13 = vld [vmem:[%s17291_s6 + $0x10] sm:$0xff]  ;;  %v87_v14 = vld [vmem:[%s17291_s6 + $0x18] sm:$0xff] }
   0xc   :  { %12224 = vmatprep.subr.bf16.mxu0 %v14020_v1  ;;  %v14655_v12 = vpack.c.bf16 %v85_v11, %v84_v10  ;;  %v14667_v15 = vpack.c.bf16 %v87_v14, %v86_v13  ;;  %v88_v16 = vld [vmem:[%s17291_s6 + $0x20] sm:$0xff]  ;;  %13802 = vmatprep.subr.bf16.mxu1 %v14495_v18 }
   0xd   :  { %v14676_v17 = vpack.c.bf16 %v88_v16, %v88_v16 }
   0xf   :  { %v78_v2 = vld [vmem:[%s17319_s29] sm:$0xff]  ;;  %v79_v3 = vld [vmem:[%s17319_s29 + $0x8] sm:$0xff]  ;;  %v80_v5 = vld [vmem:[%s17319_s29 + $0x10] sm:$0xff]  ;;  %12225 = vmatpush3.bf16.msra.mxu0 %v14020_v1 }
  0x10   :  { %v14626_v4 = vpack.c.bf16 %v79_v3, %v78_v2  ;;  %v14635_v7 = vpack.c.bf16 %v80_v5, %v80_v5  ;;  %12251 = vmatprep.subr.bf16.mxu0 %v14494_v6 }
  0x12   :  { %12226 = vmatprep.mubr.msk.bf16.mxu0 %vm120_vm0, %v14626_v4 }
  0x13   :  { %12227 = vmatmul.mubr.msk.bf16.vlgmr.msra.gmra.mrb[0].mxu0 %vm120_vm0, %v14635_v7 }
  0x14   :  { %12252 = vmatpush3.bf16.msra.mxu0 %v14021_v8  ;;  %12255 = vmatprep.mubr.msk.bf16.mxu0 %vm14493_vm1, %v14494_v6 }
  0x15   :  { %12253 = vmatprep.subr.bf16.mxu0 %v14494_v6 }
  0x18   :  { %12254 = vmatpush3.bf16.msra.mxu0 %v14022_v9 }
  0x19   :  { %13811 = vmatprep.subr.bf16.mxu0 %v14495_v18 }
  0x1b   :  { %12256 = vmatmul.mubr.msk.bf16.vlgmr.msra.gmra.mrb[4].mxu0 %vm120_vm0, %v14655_v12 }
  0x1c   :  { %12259 = vmatprep.mubr.msk.bf16.mxu0 %vm14493_vm1, %v14494_v6 }
  0x23   :  { %12260 = vmatmul.mubr.msk.bf16.gmra.mrb[8].mxu0 %vm120_vm0, %v14667_v15 }
  0x24   :  { %12263 = vmatprep.mubr.msk.bf16.mxu0 %vm14493_vm1, %v14494_v6 }
  0x2b   :  { %12264 = vmatmul.mubr.msk.bf16.gmra.mrb[12].mxu0 %vm120_vm0, %v14676_v17 }
  0x2c   :  { %12312 = vmatprep.mubr.msk.f32.mxu0 %vm14493_vm1, %v14494_v6 }
  0x2d   :  { %30 = vsyncpa [#allocation11], 0  ;;  %s17320_s22 = sld [smem:[#allocation17_spill]]  ;;  %vm182_vm2 = vcmask 195584   ;;  %s17321_s0 = sld [smem:[#allocation16_spill]]  ;;  %vm396_vm3 = vcmask 326656  }
  0x2e   :  { %v14023_v45 = vld [vmem:[%s17295_s10 + $0x20] sm:$0xff]   ;;  %v14024_v47 = vld [vmem:[%s17295_s10 + $0x28] sm:$0xff]   ;;  %s17322_s23 = sld [smem:[#allocation21_spill]]  ;;  %s17323_s25 = sld [smem:[#allocation19_spill]] }
  0x2f   :  { %v10637_v48 = vld [vmem:[%s17296_s11] ss:$0 sm:$0xff]  ;;  %s14497_s4 = smov [#allocation7]  }
  0x30   :  { %s10583_s30 = sshll.u32 %s14497_s4, 4  ;;  %s10584_s30 = int_to_ptr.vmem [resolvable:$true] %s10583_s30 }
  0x33   :  { %v14688_v24 = vld [vmem:[%s17320_s22] sm:$0xff]  ;;  %v14698_v30 = vld [vmem:[%s17320_s22 + $0x8] sm:$0xff]  ;;  %v14708_v31 = vld [vmem:[%s17320_s22 + $0x10] sm:$0xff] }
  0x34   :  { %v14717_v37 = vld [vmem:[%s17320_s22 + $0x18] sm:$0xff]  ;;  %v14727_v38 = vld [vmem:[%s17320_s22 + $0x20] sm:$0xff]  ;;  %v14746_v44 = vld [vmem:[%s17321_s0 + $0x8] sm:$0xff] }
  0x35   :  { %v14736_v39 = vld [vmem:[%s17321_s0] sm:$0xff]  ;;  %v14758_v46 = vld [vmem:[%s17321_s0 + $0x10] sm:$0xff] }
  0xe6   :  { %v12228_v19 = vpop.f32.mrb[0].mxu0 }
  0xe7   :  { %v161_v20 = vpop.f32.mrb[1].mxu0 }
  0xe8   :  { %v12229_v21 = vpop.f32.mrb[2].mxu0 }
  0xe9   :  { %v164_v22 = vpop.f32.mrb[3].mxu0 }
  0xea   :  { %v13803_v23 = vpack.c.bf16 %v164_v22, %v161_v20  ;;  %v10653_v20 = vld [vmem:[%s17296_s11 + $0x1] ss:$0 sm:$0xff] }
  0xec   :  { %13804 = vmatpush3.bf16.msra.mxu1 %v13803_v23 }
  0xed   :  { %12234 = vmatprep.subr.mxu1 %v14494_v6 }
  0xee   :  { %v366_v25 = vpop.f32.mrb[4].mxu0 }
  0xef   :  { %v12257_v26 = vpop.f32.mrb[5].mxu0 }
  0xf0   :  { %12235 = vmatpush3.msra.mxu1 %v12228_v19  ;;  %v369_v27 = vpop.f32.mrb[6].mxu0 }
  0xf1   :  { %12237 = vmatmul.mubr.msk.f32.vlgmr.msra.gmra.mrb[0].mxu1 %vm182_vm2, %v14688_v24  ;;  %v13806_v28 = vpack.c.bf16 %v369_v27, %v366_v25  ;;  %v12258_v29 = vpop.f32.mrb[7].mxu0  ;;  %13805 = vmatprep.subr.bf16.mxu1 %v14495_v18 }
  0xf2   :  { %12239 = vmatprep.mubr.msk.f32.mxu1 %vm14493_vm1, %v14494_v6 }
  0xf3   :  { %13807 = vmatpush3.bf16.msra.mxu1 %v13806_v28 }
  0xf4   :  { %13808 = vmatprep.subr.bf16.mxu1 %v14495_v18 }
  0xf5   :  { %12240 = vmatmul.mubr.msk.f32.gmra.mrb[2].mxu1 %vm182_vm2, %v14698_v30 }
  0xf6   :  { %12242 = vmatprep.mubr.msk.f32.mxu1 %vm14493_vm1, %v14494_v6  ;;  %v374_v32 = vpop.f32.mrb[8].mxu0 }
  0xf7   :  { %v12261_v33 = vpop.f32.mrb[9].mxu0 }
  0xf8   :  { %v377_v34 = vpop.f32.mrb[10].mxu0 }
  0xf9   :  { %12243 = vmatmul.mubr.msk.f32.gmra.mrb[4].mxu1 %vm182_vm2, %v14708_v31  ;;  %v13809_v35 = vpack.c.bf16 %v377_v34, %v374_v32  ;;  %v12262_v36 = vpop.f32.mrb[11].mxu0 }
  0xfa   :  { %12245 = vmatprep.mubr.msk.f32.mxu1 %vm14493_vm1, %v14494_v6 }
  0xfb   :  { %13810 = vmatpush3.bf16.msra.mxu1 %v13809_v35 }
  0xfc   :  { %12275 = vmatprep.subr.mxu1 %v14494_v6 }
  0xfd   :  { %12246 = vmatmul.mubr.msk.f32.gmra.mrb[6].mxu1 %vm182_vm2, %v14717_v37 }
  0xfe   :  { %12248 = vmatprep.mubr.msk.f32.mxu1 %vm14493_vm1, %v14494_v6  ;;  %v382_v40 = vpop.f32.mrb[12].mxu0 }
  0xff   :  { %12276 = vmatpush3.msra.mxu1 %v382_v40  ;;  %v12265_v41 = vpop.f32.mrb[13].mxu0  ;;  %v14027_v40 = vld [vmem:[%s17297_s12 + $0x10] sm:$0xff]  }
 0x100   :  { %v385_v42 = vpop.f32.mrb[14].mxu0  ;;  %12286 = vmatprep.subr.bf16.mxu1 %v14494_v6 }
 0x101   :  { %12249 = vmatmul.mubr.msk.f32.gmra.mrb[8].mxu1 %vm182_vm2, %v14727_v38  ;;  %v12266_v43 = vpop.f32.mrb[15].mxu0 }
 0x102   :  { %12277 = vmatprep.mubr.msk.f32.mxu1 %vm14493_vm1, %v14494_v6 }
 0x105   :  { %12278 = vmatmul.mubr.msk.f32.vlgmr.msra.gmra.mrb[10].mxu1 %vm396_vm3, %v14736_v39 }
 0x106   :  { %12280 = vmatprep.mubr.msk.f32.mxu1 %vm14493_vm1, %v14494_v6  ;;  %12287 = vmatpush3.bf16.msra.mxu1 %v14023_v45 }
 0x107   :  { %12288 = vmatprep.subr.bf16.mxu1 %v14494_v6 }
 0x109   :  { %12281 = vmatmul.mubr.msk.f32.gmra.mrb[12].mxu1 %vm396_vm3, %v14746_v44 }
 0x10a   :  { %12283 = vmatprep.mubr.msk.f32.mxu1 %vm14493_vm1, %v14494_v6  ;;  %12289 = vmatpush3.bf16.msra.mxu1 %v14024_v47 }
 0x10b   :  { %12350 = vmatprep.subr.bf16.mxu1 %v14027_v40 }
 0x10d   :  { %12284 = vmatmul.mubr.msk.f32.gmra.mrb[14].mxu1 %vm396_vm3, %v14758_v46 }
 0x10e   :  { %12290 = vmatprep.mubr.msk.bf16.mxu1 %vm14493_vm1, %v14494_v6 }
 0x1c4   :  { %v264_v49 = vpop.f32.mrb[0].mxu1 }
 0x1c5   :  { %v265_v50 = vadd.f32 %v10637_v48, %v264_v49  ;;  %v12238_v51 = vpop.f32.mrb[1].mxu1 }
 0x1c7   :  { %v293_v53 = vmul.f32 0.1, %v265_v50  ;;  %vm288_vm4 = vcmp.ge.f32.partialorder %v265_v50, 0.0 }
 0x1c8   :  { %v269_v52 = vpop.f32.mrb[2].mxu1 }
 0x1c9   :  { %v270_v54 = vadd.f32 %v10637_v48, %v269_v52  ;;  %v12241_v55 = vpop.f32.mrb[3].mxu1  ;;  %v298_v58 = vsel %vm288_vm4, %v265_v50, %v293_v53  ;;  %v14025_v53 = vld [vmem:[%s17295_s10 + $0x30] sm:$0xff]  }
 0x1ca   :  { %v14026_v55 = vld [vmem:[%s17295_s10 + $0x38] sm:$0xff]  }
 0x1cb   :  { %vm289_vm5 = vcmp.ge.f32.partialorder %v270_v54, 0.0  ;;  %v294_v56 = vmul.f32 0.1, %v270_v54 }
 0x1cc   :  { %v274_v57 = vpop.f32.mrb[4].mxu1 }
 0x1cd   :  { %v299_v59 = vsel %vm289_vm5, %v270_v54, %v294_v56  ;;  %v275_v60 = vadd.f32 %v10637_v48, %v274_v57  ;;  %v12244_v61 = vpop.f32.mrb[5].mxu1 }
 0x1ce   :  { %v500_v62 = vpack.c.bf16 %v299_v59, %v298_v58 }
 0x1cf   :  { %v295_v0 = vmul.f32 0.1, %v275_v60  ;;  %vm290_vm6 = vcmp.ge.f32.partialorder %v275_v60, 0.0 }
 0x1d0   :  { %v279_v63 = vpop.f32.mrb[6].mxu1  ;;  %12291 = vmatmul.mubr.msk.bf16.vlgmr.msra.gmra.mrb[16].mxu1 %vm120_vm0, %v500_v62 }
 0x1d1   :  { %v280_v1 = vadd.f32 %v10637_v48, %v279_v63  ;;  %v12247_v2 = vpop.f32.mrb[7].mxu1  ;;  %12294 = vmatprep.mubr.msk.bf16.mxu1 %vm14493_vm1, %v14494_v6  ;;  %v300_v8 = vsel %vm290_vm6, %v275_v60, %v295_v0  ;;  %12351 = vmatpush3.bf16.msra.mxu1 %v14027_v40  ;;  %v14028_v63 = vld [vmem:[%s17297_s12 + $0x18] sm:$0xff]   ;;  %v14029_v0 = vld [vmem:[%s17297_s12] sm:$0xff]  }
 0x1d2   :  { %12352 = vmatprep.subr.bf16.mxu1 %v14028_v63  ;;  %v10667_v2 = vld [vmem:[%s17296_s11 + $0x2] ss:$0 sm:$0xff] }
 0x1d3   :  { %vm291_vm7 = vcmp.ge.f32.partialorder %v280_v1, 0.0  ;;  %v296_v3 = vmul.f32 0.1, %v280_v1 }
 0x1d4   :  { %v284_v5 = vpop.f32.mrb[8].mxu1 }
 0x1d5   :  { %v301_v9 = vsel %vm291_vm7, %v280_v1, %v296_v3  ;;  %v285_v10 = vadd.f32 %v10637_v48, %v284_v5  ;;  %v12250_v11 = vpop.f32.mrb[9].mxu1  ;;  %12353 = vmatpush3.bf16.msra.mxu1 %v14028_v63  ;;  %v14030_v1 = vld [vmem:[%s17297_s12 + $0x8] sm:$0xff]  }
 0x1d6   :  { %v501_v13 = vpack.c.bf16 %v301_v9, %v300_v8  ;;  %12358 = vmatprep.subr.bf16.mxu1 %v14029_v0 }
 0x1d7   :  { %v297_v14 = vmul.f32 0.1, %v285_v10  ;;  %vm292_vm8 = vcmp.ge.f32.partialorder %v285_v10, 0.0 }
 0x1d8   :  { %12295 = vmatmul.mubr.msk.bf16.gmra.mrb[20].mxu1 %vm120_vm0, %v501_v13  ;;  %v472_v21 = vpop.f32.mrb[10].mxu1 }
 0x1d9   :  { %12298 = vmatprep.mubr.msk.bf16.mxu1 %vm14493_vm1, %v14494_v6  ;;  %v302_v16 = vsel %vm292_vm8, %v285_v10, %v297_v14  ;;  %v473_v22 = vadd.f32 %v10653_v20, %v472_v21  ;;  %v12279_v23 = vpop.f32.mrb[11].mxu1 }
 0x1da   :  { %v502_v19 = vpack.c.bf16 %v302_v16, %v302_v16 }
 0x1db   :  { %v489_v25 = vmul.f32 0.1, %v473_v22  ;;  %vm486_vm9 = vcmp.ge.f32.partialorder %v473_v22, 0.0 }
 0x1dc   :  { %v477_v26 = vpop.f32.mrb[12].mxu1 }
 0x1dd   :  { %v478_v27 = vadd.f32 %v10653_v20, %v477_v26  ;;  %v12282_v28 = vpop.f32.mrb[13].mxu1  ;;  %v492_v29 = vsel %vm486_vm9, %v473_v22, %v489_v25 }
 0x1df   :  { %vm487_vm10 = vcmp.ge.f32.partialorder %v478_v27, 0.0  ;;  %v490_v32 = vmul.f32 0.1, %v478_v27 }
 0x1e0   :  { %12299 = vmatmul.mubr.msk.bf16.gmra.mrb[24].mxu1 %vm120_vm0, %v502_v19  ;;  %v482_v35 = vpop.f32.mrb[14].mxu1 }
 0x1e1   :  { %12354 = vmatprep.mubr.msk.bf16.mxu1 %vm120_vm0, %v14626_v4  ;;  %v493_v33 = vsel %vm487_vm10, %v478_v27, %v490_v32  ;;  %v12285_v36 = vpop.f32.mrb[15].mxu1  ;;  %v483_v56 = vadd.f32 %v10653_v20, %v482_v35 }
 0x1e2   :  { %v682_v34 = vpack.c.bf16 %v493_v33, %v492_v29  ;;  %v14031_v29 = vld [vmem:[%s17297_s12 + $0x30] sm:$0xff]   ;;  %v14032_v36 = vld [vmem:[%s17297_s12 + $0x38] sm:$0xff]  }
 0x1e3   :  { %v491_v60 = vmul.f32 0.1, %v483_v56  ;;  %vm488_vm11 = vcmp.ge.f32.partialorder %v483_v56, 0.0 }
 0x1e5   :  { %v494_v61 = vsel %vm488_vm11, %v483_v56, %v491_v60 }
 0x1e6   :  { %v683_v62 = vpack.c.bf16 %v494_v61, %v494_v61 }
 0x1e8   :  { %12355 = vmatmul.mubr.msk.bf16.vlgmr.msra.gmra.mrb[28].mxu1 %vm120_vm0, %v14635_v7 }
 0x1e9   :  { %12359 = vmatpush3.bf16.msra.mxu1 %v14029_v0 }
 0x1ea   :  { %12360 = vmatprep.subr.bf16.mxu1 %v14030_v1 }
 0x1ed   :  { %12361 = vmatpush3.bf16.msra.mxu1 %v14030_v1 }
 0x1ee   :  { %12366 = vmatprep.subr.bf16.mxu1 %v14494_v6 }
 0x2a3   :  { %v558_v41 = vpop.f32.mrb[16].mxu1 }
 0x2a4   :  { %v12292_v42 = vpop.f32.mrb[17].mxu1 }
 0x2a5   :  { %v561_v43 = vpop.f32.mrb[18].mxu1  ;;  %v14033_v42 = vld [vmem:[%s17295_s10 + $0x40] sm:$0xff]  }
 0x2a6   :  { %v13812_v45 = vpack.c.bf16 %v561_v43, %v558_v41  ;;  %v12293_v47 = vpop.f32.mrb[19].mxu1  ;;  %v14034_v43 = vld [vmem:[%s17295_s10 + $0x48] sm:$0xff]  }
 0x2a8   :  { %13813 = vmatpush3.bf16.msra.mxu0 %v13812_v45  ;;  %v14036_v45 = vld [vmem:[%s17297_s12 + $0x28] sm:$0xff]  }
 0x2a9   :  { %13814 = vmatprep.subr.bf16.mxu0 %v14495_v18 }
 0x2ab   :  { %v566_v48 = vpop.f32.mrb[20].mxu1 }
 0x2ac   :  { %v12296_v49 = vpop.f32.mrb[21].mxu1 }
 0x2ad   :  { %v569_v50 = vpop.f32.mrb[22].mxu1 }
 0x2ae   :  { %v13815_v51 = vpack.c.bf16 %v569_v50, %v566_v48  ;;  %v12297_v52 = vpop.f32.mrb[23].mxu1  ;;  %v10694_v48 = vld [vmem:[%s17298_s13] ss:$0 sm:$0xff] }
 0x2b0   :  { %13816 = vmatpush3.bf16.msra.mxu0 %v13815_v51 }
 0x2b1   :  { %12310 = vmatprep.subr.mxu0 %v14494_v6 }
 0x2b3   :  { %v574_v54 = vpop.f32.mrb[24].mxu1 }
 0x2b4   :  { %v12300_v57 = vpop.f32.mrb[25].mxu1  ;;  %12311 = vmatpush3.msra.mxu0 %v574_v54 }
 0x2b5   :  { %v577_v58 = vpop.f32.mrb[26].mxu1  ;;  %12313 = vmatmul.mubr.msk.f32.vlgmr.msra.gmra.mrb[16].mxu0 %vm396_vm3, %v14736_v39  ;;  %12321 = vmatprep.subr.bf16.mxu0 %v14025_v53  ;;  %v10680_v57 = vld [vmem:[%s17296_s11 + $0x3] ss:$0 sm:$0xff] }
 0x2b6   :  { %v12301_v59 = vpop.f32.mrb[27].mxu1  ;;  %12315 = vmatprep.mubr.msk.f32.mxu0 %vm14493_vm1, %v14494_v6  ;;  %12322 = vmatpush3.bf16.msra.mxu0 %v14025_v53 }
 0x2b7   :  { %12323 = vmatprep.subr.bf16.mxu0 %v14026_v55 }
 0x2b9   :  { %12316 = vmatmul.mubr.msk.f32.gmra.mrb[18].mxu0 %vm396_vm3, %v14746_v44 }
 0x2ba   :  { %12318 = vmatprep.mubr.msk.f32.mxu0 %vm14493_vm1, %v14494_v6  ;;  %12324 = vmatpush3.bf16.msra.mxu0 %v14026_v55 }
 0x2bb   :  { %13817 = vmatprep.subr.bf16.mxu0 %v14495_v18 }
 0x2bd   :  { %12319 = vmatmul.mubr.msk.f32.gmra.mrb[20].mxu0 %vm396_vm3, %v14758_v46 }
 0x2be   :  { %12325 = vmatprep.mubr.msk.bf16.mxu0 %vm120_vm0, %v682_v34 }
 0x2c1   :  { %12326 = vmatmul.mubr.msk.bf16.vlgmr.msra.gmra.mrb[24].mxu0 %vm120_vm0, %v683_v62 }
 0x2c2   :  { %12335 = vmatprep.mubr.msk.f32.mxu0 %vm14493_vm1, %v14494_v6 }
 0x388   :  { %v654_v3 = vpop.f32.mrb[16].mxu0 }
 0x389   :  { %v655_v5 = vadd.f32 %v10667_v2, %v654_v3  ;;  %v12314_v8 = vpop.f32.mrb[17].mxu0 }
 0x38b   :  { %v671_v10 = vmul.f32 0.1, %v655_v5  ;;  %vm668_vm12 = vcmp.ge.f32.partialorder %v655_v5, 0.0 }
 0x38c   :  { %v659_v9 = vpop.f32.mrb[18].mxu0 }
 0x38d   :  { %v660_v11 = vadd.f32 %v10667_v2, %v659_v9  ;;  %v12317_v13 = vpop.f32.mrb[19].mxu0  ;;  %v674_v19 = vsel %vm668_vm12, %v655_v5, %v671_v10 }
 0x38f   :  { %vm669_vm13 = vcmp.ge.f32.partialorder %v660_v11, 0.0  ;;  %v672_v14 = vmul.f32 0.1, %v660_v11 }
 0x390   :  { %v664_v16 = vpop.f32.mrb[20].mxu0 }
 0x391   :  { %v675_v20 = vsel %vm669_vm13, %v660_v11, %v672_v14  ;;  %v665_v21 = vadd.f32 %v10667_v2, %v664_v16  ;;  %v12320_v22 = vpop.f32.mrb[21].mxu0 }
 0x392   :  { %v871_v23 = vpack.c.bf16 %v675_v20, %v674_v19 }
 0x393   :  { %vm670_vm14 = vcmp.ge.f32.partialorder %v665_v21, 0.0  ;;  %v673_v25 = vmul.f32 0.1, %v665_v21 }
 0x394   :  { %v12327_v26 = vpop.f32.mrb[24].mxu0  ;;  %12362 = vmatprep.mubr.msk.bf16.mxu1 %vm120_vm0, %v871_v23 }
 0x395   :  { %v676_v27 = vsel %vm670_vm14, %v665_v21, %v673_v25  ;;  %v736_v28 = vpop.f32.mrb[25].mxu0 }
 0x396   :  { %v872_v32 = vpack.c.bf16 %v676_v27, %v676_v27  ;;  %v12328_v33 = vpop.f32.mrb[26].mxu0 }
 0x397   :  { %v739_v34 = vpop.f32.mrb[27].mxu0 }
 0x398   :  { %v13818_v35 = vpack.c.bf16 %v739_v34, %v736_v28  ;;  %12363 = vmatmul.mubr.msk.bf16.vlgmr.msra.gmra.mrb[32].mxu1 %vm120_vm0, %v872_v32 }
 0x399   :  { %12367 = vmatpush3.bf16.msra.mxu1 %v14031_v29  ;;  %12370 = vmatprep.mubr.msk.bf16.mxu1 %vm14493_vm1, %v14494_v6 }
 0x39a   :  { %13819 = vmatpush3.bf16.msra.mxu0 %v13818_v35  ;;  %12368 = vmatprep.subr.bf16.mxu1 %v14494_v6 }
 0x39b   :  { %12333 = vmatprep.subr.mxu0 %v14494_v6 }
 0x39d   :  { %12369 = vmatpush3.bf16.msra.mxu1 %v14032_v36 }
 0x39e   :  { %12334 = vmatpush3.msra.mxu0 %v12327_v26  ;;  %12398 = vmatprep.subr.bf16.mxu1 %v14033_v42 }
 0x39f   :  { %12336 = vmatmul.mubr.msk.f32.vlgmr.msra.gmra.mrb[22].mxu0 %vm182_vm2, %v14688_v24  ;;  %12382 = vmatprep.subr.bf16.mxu0 %v14494_v6 }
 0x3a0   :  { %12338 = vmatprep.mubr.msk.f32.mxu0 %vm14493_vm1, %v14494_v6  ;;  %12371 = vmatmul.mubr.msk.bf16.vlgmr.msra.gmra.mrb[36].mxu1 %vm120_vm0, %v14655_v12  ;;  %v12356_v12 = vpop.f32.mrb[28].mxu1 }
 0x3a1   :  { %12374 = vmatprep.mubr.msk.bf16.mxu1 %vm14493_vm1, %v14494_v6  ;;  %12399 = vmatpush3.bf16.msra.mxu1 %v14033_v42 }
 0x3a2   :  { %12400 = vmatprep.subr.bf16.mxu1 %v14034_v43 }
 0x3a3   :  { %12339 = vmatmul.mubr.msk.f32.gmra.mrb[28].mxu0 %vm182_vm2, %v14698_v30 }
 0x3a4   :  { %12341 = vmatprep.mubr.msk.f32.mxu0 %vm14493_vm1, %v14494_v6 }
 0x3a5   :  { %12401 = vmatpush3.bf16.msra.mxu1 %v14034_v43 }
 0x3a6   :  { %12427 = vmatprep.subr.bf16.mxu1 %v14494_v6 }
 0x3a7   :  { %12342 = vmatmul.mubr.msk.f32.gmra.mrb[30].mxu0 %vm182_vm2, %v14708_v31 }
 0x3a8   :  { %12344 = vmatprep.mubr.msk.f32.mxu0 %vm14493_vm1, %v14494_v6  ;;  %12375 = vmatmul.mubr.msk.bf16.gmra.mrb[40].mxu1 %vm120_vm0, %v14667_v15  ;;  %v919_v15 = vpop.f32.mrb[29].mxu1 }
 0x3a9   :  { %12378 = vmatprep.mubr.msk.bf16.mxu1 %vm14493_vm1, %v14494_v6  ;;  %v12357_v40 = vpop.f32.mrb[30].mxu1 }
 0x3aa   :  { %v922_v41 = vpop.f32.mrb[31].mxu1 }
 0x3ab   :  { %12345 = vmatmul.mubr.msk.f32.gmra.mrb[32].mxu0 %vm182_vm2, %v14717_v37 }
 0x3ac   :  { %12347 = vmatprep.mubr.msk.f32.mxu0 %vm14493_vm1, %v14494_v6 }
 0x3af   :  { %12348 = vmatmul.mubr.msk.f32.gmra.mrb[34].mxu0 %vm182_vm2, %v14727_v38 }
 0x3b0   :  { %12379 = vmatmul.mubr.msk.bf16.gmra.mrb[44].mxu1 %vm120_vm0, %v14676_v17  ;;  %12386 = vmatprep.mubr.msk.bf16.mxu0 %vm14493_vm1, %v14494_v6  ;;  %v14035_v17 = vld [vmem:[%s17297_s12 + $0x20] sm:$0xff]  }
 0x3b1   :  { %12383 = vmatpush3.bf16.msra.mxu0 %v14035_v17 }
 0x3b2   :  { %12384 = vmatprep.subr.bf16.mxu0 %v14494_v6 }
 0x3b5   :  { %12385 = vmatpush3.bf16.msra.mxu0 %v14036_v45 }
 0x3b6   :  { %13820 = vmatprep.subr.bf16.mxu0 %v14495_v18 }
 0x46b   :  { %v12364_v47 = vpop.f32.mrb[32].mxu1 }
 0x46c   :  { %v994_v49 = vadd.f32 %v12364_v47, %v12356_v12  ;;  %v985_v50 = vpop.f32.mrb[33].mxu1 }
 0x46d   :  { %v986_v51 = vadd.f32 %v985_v50, %v919_v15  ;;  %v12365_v52 = vpop.f32.mrb[34].mxu1 }
 0x46e   :  { %v1008_v53 = vadd.f32 %v10694_v48, %v994_v49  ;;  %v988_v54 = vpop.f32.mrb[35].mxu1  ;;  %v14037_v52 = vld [vmem:[%s17295_s10 + $0x50] sm:$0xff]  }
 0x46f   :  { %v1006_v55 = vadd.f32 %v10694_v48, %v986_v51  ;;  %v989_v56 = vadd.f32 %v988_v54, %v922_v41 }
 0x470   :  { %v1011_v59 = vmax.f32 %v1008_v53, 0.0  ;;  %v14038_v53 = vld [vmem:[%s17295_s10 + $0x58] sm:$0xff]  }
 0x471   :  { %v1007_v58 = vadd.f32 %v10694_v48, %v989_v56  ;;  %v1009_v61 = vmax.f32 %v1006_v55, 0.0 }
 0x472   :  { %v824_v60 = vpop.f32.mrb[22].mxu0  ;;  %v14894_v8 = vpack.c.bf16 %v1011_v59, %v1011_v59 }
 0x473   :  { %v1010_v62 = vmax.f32 %v1007_v58, 0.0  ;;  %v825_v63 = vadd.f32 %v10680_v57, %v824_v60  ;;  %v12337_v0 = vpop.f32.mrb[23].mxu0  ;;  %v14888_v1 = vpop.f32.mrb[36].mxu1  ;;  %v10714_v60 = vld [vmem:[%s17298_s13 + $0x1] ss:$0 sm:$0xff] }
 0x474   :  { %v12372_v2 = vpop.f32.mrb[37].mxu1 }
 0x475   :  { %v14890_v3 = vpack.c.bf16 %v1010_v62, %v1009_v61  ;;  %v14892_v5 = vpop.f32.mrb[38].mxu1  ;;  %v853_v11 = vmul.f32 0.1, %v825_v63  ;;  %vm848_vm15 = vcmp.ge.f32.partialorder %v825_v63, 0.0 }
 0x476   :  { %v829_v9 = vpop.f32.mrb[28].mxu0  ;;  %v12373_v10 = vpop.f32.mrb[39].mxu1 }
 0x477   :  { %v830_v13 = vadd.f32 %v10680_v57, %v829_v9  ;;  %12402 = vmatprep.mubr.msk.bf16.mxu1 %vm120_vm0, %v14890_v3  ;;  %v12340_v14 = vpop.f32.mrb[29].mxu0  ;;  %v858_v20 = vsel %vm848_vm15, %v825_v63, %v853_v11 }
 0x478   :  { %12403 = vmatmul.mubr.msk.bf16.vlgmr.msra.gmra.mrb[48].mxu1 %vm120_vm0, %v14894_v8 }
 0x479   :  { %vm849_vm4 = vcmp.ge.f32.partialorder %v830_v13, 0.0  ;;  %v854_v16 = vmul.f32 0.1, %v830_v13  ;;  %12431 = vmatprep.mubr.msk.bf16.mxu1 %vm14493_vm1, %v14494_v6  ;;  %12428 = vmatpush3.bf16.msra.mxu1 %v14037_v52 }
 0x47a   :  { %v834_v19 = vpop.f32.mrb[30].mxu0  ;;  %12429 = vmatprep.subr.bf16.mxu1 %v14494_v6 }
 0x47b   :  { %v859_v21 = vsel %vm849_vm4, %v830_v13, %v854_v16  ;;  %v835_v22 = vadd.f32 %v10680_v57, %v834_v19  ;;  %v12343_v23 = vpop.f32.mrb[31].mxu0  ;;  %v1078_v25 = vpop.f32.mrb[40].mxu1 }
 0x47c   :  { %v1021_v26 = vpack.c.bf16 %v859_v21, %v858_v20  ;;  %v12376_v27 = vpop.f32.mrb[41].mxu1 }
 0x47d   :  { %v14902_v28 = vpop.f32.mrb[42].mxu1  ;;  %v855_v33 = vmul.f32 0.1, %v835_v22  ;;  %vm850_vm5 = vcmp.ge.f32.partialorder %v835_v22, 0.0  ;;  %12430 = vmatpush3.bf16.msra.mxu1 %v14038_v53 }
 0x47e   :  { %v839_v29 = vpop.f32.mrb[32].mxu0  ;;  %12387 = vmatmul.mubr.msk.bf16.vlgmr.msra.gmra.mrb[36].mxu0 %vm120_vm0, %v1021_v26  ;;  %v12377_v32 = vpop.f32.mrb[43].mxu1  ;;  %12462 = vmatprep.subr.bf16.mxu1 %v14494_v6 }
 0x47f   :  { %v840_v34 = vadd.f32 %v10680_v57, %v839_v29  ;;  %v12346_v35 = vpop.f32.mrb[33].mxu0  ;;  %12390 = vmatprep.mubr.msk.bf16.mxu0 %vm14493_vm1, %v14494_v6  ;;  %v860_v15 = vsel %vm850_vm5, %v835_v22, %v855_v33 }
 0x480   :  { %v14041_v35 = vld [vmem:[%s17297_s12 + $0x50] sm:$0xff]  }
 0x481   :  { %vm851_vm6 = vcmp.ge.f32.partialorder %v840_v34, 0.0  ;;  %v856_v36 = vmul.f32 0.1, %v840_v34 }
 0x482   :  { %v844_v12 = vpop.f32.mrb[34].mxu0 }
 0x483   :  { %v861_v40 = vsel %vm851_vm6, %v840_v34, %v856_v36  ;;  %v845_v41 = vadd.f32 %v10680_v57, %v844_v12  ;;  %v12349_v42 = vpop.f32.mrb[35].mxu0  ;;  %v1086_v43 = vpop.f32.mrb[44].mxu1  ;;  %v14039_v34 = vld [vmem:[%s17295_s10 + $0x60] sm:$0xff]  }
 0x484   :  { %v1022_v17 = vpack.c.bf16 %v861_v40, %v860_v15  ;;  %v12380_v45 = vpop.f32.mrb[45].mxu1  ;;  %v10724_v36 = vld [vmem:[%s17296_s11 + $0x4] ss:$0 sm:$0xff] }
 0x485   :  { %vm852_vm7 = vcmp.ge.f32.partialorder %v845_v41, 0.0  ;;  %v857_v47 = vmul.f32 0.1, %v845_v41  ;;  %v1089_v48 = vpop.f32.mrb[46].mxu1 }
 0x486   :  { %12391 = vmatmul.mubr.msk.bf16.gmra.mrb[40].mxu0 %vm120_vm0, %v1022_v17  ;;  %v12381_v49 = vpop.f32.mrb[47].mxu1 }
 0x487   :  { %12394 = vmatprep.mubr.msk.bf16.mxu0 %vm14493_vm1, %v14494_v6  ;;  %v862_v50 = vsel %vm852_vm7, %v845_v41, %v857_v47 }
 0x488   :  { %v1023_v51 = vpack.c.bf16 %v862_v50, %v862_v50 }
 0x48e   :  { %12395 = vmatmul.mubr.msk.bf16.gmra.mrb[44].mxu0 %vm120_vm0, %v1023_v51 }
 0x48f   :  { %12412 = vmatprep.mubr.msk.f32.mxu0 %vm14493_vm1, %v14494_v6 }
 0x54b   :  { %v12404_v54 = vpop.f32.mrb[48].mxu1 }
 0x54c   :  { %v1246_v55 = vpop.f32.mrb[49].mxu1 }
 0x54d   :  { %v12405_v56 = vpop.f32.mrb[50].mxu1 }
 0x54e   :  { %v1249_v57 = vpop.f32.mrb[51].mxu1 }
 0x54f   :  { %v13821_v58 = vpack.c.bf16 %v1249_v57, %v1246_v55 }
 0x551   :  { %v1147_v59 = vpop.f32.mrb[36].mxu0  ;;  %13822 = vmatpush3.bf16.msra.mxu0 %v13821_v58  ;;  %v14042_v58 = vld [vmem:[%s17297_s12 + $0x58] sm:$0xff]  }
 0x552   :  { %v1148_v61 = vadd.f32 %v1147_v59, %v14888_v1  ;;  %v12388_v62 = vpop.f32.mrb[37].mxu0  ;;  %12410 = vmatprep.subr.mxu0 %v14494_v6 }
 0x553   :  { %v1150_v63 = vpop.f32.mrb[38].mxu0 }
 0x554   :  { %v1177_v0 = vadd.f32 %v10714_v60, %v1148_v61  ;;  %v1151_v2 = vadd.f32 %v1150_v63, %v14892_v5  ;;  %v12389_v9 = vpop.f32.mrb[39].mxu0 }
 0x555   :  { %12411 = vmatpush3.msra.mxu0 %v12404_v54 }
 0x556   :  { %v1178_v10 = vadd.f32 %v10714_v60, %v1151_v2  ;;  %12413 = vmatmul.mubr.msk.f32.vlgmr.msra.gmra.mrb[48].mxu0 %vm182_vm2, %v14688_v24  ;;  %13823 = vmatprep.subr.bf16.mxu0 %v14495_v18  ;;  %v1182_v11 = vmax.f32 %v1177_v0, 0.0 }
 0x557   :  { %12415 = vmatprep.mubr.msk.f32.mxu0 %vm14493_vm1, %v14494_v6 }
 0x558   :  { %v1183_v1 = vmax.f32 %v1178_v10, 0.0 }
 0x559   :  { %v1155_v13 = vpop.f32.mrb[40].mxu0 }
 0x55a   :  { %v14932_v14 = vpack.c.bf16 %v1183_v1, %v1182_v11  ;;  %v1156_v16 = vadd.f32 %v1155_v13, %v1078_v25  ;;  %v12392_v19 = vpop.f32.mrb[41].mxu0  ;;  %12416 = vmatmul.mubr.msk.f32.gmra.mrb[50].mxu0 %vm182_vm2, %v14698_v30 }
 0x55b   :  { %v1158_v5 = vpop.f32.mrb[42].mxu0  ;;  %12418 = vmatprep.mubr.msk.f32.mxu0 %vm14493_vm1, %v14494_v6 }
 0x55c   :  { %v1179_v24 = vadd.f32 %v10714_v60, %v1156_v16  ;;  %v1159_v20 = vadd.f32 %v1158_v5, %v14902_v28  ;;  %v12393_v21 = vpop.f32.mrb[43].mxu0  ;;  %12432 = vmatmul.mubr.msk.bf16.vlgmr.msra.gmra.mrb[52].mxu1 %vm120_vm0, %v14932_v14 }
 0x55d   :  { %12435 = vmatprep.mubr.msk.bf16.mxu1 %vm14493_vm1, %v14494_v6  ;;  %12463 = vmatpush3.bf16.msra.mxu1 %v14039_v34 }
 0x55e   :  { %v1180_v22 = vadd.f32 %v10714_v60, %v1159_v20  ;;  %12419 = vmatmul.mubr.msk.f32.gmra.mrb[52].mxu0 %vm182_vm2, %v14708_v31  ;;  %v1184_v30 = vmax.f32 %v1179_v24, 0.0  ;;  %12464 = vmatprep.subr.bf16.mxu1 %v14494_v6 }
 0x55f   :  { %12421 = vmatprep.mubr.msk.f32.mxu0 %vm14493_vm1, %v14494_v6 }
 0x560   :  { %v1185_v23 = vmax.f32 %v1180_v22, 0.0 }
 0x561   :  { %v1163_v25 = vpop.f32.mrb[44].mxu0 }
 0x562   :  { %v1164_v26 = vadd.f32 %v1163_v25, %v1086_v43  ;;  %12422 = vmatmul.mubr.msk.f32.gmra.mrb[54].mxu0 %vm182_vm2, %v14717_v37  ;;  %v14949_v27 = vpack.c.bf16 %v1185_v23, %v1184_v30  ;;  %v12396_v28 = vpop.f32.mrb[45].mxu0 }
 0x563   :  { %12424 = vmatprep.mubr.msk.f32.mxu0 %vm14493_vm1, %v14494_v6  ;;  %v1166_v29 = vpop.f32.mrb[46].mxu0 }
 0x564   :  { %v1181_v32 = vadd.f32 %v10714_v60, %v1164_v26  ;;  %12436 = vmatmul.mubr.msk.bf16.gmra.mrb[56].mxu1 %vm120_vm0, %v14949_v27  ;;  %v12397_v31 = vpop.f32.mrb[47].mxu0 }
 0x565   :  { %12439 = vmatprep.mubr.msk.bf16.mxu1 %vm14493_vm1, %v14494_v6 }
 0x566   :  { %v1186_v33 = vmax.f32 %v1181_v32, 0.0  ;;  %12425 = vmatmul.mubr.msk.f32.gmra.mrb[56].mxu0 %vm182_vm2, %v14727_v38  ;;  %v14040_v38 = vld [vmem:[%s17295_s10 + $0x68] sm:$0xff]  }
 0x567   :  { %12453 = vmatprep.mubr.msk.f32.mxu0 %vm14493_vm1, %v14494_v6  ;;  %12465 = vmatpush3.bf16.msra.mxu1 %v14040_v38 }
 0x568   :  { %v14961_v37 = vpack.c.bf16 %v1186_v33, %v1186_v33  ;;  %12526 = vmatprep.subr.bf16.mxu1 %v14041_v35 }
 0x56c   :  { %12440 = vmatmul.mubr.msk.bf16.gmra.mrb[60].mxu1 %vm120_vm0, %v14961_v37 }
 0x56d   :  { %12466 = vmatprep.mubr.msk.bf16.mxu1 %vm14493_vm1, %v14494_v6 }
 0x629   :  { %v1334_v12 = vpop.f32.mrb[48].mxu0 }
 0x62a   :  { %v1335_v15 = vadd.f32 %v10724_v36, %v1334_v12  ;;  %v12414_v40 = vpop.f32.mrb[49].mxu0 }
 0x62c   :  { %v1363_v42 = vmul.f32 0.1, %v1335_v15  ;;  %vm1358_vm8 = vcmp.ge.f32.partialorder %v1335_v15, 0.0 }
 0x62d   :  { %v1339_v41 = vpop.f32.mrb[50].mxu0 }
 0x62e   :  { %v1340_v43 = vadd.f32 %v10724_v36, %v1339_v41  ;;  %v12417_v17 = vpop.f32.mrb[51].mxu0  ;;  %v1368_v51 = vsel %vm1358_vm8, %v1335_v15, %v1363_v42  ;;  %v14043_v41 = vld [vmem:[%s17295_s10 + $0x70] sm:$0xff]  }
 0x62f   :  { %v1436_v45 = vpop.f32.mrb[52].mxu1  ;;  %v14044_v17 = vld [vmem:[%s17295_s10 + $0x78] sm:$0xff]  }
 0x630   :  { %vm1359_vm9 = vcmp.ge.f32.partialorder %v1340_v43, 0.0  ;;  %v1364_v47 = vmul.f32 0.1, %v1340_v43  ;;  %v12433_v48 = vpop.f32.mrb[53].mxu1 }
 0x631   :  { %v1344_v49 = vpop.f32.mrb[52].mxu0  ;;  %v1439_v50 = vpop.f32.mrb[54].mxu1 }
 0x632   :  { %v1369_v52 = vsel %vm1359_vm9, %v1340_v43, %v1364_v47  ;;  %v1345_v53 = vadd.f32 %v10724_v36, %v1344_v49  ;;  %v13824_v54 = vpack.c.bf16 %v1439_v50, %v1436_v45  ;;  %v12420_v55 = vpop.f32.mrb[53].mxu0  ;;  %v12434_v56 = vpop.f32.mrb[55].mxu1 }
 0x633   :  { %v1560_v57 = vpack.c.bf16 %v1369_v52, %v1368_v51 }
 0x634   :  { %13825 = vmatpush3.bf16.msra.mxu0 %v13824_v54  ;;  %v1365_v60 = vmul.f32 0.1, %v1345_v53  ;;  %vm1360_vm10 = vcmp.ge.f32.partialorder %v1345_v53, 0.0 }
 0x635   :  { %v1349_v59 = vpop.f32.mrb[54].mxu0  ;;  %12467 = vmatmul.mubr.msk.bf16.vlgmr.msra.gmra.mrb[64].mxu1 %vm120_vm0, %v1560_v57  ;;  %13826 = vmatprep.subr.bf16.mxu0 %v14495_v18 }
 0x636   :  { %v1350_v61 = vadd.f32 %v10724_v36, %v1349_v59  ;;  %v12423_v62 = vpop.f32.mrb[55].mxu0  ;;  %12470 = vmatprep.mubr.msk.bf16.mxu1 %vm14493_vm1, %v14494_v6  ;;  %12527 = vmatpush3.bf16.msra.mxu1 %v14041_v35  ;;  %v1370_v11 = vsel %vm1360_vm10, %v1345_v53, %v1365_v60  ;;  %v10740_v35 = vld [vmem:[%s17296_s11 + $0x5] ss:$0 sm:$0xff] }
 0x637   :  { %v1444_v63 = vpop.f32.mrb[56].mxu1  ;;  %12528 = vmatprep.subr.bf16.mxu1 %v14042_v58 }
 0x638   :  { %vm1361_vm11 = vcmp.ge.f32.partialorder %v1350_v61, 0.0  ;;  %v1366_v0 = vmul.f32 0.1, %v1350_v61  ;;  %v12437_v2 = vpop.f32.mrb[57].mxu1 }
 0x639   :  { %v1447_v9 = vpop.f32.mrb[58].mxu1  ;;  %v1354_v10 = vpop.f32.mrb[56].mxu0  ;;  %v10754_v2 = vld [vmem:[%s17296_s11 + $0x6] ss:$0 sm:$0xff] }
 0x63a   :  { %v1371_v1 = vsel %vm1361_vm11, %v1350_v61, %v1366_v0  ;;  %v13827_v13 = vpack.c.bf16 %v1447_v9, %v1444_v63  ;;  %v12438_v16 = vpop.f32.mrb[59].mxu1  ;;  %v1355_v19 = vadd.f32 %v10724_v36, %v1354_v10  ;;  %v12426_v5 = vpop.f32.mrb[57].mxu0  ;;  %12529 = vmatpush3.bf16.msra.mxu1 %v14042_v58  ;;  %v14045_v0 = vld [vmem:[%s17297_s12 + $0x40] sm:$0xff]  }
 0x63b   :  { %v1561_v24 = vpack.c.bf16 %v1371_v1, %v1370_v11  ;;  %12534 = vmatprep.subr.bf16.mxu1 %v14045_v0 }
 0x63c   :  { %v1367_v20 = vmul.f32 0.1, %v1355_v19  ;;  %13828 = vmatpush3.bf16.msra.mxu0 %v13827_v13  ;;  %vm1362_vm12 = vcmp.ge.f32.partialorder %v1355_v19, 0.0 }
 0x63d   :  { %12471 = vmatmul.mubr.msk.bf16.gmra.mrb[68].mxu1 %vm120_vm0, %v1561_v24  ;;  %12451 = vmatprep.subr.mxu0 %v14494_v6 }
 0x63e   :  { %12474 = vmatprep.mubr.msk.bf16.mxu1 %vm14493_vm1, %v14494_v6  ;;  %v1372_v30 = vsel %vm1362_vm12, %v1355_v19, %v1367_v20  ;;  %vm2569_vm12 = vcmask 457728  }
 0x63f   :  { %v1452_v21 = vpop.f32.mrb[60].mxu1  ;;  %v1562_v26 = vpack.c.bf16 %v1372_v30, %v1372_v30 }
 0x640   :  { %v12441_v22 = vpop.f32.mrb[61].mxu1  ;;  %12452 = vmatpush3.msra.mxu0 %v1452_v21 }
 0x641   :  { %v1455_v23 = vpop.f32.mrb[62].mxu1  ;;  %12454 = vmatmul.mubr.msk.f32.vlgmr.msra.gmra.mrb[58].mxu0 %vm396_vm3, %v14736_v39  ;;  %13829 = vmatprep.subr.bf16.mxu0 %v14495_v18 }
 0x642   :  { %v12442_v25 = vpop.f32.mrb[63].mxu1  ;;  %12456 = vmatprep.mubr.msk.f32.mxu0 %vm14493_vm1, %v14494_v6 }
 0x645   :  { %12475 = vmatmul.mubr.msk.bf16.gmra.mrb[72].mxu1 %vm120_vm0, %v1562_v26  ;;  %12457 = vmatmul.mubr.msk.f32.gmra.mrb[60].mxu0 %vm396_vm3, %v14746_v44 }
 0x646   :  { %12530 = vmatprep.mubr.msk.bf16.mxu1 %vm120_vm0, %v14890_v3  ;;  %12459 = vmatprep.mubr.msk.f32.mxu0 %vm14493_vm1, %v14494_v6 }
 0x649   :  { %12460 = vmatmul.mubr.msk.f32.gmra.mrb[62].mxu0 %vm396_vm3, %v14758_v46 }
 0x64a   :  { %12488 = vmatprep.mubr.msk.f32.mxu0 %vm14493_vm1, %v14494_v6 }
 0x64d   :  { %12531 = vmatmul.mubr.msk.bf16.vlgmr.msra.gmra.mrb[76].mxu1 %vm120_vm0, %v14894_v8 }
 0x64e   :  { %12535 = vmatpush3.bf16.msra.mxu1 %v14045_v0 }
 0x708   :  { %v1618_v28 = vpop.f32.mrb[64].mxu1 }
 0x709   :  { %v12468_v29 = vpop.f32.mrb[65].mxu1 }
 0x70a   :  { %v1621_v32 = vpop.f32.mrb[66].mxu1 }
 0x70b   :  { %v13830_v31 = vpack.c.bf16 %v1621_v32, %v1618_v28  ;;  %v12469_v33 = vpop.f32.mrb[67].mxu1  ;;  %v14047_v32 = vld [vmem:[%s17297_s12 + $0x70] sm:$0xff]  }
 0x70d   :  { %13831 = vmatpush3.bf16.msra.mxu0 %v13830_v31 }
 0x70e   :  { %13832 = vmatprep.subr.bf16.mxu0 %v14495_v18 }
 0x710   :  { %v1626_v3 = vpop.f32.mrb[68].mxu1 }
 0x711   :  { %v12472_v34 = vpop.f32.mrb[69].mxu1 }
 0x712   :  { %v1629_v38 = vpop.f32.mrb[70].mxu1 }
 0x713   :  { %v13833_v36 = vpack.c.bf16 %v1629_v38, %v1626_v3  ;;  %v12473_v12 = vpop.f32.mrb[71].mxu1  ;;  %v14048_v38 = vld [vmem:[%s17297_s12 + $0x78] sm:$0xff]  }
 0x714   :  { %v1532_v15 = vpop.f32.mrb[58].mxu0  ;;  %v14303_v12 = vld [vmem:[%s17320_s22] sm:$0xff] }
 0x715   :  { %13834 = vmatpush3.bf16.msra.mxu0 %v13833_v36  ;;  %v1533_v8 = vadd.f32 %v10740_v35, %v1532_v15  ;;  %v12455_v40 = vpop.f32.mrb[59].mxu0  ;;  %v14050_v36 = vld [vmem:[%s17295_s10 + $0x88] sm:$0xff]   ;;  %v14051_v15 = vld [vmem:[%s17295_s10 + $0x90] sm:$0xff]  }
 0x716   :  { %12486 = vmatprep.subr.mxu0 %v14494_v6  ;;  %v81_v40 = vld [vmem:[%s17322_s23] sm:$0xff] }
 0x717   :  { %v1549_v45 = vmul.f32 0.1, %v1533_v8  ;;  %vm1546_vm13 = vcmp.ge.f32.partialorder %v1533_v8, 0.0 }
 0x718   :  { %v1634_v42 = vpop.f32.mrb[72].mxu1  ;;  %v1537_v43 = vpop.f32.mrb[60].mxu0 }
 0x719   :  { %v12476_v47 = vpop.f32.mrb[73].mxu1  ;;  %12487 = vmatpush3.msra.mxu0 %v1634_v42  ;;  %v1538_v48 = vadd.f32 %v10740_v35, %v1537_v43  ;;  %v12458_v49 = vpop.f32.mrb[61].mxu0  ;;  %v1552_v54 = vsel %vm1546_vm13, %v1533_v8, %v1549_v45  ;;  %v14304_v8 = vld [vmem:[%s17320_s22 + $0x8] sm:$0xff]  ;;  %v14306_v42 = vld [vmem:[%s17320_s22 + $0x18] sm:$0xff]  ;;  %v14307_v43 = vld [vmem:[%s17320_s22 + $0x20] sm:$0xff] }
 0x71a   :  { %v1637_v50 = vpop.f32.mrb[74].mxu1  ;;  %12489 = vmatmul.mubr.msk.f32.vlgmr.msra.gmra.mrb[64].mxu0 %vm396_vm3, %v14736_v39  ;;  %12497 = vmatprep.subr.bf16.mxu0 %v14043_v41  ;;  %v89_v45 = vld [vmem:[%s17292_s7] sm:$0xff]  ;;  %v90_v47 = vld [vmem:[%s17292_s7 + $0x8] sm:$0xff]  ;;  %v14052_v49 = vld [vmem:[%s17295_s10 + $0x98] sm:$0xff]  }
 0x71b   :  { %vm1547_vm14 = vcmp.ge.f32.partialorder %v1538_v48, 0.0  ;;  %v1550_v51 = vmul.f32 0.1, %v1538_v48  ;;  %v12477_v52 = vpop.f32.mrb[75].mxu1  ;;  %12491 = vmatprep.mubr.msk.f32.mxu0 %vm14493_vm1, %v14494_v6  ;;  %12498 = vmatpush3.bf16.msra.mxu0 %v14043_v41  ;;  %v82_v41 = vld [vmem:[%s17322_s23 + $0x8] sm:$0xff]  ;;  %v91_v50 = vld [vmem:[%s17292_s7 + $0x10] sm:$0xff] }
 0x71c   :  { %v1542_v53 = vpop.f32.mrb[62].mxu0  ;;  %12499 = vmatprep.subr.bf16.mxu0 %v14044_v17  ;;  %v93_v52 = vld [vmem:[%s17292_s7 + $0x20] sm:$0xff] }
 0x71d   :  { %v1553_v55 = vsel %vm1547_vm14, %v1538_v48, %v1550_v51  ;;  %v1543_v56 = vadd.f32 %v10740_v35, %v1542_v53  ;;  %v12461_v57 = vpop.f32.mrb[63].mxu0  ;;  %v14049_v35 = vld [vmem:[%s17295_s10 + $0x80] sm:$0xff]   ;;  %v92_v51 = vld [vmem:[%s17292_s7 + $0x18] sm:$0xff]  ;;  %v94_v53 = vld [vmem:[%s17292_s7 + $0x28] sm:$0xff] }
 0x71e   :  { %12492 = vmatmul.mubr.msk.f32.gmra.mrb[66].mxu0 %vm396_vm3, %v14746_v44  ;;  %v1742_v58 = vpack.c.bf16 %v1553_v55, %v1552_v54  ;;  %v15155_v54 = vpack.c.bf16 %v92_v51, %v91_v50  ;;  %v15157_v55 = vpack.c.bf16 %v94_v53, %v93_v52 }
 0x71f   :  { %vm1548_vm15 = vcmp.ge.f32.partialorder %v1543_v56, 0.0  ;;  %v1551_v39 = vmul.f32 0.1, %v1543_v56  ;;  %12494 = vmatprep.mubr.msk.f32.mxu0 %vm14493_vm1, %v14494_v6  ;;  %12500 = vmatpush3.bf16.msra.mxu0 %v14044_v17  ;;  %v83_v17 = vld [vmem:[%s17322_s23 + $0x10] sm:$0xff] }
 0x720   :  { %v15028_v59 = vpop.f32.mrb[76].mxu1  ;;  %13835 = vmatprep.subr.bf16.mxu0 %v14495_v18  ;;  %v15132_v48 = vpack.c.bf16 %v83_v17, %v83_v17 }
 0x721   :  { %v1554_v60 = vsel %vm1548_vm15, %v1543_v56, %v1551_v39  ;;  %v15031_v61 = vpop.f32.mrb[77].mxu1  ;;  %v95_v56 = vld [vmem:[%s17292_s7 + $0x30] sm:$0xff]  ;;  %v14054_v39 = vld [vmem:[%s17297_s12 + $0x68] sm:$0xff]   ;;  %s17324_s7 = sld [smem:[#allocation18_spill]] }
 0x722   :  { %12495 = vmatmul.mubr.msk.f32.gmra.mrb[68].mxu0 %vm396_vm3, %v14758_v46  ;;  %v12533_v62 = vpop.f32.mrb[78].mxu1  ;;  %v1743_v63 = vpack.c.bf16 %v1554_v60, %v1554_v60  ;;  %v14046_v46 = vld [vmem:[%s17297_s12 + $0x48] sm:$0xff]   ;;  %v15167_v57 = vpack.c.bf16 %v95_v56, %v95_v56 }
 0x723   :  { %12501 = vmatprep.mubr.msk.bf16.mxu0 %vm120_vm0, %v1742_v58  ;;  %v15036_v44 = vpop.f32.mrb[79].mxu1  ;;  %12536 = vmatprep.subr.bf16.mxu1 %v14046_v46  ;;  %v14053_v58 = vld [vmem:[%s17297_s12 + $0x60] sm:$0xff]  }
 0x724   :  { %12537 = vmatpush3.bf16.msra.mxu1 %v14046_v46 }
 0x725   :  { %12542 = vmatprep.subr.bf16.mxu1 %v14494_v6 }
 0x726   :  { %12502 = vmatmul.mubr.msk.bf16.vlgmr.msra.gmra.mrb[72].mxu0 %vm120_vm0, %v1743_v63 }
 0x727   :  { %12511 = vmatprep.mubr.msk.f32.mxu0 %vm14493_vm1, %v14494_v6 }
 0x7ed   :  { %v1714_v9 = vpop.f32.mrb[64].mxu0 }
 0x7ee   :  { %v1715_v10 = vadd.f32 %v10754_v2, %v1714_v9  ;;  %v12490_v11 = vpop.f32.mrb[65].mxu0 }
 0x7f0   :  { %v1731_v13 = vmul.f32 0.1, %v1715_v10  ;;  %vm1728_vm4 = vcmp.ge.f32.partialorder %v1715_v10, 0.0 }
 0x7f1   :  { %v1719_v1 = vpop.f32.mrb[66].mxu0 }
 0x7f2   :  { %v1720_v16 = vadd.f32 %v10754_v2, %v1719_v1  ;;  %v12493_v19 = vpop.f32.mrb[67].mxu0  ;;  %v1734_v20 = vsel %vm1728_vm4, %v1715_v10, %v1731_v13  ;;  %v10767_v10 = vld [vmem:[%s17296_s11 + $0x7] ss:$0 sm:$0xff] }
 0x7f4   :  { %vm1729_vm5 = vcmp.ge.f32.partialorder %v1720_v16, 0.0  ;;  %v1732_v5 = vmul.f32 0.1, %v1720_v16 }
 0x7f5   :  { %v1724_v24 = vpop.f32.mrb[68].mxu0 }
 0x7f6   :  { %v1735_v21 = vsel %vm1729_vm5, %v1720_v16, %v1732_v5  ;;  %v1725_v22 = vadd.f32 %v10754_v2, %v1724_v24  ;;  %v12496_v30 = vpop.f32.mrb[69].mxu0 }
 0x7f7   :  { %v1932_v23 = vpack.c.bf16 %v1735_v21, %v1734_v20 }
 0x7f8   :  { %vm1730_vm6 = vcmp.ge.f32.partialorder %v1725_v22, 0.0  ;;  %v1733_v25 = vmul.f32 0.1, %v1725_v22 }
 0x7f9   :  { %v12503_v26 = vpop.f32.mrb[72].mxu0  ;;  %12538 = vmatprep.mubr.msk.bf16.mxu1 %vm120_vm0, %v1932_v23 }
 0x7fa   :  { %v1736_v28 = vsel %vm1730_vm6, %v1725_v22, %v1733_v25  ;;  %v1796_v29 = vpop.f32.mrb[73].mxu0 }
 0x7fb   :  { %v1933_v31 = vpack.c.bf16 %v1736_v28, %v1736_v28  ;;  %v12504_v33 = vpop.f32.mrb[74].mxu0 }
 0x7fc   :  { %v1799_v3 = vpop.f32.mrb[75].mxu0 }
 0x7fd   :  { %v13836_v34 = vpack.c.bf16 %v1799_v3, %v1796_v29  ;;  %12539 = vmatmul.mubr.msk.bf16.vlgmr.msra.gmra.mrb[80].mxu1 %vm120_vm0, %v1933_v31 }
 0x7fe   :  { %12543 = vmatpush3.bf16.msra.mxu1 %v14047_v32  ;;  %12546 = vmatprep.mubr.msk.bf16.mxu1 %vm14493_vm1, %v14494_v6 }
 0x7ff   :  { %13837 = vmatpush3.bf16.msra.mxu0 %v13836_v34  ;;  %12544 = vmatprep.subr.bf16.mxu1 %v14494_v6 }
 0x800   :  { %12509 = vmatprep.subr.mxu0 %v14494_v6 }
 0x802   :  { %12545 = vmatpush3.bf16.msra.mxu1 %v14048_v38 }
 0x803   :  { %12510 = vmatpush3.msra.mxu0 %v12503_v26  ;;  %12574 = vmatprep.subr.bf16.mxu1 %v14049_v35 }
 0x804   :  { %12512 = vmatmul.mubr.msk.f32.vlgmr.msra.gmra.mrb[70].mxu0 %vm182_vm2, %v14303_v12  ;;  %12558 = vmatprep.subr.bf16.mxu0 %v14494_v6 }
 0x805   :  { %12547 = vmatmul.mubr.msk.bf16.vlgmr.msra.gmra.mrb[84].mxu1 %vm120_vm0, %v14932_v14  ;;  %12514 = vmatprep.mubr.msk.f32.mxu0 %vm14493_vm1, %v14494_v6  ;;  %v14305_v14 = vld [vmem:[%s17320_s22 + $0x10] sm:$0xff] }
 0x806   :  { %12550 = vmatprep.mubr.msk.bf16.mxu1 %vm14493_vm1, %v14494_v6  ;;  %12575 = vmatpush3.bf16.msra.mxu1 %v14049_v35 }
 0x807   :  { %12576 = vmatprep.subr.bf16.mxu1 %v14050_v36  ;;  %12559 = vmatpush3.bf16.msra.mxu0 %v14053_v58 }
 0x808   :  { %12515 = vmatmul.mubr.msk.f32.gmra.mrb[76].mxu0 %vm182_vm2, %v14304_v8  ;;  %12560 = vmatprep.subr.bf16.mxu0 %v14494_v6 }
 0x809   :  { %12517 = vmatprep.mubr.msk.f32.mxu0 %vm14493_vm1, %v14494_v6 }
 0x80a   :  { %12577 = vmatpush3.bf16.msra.mxu1 %v14050_v36 }
 0x80b   :  { %12609 = vmatprep.subr.bf16.mxu1 %v14051_v15  ;;  %12561 = vmatpush3.bf16.msra.mxu0 %v14054_v39  ;;  %v15216_v39 = vld [vmem:[%s17323_s25] sm:$0xff] }
 0x80c   :  { %12518 = vmatmul.mubr.msk.f32.gmra.mrb[78].mxu0 %vm182_vm2, %v14305_v14  ;;  %13838 = vmatprep.subr.bf16.mxu0 %v14495_v18 }
 0x80d   :  { %12551 = vmatmul.mubr.msk.bf16.gmra.mrb[88].mxu1 %vm120_vm0, %v14949_v27  ;;  %12520 = vmatprep.mubr.msk.f32.mxu0 %vm14493_vm1, %v14494_v6  ;;  %v15111_v27 = vpack.c.bf16 %v82_v41, %v81_v40 }
 0x80e   :  { %12554 = vmatprep.mubr.msk.bf16.mxu1 %vm14493_vm1, %v14494_v6 }
 0x810   :  { %12521 = vmatmul.mubr.msk.f32.gmra.mrb[80].mxu0 %vm182_vm2, %v14306_v42 }
 0x811   :  { %12523 = vmatprep.mubr.msk.f32.mxu0 %vm14493_vm1, %v14494_v6 }
 0x814   :  { %12524 = vmatmul.mubr.msk.f32.gmra.mrb[82].mxu0 %vm182_vm2, %v14307_v43 }
 0x815   :  { %12555 = vmatmul.mubr.msk.bf16.gmra.mrb[92].mxu1 %vm120_vm0, %v14961_v37  ;;  %12562 = vmatprep.mubr.msk.bf16.mxu0 %vm14493_vm1, %v14494_v6  ;;  %v15134_v37 = vpack.c.bf16 %v90_v47, %v89_v45 }
 0x816   :  { %12578 = vmatprep.mubr.msk.bf16.mxu1 %vm120_vm0, %v15111_v27 }
 0x81d   :  { %12579 = vmatmul.mubr.msk.bf16.vlgmr.msra.gmra.mrb[96].mxu1 %vm120_vm0, %v15132_v48 }
 0x81e   :  { %12610 = vmatpush3.bf16.msra.mxu1 %v14051_v15  ;;  %12613 = vmatprep.mubr.msk.bf16.mxu1 %vm120_vm0, %v15134_v37 }
 0x81f   :  { %12611 = vmatprep.subr.bf16.mxu1 %v14052_v49 }
 0x822   :  { %12612 = vmatpush3.bf16.msra.mxu1 %v14052_v49 }
 0x823   :  { %13841 = vmatprep.subr.bf16.mxu1 %v14495_v18 }
 0x825   :  { %12614 = vmatmul.mubr.msk.bf16.vlgmr.msra.gmra.mrb[100].mxu1 %vm120_vm0, %v15155_v54 }
 0x826   :  { %12617 = vmatprep.mubr.msk.bf16.mxu1 %vm120_vm0, %v15157_v55 }
 0x82d   :  { %12618 = vmatmul.mubr.msk.bf16.gmra.mrb[104].mxu1 %vm120_vm0, %v15167_v57 }
 0x82e   :  { %12635 = vmatprep.mubr.msk.f32.mxu1 %vm14493_vm1, %v14494_v6 }
 0x8d0   :  { %v12540_v60 = vpop.f32.mrb[80].mxu1 }
 0x8d1   :  { %v15182_v62 = vadd.f32 %v12540_v60, %v15028_v59  ;;  %v2046_v63 = vpop.f32.mrb[81].mxu1 }
 0x8d2   :  { %v15185_v0 = vadd.f32 %v2046_v63, %v15031_v61  ;;  %v12541_v46 = vpop.f32.mrb[82].mxu1 }
 0x8d3   :  { %v2049_v2 = vpop.f32.mrb[83].mxu1 }
 0x8d4   :  { %v15188_v9 = vadd.f32 %v2049_v2, %v15036_v44 }
 0x8d7   :  { %v1884_v11 = vpop.f32.mrb[70].mxu0 }
 0x8d8   :  { %v15193_v1 = vpop.f32.mrb[84].mxu1  ;;  %v1885_v13 = vadd.f32 %v10767_v10, %v1884_v11  ;;  %v12513_v16 = vpop.f32.mrb[71].mxu0  ;;  %v15225_v11 = vld [vmem:[%s17323_s25 + $0x8] sm:$0xff] }
 0x8d9   :  { %v12548_v59 = vpop.f32.mrb[85].mxu1  ;;  %v15235_v16 = vld [vmem:[%s17323_s25 + $0x10] sm:$0xff] }
 0x8da   :  { %v15195_v19 = vpop.f32.mrb[86].mxu1  ;;  %v1913_v24 = vmul.f32 0.1, %v1885_v13  ;;  %vm1908_vm7 = vcmp.ge.f32.partialorder %v1885_v13, 0.0 }
 0x8db   :  { %v1889_v5 = vpop.f32.mrb[76].mxu0  ;;  %v12549_v61 = vpop.f32.mrb[87].mxu1 }
 0x8dc   :  { %v1890_v20 = vadd.f32 %v10767_v10, %v1889_v5  ;;  %v12516_v21 = vpop.f32.mrb[77].mxu0  ;;  %v1918_v30 = vsel %vm1908_vm7, %v1885_v13, %v1913_v24 }
 0x8de   :  { %vm1909_vm8 = vcmp.ge.f32.partialorder %v1890_v20, 0.0  ;;  %v1914_v44 = vmul.f32 0.1, %v1890_v20 }
 0x8df   :  { %v1894_v22 = vpop.f32.mrb[78].mxu0 }
 0x8e0   :  { %v1919_v23 = vsel %vm1909_vm8, %v1890_v20, %v1914_v44  ;;  %v15197_v25 = vpop.f32.mrb[88].mxu1  ;;  %v1895_v26 = vadd.f32 %v10767_v10, %v1894_v22  ;;  %v12519_v28 = vpop.f32.mrb[79].mxu0  ;;  %v15245_v20 = vld [vmem:[%s17323_s25 + $0x18] sm:$0xff]  ;;  %v15255_v44 = vld [vmem:[%s17323_s25 + $0x20] sm:$0xff] }
 0x8e1   :  { %v2080_v29 = vpack.c.bf16 %v1919_v23, %v1918_v30  ;;  %v12552_v32 = vpop.f32.mrb[89].mxu1  ;;  %v15260_v22 = vld [vmem:[%s17324_s7] sm:$0xff]  ;;  %v15271_v30 = vld [vmem:[%s17323_s25 + $0x28] sm:$0xff]  ;;  %v15297_v28 = vld [vmem:[%s17324_s7 + $0x10] sm:$0xff] }
 0x8e2   :  { %v15199_v31 = vpop.f32.mrb[90].mxu1  ;;  %v1915_v34 = vmul.f32 0.1, %v1895_v26  ;;  %vm1910_vm9 = vcmp.ge.f32.partialorder %v1895_v26, 0.0  ;;  %v15278_v23 = vld [vmem:[%s17324_s7 + $0x8] sm:$0xff] }
 0x8e3   :  { %v1899_v33 = vpop.f32.mrb[80].mxu0  ;;  %v12553_v3 = vpop.f32.mrb[91].mxu1  ;;  %12563 = vmatmul.mubr.msk.bf16.vlgmr.msra.gmra.mrb[84].mxu0 %vm120_vm0, %v2080_v29  ;;  %v14055_v29 = vld [vmem:[%s17295_s10 + $0xa0] sm:$0xff]   ;;  %v14056_v32 = vld [vmem:[%s17295_s10 + $0xa8] sm:$0xff]  }
 0x8e4   :  { %v1900_v38 = vadd.f32 %v10767_v10, %v1899_v33  ;;  %v12522_v35 = vpop.f32.mrb[81].mxu0  ;;  %12566 = vmatprep.mubr.msk.bf16.mxu0 %vm14493_vm1, %v14494_v6  ;;  %v1920_v15 = vsel %vm1910_vm9, %v1895_v26, %v1915_v34  ;;  %v15290_v26 = vld [vmem:[%s17323_s25 + $0x30] sm:$0xff]  ;;  %v10810_v34 = vld [vmem:[%s17298_s13 + $0x3] ss:$0 sm:$0xff] }
 0x8e5   :  { %v15314_v33 = vld [vmem:[%s17295_s10 + $0xb0] sm:$0xff]  }
 0x8e6   :  { %vm1911_vm10 = vcmp.ge.f32.partialorder %v1900_v38, 0.0  ;;  %v1916_v36 = vmul.f32 0.1, %v1900_v38 }
 0x8e7   :  { %v1904_v12 = vpop.f32.mrb[82].mxu0 }
 0x8e8   :  { %v1921_v8 = vsel %vm1911_vm10, %v1900_v38, %v1916_v36  ;;  %v15204_v14 = vpop.f32.mrb[92].mxu1  ;;  %v1905_v40 = vadd.f32 %v10767_v10, %v1904_v12  ;;  %v12525_v41 = vpop.f32.mrb[83].mxu0 }
 0x8e9   :  { %v12556_v42 = vpop.f32.mrb[93].mxu1  ;;  %v2081_v43 = vpack.c.bf16 %v1921_v8, %v1920_v15 }
 0x8ea   :  { %v2148_v17 = vpop.f32.mrb[94].mxu1  ;;  %v1917_v45 = vmul.f32 0.1, %v1905_v40  ;;  %vm1912_vm11 = vcmp.ge.f32.partialorder %v1905_v40, 0.0 }
 0x8eb   :  { %v12557_v47 = vpop.f32.mrb[95].mxu1  ;;  %12567 = vmatmul.mubr.msk.bf16.gmra.mrb[88].mxu0 %vm120_vm0, %v2081_v43 }
 0x8ec   :  { %12570 = vmatprep.mubr.msk.bf16.mxu0 %vm14493_vm1, %v14494_v6  ;;  %v1922_v49 = vsel %vm1912_vm11, %v1905_v40, %v1917_v45 }
 0x8ed   :  { %v2082_v52 = vpack.c.bf16 %v1922_v49, %v1922_v49 }
 0x8f0   :  { %v12580_v50 = vpop.f32.mrb[96].mxu1 }
 0x8f1   :  { %v2300_v51 = vpop.f32.mrb[97].mxu1 }
 0x8f2   :  { %v12581_v53 = vpop.f32.mrb[98].mxu1 }
 0x8f3   :  { %12571 = vmatmul.mubr.msk.bf16.gmra.mrb[92].mxu0 %vm120_vm0, %v2082_v52  ;;  %v2303_v56 = vpop.f32.mrb[99].mxu1 }
 0x8f4   :  { %v13839_v58 = vpack.c.bf16 %v2303_v56, %v2300_v51  ;;  %12588 = vmatprep.mubr.msk.f32.mxu0 %vm14493_vm1, %v14494_v6 }
 0x8f6   :  { %13840 = vmatpush3.bf16.msra.mxu0 %v13839_v58 }
 0x8f7   :  { %12586 = vmatprep.subr.mxu0 %v14494_v6 }
 0x8f8   :  { %v12615_v60 = vpop.f32.mrb[100].mxu1 }
 0x8f9   :  { %v2531_v63 = vpop.f32.mrb[101].mxu1 }
 0x8fa   :  { %12587 = vmatpush3.msra.mxu0 %v12580_v50  ;;  %v12616_v46 = vpop.f32.mrb[102].mxu1 }
 0x8fb   :  { %12589 = vmatmul.mubr.msk.f32.vlgmr.msra.gmra.mrb[96].mxu0 %vm182_vm2, %v15216_v39  ;;  %v13845_v2 = vpack.c.bf16 %v12616_v46, %v12615_v60  ;;  %v2534_v10 = vpop.f32.mrb[103].mxu1  ;;  %12644 = vmatprep.subr.bf16.mxu0 %v14055_v29 }
 0x8fc   :  { %12591 = vmatprep.mubr.msk.f32.mxu0 %vm14493_vm1, %v14494_v6  ;;  %v13842_v13 = vpack.c.bf16 %v2534_v10, %v2531_v63  ;;  %12645 = vmatpush3.bf16.msra.mxu0 %v14055_v29 }
 0x8fd   :  { %12646 = vmatprep.subr.bf16.mxu0 %v14056_v32 }
 0x8fe   :  { %13843 = vmatpush3.bf16.msra.mxu1 %v13842_v13 }
 0x8ff   :  { %12592 = vmatmul.mubr.msk.f32.gmra.mrb[98].mxu0 %vm182_vm2, %v15225_v11  ;;  %13844 = vmatprep.subr.bf16.mxu1 %v14495_v18 }
 0x900   :  { %12594 = vmatprep.mubr.msk.f32.mxu0 %vm14493_vm1, %v14494_v6  ;;  %v12619_v59 = vpop.f32.mrb[104].mxu1  ;;  %12647 = vmatpush3.bf16.msra.mxu0 %v14056_v32 }
 0x901   :  { %v2547_v5 = vpop.f32.mrb[105].mxu1  ;;  %12679 = vmatprep.subr.bf16.mxu0 %v15314_v33 }
 0x902   :  { %v12620_v61 = vpop.f32.mrb[106].mxu1  ;;  %13846 = vmatpush3.bf16.msra.mxu1 %v13845_v2 }
 0x903   :  { %12595 = vmatmul.mubr.msk.f32.gmra.mrb[100].mxu0 %vm182_vm2, %v15235_v16  ;;  %v2550_v24 = vpop.f32.mrb[107].mxu1  ;;  %13847 = vmatprep.subr.bf16.mxu1 %v14495_v18 }
 0x904   :  { %12597 = vmatprep.mubr.msk.f32.mxu0 %vm14493_vm1, %v14494_v6  ;;  %v13848_v21 = vpack.c.bf16 %v2550_v24, %v2547_v5 }
 0x906   :  { %13849 = vmatpush3.bf16.msra.mxu1 %v13848_v21 }
 0x907   :  { %12598 = vmatmul.mubr.msk.f32.gmra.mrb[102].mxu0 %vm182_vm2, %v15245_v20  ;;  %12633 = vmatprep.subr.mxu1 %v14494_v6 }
 0x908   :  { %12600 = vmatprep.mubr.msk.f32.mxu0 %vm14493_vm1, %v14494_v6 }
 0x90a   :  { %12634 = vmatpush3.msra.mxu1 %v12619_v59 }
 0x90b   :  { %12601 = vmatmul.mubr.msk.f32.gmra.mrb[104].mxu0 %vm182_vm2, %v15255_v44  ;;  %12636 = vmatmul.mubr.msk.f32.vlgmr.msra.gmra.mrb[108].mxu1 %vm2569_vm12, %v15260_v22 }
 0x90c   :  { %12603 = vmatprep.mubr.msk.f32.mxu0 %vm14493_vm1, %v14494_v6  ;;  %12638 = vmatprep.mubr.msk.f32.mxu1 %vm14493_vm1, %v14494_v6 }
 0x90d   :  { %13850 = vmatprep.subr.bf16.mxu1 %v14495_v18 }
 0x90f   :  { %12604 = vmatmul.mubr.msk.f32.gmra.mrb[106].mxu0 %vm182_vm2, %v15271_v30  ;;  %12639 = vmatmul.mubr.msk.f32.gmra.mrb[110].mxu1 %vm2569_vm12, %v15278_v23 }
 0x910   :  { %12606 = vmatprep.mubr.msk.f32.mxu0 %vm14493_vm1, %v14494_v6  ;;  %12641 = vmatprep.mubr.msk.f32.mxu1 %vm14493_vm1, %v14494_v6 }
 0x913   :  { %12607 = vmatmul.mubr.msk.f32.gmra.mrb[108].mxu0 %vm182_vm2, %v15290_v26  ;;  %12642 = vmatmul.mubr.msk.f32.gmra.mrb[112].mxu1 %vm2569_vm12, %v15297_v28 }
 0x914   :  { %12670 = vmatprep.mubr.msk.f32.mxu1 %vm14493_vm1, %v14494_v6 }
 0x9b6   :  { %v2206_v3 = vpop.f32.mrb[84].mxu0 }
 0x9b7   :  { %v2207_v38 = vadd.f32 %v2206_v3, %v15193_v1  ;;  %v12564_v35 = vpop.f32.mrb[85].mxu0 }
 0x9b8   :  { %v2209_v36 = vpop.f32.mrb[86].mxu0 }
 0x9b9   :  { %v2236_v12 = vadd.f32 %v10810_v34, %v2207_v38  ;;  %v2210_v15 = vadd.f32 %v2209_v36, %v15195_v19  ;;  %v12565_v8 = vpop.f32.mrb[87].mxu0  ;;  %v10839_v38 = vld [vmem:[%s17296_s11 + $0x9] ss:$0 sm:$0xff] }
 0x9bb   :  { %10515 = vst.msk [vmem:[%s17300_s15] sm:$0xff] %vm120_vm0, %v2236_v12  ;;  %v2237_v40 = vadd.f32 %v10810_v34, %v2210_v15 }
 0x9bd   :  { %10516 = vst.msk [vmem:[%s17300_s15 + $0x8] sm:$0xff] %vm120_vm0, %v2237_v40 }
 0x9be   :  { %v2214_v41 = vpop.f32.mrb[88].mxu0 }
 0x9bf   :  { %v2215_v1 = vadd.f32 %v2214_v41, %v15197_v25  ;;  %v12568_v42 = vpop.f32.mrb[89].mxu0 }
 0x9c0   :  { %v2217_v43 = vpop.f32.mrb[90].mxu0 }
 0x9c1   :  { %v2238_v17 = vadd.f32 %v10810_v34, %v2215_v1  ;;  %v2218_v19 = vadd.f32 %v2217_v43, %v15199_v31  ;;  %v12569_v45 = vpop.f32.mrb[91].mxu0  ;;  %v10820_v31 = vld [vmem:[%s17296_s11 + $0x8] ss:$0 sm:$0xff] }
 0x9c3   :  { %10517 = vst.msk [vmem:[%s17300_s15 + $0x10] sm:$0xff] %vm120_vm0, %v2238_v17  ;;  %v2239_v47 = vadd.f32 %v10810_v34, %v2218_v19  ;;  %v14058_v17 = vld [vmem:[%s17295_s10 + $0xb8] sm:$0xff]  }
 0x9c5   :  { %10518 = vst.msk [vmem:[%s17300_s15 + $0x18] sm:$0xff] %vm120_vm0, %v2239_v47 }
 0x9c6   :  { %v2222_v49 = vpop.f32.mrb[92].mxu0 }
 0x9c7   :  { %v2223_v25 = vadd.f32 %v2222_v49, %v15204_v14  ;;  %v12572_v50 = vpop.f32.mrb[93].mxu0 }
 0x9c8   :  { %v2225_v51 = vpop.f32.mrb[94].mxu0 }
 0x9c9   :  { %v2240_v52 = vadd.f32 %v10810_v34, %v2223_v25  ;;  %v12573_v53 = vpop.f32.mrb[95].mxu0 }
 0x9cb   :  { %10519 = vst.msk [vmem:[%s17300_s15 + $0x20] sm:$0xff] %vm120_vm0, %v2240_v52 }
 0x9ce   :  { %v2409_v56 = vpop.f32.mrb[96].mxu0 }
 0x9cf   :  { %v2410_v58 = vadd.f32 %v10820_v31, %v2409_v56  ;;  %v12590_v60 = vpop.f32.mrb[97].mxu0 }
 0x9d1   :  { %v2450_v46 = vmul.f32 0.1, %v2410_v58  ;;  %vm2443_vm13 = vcmp.ge.f32.partialorder %v2410_v58, 0.0 }
 0x9d2   :  { %v2414_v63 = vpop.f32.mrb[98].mxu0 }
 0x9d3   :  { %v2415_v2 = vadd.f32 %v10820_v31, %v2414_v63  ;;  %v12593_v14 = vpop.f32.mrb[99].mxu0  ;;  %v2457_v59 = vsel %vm2443_vm13, %v2410_v58, %v2450_v46 }
 0x9d5   :  { %vm2444_vm14 = vcmp.ge.f32.partialorder %v2415_v2, 0.0  ;;  %v2451_v10 = vmul.f32 0.1, %v2415_v2 }
 0x9d6   :  { %v2419_v13 = vpop.f32.mrb[100].mxu0 }
 0x9d7   :  { %v2458_v5 = vsel %vm2444_vm14, %v2415_v2, %v2451_v10  ;;  %v2420_v61 = vadd.f32 %v10820_v31, %v2419_v13  ;;  %v12596_v24 = vpop.f32.mrb[101].mxu0 }
 0x9d8   :  { %v2673_v21 = vpack.c.bf16 %v2458_v5, %v2457_v59 }
 0x9d9   :  { %v2452_v32 = vmul.f32 0.1, %v2420_v61  ;;  %vm2445_vm15 = vcmp.ge.f32.partialorder %v2420_v61, 0.0 }
 0x9da   :  { %v2424_v29 = vpop.f32.mrb[102].mxu0  ;;  %12648 = vmatprep.mubr.msk.bf16.mxu0 %vm120_vm0, %v2673_v21 }
 0x9db   :  { %v2425_v3 = vadd.f32 %v10820_v31, %v2424_v29  ;;  %v12599_v34 = vpop.f32.mrb[103].mxu0  ;;  %v2459_v15 = vsel %vm2445_vm15, %v2420_v61, %v2452_v32 }
 0x9dc   :  { %v14059_v34 = vld [vmem:[%s17297_s12 + $0x90] sm:$0xff]  }
 0x9dd   :  { %vm2446_vm4 = vcmp.ge.f32.partialorder %v2425_v3, 0.0  ;;  %v2453_v35 = vmul.f32 0.1, %v2425_v3 }
 0x9de   :  { %v2429_v36 = vpop.f32.mrb[104].mxu0  ;;  %v2645_v12 = vpop.f32.mrb[108].mxu1 }
 0x9df   :  { %v2460_v8 = vsel %vm2446_vm4, %v2425_v3, %v2453_v35  ;;  %v2430_v40 = vadd.f32 %v10820_v31, %v2429_v36  ;;  %v12602_v41 = vpop.f32.mrb[105].mxu0  ;;  %v2646_v1 = vadd.f32 %v10839_v38, %v2645_v12  ;;  %v12637_v42 = vpop.f32.mrb[109].mxu1 }
 0x9e0   :  { %v2674_v43 = vpack.c.bf16 %v2460_v8, %v2459_v15 }
 0x9e1   :  { %vm2659_vm5 = vcmp.ge.f32.partialorder %v2646_v1, 0.0  ;;  %v2662_v19 = vmul.f32 0.1, %v2646_v1  ;;  %v2454_v45 = vmul.f32 0.1, %v2430_v40  ;;  %vm2447_vm6 = vcmp.ge.f32.partialorder %v2430_v40, 0.0 }
 0x9e2   :  { %v2434_v47 = vpop.f32.mrb[106].mxu0  ;;  %12649 = vmatmul.mubr.msk.bf16.vlgmr.msra.gmra.mrb[112].mxu0 %vm120_vm0, %v2674_v43  ;;  %v2650_v49 = vpop.f32.mrb[110].mxu1 }
 0x9e3   :  { %v2435_v25 = vadd.f32 %v10820_v31, %v2434_v47  ;;  %v12605_v50 = vpop.f32.mrb[107].mxu0  ;;  %v2651_v51 = vadd.f32 %v10839_v38, %v2650_v49  ;;  %v12640_v52 = vpop.f32.mrb[111].mxu1  ;;  %12680 = vmatpush3.bf16.msra.mxu0 %v15314_v33  ;;  %v2665_v53 = vsel %vm2659_vm5, %v2646_v1, %v2662_v19  ;;  %v2461_v60 = vsel %vm2447_vm6, %v2430_v40, %v2454_v45 }
 0x9e4   :  { %12681 = vmatprep.subr.bf16.mxu0 %v14058_v17  ;;  %v14061_v50 = vld [vmem:[%s17297_s12 + $0x80] sm:$0xff]   ;;  %v14063_v52 = vld [vmem:[%s17297_s12 + $0xb0] sm:$0xff]  }
 0x9e5   :  { %vm2448_vm7 = vcmp.ge.f32.partialorder %v2435_v25, 0.0  ;;  %v2455_v56 = vmul.f32 0.1, %v2435_v25  ;;  %vm2660_vm8 = vcmp.ge.f32.partialorder %v2651_v51, 0.0  ;;  %v2663_v58 = vmul.f32 0.1, %v2651_v51 }
 0x9e6   :  { %v2439_v63 = vpop.f32.mrb[108].mxu0  ;;  %v2655_v46 = vpop.f32.mrb[112].mxu1 }
 0x9e7   :  { %v2462_v2 = vsel %vm2448_vm7, %v2435_v25, %v2455_v56  ;;  %v2440_v14 = vadd.f32 %v10820_v31, %v2439_v63  ;;  %v12608_v10 = vpop.f32.mrb[109].mxu0  ;;  %v2666_v13 = vsel %vm2660_vm8, %v2651_v51, %v2663_v58  ;;  %v2656_v59 = vadd.f32 %v10839_v38, %v2655_v46  ;;  %12682 = vmatpush3.bf16.msra.mxu0 %v14058_v17  ;;  %v12643_v5 = vpop.f32.mrb[113].mxu1  ;;  %v14060_v25 = vld [vmem:[%s17297_s12 + $0x98] sm:$0xff]   ;;  %v14062_v51 = vld [vmem:[%s17297_s12 + $0x88] sm:$0xff]  }
 0x9e8   :  { %v2675_v61 = vpack.c.bf16 %v2462_v2, %v2461_v60  ;;  %v2867_v24 = vpack.c.bf16 %v2666_v13, %v2665_v53  ;;  %12714 = vmatprep.subr.bf16.mxu0 %v14059_v34  ;;  %v10854_v53 = vld [vmem:[%s17296_s11 + $0xa] ss:$0 sm:$0xff] }
 0x9e9   :  { %vm2449_vm9 = vcmp.ge.f32.partialorder %v2440_v14, 0.0  ;;  %v2456_v33 = vmul.f32 0.1, %v2440_v14  ;;  %v2664_v29 = vmul.f32 0.1, %v2656_v59  ;;  %vm2661_vm10 = vcmp.ge.f32.partialorder %v2656_v59, 0.0 }
 0x9ea   :  { %12652 = vmatprep.mubr.msk.bf16.mxu0 %vm120_vm0, %v2675_v61 }
 0x9eb   :  { %v2463_v21 = vsel %vm2449_vm9, %v2440_v14, %v2456_v33  ;;  %v2667_v3 = vsel %vm2661_vm10, %v2656_v59, %v2664_v29 }
 0x9ec   :  { %v2676_v32 = vpack.c.bf16 %v2463_v21, %v2463_v21  ;;  %v2868_v31 = vpack.c.bf16 %v2667_v3, %v2667_v3  ;;  %v10867_v21 = vld [vmem:[%s17296_s11 + $0xb] ss:$0 sm:$0xff] }
 0x9ee   :  { %12653 = vmatmul.mubr.msk.bf16.gmra.mrb[116].mxu0 %vm120_vm0, %v2676_v32 }
 0x9ef   :  { %12683 = vmatprep.mubr.msk.bf16.mxu0 %vm120_vm0, %v2867_v24 }
 0x9f6   :  { %12684 = vmatmul.mubr.msk.bf16.vlgmr.msra.gmra.mrb[120].mxu0 %vm120_vm0, %v2868_v31 }
 0x9f7   :  { %12718 = vmatprep.mubr.msk.bf16.mxu0 %vm120_vm0, %v15111_v27  ;;  %12715 = vmatpush3.bf16.msra.mxu0 %v14059_v34 }
 0x9f8   :  { %12716 = vmatprep.subr.bf16.mxu0 %v14060_v25 }
 0x9fb   :  { %12717 = vmatpush3.bf16.msra.mxu0 %v14060_v25 }
 0x9fc   :  { %12722 = vmatprep.subr.bf16.mxu0 %v14061_v50 }
 0x9fe   :  { %12719 = vmatmul.mubr.msk.bf16.vlgmr.msra.gmra.mrb[124].mxu0 %vm120_vm0, %v15132_v48 }
 0x9ff   :  { %12723 = vmatpush3.bf16.msra.mxu0 %v14061_v50 }
 0xa00   :  { %12724 = vmatprep.subr.bf16.mxu0 %v14062_v51 }
 0xa03   :  { %12725 = vmatpush3.bf16.msra.mxu0 %v14062_v51 }
 0xa04   :  { %12730 = vmatprep.subr.bf16.mxu0 %v14063_v52 }
 0xab5   :  { %v12650_v38 = vpop.f32.mrb[112].mxu0 }
 0xab6   :  { %v2735_v35 = vpop.f32.mrb[113].mxu0 }
 0xab7   :  { %v12651_v36 = vpop.f32.mrb[114].mxu0 }
 0xab8   :  { %v13854_v12 = vpack.c.bf16 %v12651_v36, %v12650_v38  ;;  %v2738_v15 = vpop.f32.mrb[115].mxu0 }
 0xab9   :  { %v13851_v8 = vpack.c.bf16 %v2738_v15, %v2735_v35  ;;  %v14064_v35 = vld [vmem:[%s17297_s12 + $0xb8] sm:$0xff]  }
 0xabb   :  { %13852 = vmatpush3.bf16.msra.mxu1 %v13851_v8 }
 0xabc   :  { %13853 = vmatprep.subr.bf16.mxu1 %v14495_v18 }
 0xabf   :  { %13855 = vmatpush3.bf16.msra.mxu1 %v13854_v12 }
 0xac0   :  { %13856 = vmatprep.subr.bf16.mxu1 %v14495_v18 }
 0xac1   :  { %v12654_v40 = vpop.f32.mrb[116].mxu0 }
 0xac2   :  { %v2751_v41 = vpop.f32.mrb[117].mxu0 }
 0xac3   :  { %v12655_v1 = vpop.f32.mrb[118].mxu0 }
 0xac4   :  { %v2754_v42 = vpop.f32.mrb[119].mxu0 }
 0xac5   :  { %v13857_v43 = vpack.c.bf16 %v2754_v42, %v2751_v41 }
 0xac7   :  { %13858 = vmatpush3.bf16.msra.mxu1 %v13857_v43 }
 0xac8   :  { %12668 = vmatprep.subr.mxu1 %v14494_v6 }
 0xac9   :  { %v12685_v17 = vpop.f32.mrb[120].mxu0 }
 0xaca   :  { %v2921_v19 = vpop.f32.mrb[121].mxu0 }
 0xacb   :  { %12669 = vmatpush3.msra.mxu1 %v12654_v40  ;;  %v12686_v45 = vpop.f32.mrb[122].mxu0  ;;  %v14065_v40 = vld [vmem:[%s17297_s12 + $0xa0] sm:$0xff]  }
 0xacc   :  { %12671 = vmatmul.mubr.msk.f32.vlgmr.msra.gmra.mrb[114].mxu1 %vm2569_vm12, %v15260_v22  ;;  %v2924_v47 = vpop.f32.mrb[123].mxu0  ;;  %13859 = vmatprep.subr.bf16.mxu1 %v14495_v18 }
 0xacd   :  { %12673 = vmatprep.mubr.msk.f32.mxu1 %vm14493_vm1, %v14494_v6  ;;  %v13860_v49 = vpack.c.bf16 %v2924_v47, %v2921_v19 }
 0xacf   :  { %13861 = vmatpush3.bf16.msra.mxu1 %v13860_v49 }
 0xad0   :  { %12674 = vmatmul.mubr.msk.f32.gmra.mrb[116].mxu1 %vm2569_vm12, %v15278_v23  ;;  %12691 = vmatprep.subr.mxu1 %v14494_v6 }
 0xad1   :  { %12676 = vmatprep.mubr.msk.f32.mxu1 %vm14493_vm1, %v14494_v6 }
 0xad3   :  { %12692 = vmatpush3.msra.mxu1 %v12685_v17 }
 0xad4   :  { %12677 = vmatmul.mubr.msk.f32.gmra.mrb[118].mxu1 %vm2569_vm12, %v15297_v28 }
 0xad5   :  { %12693 = vmatprep.mubr.msk.f32.mxu1 %vm14493_vm1, %v14494_v6 }
 0xad8   :  { %12694 = vmatmul.mubr.msk.f32.vlgmr.msra.gmra.mrb[120].mxu1 %vm182_vm2, %v15216_v39 }
 0xad9   :  { %12696 = vmatprep.mubr.msk.f32.mxu1 %vm14493_vm1, %v14494_v6 }
 0xadc   :  { %12697 = vmatmul.mubr.msk.f32.gmra.mrb[122].mxu1 %vm182_vm2, %v15225_v11 }
 0xadd   :  { %12699 = vmatprep.mubr.msk.f32.mxu1 %vm14493_vm1, %v14494_v6 }
 0xae0   :  { %12700 = vmatmul.mubr.msk.f32.gmra.mrb[124].mxu1 %vm182_vm2, %v15235_v16 }
 0xae1   :  { %12702 = vmatprep.mubr.msk.f32.mxu1 %vm14493_vm1, %v14494_v6 }
 0xae4   :  { %12703 = vmatmul.mubr.msk.f32.gmra.mrb[126].mxu1 %vm182_vm2, %v15245_v20 }
 0xae5   :  { %12705 = vmatprep.mubr.msk.f32.mxu1 %vm14493_vm1, %v14494_v6 }
 0xae8   :  { %12706 = vmatmul.mubr.msk.f32.gmra.mrb[128].mxu1 %vm182_vm2, %v15255_v44 }
 0xae9   :  { %12708 = vmatprep.mubr.msk.f32.mxu1 %vm14493_vm1, %v14494_v6 }
 0xaec   :  { %12709 = vmatmul.mubr.msk.f32.gmra.mrb[130].mxu1 %vm182_vm2, %v15271_v30 }
 0xaed   :  { %12711 = vmatprep.mubr.msk.f32.mxu1 %vm14493_vm1, %v14494_v6 }
 0xaf0   :  { %12712 = vmatmul.mubr.msk.f32.gmra.mrb[132].mxu1 %vm182_vm2, %v15290_v26 }
 0xb9f   :  { %v2839_v56 = vpop.f32.mrb[114].mxu1 }
 0xba0   :  { %v12672_v58 = vpop.f32.mrb[115].mxu1  ;;  %v2840_v60 = vadd.f32 %v10854_v53, %v2839_v56 }
 0xba2   :  { %v2856_v14 = vmul.f32 0.1, %v2840_v60  ;;  %vm2853_vm11 = vcmp.ge.f32.partialorder %v2840_v60, 0.0 }
 0xba3   :  { %v2844_v63 = vpop.f32.mrb[116].mxu1 }
 0xba4   :  { %v12675_v46 = vpop.f32.mrb[117].mxu1  ;;  %v2845_v2 = vadd.f32 %v10854_v53, %v2844_v63  ;;  %v2859_v5 = vsel %vm2853_vm11, %v2840_v60, %v2856_v14 }
 0xba6   :  { %vm2854_vm13 = vcmp.ge.f32.partialorder %v2845_v2, 0.0  ;;  %v2857_v10 = vmul.f32 0.1, %v2845_v2 }
 0xba7   :  { %v2849_v13 = vpop.f32.mrb[118].mxu1 }
 0xba8   :  { %v2850_v59 = vadd.f32 %v10854_v53, %v2849_v13  ;;  %v2860_v61 = vsel %vm2854_vm13, %v2845_v2, %v2857_v10  ;;  %v12678_v24 = vpop.f32.mrb[119].mxu1 }
 0xba9   :  { %v3073_v33 = vpack.c.bf16 %v2860_v61, %v2859_v5 }
 0xbaa   :  { %vm2855_vm14 = vcmp.ge.f32.partialorder %v2850_v59, 0.0  ;;  %v2858_v29 = vmul.f32 0.1, %v2850_v59 }
 0xbab   :  { %12726 = vmatprep.mubr.msk.bf16.mxu0 %vm120_vm0, %v3073_v33  ;;  %v3009_v32 = vpop.f32.mrb[120].mxu1 }
 0xbac   :  { %v2861_v3 = vsel %vm2855_vm14, %v2850_v59, %v2858_v29  ;;  %v3010_v31 = vadd.f32 %v10867_v21, %v3009_v32  ;;  %v12695_v34 = vpop.f32.mrb[121].mxu1  ;;  %v12720_v32 = vpop.f32.mrb[124].mxu0 }
 0xbad   :  { %v3074_v38 = vpack.c.bf16 %v2861_v3, %v2861_v3  ;;  %v3121_v3 = vpop.f32.mrb[125].mxu0 }
 0xbae   :  { %v3050_v12 = vmul.f32 0.1, %v3010_v31  ;;  %vm3043_vm15 = vcmp.ge.f32.partialorder %v3010_v31, 0.0 }
 0xbaf   :  { %12727 = vmatmul.mubr.msk.bf16.vlgmr.msra.gmra.mrb[128].mxu0 %vm120_vm0, %v3074_v38  ;;  %v3014_v36 = vpop.f32.mrb[122].mxu1  ;;  %v14068_v38 = vld [vmem:[%s17295_s10 + $0xc8] sm:$0xff]  }
 0xbb0   :  { %12731 = vmatpush3.bf16.msra.mxu0 %v14063_v52  ;;  %12734 = vmatprep.mubr.msk.bf16.mxu0 %vm120_vm0, %v15134_v37  ;;  %v3015_v15 = vadd.f32 %v10867_v21, %v3014_v36  ;;  %v12698_v8 = vpop.f32.mrb[123].mxu1  ;;  %v3057_v42 = vsel %vm3043_vm15, %v3010_v31, %v3050_v12  ;;  %v14066_v37 = vld [vmem:[%s17297_s12 + $0xa8] sm:$0xff]   ;;  %v12721_v31 = vpop.f32.mrb[126].mxu0  ;;  %v14070_v36 = vld [vmem:[%s17295_s10 + $0xd8] sm:$0xff]  }
 0xbb1   :  { %12732 = vmatprep.subr.bf16.mxu0 %v14064_v35  ;;  %v3124_v34 = vpop.f32.mrb[127].mxu0 }
 0xbb2   :  { %vm3044_vm4 = vcmp.ge.f32.partialorder %v3015_v15, 0.0  ;;  %v3051_v41 = vmul.f32 0.1, %v3015_v15 }
 0xbb3   :  { %v3019_v1 = vpop.f32.mrb[124].mxu1 }
 0xbb4   :  { %12733 = vmatpush3.bf16.msra.mxu0 %v14064_v35  ;;  %v3058_v43 = vsel %vm3044_vm4, %v3015_v15, %v3051_v41  ;;  %v3020_v17 = vadd.f32 %v10867_v21, %v3019_v1  ;;  %v12701_v19 = vpop.f32.mrb[125].mxu1  ;;  %v14069_v35 = vld [vmem:[%s17295_s10 + $0xd0] sm:$0xff]   ;;  %v10892_v15 = vld [vmem:[%s17298_s13 + $0x4] ss:$0 sm:$0xff] }
 0xbb5   :  { %12742 = vmatprep.subr.bf16.mxu0 %v14065_v40  ;;  %v3224_v45 = vpack.c.bf16 %v3058_v43, %v3057_v42 }
 0xbb6   :  { %v3052_v49 = vmul.f32 0.1, %v3020_v17  ;;  %vm3045_vm5 = vcmp.ge.f32.partialorder %v3020_v17, 0.0 }
 0xbb7   :  { %12735 = vmatmul.mubr.msk.bf16.vlgmr.msra.gmra.mrb[132].mxu0 %vm120_vm0, %v15155_v54  ;;  %v3024_v47 = vpop.f32.mrb[126].mxu1 }
 0xbb8   :  { %12738 = vmatprep.mubr.msk.bf16.mxu0 %vm120_vm0, %v15157_v55  ;;  %v3025_v25 = vadd.f32 %v10867_v21, %v3024_v47  ;;  %12743 = vmatpush3.bf16.msra.mxu0 %v14065_v40  ;;  %v12704_v50 = vpop.f32.mrb[127].mxu1  ;;  %v3059_v53 = vsel %vm3045_vm5, %v3020_v17, %v3052_v49 }
 0xbb9   :  { %12744 = vmatprep.subr.bf16.mxu0 %v14066_v37 }
 0xbba   :  { %vm3046_vm6 = vcmp.ge.f32.partialorder %v3025_v25, 0.0  ;;  %v3053_v51 = vmul.f32 0.1, %v3025_v25 }
 0xbbb   :  { %v3029_v52 = vpop.f32.mrb[128].mxu1 }
 0xbbc   :  { %v3060_v56 = vsel %vm3046_vm6, %v3025_v25, %v3053_v51  ;;  %v3030_v58 = vadd.f32 %v10867_v21, %v3029_v52  ;;  %v12707_v60 = vpop.f32.mrb[129].mxu1  ;;  %12745 = vmatpush3.bf16.msra.mxu0 %v14066_v37 }
 0xbbd   :  { %v3225_v63 = vpack.c.bf16 %v3060_v56, %v3059_v53  ;;  %12789 = vmatprep.subr.bf16.mxu0 %v14069_v35 }
 0xbbe   :  { %v3054_v55 = vmul.f32 0.1, %v3030_v58  ;;  %vm3047_vm7 = vcmp.ge.f32.partialorder %v3030_v58, 0.0 }
 0xbbf   :  { %12739 = vmatmul.mubr.msk.bf16.gmra.mrb[136].mxu0 %vm120_vm0, %v15167_v57  ;;  %v3034_v54 = vpop.f32.mrb[130].mxu1 }
 0xbc0   :  { %12746 = vmatprep.mubr.msk.bf16.mxu0 %vm120_vm0, %v3224_v45  ;;  %v3035_v46 = vadd.f32 %v10867_v21, %v3034_v54  ;;  %v12710_v2 = vpop.f32.mrb[131].mxu1  ;;  %v3061_v13 = vsel %vm3047_vm7, %v3030_v58, %v3054_v55  ;;  %v10914_v58 = vld [vmem:[%s17298_s13 + $0x5] ss:$0 sm:$0xff] }
 0xbc2   :  { %vm3048_vm8 = vcmp.ge.f32.partialorder %v3035_v46, 0.0  ;;  %v3055_v14 = vmul.f32 0.1, %v3035_v46 }
 0xbc3   :  { %v3039_v10 = vpop.f32.mrb[132].mxu1 }
 0xbc4   :  { %v3062_v59 = vsel %vm3048_vm8, %v3035_v46, %v3055_v14  ;;  %v3040_v5 = vadd.f32 %v10867_v21, %v3039_v10  ;;  %v12713_v61 = vpop.f32.mrb[133].mxu1  ;;  %v14067_v21 = vld [vmem:[%s17295_s10 + $0xc0] sm:$0xff]  }
 0xbc5   :  { %v3226_v24 = vpack.c.bf16 %v3062_v59, %v3061_v13  ;;  %12754 = vmatprep.subr.bf16.mxu1 %v14067_v21 }
 0xbc6   :  { %v3056_v33 = vmul.f32 0.1, %v3040_v5  ;;  %vm3049_vm9 = vcmp.ge.f32.partialorder %v3040_v5, 0.0  ;;  %12755 = vmatpush3.bf16.msra.mxu1 %v14067_v21 }
 0xbc7   :  { %12747 = vmatmul.mubr.msk.bf16.vlgmr.msra.gmra.mrb[132].mxu0 %vm120_vm0, %v3225_v63  ;;  %12756 = vmatprep.subr.bf16.mxu1 %v14068_v38 }
 0xbc8   :  { %12750 = vmatprep.mubr.msk.bf16.mxu0 %vm120_vm0, %v3226_v24  ;;  %v3063_v57 = vsel %vm3049_vm9, %v3040_v5, %v3056_v33  ;;  %12790 = vmatpush3.bf16.msra.mxu0 %v14069_v35 }
 0xbc9   :  { %v3227_v29 = vpack.c.bf16 %v3063_v57, %v3063_v57  ;;  %12791 = vmatprep.subr.bf16.mxu0 %v14070_v36 }
 0xbca   :  { %12757 = vmatpush3.bf16.msra.mxu1 %v14068_v38 }
 0xbcb   :  { %13862 = vmatprep.subr.bf16.mxu1 %v14495_v18 }
 0xbcc   :  { %12792 = vmatpush3.bf16.msra.mxu0 %v14070_v36 }
 0xbcf   :  { %12751 = vmatmul.mubr.msk.bf16.gmra.mrb[140].mxu0 %vm120_vm0, %v3227_v29 }
 0xc82   :  { %v12728_v12 = vpop.f32.mrb[128].mxu0 }
 0xc83   :  { %v3196_v8 = vadd.f32 %v12728_v12, %v12720_v32  ;;  %v3187_v40 = vpop.f32.mrb[129].mxu0 }
 0xc84   :  { %v3188_v41 = vadd.f32 %v3187_v40, %v3121_v3  ;;  %v12729_v1 = vpop.f32.mrb[130].mxu0 }
 0xc85   :  { %v3211_v42 = vadd.f32 %v10892_v15, %v3196_v8  ;;  %v3190_v43 = vpop.f32.mrb[131].mxu0 }
 0xc86   :  { %v3209_v17 = vadd.f32 %v10892_v15, %v3188_v41  ;;  %v3191_v19 = vadd.f32 %v3190_v43, %v3124_v34 }
 0xc87   :  { %v3214_v37 = vmax.f32 %v3211_v42, 0.0 }
 0xc88   :  { %v3210_v45 = vadd.f32 %v10892_v15, %v3191_v19  ;;  %v3212_v47 = vmax.f32 %v3209_v17, 0.0 }
 0xc89   :  { %v15470_v50 = vpack.c.bf16 %v3214_v37, %v3214_v37 }
 0xc8a   :  { %v3213_v49 = vmax.f32 %v3210_v45, 0.0 }
 0xc8c   :  { %v15468_v25 = vpack.c.bf16 %v3213_v49, %v3212_v47 }
 0xc8e   :  { %12758 = vmatprep.mubr.msk.bf16.mxu1 %vm120_vm0, %v15468_v25 }
 0xc8f   :  { %12759 = vmatmul.mubr.msk.bf16.vlgmr.msra.gmra.mrb[136].mxu1 %vm120_vm0, %v15470_v50 }
 0xc90   :  { %12768 = vmatprep.mubr.msk.f32.mxu1 %vm14493_vm1, %v14494_v6 }
 0xc92   :  { %v12740_v51 = vpop.f32.mrb[136].mxu0 }
 0xc93   :  { %v3290_v52 = vpop.f32.mrb[137].mxu0 }
 0xc94   :  { %v12741_v53 = vpop.f32.mrb[138].mxu0 }
 0xc95   :  { %v3293_v56 = vpop.f32.mrb[139].mxu0 }
 0xc9a   :  { %v12748_v60 = vpop.f32.mrb[132].mxu0 }
 0xc9b   :  { %v3402_v63 = vadd.f32 %v12748_v60, %v10914_v58  ;;  %v3362_v54 = vpop.f32.mrb[133].mxu0 }
 0xc9c   :  { %v3400_v55 = vadd.f32 %v10914_v58, %v3362_v54  ;;  %v12749_v46 = vpop.f32.mrb[134].mxu0 }
 0xc9d   :  { %v3403_v2 = vadd.f32 %v12749_v46, %v10914_v58  ;;  %v3365_v14 = vpop.f32.mrb[135].mxu0  ;;  %v3409_v13 = vmax.f32 %v3402_v63, 0.0 }
 0xc9e   :  { %v3401_v10 = vadd.f32 %v10914_v58, %v3365_v14  ;;  %v3407_v5 = vmax.f32 %v3400_v55, 0.0 }
 0xc9f   :  { %v3410_v59 = vmax.f32 %v3403_v2, 0.0 }
 0xca0   :  { %v3408_v61 = vmax.f32 %v3401_v10, 0.0 }
 0xca1   :  { %v15481_v24 = vpack.c.bf16 %v3410_v59, %v3409_v13 }
 0xca2   :  { %v15483_v33 = vpack.c.bf16 %v3408_v61, %v3407_v5  ;;  %v12752_v57 = vpop.f32.mrb[140].mxu0 }
 0xca3   :  { %v3387_v29 = vadd.f32 %v12752_v57, %v12740_v51  ;;  %v3378_v32 = vpop.f32.mrb[141].mxu0 }
 0xca4   :  { %v3379_v3 = vadd.f32 %v3378_v32, %v3290_v52  ;;  %v12753_v31 = vpop.f32.mrb[142].mxu0  ;;  %12793 = vmatprep.mubr.msk.bf16.mxu0 %vm120_vm0, %v15483_v33 }
 0xca5   :  { %v3406_v34 = vadd.f32 %v10914_v58, %v3387_v29  ;;  %v3381_v21 = vpop.f32.mrb[143].mxu0  ;;  %12794 = vmatmul.mubr.msk.bf16.vlgmr.msra.gmra.mrb[144].mxu0 %vm120_vm0, %v15481_v24 }
 0xca6   :  { %v3404_v38 = vadd.f32 %v10914_v58, %v3379_v3  ;;  %v3382_v35 = vadd.f32 %v3381_v21, %v3293_v56 }
 0xca7   :  { %v3413_v12 = vmax.f32 %v3406_v34, 0.0 }
 0xca8   :  { %v3405_v36 = vadd.f32 %v10914_v58, %v3382_v35  ;;  %v3411_v15 = vmax.f32 %v3404_v38, 0.0 }
 0xca9   :  { %v15491_v41 = vpack.c.bf16 %v3413_v12, %v3413_v12  ;;  %v14074_v12 = vld [vmem:[%s17295_s10 + $0xf8] sm:$0xff]  }
 0xcaa   :  { %v3412_v8 = vmax.f32 %v3405_v36, 0.0 }
 0xcac   :  { %v15489_v40 = vpack.c.bf16 %v3412_v8, %v3411_v15 }
 0xcae   :  { %12797 = vmatprep.mubr.msk.bf16.mxu0 %vm120_vm0, %v15489_v40 }
 0xcaf   :  { %12798 = vmatmul.mubr.msk.bf16.gmra.mrb[148].mxu0 %vm120_vm0, %v15491_v41 }
 0xd62   :  { %v12760_v1 = vpop.f32.mrb[136].mxu1 }
 0xd63   :  { %v3473_v42 = vpop.f32.mrb[137].mxu1 }
 0xd64   :  { %v12761_v43 = vpop.f32.mrb[138].mxu1 }
 0xd65   :  { %v3476_v17 = vpop.f32.mrb[139].mxu1  ;;  %v14075_v43 = vld [vmem:[%s17297_s12 + $0xd0] sm:$0xff]  }
 0xd66   :  { %v13863_v19 = vpack.c.bf16 %v3476_v17, %v3473_v42 }
 0xd68   :  { %13864 = vmatpush3.bf16.msra.mxu1 %v13863_v19 }
 0xd69   :  { %12766 = vmatprep.subr.mxu1 %v14494_v6 }
 0xd6c   :  { %12767 = vmatpush3.msra.mxu1 %v12760_v1 }
 0xd6d   :  { %12769 = vmatmul.mubr.msk.f32.vlgmr.msra.gmra.mrb[134].mxu1 %vm182_vm2, %v15216_v39  ;;  %13865 = vmatprep.subr.bf16.mxu1 %v14495_v18 }
 0xd6e   :  { %12771 = vmatprep.mubr.msk.f32.mxu1 %vm14493_vm1, %v14494_v6 }
 0xd71   :  { %12772 = vmatmul.mubr.msk.f32.gmra.mrb[140].mxu1 %vm182_vm2, %v15225_v11 }
 0xd72   :  { %12774 = vmatprep.mubr.msk.f32.mxu1 %vm14493_vm1, %v14494_v6 }
 0xd75   :  { %12775 = vmatmul.mubr.msk.f32.gmra.mrb[142].mxu1 %vm182_vm2, %v15235_v16 }
 0xd76   :  { %12777 = vmatprep.mubr.msk.f32.mxu1 %vm14493_vm1, %v14494_v6 }
 0xd78   :  { %v12795_v45 = vpop.f32.mrb[144].mxu0 }
 0xd79   :  { %12778 = vmatmul.mubr.msk.f32.gmra.mrb[144].mxu1 %vm182_vm2, %v15245_v20  ;;  %v3683_v39 = vpop.f32.mrb[145].mxu0 }
 0xd7a   :  { %v12796_v37 = vpop.f32.mrb[146].mxu0  ;;  %12780 = vmatprep.mubr.msk.f32.mxu1 %vm14493_vm1, %v14494_v6 }
 0xd7b   :  { %v13869_v47 = vpack.c.bf16 %v12796_v37, %v12795_v45  ;;  %v3686_v11 = vpop.f32.mrb[147].mxu0 }
 0xd7c   :  { %v13866_v49 = vpack.c.bf16 %v3686_v11, %v3683_v39 }
 0xd7d   :  { %12781 = vmatmul.mubr.msk.f32.gmra.mrb[146].mxu1 %vm182_vm2, %v15255_v44 }
 0xd7e   :  { %13867 = vmatpush3.bf16.msra.mxu1 %v13866_v49  ;;  %12783 = vmatprep.mubr.msk.f32.mxu1 %vm14493_vm1, %v14494_v6 }
 0xd7f   :  { %13868 = vmatprep.subr.bf16.mxu1 %v14495_v18 }
 0xd81   :  { %12784 = vmatmul.mubr.msk.f32.gmra.mrb[148].mxu1 %vm182_vm2, %v15271_v30  ;;  %v14072_v30 = vld [vmem:[%s17295_s10 + $0xe8] sm:$0xff]  }
 0xd82   :  { %v12799_v16 = vpop.f32.mrb[148].mxu0  ;;  %13870 = vmatpush3.bf16.msra.mxu1 %v13869_v47  ;;  %12786 = vmatprep.mubr.msk.f32.mxu1 %vm14493_vm1, %v14494_v6 }
 0xd83   :  { %v3699_v20 = vpop.f32.mrb[149].mxu0  ;;  %13871 = vmatprep.subr.bf16.mxu1 %v14495_v18 }
 0xd84   :  { %v12800_v51 = vpop.f32.mrb[150].mxu0 }
 0xd85   :  { %12787 = vmatmul.mubr.msk.f32.gmra.mrb[150].mxu1 %vm182_vm2, %v15290_v26  ;;  %v3702_v44 = vpop.f32.mrb[151].mxu0  ;;  %v10924_v26 = vld [vmem:[%s17296_s11 + $0xc] ss:$0 sm:$0xff]  ;;  %v10943_v51 = vld [vmem:[%s17296_s11 + $0xd] ss:$0 sm:$0xff] }
 0xd86   :  { %v13872_v52 = vpack.c.bf16 %v3702_v44, %v3699_v20  ;;  %12815 = vmatprep.mubr.msk.f32.mxu1 %vm14493_vm1, %v14494_v6 }
 0xd88   :  { %13873 = vmatpush3.bf16.msra.mxu1 %v13872_v52 }
 0xd89   :  { %12813 = vmatprep.subr.mxu1 %v14494_v6 }
 0xd8c   :  { %12814 = vmatpush3.msra.mxu1 %v12799_v16 }
 0xd8d   :  { %12816 = vmatmul.mubr.msk.f32.vlgmr.msra.gmra.mrb[152].mxu1 %vm2569_vm12, %v15260_v22  ;;  %13874 = vmatprep.subr.bf16.mxu1 %v14495_v18  ;;  %v14071_v22 = vld [vmem:[%s17295_s10 + $0xe0] sm:$0xff]  }
 0xd8e   :  { %12818 = vmatprep.mubr.msk.f32.mxu1 %vm14493_vm1, %v14494_v6  ;;  %12824 = vmatprep.subr.bf16.mxu0 %v14071_v22 }
 0xd8f   :  { %12825 = vmatpush3.bf16.msra.mxu0 %v14071_v22 }
 0xd90   :  { %12826 = vmatprep.subr.bf16.mxu0 %v14072_v30 }
 0xd91   :  { %12819 = vmatmul.mubr.msk.f32.gmra.mrb[154].mxu1 %vm2569_vm12, %v15278_v23  ;;  %v14073_v23 = vld [vmem:[%s17295_s10 + $0xf0] sm:$0xff]  }
 0xd92   :  { %12821 = vmatprep.mubr.msk.f32.mxu1 %vm14493_vm1, %v14494_v6 }
 0xd93   :  { %12827 = vmatpush3.bf16.msra.mxu0 %v14072_v30 }
 0xd94   :  { %12859 = vmatprep.subr.bf16.mxu0 %v14073_v23 }
 0xd95   :  { %12822 = vmatmul.mubr.msk.f32.gmra.mrb[156].mxu1 %vm2569_vm12, %v15297_v28 }
 0xd96   :  { %12850 = vmatprep.mubr.msk.f32.mxu1 %vm14493_vm1, %v14494_v6 }
 0xe40   :  { %v3561_v53 = vpop.f32.mrb[134].mxu1 }
 0xe41   :  { %v3562_v56 = vadd.f32 %v10924_v26, %v3561_v53  ;;  %v12770_v58 = vpop.f32.mrb[135].mxu1 }
 0xe43   :  { %v3602_v63 = vmul.f32 0.1, %v3562_v56  ;;  %vm3595_vm10 = vcmp.ge.f32.partialorder %v3562_v56, 0.0 }
 0xe44   :  { %v3566_v60 = vpop.f32.mrb[140].mxu1 }
 0xe45   :  { %v3567_v54 = vadd.f32 %v10924_v26, %v3566_v60  ;;  %v12773_v55 = vpop.f32.mrb[141].mxu1  ;;  %v3609_v14 = vsel %vm3595_vm10, %v3562_v56, %v3602_v63 }
 0xe47   :  { %vm3596_vm11 = vcmp.ge.f32.partialorder %v3567_v54, 0.0  ;;  %v3603_v46 = vmul.f32 0.1, %v3567_v54 }
 0xe48   :  { %v3571_v2 = vpop.f32.mrb[142].mxu1 }
 0xe49   :  { %v3610_v10 = vsel %vm3596_vm11, %v3567_v54, %v3603_v46  ;;  %v3572_v13 = vadd.f32 %v10924_v26, %v3571_v2  ;;  %v12776_v59 = vpop.f32.mrb[143].mxu1 }
 0xe4a   :  { %v3815_v5 = vpack.c.bf16 %v3610_v10, %v3609_v14 }
 0xe4b   :  { %v3604_v57 = vmul.f32 0.1, %v3572_v13  ;;  %vm3597_vm13 = vcmp.ge.f32.partialorder %v3572_v13, 0.0 }
 0xe4c   :  { %v3576_v61 = vpop.f32.mrb[144].mxu1  ;;  %12828 = vmatprep.mubr.msk.bf16.mxu0 %vm120_vm0, %v3815_v5 }
 0xe4d   :  { %v3577_v29 = vadd.f32 %v10924_v26, %v3576_v61  ;;  %v12779_v32 = vpop.f32.mrb[145].mxu1  ;;  %v3611_v34 = vsel %vm3597_vm13, %v3572_v13, %v3604_v57  ;;  %v14076_v13 = vld [vmem:[%s17297_s12 + $0xd8] sm:$0xff]  }
 0xe4f   :  { %vm3598_vm14 = vcmp.ge.f32.partialorder %v3577_v29, 0.0  ;;  %v3605_v3 = vmul.f32 0.1, %v3577_v29 }
 0xe50   :  { %v3581_v31 = vpop.f32.mrb[146].mxu1 }
 0xe51   :  { %v3612_v21 = vsel %vm3598_vm14, %v3577_v29, %v3605_v3  ;;  %v3582_v38 = vadd.f32 %v10924_v26, %v3581_v31  ;;  %v12782_v35 = vpop.f32.mrb[147].mxu1 }
 0xe52   :  { %v3816_v36 = vpack.c.bf16 %v3612_v21, %v3611_v34 }
 0xe53   :  { %v3606_v8 = vmul.f32 0.1, %v3582_v38  ;;  %vm3599_vm15 = vcmp.ge.f32.partialorder %v3582_v38, 0.0 }
 0xe54   :  { %v3586_v15 = vpop.f32.mrb[148].mxu1  ;;  %12829 = vmatmul.mubr.msk.bf16.vlgmr.msra.gmra.mrb[152].mxu0 %vm120_vm0, %v3816_v36 }
 0xe55   :  { %v3587_v1 = vadd.f32 %v10924_v26, %v3586_v15  ;;  %v12785_v42 = vpop.f32.mrb[149].mxu1  ;;  %12860 = vmatpush3.bf16.msra.mxu0 %v14073_v23  ;;  %v3613_v45 = vsel %vm3599_vm15, %v3582_v38, %v3606_v8  ;;  %v14309_v38 = vld [vmem:[%s17324_s7 + $0x8] sm:$0xff] }
 0xe56   :  { %12861 = vmatprep.subr.bf16.mxu0 %v14074_v12 }
 0xe57   :  { %vm3600_vm4 = vcmp.ge.f32.partialorder %v3587_v1, 0.0  ;;  %v3607_v17 = vmul.f32 0.1, %v3587_v1 }
 0xe58   :  { %v3591_v19 = vpop.f32.mrb[150].mxu1 }
 0xe59   :  { %v3614_v39 = vsel %vm3600_vm4, %v3587_v1, %v3607_v17  ;;  %v3592_v37 = vadd.f32 %v10924_v26, %v3591_v19  ;;  %v12788_v47 = vpop.f32.mrb[151].mxu1  ;;  %12862 = vmatpush3.bf16.msra.mxu0 %v14074_v12  ;;  %v14077_v1 = vld [vmem:[%s17295_s10 + $0x100] sm:$0xff]  }
 0xe5a   :  { %v3817_v11 = vpack.c.bf16 %v3614_v39, %v3613_v45  ;;  %12894 = vmatprep.subr.bf16.mxu0 %v14075_v43  ;;  %v14310_v19 = vld [vmem:[%s17323_s25] sm:$0xff]  ;;  %v14311_v39 = vld [vmem:[%s17323_s25 + $0x8] sm:$0xff]  ;;  %v14313_v47 = vld [vmem:[%s17323_s25 + $0x18] sm:$0xff] }
 0xe5b   :  { %vm3601_vm5 = vcmp.ge.f32.partialorder %v3592_v37, 0.0  ;;  %v3608_v49 = vmul.f32 0.1, %v3592_v37 }
 0xe5c   :  { %12832 = vmatprep.mubr.msk.bf16.mxu0 %vm120_vm0, %v3817_v11  ;;  %v14314_v11 = vld [vmem:[%s17323_s25 + $0x20] sm:$0xff] }
 0xe5d   :  { %v3615_v16 = vsel %vm3601_vm5, %v3592_v37, %v3608_v49  ;;  %v14312_v37 = vld [vmem:[%s17323_s25 + $0x10] sm:$0xff]  ;;  %v14315_v49 = vld [vmem:[%s17323_s25 + $0x28] sm:$0xff] }
 0xe5e   :  { %v3818_v20 = vpack.c.bf16 %v3615_v16, %v3615_v16  ;;  %v14316_v16 = vld [vmem:[%s17323_s25 + $0x30] sm:$0xff] }
 0xe60   :  { %12833 = vmatmul.mubr.msk.bf16.gmra.mrb[156].mxu0 %vm120_vm0, %v3818_v20  ;;  %v3787_v44 = vpop.f32.mrb[152].mxu1  ;;  %v14079_v20 = vld [vmem:[%s17297_s12 + $0xc0] sm:$0xff]  }
 0xe61   :  { %v3788_v52 = vadd.f32 %v10943_v51, %v3787_v44  ;;  %v12817_v22 = vpop.f32.mrb[153].mxu1  ;;  %v14081_v44 = vld [vmem:[%s17297_s12 + $0xf0] sm:$0xff]  }
 0xe63   :  { %v3804_v23 = vmul.f32 0.1, %v3788_v52  ;;  %vm3801_vm6 = vcmp.ge.f32.partialorder %v3788_v52, 0.0 }
 0xe64   :  { %v3792_v30 = vpop.f32.mrb[154].mxu1 }
 0xe65   :  { %v3793_v26 = vadd.f32 %v10943_v51, %v3792_v30  ;;  %v12820_v53 = vpop.f32.mrb[155].mxu1  ;;  %v3807_v60 = vsel %vm3801_vm6, %v3788_v52, %v3804_v23  ;;  %v10958_v52 = vld [vmem:[%s17296_s11 + $0xe] ss:$0 sm:$0xff] }
 0xe67   :  { %vm3802_vm7 = vcmp.ge.f32.partialorder %v3793_v26, 0.0  ;;  %v3805_v56 = vmul.f32 0.1, %v3793_v26 }
 0xe68   :  { %v3797_v58 = vpop.f32.mrb[156].mxu1 }
 0xe69   :  { %v3808_v63 = vsel %vm3802_vm7, %v3793_v26, %v3805_v56  ;;  %v3798_v54 = vadd.f32 %v10943_v51, %v3797_v58  ;;  %v12823_v55 = vpop.f32.mrb[157].mxu1  ;;  %v14080_v51 = vld [vmem:[%s17297_s12 + $0xc8] sm:$0xff]  }
 0xe6a   :  { %v4009_v46 = vpack.c.bf16 %v3808_v63, %v3807_v60 }
 0xe6b   :  { %vm3803_vm8 = vcmp.ge.f32.partialorder %v3798_v54, 0.0  ;;  %v3806_v2 = vmul.f32 0.1, %v3798_v54 }
 0xe6c   :  { %12863 = vmatprep.mubr.msk.bf16.mxu0 %vm120_vm0, %v4009_v46 }
 0xe6d   :  { %v3809_v14 = vsel %vm3803_vm8, %v3798_v54, %v3806_v2 }
 0xe6e   :  { %v4010_v10 = vpack.c.bf16 %v3809_v14, %v3809_v14 }
 0xe70   :  { %12864 = vmatmul.mubr.msk.bf16.vlgmr.msra.gmra.mrb[160].mxu0 %vm120_vm0, %v4010_v10 }
 0xe71   :  { %12895 = vmatpush3.bf16.msra.mxu0 %v14075_v43  ;;  %12898 = vmatprep.mubr.msk.bf16.mxu0 %vm120_vm0, %v15468_v25 }
 0xe72   :  { %12896 = vmatprep.subr.bf16.mxu0 %v14076_v13 }
 0xe75   :  { %12897 = vmatpush3.bf16.msra.mxu0 %v14076_v13 }
 0xe76   :  { %12902 = vmatprep.subr.bf16.mxu0 %v14079_v20 }
 0xe78   :  { %12899 = vmatmul.mubr.msk.bf16.vlgmr.msra.gmra.mrb[164].mxu0 %vm120_vm0, %v15470_v50  ;;  %v14308_v50 = vld [vmem:[%s17324_s7] sm:$0xff] }
 0xe79   :  { %12903 = vmatpush3.bf16.msra.mxu0 %v14079_v20 }
 0xe7a   :  { %12904 = vmatprep.subr.bf16.mxu0 %v14080_v51 }
 0xe7d   :  { %12905 = vmatpush3.bf16.msra.mxu0 %v14080_v51 }
 0xe7e   :  { %12910 = vmatprep.subr.bf16.mxu0 %v14081_v44 }
 0xf27   :  { %v12830_v59 = vpop.f32.mrb[152].mxu0 }
 0xf28   :  { %v3877_v5 = vpop.f32.mrb[153].mxu0 }
 0xf29   :  { %v12831_v61 = vpop.f32.mrb[154].mxu0 }
 0xf2a   :  { %v13878_v57 = vpack.c.bf16 %v12831_v61, %v12830_v59  ;;  %v3880_v29 = vpop.f32.mrb[155].mxu0  ;;  %v10971_v61 = vld [vmem:[%s17296_s11 + $0xf] ss:$0 sm:$0xff] }
 0xf2b   :  { %v13875_v32 = vpack.c.bf16 %v3880_v29, %v3877_v5  ;;  %v14082_v5 = vld [vmem:[%s17297_s12 + $0xf8] sm:$0xff]  }
 0xf2d   :  { %13876 = vmatpush3.bf16.msra.mxu1 %v13875_v32 }
 0xf2e   :  { %13877 = vmatprep.subr.bf16.mxu1 %v14495_v18 }
 0xf31   :  { %13879 = vmatpush3.bf16.msra.mxu1 %v13878_v57 }
 0xf32   :  { %13880 = vmatprep.subr.bf16.mxu1 %v14495_v18 }
 0xf33   :  { %v12834_v3 = vpop.f32.mrb[156].mxu0 }
 0xf34   :  { %v3893_v31 = vpop.f32.mrb[157].mxu0 }
 0xf35   :  { %v12835_v25 = vpop.f32.mrb[158].mxu0 }
 0xf36   :  { %v3896_v34 = vpop.f32.mrb[159].mxu0 }
 0xf37   :  { %v13881_v21 = vpack.c.bf16 %v3896_v34, %v3893_v31 }
 0xf39   :  { %13882 = vmatpush3.bf16.msra.mxu1 %v13881_v21 }
 0xf3a   :  { %12848 = vmatprep.subr.mxu1 %v14494_v6 }
 0xf3d   :  { %12849 = vmatpush3.msra.mxu1 %v12834_v3  ;;  %v14083_v3 = vld [vmem:[%s17297_s12 + $0xe0] sm:$0xff]  }
 0xf3e   :  { %12851 = vmatmul.mubr.msk.f32.vlgmr.msra.gmra.mrb[158].mxu1 %vm2569_vm12, %v14308_v50  ;;  %13883 = vmatprep.subr.bf16.mxu1 %v14495_v18  ;;  %v14084_v50 = vld [vmem:[%s17297_s12 + $0xe8] sm:$0xff]  }
 0xf3f   :  { %12853 = vmatprep.mubr.msk.f32.mxu1 %vm14493_vm1, %v14494_v6 }
 0xf42   :  { %12854 = vmatmul.mubr.msk.f32.gmra.mrb[160].mxu1 %vm2569_vm12, %v14309_v38 }
 0xf43   :  { %v12865_v35 = vpop.f32.mrb[160].mxu0  ;;  %12856 = vmatprep.mubr.msk.f32.mxu1 %vm14493_vm1, %v14494_v6 }
 0xf44   :  { %v4063_v36 = vpop.f32.mrb[161].mxu0 }
 0xf45   :  { %v12866_v12 = vpop.f32.mrb[162].mxu0 }
 0xf46   :  { %12857 = vmatmul.mubr.msk.f32.gmra.mrb[162].mxu1 %vm2569_vm12, %v15297_v28  ;;  %v4066_v15 = vpop.f32.mrb[163].mxu0  ;;  %v14078_v28 = vld [vmem:[%s17295_s10 + $0x108] sm:$0xff]  }
 0xf47   :  { %v13884_v8 = vpack.c.bf16 %v4066_v15, %v4063_v36  ;;  %12873 = vmatprep.mubr.msk.f32.mxu1 %vm14493_vm1, %v14494_v6 }
 0xf49   :  { %13885 = vmatpush3.bf16.msra.mxu1 %v13884_v8 }
 0xf4a   :  { %12871 = vmatprep.subr.mxu1 %v14494_v6 }
 0xf4b   :  { %v15601_v42 = vpop.f32.mrb[164].mxu0 }
 0xf4c   :  { %v15603_v43 = vpop.f32.mrb[165].mxu0 }
 0xf4d   :  { %12872 = vmatpush3.msra.mxu1 %v12865_v35  ;;  %v12901_v17 = vpop.f32.mrb[166].mxu0 }
 0xf4e   :  { %12874 = vmatmul.mubr.msk.f32.vlgmr.msra.gmra.mrb[164].mxu1 %vm182_vm2, %v14310_v19  ;;  %v15612_v45 = vpop.f32.mrb[167].mxu0  ;;  %12934 = vmatprep.subr.bf16.mxu1 %v14077_v1 }
 0xf4f   :  { %12876 = vmatprep.mubr.msk.f32.mxu1 %vm14493_vm1, %v14494_v6  ;;  %12935 = vmatpush3.bf16.msra.mxu1 %v14077_v1 }
 0xf50   :  { %12936 = vmatprep.subr.bf16.mxu1 %v14078_v28 }
 0xf52   :  { %12877 = vmatmul.mubr.msk.f32.gmra.mrb[166].mxu1 %vm182_vm2, %v14311_v39 }
 0xf53   :  { %12879 = vmatprep.mubr.msk.f32.mxu1 %vm14493_vm1, %v14494_v6  ;;  %12937 = vmatpush3.bf16.msra.mxu1 %v14078_v28 }
 0xf54   :  { %13886 = vmatprep.subr.bf16.mxu1 %v14495_v18 }
 0xf56   :  { %12880 = vmatmul.mubr.msk.f32.gmra.mrb[168].mxu1 %vm182_vm2, %v14312_v37 }
 0xf57   :  { %12882 = vmatprep.mubr.msk.f32.mxu1 %vm14493_vm1, %v14494_v6 }
 0xf5a   :  { %12883 = vmatmul.mubr.msk.f32.gmra.mrb[170].mxu1 %vm182_vm2, %v14313_v47 }
 0xf5b   :  { %12885 = vmatprep.mubr.msk.f32.mxu1 %vm14493_vm1, %v14494_v6 }
 0xf5e   :  { %12886 = vmatmul.mubr.msk.f32.gmra.mrb[172].mxu1 %vm182_vm2, %v14314_v11 }
 0xf5f   :  { %12888 = vmatprep.mubr.msk.f32.mxu1 %vm14493_vm1, %v14494_v6 }
 0xf62   :  { %12889 = vmatmul.mubr.msk.f32.gmra.mrb[174].mxu1 %vm182_vm2, %v14315_v49 }
 0xf63   :  { %12891 = vmatprep.mubr.msk.f32.mxu1 %vm14493_vm1, %v14494_v6 }
 0xf66   :  { %12892 = vmatmul.mubr.msk.f32.gmra.mrb[176].mxu1 %vm182_vm2, %v14316_v16 }
 0xf67   :  { %12938 = vmatprep.mubr.msk.bf16.mxu1 %vm120_vm0, %v14626_v4 }
 0xf6a   :  { %12939 = vmatmul.mubr.msk.bf16.vlgmr.msra.gmra.mrb[180].mxu1 %vm120_vm0, %v14635_v7 }
 0xf6b   :  { %12948 = vmatprep.mubr.msk.f32.mxu1 %vm14493_vm1, %v14494_v6 }
0x1011   :  { %v3981_v22 = vpop.f32.mrb[158].mxu1 }
0x1012   :  { %v3982_v30 = vadd.f32 %v10958_v52, %v3981_v22  ;;  %v12852_v23 = vpop.f32.mrb[159].mxu1 }
0x1014   :  { %v3998_v53 = vmul.f32 0.1, %v3982_v30  ;;  %vm3995_vm9 = vcmp.ge.f32.partialorder %v3982_v30, 0.0 }
0x1015   :  { %v3986_v26 = vpop.f32.mrb[160].mxu1 }
0x1016   :  { %v3987_v56 = vadd.f32 %v10958_v52, %v3986_v26  ;;  %v12855_v58 = vpop.f32.mrb[161].mxu1  ;;  %v4001_v54 = vsel %vm3995_vm9, %v3982_v30, %v3998_v53 }
0x1018   :  { %vm3996_vm10 = vcmp.ge.f32.partialorder %v3987_v56, 0.0  ;;  %v3999_v60 = vmul.f32 0.1, %v3987_v56 }
0x1019   :  { %v3991_v63 = vpop.f32.mrb[162].mxu1 }
0x101a   :  { %v4002_v55 = vsel %vm3996_vm10, %v3987_v56, %v3999_v60  ;;  %v3992_v46 = vadd.f32 %v10958_v52, %v3991_v63  ;;  %v12858_v2 = vpop.f32.mrb[163].mxu1 }
0x101b   :  { %v4215_v14 = vpack.c.bf16 %v4002_v55, %v4001_v54 }
0x101c   :  { %vm3997_vm11 = vcmp.ge.f32.partialorder %v3992_v46, 0.0  ;;  %v4000_v10 = vmul.f32 0.1, %v3992_v46 }
0x101d   :  { %12906 = vmatprep.mubr.msk.bf16.mxu0 %vm120_vm0, %v4215_v14  ;;  %v15702_v14 = vld [vmem:[%s17320_s22] sm:$0xff] }
0x101e   :  { %v4003_v13 = vsel %vm3997_vm11, %v3992_v46, %v4000_v10  ;;  %v15712_v10 = vld [vmem:[%s17320_s22 + $0x8] sm:$0xff] }
0x101f   :  { %v4216_v59 = vpack.c.bf16 %v4003_v13, %v4003_v13  ;;  %v15721_v13 = vld [vmem:[%s17320_s22 + $0x10] sm:$0xff] }
0x1021   :  { %12907 = vmatmul.mubr.msk.bf16.vlgmr.msra.gmra.mrb[168].mxu0 %vm120_vm0, %v4216_v59  ;;  %v4151_v57 = vpop.f32.mrb[164].mxu1  ;;  %v15730_v59 = vld [vmem:[%s17320_s22 + $0x18] sm:$0xff] }
0x1022   :  { %12911 = vmatpush3.bf16.msra.mxu0 %v14081_v44  ;;  %12914 = vmatprep.mubr.msk.bf16.mxu0 %vm120_vm0, %v15483_v33  ;;  %v4152_v29 = vadd.f32 %v10971_v61, %v4151_v57  ;;  %v12875_v32 = vpop.f32.mrb[165].mxu1  ;;  %v14086_v57 = vld [vmem:[%s17295_s10 + $0x118] sm:$0xff]  }
0x1023   :  { %12912 = vmatprep.subr.bf16.mxu0 %v14082_v5 }
0x1024   :  { %v4192_v25 = vmul.f32 0.1, %v4152_v29  ;;  %vm4185_vm13 = vcmp.ge.f32.partialorder %v4152_v29, 0.0 }
0x1025   :  { %v4156_v31 = vpop.f32.mrb[166].mxu1 }
0x1026   :  { %12913 = vmatpush3.bf16.msra.mxu0 %v14082_v5  ;;  %v4157_v34 = vadd.f32 %v10971_v61, %v4156_v31  ;;  %v12878_v21 = vpop.f32.mrb[167].mxu1  ;;  %v4199_v35 = vsel %vm4185_vm13, %v4152_v29, %v4192_v25  ;;  %v15739_v5 = vld [vmem:[%s17320_s22 + $0x20] sm:$0xff] }
0x1027   :  { %12922 = vmatprep.subr.bf16.mxu0 %v14083_v3 }
0x1028   :  { %vm4186_vm14 = vcmp.ge.f32.partialorder %v4157_v34, 0.0  ;;  %v4193_v33 = vmul.f32 0.1, %v4157_v34 }
0x1029   :  { %12915 = vmatmul.mubr.msk.bf16.vlgmr.msra.gmra.mrb[172].mxu0 %vm120_vm0, %v15481_v24  ;;  %v4161_v38 = vpop.f32.mrb[168].mxu1 }
0x102a   :  { %v4200_v36 = vsel %vm4186_vm14, %v4157_v34, %v4193_v33  ;;  %12918 = vmatprep.mubr.msk.bf16.mxu0 %vm120_vm0, %v15489_v40  ;;  %v4162_v12 = vadd.f32 %v10971_v61, %v4161_v38  ;;  %v12881_v15 = vpop.f32.mrb[169].mxu1  ;;  %12923 = vmatpush3.bf16.msra.mxu0 %v14083_v3 }
0x102b   :  { %v4363_v8 = vpack.c.bf16 %v4200_v36, %v4199_v35  ;;  %12924 = vmatprep.subr.bf16.mxu0 %v14084_v50  ;;  %v11018_v36 = vld [vmem:[%s17298_s13 + $0x7] ss:$0 sm:$0xff] }
0x102c   :  { %v4194_v28 = vmul.f32 0.1, %v4162_v12  ;;  %vm4187_vm15 = vcmp.ge.f32.partialorder %v4162_v12, 0.0 }
0x102d   :  { %v4166_v1 = vpop.f32.mrb[170].mxu1 }
0x102e   :  { %v4167_v17 = vadd.f32 %v10971_v61, %v4166_v1  ;;  %v12884_v19 = vpop.f32.mrb[171].mxu1  ;;  %12925 = vmatpush3.bf16.msra.mxu0 %v14084_v50  ;;  %v4201_v40 = vsel %vm4187_vm15, %v4162_v12, %v4194_v28 }
0x102f   :  { %12963 = vmatprep.subr.bf16.mxu0 %v14494_v6 }
0x1030   :  { %vm4188_vm4 = vcmp.ge.f32.partialorder %v4167_v17, 0.0  ;;  %v4195_v24 = vmul.f32 0.1, %v4167_v17 }
0x1031   :  { %12919 = vmatmul.mubr.msk.bf16.gmra.mrb[176].mxu0 %vm120_vm0, %v15491_v41  ;;  %v4171_v39 = vpop.f32.mrb[172].mxu1 }
0x1032   :  { %v4202_v37 = vsel %vm4188_vm4, %v4167_v17, %v4195_v24  ;;  %12926 = vmatprep.mubr.msk.bf16.mxu0 %vm120_vm0, %v4363_v8  ;;  %v4172_v47 = vadd.f32 %v10971_v61, %v4171_v39  ;;  %v12887_v11 = vpop.f32.mrb[173].mxu1 }
0x1033   :  { %v4364_v49 = vpack.c.bf16 %v4202_v37, %v4201_v40 }
0x1034   :  { %v4196_v20 = vmul.f32 0.1, %v4172_v47  ;;  %vm4189_vm5 = vcmp.ge.f32.partialorder %v4172_v47, 0.0 }
0x1035   :  { %v4176_v16 = vpop.f32.mrb[174].mxu1 }
0x1036   :  { %v4177_v51 = vadd.f32 %v10971_v61, %v4176_v16  ;;  %v12890_v44 = vpop.f32.mrb[175].mxu1  ;;  %v4203_v30 = vsel %vm4189_vm5, %v4172_v47, %v4196_v20  ;;  %v11028_v16 = vld [vmem:[%s17296_s11 + $0x10] ss:$0 sm:$0xff] }
0x1038   :  { %vm4190_vm6 = vcmp.ge.f32.partialorder %v4177_v51, 0.0  ;;  %v4197_v52 = vmul.f32 0.1, %v4177_v51 }
0x1039   :  { %v4181_v22 = vpop.f32.mrb[176].mxu1  ;;  %12927 = vmatmul.mubr.msk.bf16.vlgmr.msra.gmra.mrb[172].mxu0 %vm120_vm0, %v4364_v49 }
0x103a   :  { %v4204_v41 = vsel %vm4190_vm6, %v4177_v51, %v4197_v52  ;;  %v4182_v23 = vadd.f32 %v10971_v61, %v4181_v22  ;;  %v12893_v26 = vpop.f32.mrb[177].mxu1  ;;  %v14085_v61 = vld [vmem:[%s17295_s10 + $0x110] sm:$0xff]  }
0x103b   :  { %v4365_v53 = vpack.c.bf16 %v4204_v41, %v4203_v30  ;;  %12964 = vmatpush3.bf16.msra.mxu0 %v14085_v61 }
0x103c   :  { %vm4191_vm7 = vcmp.ge.f32.partialorder %v4182_v23, 0.0  ;;  %v4198_v56 = vmul.f32 0.1, %v4182_v23  ;;  %12965 = vmatprep.subr.bf16.mxu0 %v14494_v6 }
0x103d   :  { %v12940_v58 = vpop.f32.mrb[180].mxu1  ;;  %12930 = vmatprep.mubr.msk.bf16.mxu0 %vm120_vm0, %v4365_v53 }
0x103e   :  { %v4205_v60 = vsel %vm4191_vm7, %v4182_v23, %v4198_v56  ;;  %v4597_v63 = vpop.f32.mrb[181].mxu1 }
0x103f   :  { %v4366_v54 = vpack.c.bf16 %v4205_v60, %v4205_v60  ;;  %v12941_v55 = vpop.f32.mrb[182].mxu1  ;;  %12966 = vmatpush3.bf16.msra.mxu0 %v14086_v57 }
0x1040   :  { %v4600_v46 = vpop.f32.mrb[183].mxu1 }
0x1041   :  { %v13887_v2 = vpack.c.bf16 %v4600_v46, %v4597_v63  ;;  %12931 = vmatmul.mubr.msk.bf16.gmra.mrb[180].mxu0 %vm120_vm0, %v4366_v54 }
0x1042   :  { %12967 = vmatprep.mubr.msk.bf16.mxu0 %vm14493_vm1, %v14494_v6 }
0x1043   :  { %13888 = vmatpush3.bf16.msra.mxu1 %v13887_v2 }
0x1044   :  { %12946 = vmatprep.subr.mxu1 %v14494_v6 }
0x1047   :  { %12947 = vmatpush3.msra.mxu1 %v12940_v58 }
0x1048   :  { %12949 = vmatmul.mubr.msk.f32.vlgmr.msra.gmra.mrb[178].mxu1 %vm182_vm2, %v15702_v14  ;;  %13889 = vmatprep.subr.bf16.mxu1 %v14495_v18 }
0x1049   :  { %12951 = vmatprep.mubr.msk.f32.mxu1 %vm14493_vm1, %v14494_v6 }
0x104c   :  { %12952 = vmatmul.mubr.msk.f32.gmra.mrb[184].mxu1 %vm182_vm2, %v15712_v10 }
0x104d   :  { %12954 = vmatprep.mubr.msk.f32.mxu1 %vm14493_vm1, %v14494_v6 }
0x1050   :  { %12955 = vmatmul.mubr.msk.f32.gmra.mrb[186].mxu1 %vm182_vm2, %v15721_v13 }
0x1051   :  { %12957 = vmatprep.mubr.msk.f32.mxu1 %vm14493_vm1, %v14494_v6 }
0x1054   :  { %12958 = vmatmul.mubr.msk.f32.gmra.mrb[188].mxu1 %vm182_vm2, %v15730_v59 }
0x1055   :  { %12960 = vmatprep.mubr.msk.f32.mxu1 %vm14493_vm1, %v14494_v6 }
0x1058   :  { %12961 = vmatmul.mubr.msk.f32.gmra.mrb[190].mxu1 %vm182_vm2, %v15739_v5 }
0x1059   :  { %12989 = vmatprep.mubr.msk.f32.mxu1 %vm14493_vm1, %v14494_v6 }
0x10f4   :  { %v12908_v29 = vpop.f32.mrb[168].mxu0 }
0x10f5   :  { %v15753_v32 = vadd.f32 %v12908_v29, %v15601_v42  ;;  %v4329_v3 = vpop.f32.mrb[169].mxu0 }
0x10f6   :  { %v15756_v31 = vadd.f32 %v4329_v3, %v15603_v43  ;;  %v12909_v25 = vpop.f32.mrb[170].mxu0 }
0x10f7   :  { %v4332_v34 = vpop.f32.mrb[171].mxu0 }
0x10f8   :  { %v15759_v21 = vadd.f32 %v4332_v34, %v15612_v45 }
0x1104   :  { %v12920_v50 = vpop.f32.mrb[176].mxu0 }
0x1105   :  { %v4429_v33 = vpop.f32.mrb[177].mxu0 }
0x1106   :  { %v12921_v38 = vpop.f32.mrb[178].mxu0 }
0x1107   :  { %v4432_v35 = vpop.f32.mrb[179].mxu0 }
0x110c   :  { %v12928_v12 = vpop.f32.mrb[172].mxu0 }
0x110d   :  { %v4541_v42 = vadd.f32 %v12928_v12, %v11018_v36  ;;  %v4501_v15 = vpop.f32.mrb[173].mxu0 }
0x110e   :  { %v4539_v8 = vadd.f32 %v11018_v36, %v4501_v15  ;;  %v12929_v1 = vpop.f32.mrb[174].mxu0 }
0x110f   :  { %10522 = vst.msk [vmem:[%s17302_s17 + $0x10] sm:$0xff] %vm120_vm0, %v4541_v42  ;;  %v4542_v43 = vadd.f32 %v12929_v1, %v11018_v36  ;;  %v4504_v45 = vpop.f32.mrb[175].mxu0 }
0x1110   :  { %10520 = vst.msk [vmem:[%s17302_s17] sm:$0xff] %vm120_vm0, %v4539_v8  ;;  %v4540_v28 = vadd.f32 %v11018_v36, %v4504_v45 }
0x1111   :  { %10523 = vst.msk [vmem:[%s17302_s17 + $0x18] sm:$0xff] %vm120_vm0, %v4542_v43 }
0x1112   :  { %10521 = vst.msk [vmem:[%s17302_s17 + $0x8] sm:$0xff] %vm120_vm0, %v4540_v28 }
0x1114   :  { %v12932_v17 = vpop.f32.mrb[180].mxu0 }
0x1115   :  { %v4526_v19 = vadd.f32 %v12932_v17, %v12920_v50  ;;  %v4517_v24 = vpop.f32.mrb[181].mxu0 }
0x1116   :  { %v4518_v39 = vadd.f32 %v4517_v24, %v4429_v33  ;;  %v12933_v40 = vpop.f32.mrb[182].mxu0 }
0x1117   :  { %v4545_v37 = vadd.f32 %v11018_v36, %v4526_v19  ;;  %v4520_v47 = vpop.f32.mrb[183].mxu0  ;;  %v15807_v40 = vld [vmem:[%s17321_s0] sm:$0xff] }
0x1118   :  { %v4543_v11 = vadd.f32 %v11018_v36, %v4518_v39  ;;  %v4521_v49 = vadd.f32 %v4520_v47, %v4432_v35 }
0x1119   :  { %10526 = vst.msk [vmem:[%s17302_s17 + $0x30] sm:$0xff] %vm120_vm0, %v4545_v37 }
0x111a   :  { %10524 = vst.msk [vmem:[%s17302_s17 + $0x20] sm:$0xff] %vm120_vm0, %v4543_v11  ;;  %v4544_v20 = vadd.f32 %v11018_v36, %v4521_v49  ;;  %v15816_v11 = vld [vmem:[%s17321_s0 + $0x8] sm:$0xff]  ;;  %v15825_v49 = vld [vmem:[%s17321_s0 + $0x10] sm:$0xff] }
0x111b   :  { %v4685_v51 = vpop.f32.mrb[178].mxu1 }
0x111c   :  { %10525 = vst.msk [vmem:[%s17302_s17 + $0x28] sm:$0xff] %vm120_vm0, %v4544_v20  ;;  %v4686_v44 = vadd.f32 %v11028_v16, %v4685_v51  ;;  %v12950_v52 = vpop.f32.mrb[179].mxu1  ;;  %v14088_v20 = vld [vmem:[%s17297_s12 + $0x100] sm:$0xff]   ;;  %v14089_v51 = vld [vmem:[%s17297_s12 + $0x118] sm:$0xff]  }
0x111d   :  { %13006 = vmatprep.subr.bf16.mxu0 %v14088_v20 }
0x111e   :  { %v4714_v30 = vmul.f32 0.1, %v4686_v44  ;;  %vm4709_vm8 = vcmp.ge.f32.partialorder %v4686_v44, 0.0 }
0x111f   :  { %v4690_v22 = vpop.f32.mrb[184].mxu1 }
0x1120   :  { %v4691_v41 = vadd.f32 %v11028_v16, %v4690_v22  ;;  %v12953_v23 = vpop.f32.mrb[185].mxu1  ;;  %v4719_v56 = vsel %vm4709_vm8, %v4686_v44, %v4714_v30  ;;  %v11044_v44 = vld [vmem:[%s17296_s11 + $0x11] ss:$0 sm:$0xff] }
0x1122   :  { %vm4710_vm9 = vcmp.ge.f32.partialorder %v4691_v41, 0.0  ;;  %v4715_v26 = vmul.f32 0.1, %v4691_v41 }
0x1123   :  { %v4695_v53 = vpop.f32.mrb[186].mxu1 }
0x1124   :  { %v4720_v58 = vsel %vm4710_vm9, %v4691_v41, %v4715_v26  ;;  %v4696_v60 = vadd.f32 %v11028_v16, %v4695_v53  ;;  %v12956_v63 = vpop.f32.mrb[187].mxu1 }
0x1125   :  { %v4729_v54 = vpack.c.bf16 %v4720_v58, %v4719_v56 }
0x1126   :  { %v4716_v46 = vmul.f32 0.1, %v4696_v60  ;;  %vm4711_vm10 = vcmp.ge.f32.partialorder %v4696_v60, 0.0 }
0x1127   :  { %v4700_v55 = vpop.f32.mrb[188].mxu1  ;;  %12968 = vmatmul.mubr.msk.bf16.vlgmr.msra.gmra.mrb[184].mxu0 %vm120_vm0, %v4729_v54 }
0x1128   :  { %v4701_v2 = vadd.f32 %v11028_v16, %v4700_v55  ;;  %v12959_v61 = vpop.f32.mrb[189].mxu1  ;;  %12971 = vmatprep.mubr.msk.bf16.mxu0 %vm14493_vm1, %v14494_v6  ;;  %v4721_v3 = vsel %vm4711_vm10, %v4696_v60, %v4716_v46  ;;  %13007 = vmatpush3.bf16.msra.mxu0 %v14088_v20 }
0x112a   :  { %vm4712_vm11 = vcmp.ge.f32.partialorder %v4701_v2, 0.0  ;;  %v4717_v57 = vmul.f32 0.1, %v4701_v2 }
0x112b   :  { %v4705_v29 = vpop.f32.mrb[190].mxu1 }
0x112c   :  { %v4722_v25 = vsel %vm4712_vm11, %v4701_v2, %v4717_v57  ;;  %v4706_v34 = vadd.f32 %v11028_v16, %v4705_v29  ;;  %v12962_v50 = vpop.f32.mrb[191].mxu1  ;;  %v14087_v16 = vld [vmem:[%s17297_s12 + $0x110] sm:$0xff]  }
0x112d   :  { %v4730_v33 = vpack.c.bf16 %v4722_v25, %v4721_v3  ;;  %v14092_v50 = vld [vmem:[%s17295_s10 + $0x128] sm:$0xff]  }
0x112e   :  { %v4718_v38 = vmul.f32 0.1, %v4706_v34  ;;  %vm4713_vm13 = vcmp.ge.f32.partialorder %v4706_v34, 0.0 }
0x112f   :  { %12972 = vmatmul.mubr.msk.bf16.gmra.mrb[188].mxu0 %vm120_vm0, %v4730_v33 }
0x1130   :  { %12975 = vmatprep.mubr.msk.bf16.mxu0 %vm14493_vm1, %v14494_v6  ;;  %v4723_v35 = vsel %vm4713_vm13, %v4706_v34, %v4718_v38  ;;  %v14091_v34 = vld [vmem:[%s17295_s10 + $0x120] sm:$0xff]   ;;  %v11065_v38 = vld [vmem:[%s17298_s13 + $0x8] ss:$0 sm:$0xff] }
0x1131   :  { %v4731_v36 = vpack.c.bf16 %v4723_v35, %v4723_v35 }
0x1137   :  { %12976 = vmatmul.mubr.msk.bf16.gmra.mrb[192].mxu0 %vm120_vm0, %v4731_v36 }
0x11fa   :  { %v4787_v12 = vpop.f32.mrb[184].mxu0 }
0x11fb   :  { %v12969_v42 = vpop.f32.mrb[185].mxu0 }
0x11fc   :  { %v4790_v15 = vpop.f32.mrb[186].mxu0 }
0x11fd   :  { %v13890_v8 = vpack.c.bf16 %v4790_v15, %v4787_v12  ;;  %v12970_v1 = vpop.f32.mrb[187].mxu0 }
0x11ff   :  { %13891 = vmatpush3.bf16.msra.mxu1 %v13890_v8 }
0x1200   :  { %13892 = vmatprep.subr.bf16.mxu1 %v14495_v18 }
0x1202   :  { %v4795_v43 = vpop.f32.mrb[188].mxu0 }
0x1203   :  { %v12973_v45 = vpop.f32.mrb[189].mxu0 }
0x1204   :  { %v4798_v28 = vpop.f32.mrb[190].mxu0 }
0x1205   :  { %v13893_v17 = vpack.c.bf16 %v4798_v28, %v4795_v43  ;;  %v12974_v19 = vpop.f32.mrb[191].mxu0 }
0x1207   :  { %13894 = vmatpush3.bf16.msra.mxu1 %v13893_v17 }
0x1208   :  { %12987 = vmatprep.subr.mxu1 %v14494_v6 }
0x120a   :  { %v4803_v24 = vpop.f32.mrb[192].mxu0 }
0x120b   :  { %12988 = vmatpush3.msra.mxu1 %v4803_v24  ;;  %v12977_v39 = vpop.f32.mrb[193].mxu0 }
0x120c   :  { %12990 = vmatmul.mubr.msk.f32.vlgmr.msra.gmra.mrb[192].mxu1 %vm396_vm3, %v15807_v40  ;;  %v4806_v37 = vpop.f32.mrb[194].mxu0  ;;  %12998 = vmatprep.subr.bf16.mxu1 %v14087_v16 }
0x120d   :  { %12992 = vmatprep.mubr.msk.f32.mxu1 %vm14493_vm1, %v14494_v6  ;;  %v12978_v47 = vpop.f32.mrb[195].mxu0  ;;  %12999 = vmatpush3.bf16.msra.mxu1 %v14087_v16 }
0x120e   :  { %13000 = vmatprep.subr.bf16.mxu1 %v14089_v51 }
0x1210   :  { %12993 = vmatmul.mubr.msk.f32.gmra.mrb[194].mxu1 %vm396_vm3, %v15816_v11 }
0x1211   :  { %12995 = vmatprep.mubr.msk.f32.mxu1 %vm14493_vm1, %v14494_v6  ;;  %13001 = vmatpush3.bf16.msra.mxu1 %v14089_v51 }
0x1212   :  { %13014 = vmatprep.subr.bf16.mxu1 %v14091_v34 }
0x1214   :  { %12996 = vmatmul.mubr.msk.f32.gmra.mrb[196].mxu1 %vm396_vm3, %v15825_v49 }
0x1215   :  { %13002 = vmatprep.mubr.msk.bf16.mxu1 %vm120_vm0, %v14626_v4  ;;  %v14090_v4 = vld [vmem:[%s17297_s12 + $0x108] sm:$0xff]  }
0x1216   :  { %13008 = vmatprep.subr.bf16.mxu0 %v14090_v4 }
0x1217   :  { %13009 = vmatpush3.bf16.msra.mxu0 %v14090_v4 }
0x1218   :  { %13003 = vmatmul.mubr.msk.bf16.vlgmr.msra.gmra.mrb[200].mxu1 %vm120_vm0, %v14635_v7  ;;  %13895 = vmatprep.subr.bf16.mxu0 %v14495_v18 }
0x1219   :  { %13015 = vmatpush3.bf16.msra.mxu1 %v14091_v34 }
0x121a   :  { %13016 = vmatprep.subr.bf16.mxu1 %v14092_v50 }
0x121d   :  { %13017 = vmatpush3.bf16.msra.mxu1 %v14092_v50 }
0x121e   :  { %13043 = vmatprep.subr.bf16.mxu1 %v14494_v6 }
0x12df   :  { %v4883_v52 = vpop.f32.mrb[192].mxu1 }
0x12e0   :  { %v4884_v22 = vadd.f32 %v11044_v44, %v4883_v52  ;;  %v12991_v30 = vpop.f32.mrb[193].mxu1 }
0x12e2   :  { %v4900_v23 = vmul.f32 0.1, %v4884_v22  ;;  %vm4897_vm14 = vcmp.ge.f32.partialorder %v4884_v22, 0.0 }
0x12e3   :  { %v4888_v41 = vpop.f32.mrb[194].mxu1 }
0x12e4   :  { %v4889_v26 = vadd.f32 %v11044_v44, %v4888_v41  ;;  %v12994_v53 = vpop.f32.mrb[195].mxu1  ;;  %v4903_v60 = vsel %vm4897_vm14, %v4884_v22, %v4900_v23 }
0x12e6   :  { %vm4898_vm15 = vcmp.ge.f32.partialorder %v4889_v26, 0.0  ;;  %v4901_v56 = vmul.f32 0.1, %v4889_v26 }
0x12e7   :  { %v4893_v58 = vpop.f32.mrb[196].mxu1 }
0x12e8   :  { %v4904_v63 = vsel %vm4898_vm15, %v4889_v26, %v4901_v56  ;;  %v4894_v7 = vadd.f32 %v11044_v44, %v4893_v58  ;;  %v12997_v54 = vpop.f32.mrb[197].mxu1 }
0x12e9   :  { %v4915_v55 = vpack.c.bf16 %v4904_v63, %v4903_v60  ;;  %v14095_v60 = vld [vmem:[%s17295_s10 + $0x140] sm:$0xff]  }
0x12ea   :  { %vm4899_vm4 = vcmp.ge.f32.partialorder %v4894_v7, 0.0  ;;  %v4902_v46 = vmul.f32 0.1, %v4894_v7 }
0x12eb   :  { %13010 = vmatprep.mubr.msk.bf16.mxu0 %vm120_vm0, %v4915_v55  ;;  %v13004_v57 = vpop.f32.mrb[200].mxu1 }
0x12ec   :  { %v4905_v2 = vsel %vm4899_vm4, %v4894_v7, %v4902_v46  ;;  %v4963_v29 = vpop.f32.mrb[201].mxu1 }
0x12ed   :  { %v4916_v61 = vpack.c.bf16 %v4905_v2, %v4905_v2  ;;  %v13005_v3 = vpop.f32.mrb[202].mxu1  ;;  %v14096_v2 = vld [vmem:[%s17295_s10 + $0x148] sm:$0xff]  }
0x12ee   :  { %v4966_v25 = vpop.f32.mrb[203].mxu1 }
0x12ef   :  { %13011 = vmatmul.mubr.msk.bf16.vlgmr.msra.gmra.mrb[196].mxu0 %vm120_vm0, %v4916_v61 }
0x12f0   :  { %13028 = vmatprep.mubr.msk.f32.mxu0 %vm14493_vm1, %v14494_v6 }
0x13c2   :  { %v13012_v33 = vpop.f32.mrb[196].mxu0 }
0x13c3   :  { %v5038_v35 = vadd.f32 %v13012_v33, %v13004_v57  ;;  %v5029_v36 = vpop.f32.mrb[197].mxu0 }
0x13c4   :  { %v5030_v12 = vadd.f32 %v5029_v36, %v4963_v29  ;;  %v13013_v42 = vpop.f32.mrb[198].mxu0 }
0x13c5   :  { %v5053_v15 = vadd.f32 %v11065_v38, %v5038_v35  ;;  %v5032_v8 = vpop.f32.mrb[199].mxu0 }
0x13c6   :  { %v5051_v1 = vadd.f32 %v11065_v38, %v5030_v12  ;;  %v5033_v43 = vadd.f32 %v5032_v8, %v4966_v25 }
0x13c7   :  { %v5056_v28 = vmax.f32 %v5053_v15, 0.0 }
0x13c8   :  { %v5052_v45 = vadd.f32 %v11065_v38, %v5033_v43  ;;  %v5054_v17 = vmax.f32 %v5051_v1, 0.0 }
0x13c9   :  { %v15865_v39 = vpack.c.bf16 %v5056_v28, %v5056_v28 }
0x13ca   :  { %v5055_v19 = vmax.f32 %v5052_v45, 0.0 }
0x13cc   :  { %v15863_v24 = vpack.c.bf16 %v5055_v19, %v5054_v17 }
0x13ce   :  { %13018 = vmatprep.mubr.msk.bf16.mxu1 %vm120_vm0, %v15863_v24 }
0x13cf   :  { %13019 = vmatmul.mubr.msk.bf16.vlgmr.msra.gmra.mrb[204].mxu1 %vm120_vm0, %v15865_v39 }
0x13d0   :  { %13047 = vmatprep.mubr.msk.bf16.mxu1 %vm14493_vm1, %v14494_v6 }
0x14a2   :  { %v13020_v37 = vpop.f32.mrb[204].mxu1 }
0x14a3   :  { %v5116_v47 = vpop.f32.mrb[205].mxu1 }
0x14a4   :  { %v13021_v16 = vpop.f32.mrb[206].mxu1 }
0x14a5   :  { %v5119_v20 = vpop.f32.mrb[207].mxu1 }
0x14a6   :  { %v13896_v51 = vpack.c.bf16 %v5119_v20, %v5116_v47 }
0x14a8   :  { %13897 = vmatpush3.bf16.msra.mxu0 %v13896_v51 }
0x14a9   :  { %13026 = vmatprep.subr.mxu0 %v14494_v6 }
0x14ac   :  { %13027 = vmatpush3.msra.mxu0 %v13020_v37 }
0x14ad   :  { %13029 = vmatmul.mubr.msk.f32.vlgmr.msra.gmra.mrb[110].mxu0 %vm182_vm2, %v15702_v14  ;;  %13898 = vmatprep.subr.bf16.mxu0 %v14495_v18  ;;  %v14093_v14 = vld [vmem:[%s17295_s10 + $0x130] sm:$0xff]  }
0x14ae   :  { %13031 = vmatprep.mubr.msk.f32.mxu0 %vm14493_vm1, %v14494_v6  ;;  %13044 = vmatpush3.bf16.msra.mxu1 %v14093_v14 }
0x14af   :  { %13045 = vmatprep.subr.bf16.mxu1 %v14494_v6 }
0x14b1   :  { %13032 = vmatmul.mubr.msk.f32.gmra.mrb[200].mxu0 %vm182_vm2, %v15712_v10  ;;  %v14094_v10 = vld [vmem:[%s17295_s10 + $0x138] sm:$0xff]  }
0x14b2   :  { %13034 = vmatprep.mubr.msk.f32.mxu0 %vm14493_vm1, %v14494_v6  ;;  %13046 = vmatpush3.bf16.msra.mxu1 %v14094_v10 }
0x14b3   :  { %13078 = vmatprep.subr.bf16.mxu1 %v14494_v6 }
0x14b5   :  { %13035 = vmatmul.mubr.msk.f32.gmra.mrb[202].mxu0 %vm182_vm2, %v15721_v13  ;;  %v11075_v13 = vld [vmem:[%s17296_s11 + $0x12] ss:$0 sm:$0xff] }
0x14b6   :  { %13037 = vmatprep.mubr.msk.f32.mxu0 %vm14493_vm1, %v14494_v6 }
0x14b9   :  { %13038 = vmatmul.mubr.msk.f32.gmra.mrb[204].mxu0 %vm182_vm2, %v15730_v59 }
0x14ba   :  { %13040 = vmatprep.mubr.msk.f32.mxu0 %vm14493_vm1, %v14494_v6 }
0x14bd   :  { %13041 = vmatmul.mubr.msk.f32.gmra.mrb[206].mxu0 %vm182_vm2, %v15739_v5 }
0x14be   :  { %13069 = vmatprep.mubr.msk.f32.mxu0 %vm14493_vm1, %v14494_v6 }
0x1580   :  { %v5204_v59 = vpop.f32.mrb[110].mxu0 }
0x1581   :  { %v5205_v5 = vadd.f32 %v11075_v13, %v5204_v59  ;;  %v13030_v4 = vpop.f32.mrb[111].mxu0 }
0x1583   :  { %v5233_v52 = vmul.f32 0.1, %v5205_v5  ;;  %vm5228_vm5 = vcmp.ge.f32.partialorder %v5205_v5, 0.0 }
0x1584   :  { %v5209_v44 = vpop.f32.mrb[200].mxu0 }
0x1585   :  { %v5210_v22 = vadd.f32 %v11075_v13, %v5209_v44  ;;  %v13033_v30 = vpop.f32.mrb[201].mxu0  ;;  %v5238_v26 = vsel %vm5228_vm5, %v5205_v5, %v5233_v52 }
0x1587   :  { %vm5229_vm6 = vcmp.ge.f32.partialorder %v5210_v22, 0.0  ;;  %v5234_v41 = vmul.f32 0.1, %v5210_v22 }
0x1588   :  { %v5214_v23 = vpop.f32.mrb[202].mxu0 }
0x1589   :  { %v5239_v53 = vsel %vm5229_vm6, %v5210_v22, %v5234_v41  ;;  %v5215_v56 = vadd.f32 %v11075_v13, %v5214_v23  ;;  %v13036_v58 = vpop.f32.mrb[203].mxu0  ;;  %v14097_v22 = vld [vmem:[%s17297_s12 + $0x130] sm:$0xff]   ;;  %v14098_v41 = vld [vmem:[%s17297_s12 + $0x138] sm:$0xff]  }
0x158a   :  { %v5248_v63 = vpack.c.bf16 %v5239_v53, %v5238_v26  ;;  %v14104_v58 = vld [vmem:[%s17297_s12 + $0x128] sm:$0xff]  }
0x158b   :  { %v5235_v54 = vmul.f32 0.1, %v5215_v56  ;;  %vm5230_vm7 = vcmp.ge.f32.partialorder %v5215_v56, 0.0 }
0x158c   :  { %v5219_v7 = vpop.f32.mrb[204].mxu0  ;;  %13048 = vmatmul.mubr.msk.bf16.vlgmr.msra.gmra.mrb[208].mxu1 %vm120_vm0, %v5248_v63 }
0x158d   :  { %v5220_v55 = vadd.f32 %v11075_v13, %v5219_v7  ;;  %v13039_v46 = vpop.f32.mrb[205].mxu0  ;;  %13051 = vmatprep.mubr.msk.bf16.mxu1 %vm14493_vm1, %v14494_v6  ;;  %13079 = vmatpush3.bf16.msra.mxu1 %v14095_v60  ;;  %v5240_v29 = vsel %vm5230_vm7, %v5215_v56, %v5235_v54  ;;  %v14099_v56 = vld [vmem:[%s17297_s12 + $0x150] sm:$0xff]  }
0x158e   :  { %13080 = vmatprep.subr.bf16.mxu1 %v14494_v6  ;;  %v11091_v60 = vld [vmem:[%s17296_s11 + $0x13] ss:$0 sm:$0xff] }
0x158f   :  { %vm5231_vm8 = vcmp.ge.f32.partialorder %v5220_v55, 0.0  ;;  %v5236_v61 = vmul.f32 0.1, %v5220_v55 }
0x1590   :  { %v5224_v57 = vpop.f32.mrb[206].mxu0 }
0x1591   :  { %v5241_v3 = vsel %vm5231_vm8, %v5220_v55, %v5236_v61  ;;  %v5225_v25 = vadd.f32 %v11075_v13, %v5224_v57  ;;  %v13042_v34 = vpop.f32.mrb[207].mxu0  ;;  %13081 = vmatpush3.bf16.msra.mxu1 %v14096_v2 }
0x1592   :  { %v5249_v50 = vpack.c.bf16 %v5241_v3, %v5240_v29 }
0x1593   :  { %v5237_v33 = vmul.f32 0.1, %v5225_v25  ;;  %vm5232_vm9 = vcmp.ge.f32.partialorder %v5225_v25, 0.0 }
0x1594   :  { %13052 = vmatmul.mubr.msk.bf16.gmra.mrb[212].mxu1 %vm120_vm0, %v5249_v50 }
0x1595   :  { %13055 = vmatprep.mubr.msk.bf16.mxu1 %vm14493_vm1, %v14494_v6  ;;  %v5242_v38 = vsel %vm5232_vm9, %v5225_v25, %v5237_v33 }
0x1596   :  { %v5250_v35 = vpack.c.bf16 %v5242_v38, %v5242_v38 }
0x159c   :  { %13056 = vmatmul.mubr.msk.bf16.gmra.mrb[216].mxu1 %vm120_vm0, %v5250_v35 }
0x159d   :  { %13082 = vmatprep.mubr.msk.bf16.mxu1 %vm14493_vm1, %v14494_v6 }
0x15a4   :  { %13083 = vmatmul.mubr.msk.bf16.vlgmr.msra.gmra.mrb[220].mxu1 %vm120_vm0, %v5248_v63 }
0x15a5   :  { %13086 = vmatprep.mubr.msk.bf16.mxu1 %vm14493_vm1, %v14494_v6 }
0x15ac   :  { %13087 = vmatmul.mubr.msk.bf16.gmra.mrb[224].mxu1 %vm120_vm0, %v5249_v50 }
0x15ad   :  { %13090 = vmatprep.mubr.msk.bf16.mxu1 %vm14493_vm1, %v14494_v6 }
0x15b4   :  { %13091 = vmatmul.mubr.msk.bf16.gmra.mrb[228].mxu1 %vm120_vm0, %v5250_v35 }
0x165f   :  { %v5306_v36 = vpop.f32.mrb[208].mxu1 }
0x1660   :  { %v13049_v12 = vpop.f32.mrb[209].mxu1 }
0x1661   :  { %v5309_v42 = vpop.f32.mrb[210].mxu1  ;;  %v14106_v12 = vld [vmem:[%s17297_s12 + $0x148] sm:$0xff]  }
0x1662   :  { %v13899_v15 = vpack.c.bf16 %v5309_v42, %v5306_v36  ;;  %v13050_v8 = vpop.f32.mrb[211].mxu1  ;;  %v11105_v42 = vld [vmem:[%s17296_s11 + $0x14] ss:$0 sm:$0xff] }
0x1664   :  { %13900 = vmatpush3.bf16.msra.mxu0 %v13899_v15 }
0x1665   :  { %13901 = vmatprep.subr.bf16.mxu0 %v14495_v18 }
0x1667   :  { %v5314_v1 = vpop.f32.mrb[212].mxu1 }
0x1668   :  { %v13053_v43 = vpop.f32.mrb[213].mxu1 }
0x1669   :  { %v5317_v45 = vpop.f32.mrb[214].mxu1 }
0x166a   :  { %v13902_v28 = vpack.c.bf16 %v5317_v45, %v5314_v1  ;;  %v13054_v17 = vpop.f32.mrb[215].mxu1 }
0x166c   :  { %13903 = vmatpush3.bf16.msra.mxu0 %v13902_v28 }
0x166d   :  { %13067 = vmatprep.subr.mxu0 %v14494_v6 }
0x166f   :  { %v5322_v19 = vpop.f32.mrb[216].mxu1 }
0x1670   :  { %13068 = vmatpush3.msra.mxu0 %v5322_v19  ;;  %v13057_v37 = vpop.f32.mrb[217].mxu1 }
0x1671   :  { %13070 = vmatmul.mubr.msk.f32.vlgmr.msra.gmra.mrb[208].mxu0 %vm396_vm3, %v15807_v40  ;;  %v5325_v47 = vpop.f32.mrb[218].mxu1  ;;  %13904 = vmatprep.subr.bf16.mxu0 %v14495_v18 }
0x1672   :  { %13072 = vmatprep.mubr.msk.f32.mxu0 %vm14493_vm1, %v14494_v6  ;;  %v13058_v16 = vpop.f32.mrb[219].mxu1 }
0x1675   :  { %13073 = vmatmul.mubr.msk.f32.gmra.mrb[210].mxu0 %vm396_vm3, %v15816_v11 }
0x1676   :  { %13075 = vmatprep.mubr.msk.f32.mxu0 %vm14493_vm1, %v14494_v6 }
0x1677   :  { %v5476_v20 = vpop.f32.mrb[220].mxu1 }
0x1678   :  { %v13084_v51 = vpop.f32.mrb[221].mxu1 }
0x1679   :  { %13076 = vmatmul.mubr.msk.f32.gmra.mrb[212].mxu0 %vm396_vm3, %v15825_v49  ;;  %v5479_v14 = vpop.f32.mrb[222].mxu1 }
0x167a   :  { %v13905_v10 = vpack.c.bf16 %v5479_v14, %v5476_v20  ;;  %v13085_v13 = vpop.f32.mrb[223].mxu1  ;;  %13104 = vmatprep.mubr.msk.f32.mxu0 %vm14493_vm1, %v14494_v6 }
0x167c   :  { %13906 = vmatpush3.bf16.msra.mxu0 %v13905_v10 }
0x167d   :  { %13907 = vmatprep.subr.bf16.mxu0 %v14495_v18 }
0x167f   :  { %v5484_v59 = vpop.f32.mrb[224].mxu1 }
0x1680   :  { %v13088_v5 = vpop.f32.mrb[225].mxu1 }
0x1681   :  { %v5487_v4 = vpop.f32.mrb[226].mxu1 }
0x1682   :  { %v13908_v44 = vpack.c.bf16 %v5487_v4, %v5484_v59  ;;  %v13089_v52 = vpop.f32.mrb[227].mxu1 }
0x1684   :  { %13909 = vmatpush3.bf16.msra.mxu0 %v13908_v44 }
0x1685   :  { %13102 = vmatprep.subr.mxu0 %v14494_v6 }
0x1687   :  { %v5492_v30 = vpop.f32.mrb[228].mxu1 }
0x1688   :  { %v13092_v23 = vpop.f32.mrb[229].mxu1  ;;  %13103 = vmatpush3.msra.mxu0 %v5492_v30 }
0x1689   :  { %v5495_v26 = vpop.f32.mrb[230].mxu1  ;;  %13105 = vmatmul.mubr.msk.f32.vlgmr.msra.gmra.mrb[214].mxu0 %vm396_vm3, %v15807_v40  ;;  %13113 = vmatprep.subr.bf16.mxu0 %v14097_v22  ;;  %v14100_v40 = vld [vmem:[%s17297_s12 + $0x158] sm:$0xff]  }
0x168a   :  { %v13093_v53 = vpop.f32.mrb[231].mxu1  ;;  %13107 = vmatprep.mubr.msk.f32.mxu0 %vm14493_vm1, %v14494_v6  ;;  %13114 = vmatpush3.bf16.msra.mxu0 %v14097_v22 }
0x168b   :  { %13115 = vmatprep.subr.bf16.mxu0 %v14098_v41 }
0x168d   :  { %13108 = vmatmul.mubr.msk.f32.gmra.mrb[216].mxu0 %vm396_vm3, %v15816_v11  ;;  %v14101_v11 = vld [vmem:[%s17295_s10 + $0x150] sm:$0xff]  }
0x168e   :  { %13110 = vmatprep.mubr.msk.f32.mxu0 %vm14493_vm1, %v14494_v6  ;;  %13116 = vmatpush3.bf16.msra.mxu0 %v14098_v41 }
0x168f   :  { %13129 = vmatprep.subr.bf16.mxu0 %v14099_v56 }
0x1691   :  { %13111 = vmatmul.mubr.msk.f32.gmra.mrb[218].mxu0 %vm396_vm3, %v15825_v49  ;;  %v14102_v49 = vld [vmem:[%s17295_s10 + $0x158] sm:$0xff]  }
0x1692   :  { %13117 = vmatprep.mubr.msk.bf16.mxu0 %vm120_vm0, %v15863_v24 }
0x1695   :  { %13118 = vmatmul.mubr.msk.bf16.vlgmr.msra.gmra.mrb[220].mxu0 %vm120_vm0, %v15865_v39 }
0x1696   :  { %13130 = vmatpush3.bf16.msra.mxu0 %v14099_v56  ;;  %13133 = vmatprep.mubr.msk.bf16.mxu0 %vm120_vm0, %v15863_v24  ;;  %v14103_v24 = vld [vmem:[%s17297_s12 + $0x120] sm:$0xff]  }
0x1697   :  { %13131 = vmatprep.subr.bf16.mxu0 %v14100_v40  ;;  %13121 = vmatprep.subr.bf16.mxu1 %v14103_v24 }
0x1698   :  { %13122 = vmatpush3.bf16.msra.mxu1 %v14103_v24  ;;  %v16024_v24 = vld [vmem:[%s17323_s25 + $0x8] sm:$0xff] }
0x1699   :  { %13123 = vmatprep.subr.bf16.mxu1 %v14104_v58 }
0x169a   :  { %13132 = vmatpush3.bf16.msra.mxu0 %v14100_v40 }
0x169b   :  { %13145 = vmatprep.subr.bf16.mxu0 %v14101_v11 }
0x169c   :  { %13124 = vmatpush3.bf16.msra.mxu1 %v14104_v58  ;;  %v16033_v58 = vld [vmem:[%s17323_s25 + $0x10] sm:$0xff] }
0x169d   :  { %13134 = vmatmul.mubr.msk.bf16.vlgmr.msra.gmra.mrb[224].mxu0 %vm120_vm0, %v15865_v39  ;;  %v14105_v39 = vld [vmem:[%s17297_s12 + $0x140] sm:$0xff]  }
0x169e   :  { %13146 = vmatpush3.bf16.msra.mxu0 %v14101_v11  ;;  %13149 = vmatprep.mubr.msk.bf16.mxu0 %vm120_vm0, %v15111_v27 }
0x169f   :  { %13147 = vmatprep.subr.bf16.mxu0 %v14102_v49  ;;  %13137 = vmatprep.subr.bf16.mxu1 %v14105_v39 }
0x16a2   :  { %13148 = vmatpush3.bf16.msra.mxu0 %v14102_v49  ;;  %v16015_v49 = vld [vmem:[%s17323_s25] sm:$0xff] }
0x16a5   :  { %13150 = vmatmul.mubr.msk.bf16.vlgmr.msra.gmra.mrb[228].mxu0 %vm120_vm0, %v15132_v48 }
0x1744   :  { %v5402_v63 = vpop.f32.mrb[208].mxu0 }
0x1745   :  { %v5403_v7 = vadd.f32 %v11091_v60, %v5402_v63  ;;  %v13071_v54 = vpop.f32.mrb[209].mxu0  ;;  %v16060_v63 = vld [vmem:[%s17323_s25 + $0x28] sm:$0xff] }
0x1746   :  { %v14107_v54 = vld [vmem:[%s17295_s10 + $0x160] sm:$0xff]  }
0x1747   :  { %v5419_v55 = vmul.f32 0.1, %v5403_v7  ;;  %vm5416_vm10 = vcmp.ge.f32.partialorder %v5403_v7, 0.0  ;;  %13180 = vmatprep.subr.bf16.mxu0 %v14107_v54 }
0x1748   :  { %v5407_v46 = vpop.f32.mrb[210].mxu0  ;;  %13181 = vmatpush3.bf16.msra.mxu0 %v14107_v54 }
0x1749   :  { %v5408_v2 = vadd.f32 %v11091_v60, %v5407_v46  ;;  %v13074_v61 = vpop.f32.mrb[211].mxu0  ;;  %v5422_v57 = vsel %vm5416_vm10, %v5403_v7, %v5419_v55  ;;  %v16069_v7 = vld [vmem:[%s17323_s25 + $0x30] sm:$0xff]  ;;  %v14108_v55 = vld [vmem:[%s17295_s10 + $0x168] sm:$0xff]  }
0x174a   :  { %13182 = vmatprep.subr.bf16.mxu0 %v14108_v55 }
0x174b   :  { %vm5417_vm11 = vcmp.ge.f32.partialorder %v5408_v2, 0.0  ;;  %v5420_v29 = vmul.f32 0.1, %v5408_v2 }
0x174c   :  { %v5412_v3 = vpop.f32.mrb[212].mxu0  ;;  %13183 = vmatpush3.bf16.msra.mxu0 %v14108_v55 }
0x174d   :  { %v5423_v25 = vsel %vm5417_vm11, %v5408_v2, %v5420_v29  ;;  %v5413_v34 = vadd.f32 %v11091_v60, %v5412_v3  ;;  %v13077_v50 = vpop.f32.mrb[213].mxu0  ;;  %v16051_v60 = vld [vmem:[%s17323_s25 + $0x20] sm:$0xff]  ;;  %13913 = vmatprep.subr.bf16.mxu0 %v14495_v18 }
0x174e   :  { %v5604_v33 = vpack.c.bf16 %v5423_v25, %v5422_v57 }
0x174f   :  { %vm5418_vm13 = vcmp.ge.f32.partialorder %v5413_v34, 0.0  ;;  %v5421_v38 = vmul.f32 0.1, %v5413_v34 }
0x1750   :  { %13125 = vmatprep.mubr.msk.bf16.mxu1 %vm120_vm0, %v5604_v33 }
0x1751   :  { %v5424_v35 = vsel %vm5418_vm13, %v5413_v34, %v5421_v38 }
0x1752   :  { %v5605_v36 = vpack.c.bf16 %v5424_v35, %v5424_v35 }
0x1754   :  { %13126 = vmatmul.mubr.msk.bf16.vlgmr.msra.gmra.mrb[232].mxu1 %vm120_vm0, %v5605_v36 }
0x1755   :  { %13138 = vmatpush3.bf16.msra.mxu1 %v14105_v39  ;;  %v16042_v39 = vld [vmem:[%s17323_s25 + $0x18] sm:$0xff] }
0x1756   :  { %13139 = vmatprep.subr.bf16.mxu1 %v14106_v12 }
0x1759   :  { %13140 = vmatpush3.bf16.msra.mxu1 %v14106_v12  ;;  %v11154_v12 = vld [vmem:[%s17296_s11 + $0x15] ss:$0 sm:$0xff] }
0x175a   :  { %13910 = vmatprep.subr.bf16.mxu1 %v14495_v18 }
0x175c   :  { %v5572_v15 = vpop.f32.mrb[214].mxu0 }
0x175d   :  { %v5573_v8 = vadd.f32 %v11105_v42, %v5572_v15  ;;  %v13106_v1 = vpop.f32.mrb[215].mxu0 }
0x175f   :  { %v5589_v45 = vmul.f32 0.1, %v5573_v8  ;;  %vm5586_vm14 = vcmp.ge.f32.partialorder %v5573_v8, 0.0 }
0x1760   :  { %v5577_v43 = vpop.f32.mrb[216].mxu0 }
0x1761   :  { %v5578_v28 = vadd.f32 %v11105_v42, %v5577_v43  ;;  %v13109_v17 = vpop.f32.mrb[217].mxu0  ;;  %v5592_v47 = vsel %vm5586_vm14, %v5573_v8, %v5589_v45 }
0x1763   :  { %vm5587_vm15 = vcmp.ge.f32.partialorder %v5578_v28, 0.0  ;;  %v5590_v19 = vmul.f32 0.1, %v5578_v28 }
0x1764   :  { %v5582_v37 = vpop.f32.mrb[218].mxu0 }
0x1765   :  { %v5593_v16 = vsel %vm5587_vm15, %v5578_v28, %v5590_v19  ;;  %v5583_v20 = vadd.f32 %v11105_v42, %v5582_v37  ;;  %v13112_v51 = vpop.f32.mrb[219].mxu0 }
0x1766   :  { %v5752_v14 = vpack.c.bf16 %v5593_v16, %v5592_v47 }
0x1767   :  { %vm5588_vm4 = vcmp.ge.f32.partialorder %v5583_v20, 0.0  ;;  %v5591_v10 = vmul.f32 0.1, %v5583_v20 }
0x1768   :  { %v13119_v13 = vpop.f32.mrb[220].mxu0  ;;  %13141 = vmatprep.mubr.msk.bf16.mxu1 %vm120_vm0, %v5752_v14 }
0x1769   :  { %v5594_v59 = vsel %vm5588_vm4, %v5583_v20, %v5591_v10  ;;  %v5652_v5 = vpop.f32.mrb[221].mxu0 }
0x176a   :  { %v5753_v4 = vpack.c.bf16 %v5594_v59, %v5594_v59  ;;  %v13120_v44 = vpop.f32.mrb[222].mxu0 }
0x176b   :  { %v5655_v52 = vpop.f32.mrb[223].mxu0 }
0x176c   :  { %13142 = vmatmul.mubr.msk.bf16.vlgmr.msra.gmra.mrb[236].mxu1 %vm120_vm0, %v5753_v4 }
0x176d   :  { %13159 = vmatprep.mubr.msk.f32.mxu1 %vm14493_vm1, %v14494_v6 }
0x1770   :  { %v13135_v22 = vpop.f32.mrb[224].mxu0 }
0x1771   :  { %v5800_v30 = vpop.f32.mrb[225].mxu0 }
0x1772   :  { %v13136_v41 = vpop.f32.mrb[226].mxu0 }
0x1773   :  { %v5803_v23 = vpop.f32.mrb[227].mxu0 }
0x1778   :  { %v13151_v26 = vpop.f32.mrb[228].mxu0 }
0x1779   :  { %v5942_v53 = vpop.f32.mrb[229].mxu0 }
0x177a   :  { %v13152_v56 = vpop.f32.mrb[230].mxu0 }
0x177b   :  { %v5945_v40 = vpop.f32.mrb[231].mxu0 }
0x177c   :  { %v13911_v11 = vpack.c.bf16 %v5945_v40, %v5942_v53 }
0x177e   :  { %13912 = vmatpush3.bf16.msra.mxu1 %v13911_v11 }
0x177f   :  { %13157 = vmatprep.subr.mxu1 %v14494_v6 }
0x1782   :  { %13158 = vmatpush3.msra.mxu1 %v13151_v26 }
0x1783   :  { %13160 = vmatmul.mubr.msk.f32.vlgmr.msra.gmra.mrb[198].mxu1 %vm182_vm2, %v16015_v49 }
0x1784   :  { %13162 = vmatprep.mubr.msk.f32.mxu1 %vm14493_vm1, %v14494_v6 }
0x1787   :  { %13163 = vmatmul.mubr.msk.f32.gmra.mrb[240].mxu1 %vm182_vm2, %v16024_v24 }
0x1788   :  { %13165 = vmatprep.mubr.msk.f32.mxu1 %vm14493_vm1, %v14494_v6 }
0x178b   :  { %13166 = vmatmul.mubr.msk.f32.gmra.mrb[242].mxu1 %vm182_vm2, %v16033_v58 }
0x178c   :  { %13168 = vmatprep.mubr.msk.f32.mxu1 %vm14493_vm1, %v14494_v6 }
0x178f   :  { %13169 = vmatmul.mubr.msk.f32.gmra.mrb[244].mxu1 %vm182_vm2, %v16042_v39 }
0x1790   :  { %13171 = vmatprep.mubr.msk.f32.mxu1 %vm14493_vm1, %v14494_v6 }
0x1793   :  { %13172 = vmatmul.mubr.msk.f32.gmra.mrb[246].mxu1 %vm182_vm2, %v16051_v60 }
0x1794   :  { %13174 = vmatprep.mubr.msk.f32.mxu1 %vm14493_vm1, %v14494_v6 }
0x1797   :  { %13175 = vmatmul.mubr.msk.f32.gmra.mrb[248].mxu1 %vm182_vm2, %v16060_v63 }
0x1798   :  { %13177 = vmatprep.mubr.msk.f32.mxu1 %vm14493_vm1, %v14494_v6 }
0x179b   :  { %13178 = vmatmul.mubr.msk.f32.gmra.mrb[250].mxu1 %vm182_vm2, %v16069_v7 }
0x179c   :  { %13219 = vmatprep.mubr.msk.bf16.mxu1 %vm120_vm0, %v15111_v27 }
0x1827   :  { %v13127_v46 = vpop.f32.mrb[232].mxu1 }
0x1828   :  { %v16082_v2 = vadd.f32 %v13127_v46, %v13119_v13  ;;  %v5718_v61 = vpop.f32.mrb[233].mxu1 }
0x1829   :  { %v16084_v57 = vadd.f32 %v5718_v61, %v5652_v5  ;;  %v13128_v27 = vpop.f32.mrb[234].mxu1 }
0x182a   :  { %v5721_v29 = vpop.f32.mrb[235].mxu1 }
0x182b   :  { %v16086_v3 = vadd.f32 %v5721_v29, %v5655_v52 }
0x183f   :  { %v13143_v25 = vpop.f32.mrb[236].mxu1 }
0x1840   :  { %v16088_v34 = vadd.f32 %v13143_v25, %v13135_v22  ;;  %v5866_v50 = vpop.f32.mrb[237].mxu1 }
0x1841   :  { %v16090_v33 = vadd.f32 %v5866_v50, %v5800_v30  ;;  %v13144_v38 = vpop.f32.mrb[238].mxu1 }
0x1842   :  { %v5869_v35 = vpop.f32.mrb[239].mxu1 }
0x1843   :  { %v16092_v36 = vadd.f32 %v5869_v35, %v5803_v23 }
0x1856   :  { %v6030_v42 = vpop.f32.mrb[198].mxu1 }
0x1857   :  { %v6031_v15 = vadd.f32 %v11154_v12, %v6030_v42  ;;  %v13161_v8 = vpop.f32.mrb[199].mxu1 }
0x1859   :  { %v6071_v43 = vmul.f32 0.1, %v6031_v15  ;;  %vm6064_vm5 = vcmp.ge.f32.partialorder %v6031_v15, 0.0 }
0x185a   :  { %v6035_v1 = vpop.f32.mrb[240].mxu1 }
0x185b   :  { %v6036_v45 = vadd.f32 %v11154_v12, %v6035_v1  ;;  %v13164_v28 = vpop.f32.mrb[241].mxu1  ;;  %v6078_v37 = vsel %vm6064_vm5, %v6031_v15, %v6071_v43 }
0x185d   :  { %vm6065_vm6 = vcmp.ge.f32.partialorder %v6036_v45, 0.0  ;;  %v6072_v17 = vmul.f32 0.1, %v6036_v45 }
0x185e   :  { %v6040_v19 = vpop.f32.mrb[242].mxu1 }
0x185f   :  { %v6079_v47 = vsel %vm6065_vm6, %v6036_v45, %v6072_v17  ;;  %v6041_v16 = vadd.f32 %v11154_v12, %v6040_v19  ;;  %v13167_v20 = vpop.f32.mrb[243].mxu1  ;;  %v16109_v19 = vld [vmem:[%s17324_s7] sm:$0xff] }
0x1860   :  { %v6090_v51 = vpack.c.bf16 %v6079_v47, %v6078_v37  ;;  %v16118_v37 = vld [vmem:[%s17324_s7 + $0x8] sm:$0xff]  ;;  %v16127_v47 = vld [vmem:[%s17324_s7 + $0x10] sm:$0xff]  ;;  %v14110_v20 = vld [vmem:[%s17297_s12 + $0x160] sm:$0xff]  }
0x1861   :  { %v6073_v10 = vmul.f32 0.1, %v6041_v16  ;;  %vm6066_vm7 = vcmp.ge.f32.partialorder %v6041_v16, 0.0 }
0x1862   :  { %v6045_v14 = vpop.f32.mrb[244].mxu1  ;;  %13184 = vmatprep.mubr.msk.bf16.mxu0 %vm120_vm0, %v6090_v51  ;;  %v14111_v51 = vld [vmem:[%s17297_s12 + $0x178] sm:$0xff]  }
0x1863   :  { %v6046_v13 = vadd.f32 %v11154_v12, %v6045_v14  ;;  %v13170_v59 = vpop.f32.mrb[245].mxu1  ;;  %v6080_v44 = vsel %vm6066_vm7, %v6041_v16, %v6073_v10  ;;  %v14109_v16 = vld [vmem:[%s17297_s12 + $0x170] sm:$0xff]   ;;  %v14112_v14 = vld [vmem:[%s17297_s12 + $0x168] sm:$0xff]  }
0x1864   :  { %13215 = vmatprep.subr.bf16.mxu1 %v14109_v16  ;;  %v11173_v10 = vld [vmem:[%s17296_s11 + $0x16] ss:$0 sm:$0xff] }
0x1865   :  { %vm6067_vm8 = vcmp.ge.f32.partialorder %v6046_v13, 0.0  ;;  %v6074_v5 = vmul.f32 0.1, %v6046_v13  ;;  %13216 = vmatpush3.bf16.msra.mxu1 %v14109_v16 }
0x1866   :  { %v6050_v4 = vpop.f32.mrb[246].mxu1  ;;  %13217 = vmatprep.subr.bf16.mxu1 %v14111_v51 }
0x1867   :  { %v6081_v52 = vsel %vm6067_vm8, %v6046_v13, %v6074_v5  ;;  %v6051_v22 = vadd.f32 %v11154_v12, %v6050_v4  ;;  %v13173_v30 = vpop.f32.mrb[247].mxu1 }
0x1868   :  { %v6091_v41 = vpack.c.bf16 %v6081_v52, %v6080_v44 }
0x1869   :  { %v6075_v26 = vmul.f32 0.1, %v6051_v22  ;;  %vm6068_vm9 = vcmp.ge.f32.partialorder %v6051_v22, 0.0  ;;  %13218 = vmatpush3.bf16.msra.mxu1 %v14111_v51 }
0x186a   :  { %13185 = vmatmul.mubr.msk.bf16.vlgmr.msra.gmra.mrb[232].mxu0 %vm120_vm0, %v6091_v41  ;;  %v6055_v23 = vpop.f32.mrb[248].mxu1 }
0x186b   :  { %v6056_v53 = vadd.f32 %v11154_v12, %v6055_v23  ;;  %v13176_v56 = vpop.f32.mrb[249].mxu1  ;;  %v6082_v54 = vsel %vm6068_vm9, %v6051_v22, %v6075_v26 }
0x186c   :  { %13220 = vmatmul.mubr.msk.bf16.vlgmr.msra.gmra.mrb[252].mxu1 %vm120_vm0, %v15132_v48 }
0x186d   :  { %vm6069_vm10 = vcmp.ge.f32.partialorder %v6056_v53, 0.0  ;;  %v6076_v40 = vmul.f32 0.1, %v6056_v53 }
0x186e   :  { %v6060_v11 = vpop.f32.mrb[250].mxu1 }
0x186f   :  { %v6083_v55 = vsel %vm6069_vm10, %v6056_v53, %v6076_v40  ;;  %v6061_v46 = vadd.f32 %v11154_v12, %v6060_v11  ;;  %v13179_v61 = vpop.f32.mrb[251].mxu1 }
0x1870   :  { %v6092_v27 = vpack.c.bf16 %v6083_v55, %v6082_v54 }
0x1871   :  { %vm6070_vm11 = vcmp.ge.f32.partialorder %v6061_v46, 0.0  ;;  %v6077_v29 = vmul.f32 0.1, %v6061_v46 }
0x1872   :  { %13188 = vmatprep.mubr.msk.bf16.mxu0 %vm120_vm0, %v6092_v27 }
0x1873   :  { %v6084_v25 = vsel %vm6070_vm11, %v6061_v46, %v6077_v29  ;;  %v14113_v29 = vld [vmem:[%s17295_s10 + $0x170] sm:$0xff]  }
0x1874   :  { %v6093_v50 = vpack.c.bf16 %v6084_v25, %v6084_v25  ;;  %13231 = vmatprep.subr.bf16.mxu1 %v14113_v29  ;;  %v14114_v25 = vld [vmem:[%s17295_s10 + $0x178] sm:$0xff]  }
0x1875   :  { %13232 = vmatpush3.bf16.msra.mxu1 %v14113_v29 }
0x1876   :  { %13189 = vmatmul.mubr.msk.bf16.gmra.mrb[236].mxu0 %vm120_vm0, %v6093_v50  ;;  %13233 = vmatprep.subr.bf16.mxu1 %v14114_v25 }
0x1877   :  { %13206 = vmatprep.mubr.msk.f32.mxu0 %vm14493_vm1, %v14494_v6 }
0x1879   :  { %13234 = vmatpush3.bf16.msra.mxu1 %v14114_v25 }
0x193d   :  { %v13186_v38 = vpop.f32.mrb[232].mxu0 }
0x193e   :  { %v6152_v35 = vpop.f32.mrb[233].mxu0 }
0x193f   :  { %v13187_v42 = vpop.f32.mrb[234].mxu0  ;;  %v13221_v55 = vpop.f32.mrb[252].mxu1 }
0x1940   :  { %v13917_v15 = vpack.c.bf16 %v13187_v42, %v13186_v38  ;;  %v6155_v8 = vpop.f32.mrb[235].mxu0  ;;  %v6336_v46 = vpop.f32.mrb[253].mxu1  ;;  %v11194_v38 = vld [vmem:[%s17298_s13 + $0xb] ss:$0 sm:$0xff] }
0x1941   :  { %v13914_v1 = vpack.c.bf16 %v6155_v8, %v6152_v35  ;;  %v13222_v61 = vpop.f32.mrb[254].mxu1 }
0x1942   :  { %v6339_v27 = vpop.f32.mrb[255].mxu1 }
0x1943   :  { %13915 = vmatpush3.bf16.msra.mxu0 %v13914_v1 }
0x1944   :  { %13916 = vmatprep.subr.bf16.mxu0 %v14495_v18 }
0x1947   :  { %13918 = vmatpush3.bf16.msra.mxu0 %v13917_v15 }
0x1948   :  { %13919 = vmatprep.subr.bf16.mxu0 %v14495_v18 }
0x1949   :  { %v13190_v12 = vpop.f32.mrb[236].mxu0 }
0x194a   :  { %v6168_v43 = vpop.f32.mrb[237].mxu0 }
0x194b   :  { %v13191_v45 = vpop.f32.mrb[238].mxu0 }
0x194c   :  { %v6171_v28 = vpop.f32.mrb[239].mxu0 }
0x194d   :  { %v13920_v17 = vpack.c.bf16 %v6171_v28, %v6168_v43 }
0x194f   :  { %13921 = vmatpush3.bf16.msra.mxu0 %v13920_v17 }
0x1950   :  { %13204 = vmatprep.subr.mxu0 %v14494_v6 }
0x1953   :  { %13205 = vmatpush3.msra.mxu0 %v13190_v12 }
0x1954   :  { %13207 = vmatmul.mubr.msk.f32.vlgmr.msra.gmra.mrb[240].mxu0 %vm2569_vm12, %v16109_v19  ;;  %13223 = vmatprep.subr.bf16.mxu0 %v14110_v20 }
0x1955   :  { %13209 = vmatprep.mubr.msk.f32.mxu0 %vm14493_vm1, %v14494_v6  ;;  %13224 = vmatpush3.bf16.msra.mxu0 %v14110_v20 }
0x1956   :  { %13225 = vmatprep.subr.bf16.mxu0 %v14112_v14 }
0x1958   :  { %13210 = vmatmul.mubr.msk.f32.gmra.mrb[242].mxu0 %vm2569_vm12, %v16118_v37 }
0x1959   :  { %13212 = vmatprep.mubr.msk.f32.mxu0 %vm14493_vm1, %v14494_v6  ;;  %13226 = vmatpush3.bf16.msra.mxu0 %v14112_v14 }
0x195a   :  { %13922 = vmatprep.subr.bf16.mxu0 %v14495_v18 }
0x195c   :  { %13213 = vmatmul.mubr.msk.f32.gmra.mrb[244].mxu0 %vm2569_vm12, %v16127_v47 }
0x1a27   :  { %v6256_v13 = vpop.f32.mrb[240].mxu0 }
0x1a28   :  { %v6257_v59 = vadd.f32 %v11173_v10, %v6256_v13  ;;  %v13208_v5 = vpop.f32.mrb[241].mxu0 }
0x1a2a   :  { %v6273_v44 = vmul.f32 0.1, %v6257_v59  ;;  %vm6270_vm13 = vcmp.ge.f32.partialorder %v6257_v59, 0.0 }
0x1a2b   :  { %v6261_v4 = vpop.f32.mrb[242].mxu0 }
0x1a2c   :  { %v6262_v52 = vadd.f32 %v11173_v10, %v6261_v4  ;;  %v13211_v22 = vpop.f32.mrb[243].mxu0  ;;  %v6276_v23 = vsel %vm6270_vm13, %v6257_v59, %v6273_v44 }
0x1a2e   :  { %vm6271_vm14 = vcmp.ge.f32.partialorder %v6262_v52, 0.0  ;;  %v6274_v30 = vmul.f32 0.1, %v6262_v52 }
0x1a2f   :  { %v6266_v41 = vpop.f32.mrb[244].mxu0 }
0x1a30   :  { %v6277_v26 = vsel %vm6271_vm14, %v6262_v52, %v6274_v30  ;;  %v6267_v48 = vadd.f32 %v11173_v10, %v6266_v41  ;;  %v13214_v53 = vpop.f32.mrb[245].mxu0 }
0x1a31   :  { %v6288_v56 = vpack.c.bf16 %v6277_v26, %v6276_v23 }
0x1a32   :  { %vm6272_vm15 = vcmp.ge.f32.partialorder %v6267_v48, 0.0  ;;  %v6275_v40 = vmul.f32 0.1, %v6267_v48 }
0x1a33   :  { %13227 = vmatprep.mubr.msk.bf16.mxu0 %vm120_vm0, %v6288_v56 }
0x1a34   :  { %v6278_v11 = vsel %vm6272_vm15, %v6267_v48, %v6275_v40 }
0x1a35   :  { %v6289_v54 = vpack.c.bf16 %v6278_v11, %v6278_v11 }
0x1a37   :  { %13228 = vmatmul.mubr.msk.bf16.vlgmr.msra.gmra.mrb[248].mxu0 %vm120_vm0, %v6289_v54 }
0x1a38   :  { %13245 = vmatprep.mubr.msk.f32.mxu0 %vm14493_vm1, %v14494_v6 }
0x1b0a   :  { %v13229_v50 = vpop.f32.mrb[248].mxu0 }
0x1b0b   :  { %v6411_v35 = vadd.f32 %v13229_v50, %v13221_v55  ;;  %v6402_v42 = vpop.f32.mrb[249].mxu0 }
0x1b0c   :  { %v6403_v15 = vadd.f32 %v6402_v42, %v6336_v46  ;;  %v13230_v8 = vpop.f32.mrb[250].mxu0 }
0x1b0d   :  { %v6426_v1 = vadd.f32 %v11194_v38, %v6411_v35  ;;  %v6405_v12 = vpop.f32.mrb[251].mxu0  ;;  %v14120_v8 = vld [vmem:[%s17297_s12 + $0x198] sm:$0xff]  }
0x1b0e   :  { %v6424_v43 = vadd.f32 %v11194_v38, %v6403_v15  ;;  %v6406_v45 = vadd.f32 %v6405_v12, %v6339_v27 }
0x1b0f   :  { %v6429_v17 = vmax.f32 %v6426_v1, 0.0 }
0x1b10   :  { %v6425_v28 = vadd.f32 %v11194_v38, %v6406_v45  ;;  %v6427_v16 = vmax.f32 %v6424_v43, 0.0 }
0x1b11   :  { %v16164_v14 = vpack.c.bf16 %v6429_v17, %v6429_v17 }
0x1b12   :  { %v6428_v20 = vmax.f32 %v6425_v28, 0.0  ;;  %v14121_v28 = vld [vmem:[%s17297_s12 + $0x1b0] sm:$0xff]  }
0x1b14   :  { %v16162_v51 = vpack.c.bf16 %v6428_v20, %v6427_v16 }
0x1b16   :  { %13235 = vmatprep.mubr.msk.bf16.mxu1 %vm120_vm0, %v16162_v51 }
0x1b17   :  { %13236 = vmatmul.mubr.msk.bf16.vlgmr.msra.gmra.mrb[0].mxu1 %vm120_vm0, %v16164_v14 }
0x1bea   :  { %v13237_v10 = vpop.f32.mrb[0].mxu1 }
0x1beb   :  { %v6489_v13 = vpop.f32.mrb[1].mxu1 }
0x1bec   :  { %v13238_v59 = vpop.f32.mrb[2].mxu1 }
0x1bed   :  { %v6492_v5 = vpop.f32.mrb[3].mxu1 }
0x1bee   :  { %v13923_v4 = vpack.c.bf16 %v6492_v5, %v6489_v13 }
0x1bf0   :  { %13924 = vmatpush3.bf16.msra.mxu0 %v13923_v4 }
0x1bf1   :  { %13243 = vmatprep.subr.mxu0 %v14494_v6 }
0x1bf4   :  { %13244 = vmatpush3.msra.mxu0 %v13237_v10 }
0x1bf5   :  { %13246 = vmatmul.mubr.msk.f32.vlgmr.msra.gmra.mrb[246].mxu0 %vm182_vm2, %v16015_v49  ;;  %v14115_v49 = vld [vmem:[%s17295_s10 + $0x180] sm:$0xff]  }
0x1bf6   :  { %13248 = vmatprep.mubr.msk.f32.mxu0 %vm14493_vm1, %v14494_v6  ;;  %13266 = vmatprep.subr.bf16.mxu1 %v14115_v49 }
0x1bf7   :  { %13267 = vmatpush3.bf16.msra.mxu1 %v14115_v49 }
0x1bf9   :  { %13249 = vmatmul.mubr.msk.f32.gmra.mrb[252].mxu0 %vm182_vm2, %v16024_v24  ;;  %v14116_v24 = vld [vmem:[%s17295_s10 + $0x190] sm:$0xff]  }
0x1bfa   :  { %13251 = vmatprep.mubr.msk.f32.mxu0 %vm14493_vm1, %v14494_v6  ;;  %13301 = vmatprep.subr.bf16.mxu0 %v14116_v24 }
0x1bfb   :  { %13302 = vmatpush3.bf16.msra.mxu0 %v14116_v24 }
0x1bfd   :  { %13252 = vmatmul.mubr.msk.f32.gmra.mrb[254].mxu0 %vm182_vm2, %v16033_v58  ;;  %v14117_v58 = vld [vmem:[%s17295_s10 + $0x188] sm:$0xff]  }
0x1bfe   :  { %13254 = vmatprep.mubr.msk.f32.mxu0 %vm14493_vm1, %v14494_v6  ;;  %13268 = vmatprep.subr.bf16.mxu1 %v14117_v58 }
0x1bff   :  { %13269 = vmatpush3.bf16.msra.mxu1 %v14117_v58  ;;  %v14122_v58 = vld [vmem:[%s17297_s12 + $0x1b8] sm:$0xff]  }
0x1c00   :  { %13925 = vmatprep.subr.bf16.mxu1 %v14495_v18 }
0x1c01   :  { %13255 = vmatmul.mubr.msk.f32.gmra.mrb[0].mxu0 %vm182_vm2, %v16042_v39  ;;  %v14118_v39 = vld [vmem:[%s17295_s10 + $0x198] sm:$0xff]  }
0x1c02   :  { %13257 = vmatprep.mubr.msk.f32.mxu0 %vm14493_vm1, %v14494_v6  ;;  %13303 = vmatprep.subr.bf16.mxu0 %v14118_v39 }
0x1c03   :  { %13304 = vmatpush3.bf16.msra.mxu0 %v14118_v39  ;;  %v14123_v39 = vld [vmem:[%s17295_s10 + $0x1a0] sm:$0xff]  }
0x1c05   :  { %13258 = vmatmul.mubr.msk.f32.gmra.mrb[2].mxu0 %vm182_vm2, %v16051_v60  ;;  %v14119_v60 = vld [vmem:[%s17297_s12 + $0x190] sm:$0xff]  }
0x1c06   :  { %13260 = vmatprep.mubr.msk.f32.mxu0 %vm14493_vm1, %v14494_v6  ;;  %13336 = vmatprep.subr.bf16.mxu0 %v14119_v60 }
0x1c09   :  { %13261 = vmatmul.mubr.msk.f32.gmra.mrb[4].mxu0 %vm182_vm2, %v16060_v63  ;;  %v11204_v63 = vld [vmem:[%s17296_s11 + $0x17] ss:$0 sm:$0xff] }
0x1c0a   :  { %13263 = vmatprep.mubr.msk.f32.mxu0 %vm14493_vm1, %v14494_v6 }
0x1c0d   :  { %13264 = vmatmul.mubr.msk.f32.gmra.mrb[6].mxu0 %vm182_vm2, %v16069_v7 }
0x1cc8   :  { %v6577_v7 = vpop.f32.mrb[246].mxu0 }
0x1cc9   :  { %v6578_v44 = vadd.f32 %v11204_v63, %v6577_v7  ;;  %v13247_v52 = vpop.f32.mrb[247].mxu0  ;;  %v98_v7 = vld [vmem:[%s17293_s8 + $0x10] sm:$0xff] }
0x1ccb   :  { %v6618_v30 = vmul.f32 0.1, %v6578_v44  ;;  %vm6611_vm4 = vcmp.ge.f32.partialorder %v6578_v44, 0.0 }
0x1ccc   :  { %v6582_v22 = vpop.f32.mrb[252].mxu0 }
0x1ccd   :  { %v6583_v41 = vadd.f32 %v11204_v63, %v6582_v22  ;;  %v13250_v23 = vpop.f32.mrb[253].mxu0  ;;  %v6625_v53 = vsel %vm6611_vm4, %v6578_v44, %v6618_v30  ;;  %v16260_v44 = vpack.c.bf16 %v98_v7, %v98_v7 }
0x1ccf   :  { %vm6612_vm5 = vcmp.ge.f32.partialorder %v6583_v41, 0.0  ;;  %v6619_v26 = vmul.f32 0.1, %v6583_v41 }
0x1cd0   :  { %v6587_v48 = vpop.f32.mrb[254].mxu0 }
0x1cd1   :  { %v6626_v56 = vsel %vm6612_vm5, %v6583_v41, %v6619_v26  ;;  %v6588_v40 = vadd.f32 %v11204_v63, %v6587_v48  ;;  %v13253_v11 = vpop.f32.mrb[255].mxu0 }
0x1cd2   :  { %v6637_v54 = vpack.c.bf16 %v6626_v56, %v6625_v53 }
0x1cd3   :  { %v6620_v46 = vmul.f32 0.1, %v6588_v40  ;;  %vm6613_vm6 = vcmp.ge.f32.partialorder %v6588_v40, 0.0 }
0x1cd4   :  { %v6592_v55 = vpop.f32.mrb[0].mxu0  ;;  %13270 = vmatprep.mubr.msk.bf16.mxu1 %vm120_vm0, %v6637_v54  ;;  %13305 = vmatprep.mubr.msk.bf16.mxu0 %vm120_vm0, %v6637_v54 }
0x1cd5   :  { %v6593_v61 = vadd.f32 %v11204_v63, %v6592_v55  ;;  %v13256_v27 = vpop.f32.mrb[1].mxu0  ;;  %v6627_v50 = vsel %vm6613_vm6, %v6588_v40, %v6620_v46 }
0x1cd7   :  { %vm6614_vm7 = vcmp.ge.f32.partialorder %v6593_v61, 0.0  ;;  %v6621_v29 = vmul.f32 0.1, %v6593_v61 }
0x1cd8   :  { %v6597_v25 = vpop.f32.mrb[2].mxu0 }
0x1cd9   :  { %v6628_v38 = vsel %vm6614_vm7, %v6593_v61, %v6621_v29  ;;  %v6598_v35 = vadd.f32 %v11204_v63, %v6597_v25  ;;  %v13259_v42 = vpop.f32.mrb[3].mxu0 }
0x1cda   :  { %v6638_v15 = vpack.c.bf16 %v6628_v38, %v6627_v50 }
0x1cdb   :  { %v6622_v12 = vmul.f32 0.1, %v6598_v35  ;;  %vm6615_vm8 = vcmp.ge.f32.partialorder %v6598_v35, 0.0 }
0x1cdc   :  { %13271 = vmatmul.mubr.msk.bf16.vlgmr.msra.gmra.mrb[4].mxu1 %vm120_vm0, %v6638_v15  ;;  %v6602_v1 = vpop.f32.mrb[4].mxu0  ;;  %13306 = vmatmul.mubr.msk.bf16.vlgmr.msra.gmra.mrb[8].mxu0 %vm120_vm0, %v6638_v15 }
0x1cdd   :  { %v6603_v43 = vadd.f32 %v11204_v63, %v6602_v1  ;;  %v13262_v45 = vpop.f32.mrb[5].mxu0  ;;  %13337 = vmatpush3.bf16.msra.mxu0 %v14119_v60  ;;  %v6629_v20 = vsel %vm6615_vm8, %v6598_v35, %v6622_v12  ;;  %v14124_v60 = vld [vmem:[%s17295_s10 + $0x1a8] sm:$0xff]  }
0x1cde   :  { %13338 = vmatprep.subr.bf16.mxu0 %v14120_v8 }
0x1cdf   :  { %vm6616_vm9 = vcmp.ge.f32.partialorder %v6603_v43, 0.0  ;;  %v6623_v17 = vmul.f32 0.1, %v6603_v43 }
0x1ce0   :  { %v6607_v16 = vpop.f32.mrb[6].mxu0 }
0x1ce1   :  { %v6630_v10 = vsel %vm6616_vm9, %v6603_v43, %v6623_v17  ;;  %v6608_v13 = vadd.f32 %v11204_v63, %v6607_v16  ;;  %v13265_v59 = vpop.f32.mrb[7].mxu0  ;;  %13339 = vmatpush3.bf16.msra.mxu0 %v14120_v8  ;;  %v97_v63 = vld [vmem:[%s17293_s8 + $0x8] sm:$0xff]  ;;  %v14125_v16 = vld [vmem:[%s17297_s12 + $0x180] sm:$0xff]  }
0x1ce2   :  { %v6639_v5 = vpack.c.bf16 %v6630_v10, %v6629_v20  ;;  %13352 = vmatprep.subr.bf16.mxu0 %v14121_v28 }
0x1ce3   :  { %vm6617_vm10 = vcmp.ge.f32.partialorder %v6608_v13, 0.0  ;;  %v6624_v4 = vmul.f32 0.1, %v6608_v13 }
0x1ce4   :  { %13274 = vmatprep.mubr.msk.bf16.mxu1 %vm120_vm0, %v6639_v5  ;;  %13309 = vmatprep.mubr.msk.bf16.mxu0 %vm120_vm0, %v6639_v5  ;;  %v11223_v5 = vld [vmem:[%s17296_s11 + $0x18] ss:$0 sm:$0xff] }
0x1ce5   :  { %v6631_v49 = vsel %vm6617_vm10, %v6608_v13, %v6624_v4 }
0x1ce6   :  { %v6640_v24 = vpack.c.bf16 %v6631_v49, %v6631_v49 }
0x1ce8   :  { %13275 = vmatmul.mubr.msk.bf16.gmra.mrb[8].mxu1 %vm120_vm0, %v6640_v24  ;;  %13310 = vmatmul.mubr.msk.bf16.gmra.mrb[12].mxu0 %vm120_vm0, %v6640_v24 }
0x1ce9   :  { %13340 = vmatprep.mubr.msk.bf16.mxu0 %vm120_vm0, %v16162_v51  ;;  %13292 = vmatprep.mubr.msk.f32.mxu1 %vm14493_vm1, %v14494_v6 }
0x1cf0   :  { %13341 = vmatmul.mubr.msk.bf16.vlgmr.msra.gmra.mrb[16].mxu0 %vm120_vm0, %v16164_v14 }
0x1cf1   :  { %13353 = vmatpush3.bf16.msra.mxu0 %v14121_v28  ;;  %13356 = vmatprep.mubr.msk.bf16.mxu0 %vm120_vm0, %v16162_v51  ;;  %v96_v51 = vld [vmem:[%s17293_s8] sm:$0xff] }
0x1cf2   :  { %13354 = vmatprep.subr.bf16.mxu0 %v14122_v58 }
0x1cf5   :  { %13355 = vmatpush3.bf16.msra.mxu0 %v14122_v58 }
0x1cf6   :  { %13368 = vmatprep.subr.bf16.mxu0 %v14123_v39 }
0x1cf8   :  { %13357 = vmatmul.mubr.msk.bf16.vlgmr.msra.gmra.mrb[24].mxu0 %vm120_vm0, %v16164_v14  ;;  %v16255_v14 = vpack.c.bf16 %v97_v63, %v96_v51 }
0x1cf9   :  { %13369 = vmatpush3.bf16.msra.mxu0 %v14123_v39 }
0x1cfa   :  { %13370 = vmatprep.subr.bf16.mxu0 %v14124_v60  ;;  %13372 = vmatprep.mubr.msk.bf16.mxu0 %vm120_vm0, %v16255_v14 }
0x1cfd   :  { %13371 = vmatpush3.bf16.msra.mxu0 %v14124_v60 }
0x1cfe   :  { %13397 = vmatprep.subr.bf16.mxu0 %v14494_v6 }
0x1d00   :  { %13373 = vmatmul.mubr.msk.bf16.vlgmr.msra.gmra.mrb[20].mxu0 %vm120_vm0, %v16260_v44 }
0x1d01   :  { %13401 = vmatprep.mubr.msk.bf16.mxu0 %vm14493_vm1, %v14494_v6 }
0x1daf   :  { %v13272_v52 = vpop.f32.mrb[4].mxu1  ;;  %v13307_v22 = vpop.f32.mrb[8].mxu0 }
0x1db0   :  { %v6699_v30 = vpop.f32.mrb[5].mxu1  ;;  %v6877_v41 = vpop.f32.mrb[9].mxu0 }
0x1db1   :  { %v13273_v23 = vpop.f32.mrb[6].mxu1  ;;  %v13308_v26 = vpop.f32.mrb[10].mxu0 }
0x1db2   :  { %v13929_v48 = vpack.c.bf16 %v13273_v23, %v13272_v52  ;;  %v6702_v53 = vpop.f32.mrb[7].mxu1  ;;  %v13938_v56 = vpack.c.bf16 %v13308_v26, %v13307_v22  ;;  %v6880_v40 = vpop.f32.mrb[11].mxu0 }
0x1db3   :  { %v13926_v11 = vpack.c.bf16 %v6702_v53, %v6699_v30  ;;  %v13935_v54 = vpack.c.bf16 %v6880_v40, %v6877_v41 }
0x1db5   :  { %13927 = vmatpush3.bf16.msra.mxu1 %v13926_v11  ;;  %v14128_v11 = vld [vmem:[%s17297_s12 + $0x1a8] sm:$0xff]  }
0x1db6   :  { %13928 = vmatprep.subr.bf16.mxu1 %v14495_v18 }
0x1db9   :  { %13930 = vmatpush3.bf16.msra.mxu1 %v13929_v48  ;;  %v11238_v48 = vld [vmem:[%s17296_s11 + $0x19] ss:$0 sm:$0xff] }
0x1dba   :  { %13931 = vmatprep.subr.bf16.mxu1 %v14495_v18 }
0x1dbb   :  { %v13276_v55 = vpop.f32.mrb[8].mxu1  ;;  %v13311_v46 = vpop.f32.mrb[12].mxu0 }
0x1dbc   :  { %v6715_v61 = vpop.f32.mrb[9].mxu1  ;;  %v6893_v27 = vpop.f32.mrb[13].mxu0 }
0x1dbd   :  { %v13277_v29 = vpop.f32.mrb[10].mxu1  ;;  %v13312_v25 = vpop.f32.mrb[14].mxu0 }
0x1dbe   :  { %v6718_v50 = vpop.f32.mrb[11].mxu1  ;;  %v6896_v38 = vpop.f32.mrb[15].mxu0 }
0x1dbf   :  { %v13932_v35 = vpack.c.bf16 %v6718_v50, %v6715_v61  ;;  %v13941_v42 = vpack.c.bf16 %v6896_v38, %v6893_v27 }
0x1dc1   :  { %13933 = vmatpush3.bf16.msra.mxu1 %v13932_v35 }
0x1dc2   :  { %13290 = vmatprep.subr.mxu1 %v14494_v6 }
0x1dc3   :  { %v16272_v15 = vpop.f32.mrb[16].mxu0 }
0x1dc4   :  { %v16274_v8 = vpop.f32.mrb[17].mxu0 }
0x1dc5   :  { %13291 = vmatpush3.msra.mxu1 %v13276_v55  ;;  %v13343_v1 = vpop.f32.mrb[18].mxu0 }
0x1dc6   :  { %13293 = vmatmul.mubr.msk.f32.vlgmr.msra.gmra.mrb[12].mxu1 %vm2569_vm12, %v16109_v19  ;;  %13934 = vmatprep.subr.bf16.mxu1 %v14495_v18  ;;  %v16279_v12 = vpop.f32.mrb[19].mxu0 }
0x1dc7   :  { %13936 = vmatpush3.bf16.msra.mxu1 %v13935_v54  ;;  %13295 = vmatprep.mubr.msk.f32.mxu1 %vm14493_vm1, %v14494_v6 }
0x1dc8   :  { %13937 = vmatprep.subr.bf16.mxu1 %v14495_v18 }
0x1dca   :  { %13296 = vmatmul.mubr.msk.f32.gmra.mrb[14].mxu1 %vm2569_vm12, %v16118_v37 }
0x1dcb   :  { %13939 = vmatpush3.bf16.msra.mxu1 %v13938_v56  ;;  %v16286_v43 = vpop.f32.mrb[24].mxu0  ;;  %13298 = vmatprep.mubr.msk.f32.mxu1 %vm14493_vm1, %v14494_v6 }
0x1dcc   :  { %v16290_v45 = vpop.f32.mrb[25].mxu0  ;;  %13940 = vmatprep.subr.bf16.mxu1 %v14495_v18 }
0x1dcd   :  { %v13359_v28 = vpop.f32.mrb[26].mxu0 }
0x1dce   :  { %13299 = vmatmul.mubr.msk.f32.gmra.mrb[16].mxu1 %vm2569_vm12, %v16127_v47  ;;  %v16295_v17 = vpop.f32.mrb[27].mxu0 }
0x1dcf   :  { %13942 = vmatpush3.bf16.msra.mxu1 %v13941_v42  ;;  %13327 = vmatprep.mubr.msk.f32.mxu1 %vm14493_vm1, %v14494_v6 }
0x1dd0   :  { %13325 = vmatprep.subr.mxu1 %v14494_v6 }
0x1dd3   :  { %13326 = vmatpush3.msra.mxu1 %v13311_v46  ;;  %v13374_v20 = vpop.f32.mrb[20].mxu0 }
0x1dd4   :  { %13328 = vmatmul.mubr.msk.f32.vlgmr.msra.gmra.mrb[18].mxu1 %vm2569_vm12, %v16109_v19  ;;  %13344 = vmatprep.subr.bf16.mxu1 %v14125_v16  ;;  %v14126_v19 = vld [vmem:[%s17297_s12 + $0x188] sm:$0xff]   ;;  %v7359_v10 = vpop.f32.mrb[21].mxu0 }
0x1dd5   :  { %13330 = vmatprep.mubr.msk.f32.mxu1 %vm14493_vm1, %v14494_v6  ;;  %13345 = vmatpush3.bf16.msra.mxu1 %v14125_v16 }
0x1dd6   :  { %13346 = vmatprep.subr.bf16.mxu1 %v14126_v19 }
0x1dd8   :  { %13331 = vmatmul.mubr.msk.f32.gmra.mrb[20].mxu1 %vm2569_vm12, %v16118_v37  ;;  %v14127_v37 = vld [vmem:[%s17297_s12 + $0x1a0] sm:$0xff]  }
0x1dd9   :  { %13333 = vmatprep.mubr.msk.f32.mxu1 %vm14493_vm1, %v14494_v6  ;;  %13347 = vmatpush3.bf16.msra.mxu1 %v14126_v19 }
0x1dda   :  { %13360 = vmatprep.subr.bf16.mxu1 %v14127_v37 }
0x1ddc   :  { %13334 = vmatmul.mubr.msk.f32.gmra.mrb[22].mxu1 %vm2569_vm12, %v16127_v47  ;;  %v13375_v47 = vpop.f32.mrb[22].mxu0 }
0x1ddd   :  { %v7362_v13 = vpop.f32.mrb[23].mxu0  ;;  %v16349_v47 = vld [vmem:[%s17320_s22 + $0x8] sm:$0xff] }
0x1dde   :  { %v13944_v59 = vpack.c.bf16 %v7362_v13, %v7359_v10  ;;  %v16340_v10 = vld [vmem:[%s17320_s22] sm:$0xff]  ;;  %v16367_v13 = vld [vmem:[%s17320_s22 + $0x18] sm:$0xff] }
0x1e99   :  { %v6803_v4 = vpop.f32.mrb[12].mxu1 }
0x1e9a   :  { %v6804_v49 = vadd.f32 %v11223_v5, %v6803_v4  ;;  %v13294_v24 = vpop.f32.mrb[13].mxu1  ;;  %v14130_v4 = vld [vmem:[%s17295_s10 + $0x1b8] sm:$0xff]  }
0x1e9c   :  { %v6820_v39 = vmul.f32 0.1, %v6804_v49  ;;  %vm6817_vm11 = vcmp.ge.f32.partialorder %v6804_v49, 0.0 }
0x1e9d   :  { %v6808_v58 = vpop.f32.mrb[14].mxu1 }
0x1e9e   :  { %v6809_v60 = vadd.f32 %v11223_v5, %v6808_v58  ;;  %v13297_v51 = vpop.f32.mrb[15].mxu1  ;;  %v6823_v52 = vsel %vm6817_vm11, %v6804_v49, %v6820_v39 }
0x1ea0   :  { %vm6818_vm13 = vcmp.ge.f32.partialorder %v6809_v60, 0.0  ;;  %v6821_v63 = vmul.f32 0.1, %v6809_v60 }
0x1ea1   :  { %v6813_v7 = vpop.f32.mrb[16].mxu1 }
0x1ea2   :  { %v6824_v22 = vsel %vm6818_vm13, %v6809_v60, %v6821_v63  ;;  %v6814_v30 = vadd.f32 %v11223_v5, %v6813_v7  ;;  %v13300_v41 = vpop.f32.mrb[17].mxu1  ;;  %v14129_v5 = vld [vmem:[%s17295_s10 + $0x1b0] sm:$0xff]  }
0x1ea3   :  { %v7013_v23 = vpack.c.bf16 %v6824_v22, %v6823_v52  ;;  %13398 = vmatpush3.bf16.msra.mxu0 %v14129_v5 }
0x1ea4   :  { %vm6819_vm14 = vcmp.ge.f32.partialorder %v6814_v30, 0.0  ;;  %v6822_v26 = vmul.f32 0.1, %v6814_v30  ;;  %13399 = vmatprep.subr.bf16.mxu0 %v14494_v6 }
0x1ea5   :  { %13348 = vmatprep.mubr.msk.bf16.mxu1 %vm120_vm0, %v7013_v23 }
0x1ea6   :  { %v6825_v53 = vsel %vm6819_vm14, %v6814_v30, %v6822_v26 }
0x1ea7   :  { %v7014_v56 = vpack.c.bf16 %v6825_v53, %v6825_v53  ;;  %v6981_v40 = vpop.f32.mrb[18].mxu1  ;;  %13400 = vmatpush3.bf16.msra.mxu0 %v14130_v4 }
0x1ea8   :  { %v6982_v54 = vadd.f32 %v11238_v48, %v6981_v40  ;;  %v13329_v55 = vpop.f32.mrb[19].mxu1 }
0x1ea9   :  { %13349 = vmatmul.mubr.msk.bf16.vlgmr.msra.gmra.mrb[24].mxu1 %vm120_vm0, %v7014_v56 }
0x1eaa   :  { %13361 = vmatpush3.bf16.msra.mxu1 %v14127_v37  ;;  %v6998_v61 = vmul.f32 0.1, %v6982_v54  ;;  %vm6995_vm15 = vcmp.ge.f32.partialorder %v6982_v54, 0.0 }
0x1eab   :  { %v6986_v46 = vpop.f32.mrb[20].mxu1  ;;  %13362 = vmatprep.subr.bf16.mxu1 %v14128_v11 }
0x1eac   :  { %v6987_v27 = vadd.f32 %v11238_v48, %v6986_v46  ;;  %v13332_v29 = vpop.f32.mrb[21].mxu1  ;;  %v7001_v38 = vsel %vm6995_vm15, %v6982_v54, %v6998_v61 }
0x1eae   :  { %vm6996_vm4 = vcmp.ge.f32.partialorder %v6987_v27, 0.0  ;;  %v6999_v25 = vmul.f32 0.1, %v6987_v27  ;;  %13363 = vmatpush3.bf16.msra.mxu1 %v14128_v11 }
0x1eaf   :  { %v6991_v50 = vpop.f32.mrb[22].mxu1  ;;  %13943 = vmatprep.subr.bf16.mxu1 %v14495_v18 }
0x1eb0   :  { %v7002_v35 = vsel %vm6996_vm4, %v6987_v27, %v6999_v25  ;;  %v6992_v42 = vadd.f32 %v11238_v48, %v6991_v50  ;;  %v13335_v1 = vpop.f32.mrb[23].mxu1 }
0x1eb1   :  { %v7161_v28 = vpack.c.bf16 %v7002_v35, %v7001_v38 }
0x1eb2   :  { %vm6997_vm5 = vcmp.ge.f32.partialorder %v6992_v42, 0.0  ;;  %v7000_v16 = vmul.f32 0.1, %v6992_v42 }
0x1eb3   :  { %13364 = vmatprep.mubr.msk.bf16.mxu1 %vm120_vm0, %v7161_v28 }
0x1eb4   :  { %v7003_v19 = vsel %vm6997_vm5, %v6992_v42, %v7000_v16 }
0x1eb5   :  { %v7162_v37 = vpack.c.bf16 %v7003_v19, %v7003_v19 }
0x1eb7   :  { %13365 = vmatmul.mubr.msk.bf16.vlgmr.msra.gmra.mrb[28].mxu1 %vm120_vm0, %v7162_v37 }
0x1eb8   :  { %13945 = vmatpush3.bf16.msra.mxu1 %v13944_v59  ;;  %13382 = vmatprep.mubr.msk.f32.mxu1 %vm14493_vm1, %v14494_v6  ;;  %v16376_v59 = vld [vmem:[%s17320_s22 + $0x20] sm:$0xff] }
0x1eb9   :  { %13380 = vmatprep.subr.mxu1 %v14494_v6 }
0x1ebc   :  { %13381 = vmatpush3.msra.mxu1 %v13374_v20  ;;  %v16358_v20 = vld [vmem:[%s17320_s22 + $0x10] sm:$0xff] }
0x1ebd   :  { %13946 = vmatprep.subr.bf16.mxu1 %v14495_v18 }
0x1ebf   :  { %13383 = vmatmul.mubr.msk.f32.vlgmr.msra.gmra.mrb[32].mxu1 %vm182_vm2, %v16340_v10 }
0x1ec0   :  { %13385 = vmatprep.mubr.msk.f32.mxu1 %vm14493_vm1, %v14494_v6 }
0x1ec3   :  { %13386 = vmatmul.mubr.msk.f32.gmra.mrb[34].mxu1 %vm182_vm2, %v16349_v47 }
0x1ec4   :  { %13388 = vmatprep.mubr.msk.f32.mxu1 %vm14493_vm1, %v14494_v6 }
0x1ec7   :  { %13389 = vmatmul.mubr.msk.f32.gmra.mrb[36].mxu1 %vm182_vm2, %v16358_v20 }
0x1ec8   :  { %13391 = vmatprep.mubr.msk.f32.mxu1 %vm14493_vm1, %v14494_v6 }
0x1ecb   :  { %13392 = vmatmul.mubr.msk.f32.gmra.mrb[38].mxu1 %vm182_vm2, %v16367_v13 }
0x1ecc   :  { %13394 = vmatprep.mubr.msk.f32.mxu1 %vm14493_vm1, %v14494_v6 }
0x1ecf   :  { %13395 = vmatmul.mubr.msk.f32.gmra.mrb[40].mxu1 %vm182_vm2, %v16376_v59 }
0x1ed0   :  { %13423 = vmatprep.mubr.msk.f32.mxu1 %vm14493_vm1, %v14494_v6 }
0x1f7c   :  { %v13350_v49 = vpop.f32.mrb[24].mxu1 }
0x1f7d   :  { %v16390_v24 = vadd.f32 %v13350_v49, %v16272_v15  ;;  %v7127_v58 = vpop.f32.mrb[25].mxu1 }
0x1f7e   :  { %v16393_v39 = vadd.f32 %v7127_v58, %v16274_v8  ;;  %v13351_v60 = vpop.f32.mrb[26].mxu1  ;;  %v11287_v8 = vld [vmem:[%s17296_s11 + $0x1a] ss:$0 sm:$0xff] }
0x1f7f   :  { %v7130_v51 = vpop.f32.mrb[27].mxu1 }
0x1f80   :  { %v16396_v63 = vadd.f32 %v7130_v51, %v16279_v12 }
0x1f8a   :  { %v13366_v7 = vpop.f32.mrb[28].mxu1 }
0x1f8b   :  { %v16399_v52 = vadd.f32 %v13366_v7, %v16286_v43  ;;  %v7275_v22 = vpop.f32.mrb[29].mxu1 }
0x1f8c   :  { %v16402_v30 = vadd.f32 %v7275_v22, %v16290_v45  ;;  %v13367_v41 = vpop.f32.mrb[30].mxu1 }
0x1f8d   :  { %v7278_v15 = vpop.f32.mrb[31].mxu1 }
0x1f8e   :  { %v16405_v23 = vadd.f32 %v7278_v15, %v16295_v17 }
0x1f92   :  { %v7447_v26 = vpop.f32.mrb[32].mxu1 }
0x1f93   :  { %v7448_v12 = vadd.f32 %v11287_v8, %v7447_v26  ;;  %v13384_v48 = vpop.f32.mrb[33].mxu1 }
0x1f95   :  { %v7476_v56 = vmul.f32 0.1, %v7448_v12  ;;  %vm7471_vm6 = vcmp.ge.f32.partialorder %v7448_v12, 0.0 }
0x1f96   :  { %v7452_v53 = vpop.f32.mrb[34].mxu1 }
0x1f97   :  { %v7453_v43 = vadd.f32 %v11287_v8, %v7452_v53  ;;  %v13387_v40 = vpop.f32.mrb[35].mxu1  ;;  %v7481_v54 = vsel %vm7471_vm6, %v7448_v12, %v7476_v56 }
0x1f98   :  { %v16442_v40 = vld [vmem:[%s17321_s0 + $0x10] sm:$0xff] }
0x1f99   :  { %vm7472_vm7 = vcmp.ge.f32.partialorder %v7453_v43, 0.0  ;;  %v7477_v45 = vmul.f32 0.1, %v7453_v43 }
0x1f9a   :  { %v7457_v11 = vpop.f32.mrb[36].mxu1 }
0x1f9b   :  { %v7482_v55 = vsel %vm7472_vm7, %v7453_v43, %v7477_v45  ;;  %v7458_v46 = vadd.f32 %v11287_v8, %v7457_v11  ;;  %v13390_v17 = vpop.f32.mrb[37].mxu1  ;;  %v16433_v43 = vld [vmem:[%s17321_s0 + $0x8] sm:$0xff]  ;;  %v14131_v45 = vld [vmem:[%s17297_s12 + $0x1d0] sm:$0xff]   ;;  %v14132_v11 = vld [vmem:[%s17297_s12 + $0x1c0] sm:$0xff]  }
0x1f9c   :  { %v7491_v61 = vpack.c.bf16 %v7482_v55, %v7481_v54  ;;  %13432 = vmatprep.subr.bf16.mxu0 %v14131_v45  ;;  %v14133_v54 = vld [vmem:[%s17297_s12 + $0x1d8] sm:$0xff]   ;;  %v14134_v55 = vld [vmem:[%s17297_s12 + $0x1c8] sm:$0xff]  }
0x1f9d   :  { %v7478_v29 = vmul.f32 0.1, %v7458_v46  ;;  %vm7473_vm8 = vcmp.ge.f32.partialorder %v7458_v46, 0.0 }
0x1f9e   :  { %v7462_v27 = vpop.f32.mrb[38].mxu1  ;;  %13402 = vmatmul.mubr.msk.bf16.vlgmr.msra.gmra.mrb[28].mxu0 %vm120_vm0, %v7491_v61 }
0x1f9f   :  { %v7463_v25 = vadd.f32 %v11287_v8, %v7462_v27  ;;  %v13393_v50 = vpop.f32.mrb[39].mxu1  ;;  %13405 = vmatprep.mubr.msk.bf16.mxu0 %vm14493_vm1, %v14494_v6  ;;  %v7483_v42 = vsel %vm7473_vm8, %v7458_v46, %v7478_v29  ;;  %13433 = vmatpush3.bf16.msra.mxu0 %v14131_v45  ;;  %v11303_v46 = vld [vmem:[%s17296_s11 + $0x1b] ss:$0 sm:$0xff] }
0x1fa0   :  { %13434 = vmatprep.subr.bf16.mxu0 %v14133_v54 }
0x1fa1   :  { %vm7474_vm9 = vcmp.ge.f32.partialorder %v7463_v25, 0.0  ;;  %v7479_v38 = vmul.f32 0.1, %v7463_v25 }
0x1fa2   :  { %v7467_v35 = vpop.f32.mrb[40].mxu1 }
0x1fa3   :  { %v7484_v1 = vsel %vm7474_vm9, %v7463_v25, %v7479_v38  ;;  %v7468_v28 = vadd.f32 %v11287_v8, %v7467_v35  ;;  %v13396_v16 = vpop.f32.mrb[41].mxu1  ;;  %13435 = vmatpush3.bf16.msra.mxu0 %v14133_v54 }
0x1fa4   :  { %v7492_v19 = vpack.c.bf16 %v7484_v1, %v7483_v42 }
0x1fa5   :  { %v7480_v37 = vmul.f32 0.1, %v7468_v28  ;;  %vm7475_vm10 = vcmp.ge.f32.partialorder %v7468_v28, 0.0 }
0x1fa6   :  { %13406 = vmatmul.mubr.msk.bf16.gmra.mrb[32].mxu0 %vm120_vm0, %v7492_v19 }
0x1fa7   :  { %13409 = vmatprep.mubr.msk.bf16.mxu0 %vm14493_vm1, %v14494_v6  ;;  %v7485_v5 = vsel %vm7475_vm10, %v7468_v28, %v7480_v37 }
0x1fa8   :  { %v7493_v4 = vpack.c.bf16 %v7485_v5, %v7485_v5 }
0x1fae   :  { %13410 = vmatmul.mubr.msk.bf16.gmra.mrb[36].mxu0 %vm120_vm0, %v7493_v4 }
0x1faf   :  { %13436 = vmatprep.mubr.msk.bf16.mxu0 %vm120_vm0, %v16255_v14  ;;  %v16424_v14 = vld [vmem:[%s17321_s0] sm:$0xff] }
0x1fb6   :  { %13437 = vmatmul.mubr.msk.bf16.vlgmr.msra.gmra.mrb[40].mxu0 %vm120_vm0, %v16260_v44 }
0x2071   :  { %v7549_v49 = vpop.f32.mrb[28].mxu0 }
0x2072   :  { %v13403_v58 = vpop.f32.mrb[29].mxu0 }
0x2073   :  { %v7552_v60 = vpop.f32.mrb[30].mxu0 }
0x2074   :  { %v13947_v51 = vpack.c.bf16 %v7552_v60, %v7549_v49  ;;  %v13404_v7 = vpop.f32.mrb[31].mxu0 }
0x2075   :  { %v14135_v7 = vld [vmem:[%s17295_s10 + $0x1c0] sm:$0xff]  }
0x2076   :  { %13948 = vmatpush3.bf16.msra.mxu1 %v13947_v51  ;;  %13448 = vmatprep.subr.bf16.mxu0 %v14135_v7 }
0x2077   :  { %13949 = vmatprep.subr.bf16.mxu1 %v14495_v18  ;;  %13449 = vmatpush3.bf16.msra.mxu0 %v14135_v7 }
0x2079   :  { %v7557_v22 = vpop.f32.mrb[32].mxu0 }
0x207a   :  { %v13407_v41 = vpop.f32.mrb[33].mxu0 }
0x207b   :  { %v7560_v15 = vpop.f32.mrb[34].mxu0 }
0x207c   :  { %v13950_v8 = vpack.c.bf16 %v7560_v15, %v7557_v22  ;;  %v13408_v26 = vpop.f32.mrb[35].mxu0  ;;  %v14136_v22 = vld [vmem:[%s17295_s10 + $0x1c8] sm:$0xff]  }
0x207d   :  { %13450 = vmatprep.subr.bf16.mxu0 %v14136_v22  ;;  %v11324_v15 = vld [vmem:[%s17298_s13 + $0xe] ss:$0 sm:$0xff] }
0x207e   :  { %13951 = vmatpush3.bf16.msra.mxu1 %v13950_v8  ;;  %13451 = vmatpush3.bf16.msra.mxu0 %v14136_v22 }
0x207f   :  { %13421 = vmatprep.subr.mxu1 %v14494_v6  ;;  %13477 = vmatprep.subr.bf16.mxu0 %v14494_v6 }
0x2081   :  { %v7565_v12 = vpop.f32.mrb[36].mxu0 }
0x2082   :  { %13422 = vmatpush3.msra.mxu1 %v7565_v12  ;;  %v13411_v48 = vpop.f32.mrb[37].mxu0 }
0x2083   :  { %13424 = vmatmul.mubr.msk.f32.vlgmr.msra.gmra.mrb[42].mxu1 %vm396_vm3, %v16424_v14  ;;  %v7568_v53 = vpop.f32.mrb[38].mxu0  ;;  %13440 = vmatprep.subr.bf16.mxu1 %v14132_v11 }
0x2084   :  { %13426 = vmatprep.mubr.msk.f32.mxu1 %vm14493_vm1, %v14494_v6  ;;  %v13412_v56 = vpop.f32.mrb[39].mxu0  ;;  %13441 = vmatpush3.bf16.msra.mxu1 %v14132_v11 }
0x2085   :  { %13442 = vmatprep.subr.bf16.mxu1 %v14134_v55 }
0x2087   :  { %13427 = vmatmul.mubr.msk.f32.gmra.mrb[44].mxu1 %vm396_vm3, %v16433_v43 }
0x2088   :  { %13429 = vmatprep.mubr.msk.f32.mxu1 %vm14493_vm1, %v14494_v6  ;;  %13443 = vmatpush3.bf16.msra.mxu1 %v14134_v55 }
0x2089   :  { %13952 = vmatprep.subr.bf16.mxu1 %v14495_v18  ;;  %v13438_v49 = vpop.f32.mrb[40].mxu0 }
0x208a   :  { %v7725_v58 = vpop.f32.mrb[41].mxu0 }
0x208b   :  { %13430 = vmatmul.mubr.msk.f32.gmra.mrb[46].mxu1 %vm396_vm3, %v16442_v40  ;;  %v13439_v60 = vpop.f32.mrb[42].mxu0 }
0x208c   :  { %v7728_v51 = vpop.f32.mrb[43].mxu0  ;;  %v14139_v60 = vld [vmem:[%s17295_s10 + $0x1e0] sm:$0xff]  }
0x2156   :  { %v7645_v17 = vpop.f32.mrb[42].mxu1 }
0x2157   :  { %v7646_v61 = vadd.f32 %v11303_v46, %v7645_v17  ;;  %v13425_v27 = vpop.f32.mrb[43].mxu1 }
0x2159   :  { %v7662_v25 = vmul.f32 0.1, %v7646_v61  ;;  %vm7659_vm11 = vcmp.ge.f32.partialorder %v7646_v61, 0.0 }
0x215a   :  { %v7650_v29 = vpop.f32.mrb[44].mxu1 }
0x215b   :  { %v7651_v50 = vadd.f32 %v11303_v46, %v7650_v29  ;;  %v13428_v38 = vpop.f32.mrb[45].mxu1  ;;  %v7665_v1 = vsel %vm7659_vm11, %v7646_v61, %v7662_v25 }
0x215d   :  { %vm7660_vm13 = vcmp.ge.f32.partialorder %v7651_v50, 0.0  ;;  %v7663_v35 = vmul.f32 0.1, %v7651_v50 }
0x215e   :  { %v7655_v42 = vpop.f32.mrb[46].mxu1 }
0x215f   :  { %v7666_v28 = vsel %vm7660_vm13, %v7651_v50, %v7663_v35  ;;  %v7656_v44 = vadd.f32 %v11303_v46, %v7655_v42  ;;  %v13431_v16 = vpop.f32.mrb[47].mxu1 }
0x2160   :  { %v7677_v19 = vpack.c.bf16 %v7666_v28, %v7665_v1 }
0x2161   :  { %vm7661_vm14 = vcmp.ge.f32.partialorder %v7656_v44, 0.0  ;;  %v7664_v37 = vmul.f32 0.1, %v7656_v44 }
0x2162   :  { %13444 = vmatprep.mubr.msk.bf16.mxu1 %vm120_vm0, %v7677_v19 }
0x2163   :  { %v7667_v5 = vsel %vm7661_vm14, %v7656_v44, %v7664_v37 }
0x2164   :  { %v7678_v4 = vpack.c.bf16 %v7667_v5, %v7667_v5 }
0x2166   :  { %13445 = vmatmul.mubr.msk.bf16.vlgmr.msra.gmra.mrb[48].mxu1 %vm120_vm0, %v7678_v4 }
0x2167   :  { %13462 = vmatprep.mubr.msk.f32.mxu1 %vm14493_vm1, %v14494_v6 }
0x2239   :  { %v13446_v41 = vpop.f32.mrb[48].mxu1 }
0x223a   :  { %v7800_v8 = vadd.f32 %v13446_v41, %v13438_v49  ;;  %v7791_v26 = vpop.f32.mrb[49].mxu1 }
0x223b   :  { %v7792_v12 = vadd.f32 %v7791_v26, %v7725_v58  ;;  %v13447_v48 = vpop.f32.mrb[50].mxu1 }
0x223c   :  { %v7815_v53 = vadd.f32 %v11324_v15, %v7800_v8  ;;  %v7794_v56 = vpop.f32.mrb[51].mxu1  ;;  %v14140_v8 = vld [vmem:[%s17295_s10 + $0x1e8] sm:$0xff]  }
0x223d   :  { %v7813_v45 = vadd.f32 %v11324_v15, %v7792_v12  ;;  %v7795_v11 = vadd.f32 %v7794_v56, %v7728_v51 }
0x223e   :  { %v7818_v55 = vmax.f32 %v7815_v53, 0.0 }
0x223f   :  { %v7814_v54 = vadd.f32 %v11324_v15, %v7795_v11  ;;  %v7816_v46 = vmax.f32 %v7813_v45, 0.0 }
0x2240   :  { %v7825_v27 = vpack.c.bf16 %v7818_v55, %v7818_v55 }
0x2241   :  { %v7817_v17 = vmax.f32 %v7814_v54, 0.0 }
0x2243   :  { %v7824_v61 = vpack.c.bf16 %v7817_v17, %v7816_v46 }
0x2245   :  { %13452 = vmatprep.mubr.msk.bf16.mxu0 %vm120_vm0, %v7824_v61 }
0x2246   :  { %13453 = vmatmul.mubr.msk.bf16.vlgmr.msra.gmra.mrb[44].mxu0 %vm120_vm0, %v7825_v27 }
0x2247   :  { %13481 = vmatprep.mubr.msk.bf16.mxu0 %vm14493_vm1, %v14494_v6 }
0x2319   :  { %v13454_v29 = vpop.f32.mrb[44].mxu0 }
0x231a   :  { %v7878_v25 = vpop.f32.mrb[45].mxu0 }
0x231b   :  { %v13455_v50 = vpop.f32.mrb[46].mxu0 }
0x231c   :  { %v7881_v38 = vpop.f32.mrb[47].mxu0 }
0x231d   :  { %v13953_v35 = vpack.c.bf16 %v7881_v38, %v7878_v25 }
0x231f   :  { %13954 = vmatpush3.bf16.msra.mxu1 %v13953_v35 }
0x2320   :  { %13460 = vmatprep.subr.mxu1 %v14494_v6 }
0x2323   :  { %13461 = vmatpush3.msra.mxu1 %v13454_v29 }
0x2324   :  { %13463 = vmatmul.mubr.msk.f32.vlgmr.msra.gmra.mrb[52].mxu1 %vm182_vm2, %v16340_v10  ;;  %13955 = vmatprep.subr.bf16.mxu1 %v14495_v18  ;;  %v14137_v10 = vld [vmem:[%s17295_s10 + $0x1d0] sm:$0xff]  }
0x2325   :  { %13465 = vmatprep.mubr.msk.f32.mxu1 %vm14493_vm1, %v14494_v6  ;;  %13478 = vmatpush3.bf16.msra.mxu0 %v14137_v10 }
0x2326   :  { %13479 = vmatprep.subr.bf16.mxu0 %v14494_v6 }
0x2328   :  { %13466 = vmatmul.mubr.msk.f32.gmra.mrb[54].mxu1 %vm182_vm2, %v16349_v47  ;;  %v14138_v47 = vld [vmem:[%s17295_s10 + $0x1d8] sm:$0xff]  }
0x2329   :  { %13468 = vmatprep.mubr.msk.f32.mxu1 %vm14493_vm1, %v14494_v6  ;;  %13480 = vmatpush3.bf16.msra.mxu0 %v14138_v47 }
0x232a   :  { %13512 = vmatprep.subr.bf16.mxu0 %v14494_v6 }
0x232c   :  { %13469 = vmatmul.mubr.msk.f32.gmra.mrb[56].mxu1 %vm182_vm2, %v16358_v20  ;;  %v11334_v20 = vld [vmem:[%s17296_s11 + $0x1c] ss:$0 sm:$0xff] }
0x232d   :  { %13471 = vmatprep.mubr.msk.f32.mxu1 %vm14493_vm1, %v14494_v6 }
0x2330   :  { %13472 = vmatmul.mubr.msk.f32.gmra.mrb[58].mxu1 %vm182_vm2, %v16367_v13 }
0x2331   :  { %13474 = vmatprep.mubr.msk.f32.mxu1 %vm14493_vm1, %v14494_v6 }
0x2334   :  { %13475 = vmatmul.mubr.msk.f32.gmra.mrb[60].mxu1 %vm182_vm2, %v16376_v59 }
0x2335   :  { %13503 = vmatprep.mubr.msk.f32.mxu1 %vm14493_vm1, %v14494_v6 }
0x23f7   :  { %v7966_v13 = vpop.f32.mrb[52].mxu1 }
0x23f8   :  { %v7967_v59 = vadd.f32 %v11334_v20, %v7966_v13  ;;  %v13464_v42 = vpop.f32.mrb[53].mxu1 }
0x23fa   :  { %v7995_v28 = vmul.f32 0.1, %v7967_v59  ;;  %vm7990_vm15 = vcmp.ge.f32.partialorder %v7967_v59, 0.0 }
0x23fb   :  { %v7971_v1 = vpop.f32.mrb[54].mxu1 }
0x23fc   :  { %v7972_v44 = vadd.f32 %v11334_v20, %v7971_v1  ;;  %v13467_v16 = vpop.f32.mrb[55].mxu1  ;;  %v8000_v5 = vsel %vm7990_vm15, %v7967_v59, %v7995_v28 }
0x23fe   :  { %vm7991_vm4 = vcmp.ge.f32.partialorder %v7972_v44, 0.0  ;;  %v7996_v19 = vmul.f32 0.1, %v7972_v44 }
0x23ff   :  { %v7976_v37 = vpop.f32.mrb[56].mxu1 }
0x2400   :  { %v8001_v4 = vsel %vm7991_vm4, %v7972_v44, %v7996_v19  ;;  %v7977_v49 = vadd.f32 %v11334_v20, %v7976_v37  ;;  %v13470_v58 = vpop.f32.mrb[57].mxu1 }
0x2401   :  { %v8010_v51 = vpack.c.bf16 %v8001_v4, %v8000_v5 }
0x2402   :  { %v7997_v22 = vmul.f32 0.1, %v7977_v49  ;;  %vm7992_vm5 = vcmp.ge.f32.partialorder %v7977_v49, 0.0 }
0x2403   :  { %v7981_v7 = vpop.f32.mrb[58].mxu1  ;;  %13482 = vmatmul.mubr.msk.bf16.vlgmr.msra.gmra.mrb[48].mxu0 %vm120_vm0, %v8010_v51 }
0x2404   :  { %v7982_v41 = vadd.f32 %v11334_v20, %v7981_v7  ;;  %v13473_v15 = vpop.f32.mrb[59].mxu1  ;;  %13485 = vmatprep.mubr.msk.bf16.mxu0 %vm14493_vm1, %v14494_v6  ;;  %13513 = vmatpush3.bf16.msra.mxu0 %v14139_v60  ;;  %v8002_v48 = vsel %vm7992_vm5, %v7977_v49, %v7997_v22  ;;  %v14141_v60 = vld [vmem:[%s17297_s12 + $0x1f0] sm:$0xff]   ;;  %v14142_v7 = vld [vmem:[%s17297_s12 + $0x1f8] sm:$0xff]  }
0x2405   :  { %13514 = vmatprep.subr.bf16.mxu0 %v14494_v6 }
0x2406   :  { %vm7993_vm6 = vcmp.ge.f32.partialorder %v7982_v41, 0.0  ;;  %v7998_v26 = vmul.f32 0.1, %v7982_v41 }
0x2407   :  { %v7986_v12 = vpop.f32.mrb[60].mxu1 }
0x2408   :  { %v8003_v53 = vsel %vm7993_vm6, %v7982_v41, %v7998_v26  ;;  %v7987_v56 = vadd.f32 %v11334_v20, %v7986_v12  ;;  %13515 = vmatpush3.bf16.msra.mxu0 %v14140_v8  ;;  %v13476_v45 = vpop.f32.mrb[61].mxu1  ;;  %v10790_v8 = vld [vmem:[%s17298_s13 + $0x2] ss:$0 sm:$0xff]  ;;  %v14143_v26 = vld [vmem:[%s17297_s12 + $0x210] sm:$0xff]  }
0x2409   :  { %v8011_v11 = vpack.c.bf16 %v8003_v53, %v8002_v48  ;;  %v16572_v12 = vadd.f32 %v10790_v8, %v15188_v9  ;;  %v16582_v48 = vadd.f32 %v10790_v8, %v15182_v62  ;;  %v14144_v9 = vld [vmem:[%s17297_s12 + $0x218] sm:$0xff]   ;;  %v14145_v62 = vld [vmem:[%s17295_s10 + $0x1f0] sm:$0xff]  }
0x240a   :  { %v7999_v54 = vmul.f32 0.1, %v7987_v56  ;;  %vm7994_vm7 = vcmp.ge.f32.partialorder %v7987_v56, 0.0  ;;  %v14146_v45 = vld [vmem:[%s17295_s10 + $0x1f8] sm:$0xff]  }
0x240b   :  { %13486 = vmatmul.mubr.msk.bf16.gmra.mrb[52].mxu0 %vm120_vm0, %v8011_v11 }
0x240c   :  { %13489 = vmatprep.mubr.msk.bf16.mxu0 %vm14493_vm1, %v14494_v6  ;;  %v8004_v55 = vsel %vm7994_vm7, %v7987_v56, %v7999_v54 }
0x240d   :  { %v8012_v46 = vpack.c.bf16 %v8004_v55, %v8004_v55  ;;  %v14147_v55 = vld [vmem:[%s17297_s12 + $0x1e0] sm:$0xff]  }
0x240e   :  { %13555 = vmatprep.subr.bf16.mxu0 %v14147_v55 }
0x2413   :  { %13490 = vmatmul.mubr.msk.bf16.gmra.mrb[56].mxu0 %vm120_vm0, %v8012_v46 }
0x2414   :  { %13516 = vmatprep.mubr.msk.bf16.mxu0 %vm14493_vm1, %v14494_v6 }
0x241b   :  { %13517 = vmatmul.mubr.msk.bf16.vlgmr.msra.gmra.mrb[60].mxu0 %vm120_vm0, %v8010_v51 }
0x241c   :  { %13520 = vmatprep.mubr.msk.bf16.mxu0 %vm14493_vm1, %v14494_v6  ;;  %13556 = vmatpush3.bf16.msra.mxu0 %v14147_v55 }
0x2423   :  { %13521 = vmatmul.mubr.msk.bf16.gmra.mrb[64].mxu0 %vm120_vm0, %v8011_v11  ;;  %v101_v11 = vld [vmem:[%s17294_s9 + $0x10] sm:$0xff] }
0x2424   :  { %13524 = vmatprep.mubr.msk.bf16.mxu0 %vm14493_vm1, %v14494_v6  ;;  %v16616_v54 = vpack.c.bf16 %v101_v11, %v101_v11 }
0x242b   :  { %13525 = vmatmul.mubr.msk.bf16.gmra.mrb[72].mxu0 %vm120_vm0, %v8012_v46  ;;  %v14148_v46 = vld [vmem:[%s17297_s12 + $0x1e8] sm:$0xff]  }
0x242c   :  { %13557 = vmatprep.subr.bf16.mxu0 %v14148_v46 }
0x242d   :  { %13558 = vmatpush3.bf16.msra.mxu0 %v14148_v46 }
0x24d6   :  { %v8068_v17 = vpop.f32.mrb[48].mxu0 }
0x24d7   :  { %v13483_v61 = vpop.f32.mrb[49].mxu0 }
0x24d8   :  { %v8071_v27 = vpop.f32.mrb[50].mxu0  ;;  %v11350_v61 = vld [vmem:[%s17296_s11 + $0x1d] ss:$0 sm:$0xff] }
0x24d9   :  { %v13956_v29 = vpack.c.bf16 %v8071_v27, %v8068_v17  ;;  %v13484_v25 = vpop.f32.mrb[51].mxu0  ;;  %v14149_v17 = vld [vmem:[%s17297_s12 + $0x200] sm:$0xff]  }
0x24da   :  { %13571 = vmatprep.subr.bf16.mxu0 %v14149_v17 }
0x24db   :  { %13957 = vmatpush3.bf16.msra.mxu1 %v13956_v29 }
0x24dc   :  { %13958 = vmatprep.subr.bf16.mxu1 %v14495_v18 }
0x24de   :  { %v8076_v50 = vpop.f32.mrb[52].mxu0 }
0x24df   :  { %v13487_v38 = vpop.f32.mrb[53].mxu0 }
0x24e0   :  { %v8079_v35 = vpop.f32.mrb[54].mxu0 }
0x24e1   :  { %v13959_v10 = vpack.c.bf16 %v8079_v35, %v8076_v50  ;;  %v13488_v47 = vpop.f32.mrb[55].mxu0 }
0x24e3   :  { %13960 = vmatpush3.bf16.msra.mxu1 %v13959_v10 }
0x24e4   :  { %13501 = vmatprep.subr.mxu1 %v14494_v6 }
0x24e6   :  { %v8084_v20 = vpop.f32.mrb[56].mxu0 }
0x24e7   :  { %13502 = vmatpush3.msra.mxu1 %v8084_v20  ;;  %v13491_v13 = vpop.f32.mrb[57].mxu0 }
0x24e8   :  { %13504 = vmatmul.mubr.msk.f32.vlgmr.msra.gmra.mrb[62].mxu1 %vm396_vm3, %v16424_v14  ;;  %v8087_v59 = vpop.f32.mrb[58].mxu0  ;;  %13961 = vmatprep.subr.bf16.mxu1 %v14495_v18 }
0x24e9   :  { %13506 = vmatprep.mubr.msk.f32.mxu1 %vm14493_vm1, %v14494_v6  ;;  %v13492_v42 = vpop.f32.mrb[59].mxu0 }
0x24ec   :  { %13507 = vmatmul.mubr.msk.f32.gmra.mrb[64].mxu1 %vm396_vm3, %v16433_v43 }
0x24ed   :  { %13509 = vmatprep.mubr.msk.f32.mxu1 %vm14493_vm1, %v14494_v6 }
0x24ee   :  { %v8238_v1 = vpop.f32.mrb[60].mxu0 }
0x24ef   :  { %v13518_v28 = vpop.f32.mrb[61].mxu0 }
0x24f0   :  { %13510 = vmatmul.mubr.msk.f32.gmra.mrb[66].mxu1 %vm396_vm3, %v16442_v40  ;;  %v8241_v44 = vpop.f32.mrb[62].mxu0 }
0x24f1   :  { %v13962_v16 = vpack.c.bf16 %v8241_v44, %v8238_v1  ;;  %v13519_v19 = vpop.f32.mrb[63].mxu0  ;;  %13538 = vmatprep.mubr.msk.f32.mxu1 %vm14493_vm1, %v14494_v6 }
0x24f3   :  { %13963 = vmatpush3.bf16.msra.mxu1 %v13962_v16 }
0x24f4   :  { %13964 = vmatprep.subr.bf16.mxu1 %v14495_v18 }
0x24f6   :  { %v8246_v37 = vpop.f32.mrb[64].mxu0 }
0x24f7   :  { %v13522_v5 = vpop.f32.mrb[65].mxu0 }
0x24f8   :  { %v8249_v4 = vpop.f32.mrb[66].mxu0  ;;  %v11364_v5 = vld [vmem:[%s17296_s11 + $0x1e] ss:$0 sm:$0xff] }
0x24f9   :  { %v13965_v49 = vpack.c.bf16 %v8249_v4, %v8246_v37  ;;  %v13523_v58 = vpop.f32.mrb[67].mxu0  ;;  %v14150_v37 = vld [vmem:[%s17297_s12 + $0x208] sm:$0xff]  }
0x24fb   :  { %13966 = vmatpush3.bf16.msra.mxu1 %v13965_v49 }
0x24fc   :  { %13536 = vmatprep.subr.mxu1 %v14494_v6 }
0x24fe   :  { %v8254_v51 = vpop.f32.mrb[72].mxu0 }
0x24ff   :  { %v13526_v22 = vpop.f32.mrb[73].mxu0  ;;  %13537 = vmatpush3.msra.mxu1 %v8254_v51 }
0x2500   :  { %v8257_v41 = vpop.f32.mrb[74].mxu0  ;;  %13539 = vmatmul.mubr.msk.f32.vlgmr.msra.gmra.mrb[68].mxu1 %vm396_vm3, %v16424_v14  ;;  %13547 = vmatprep.subr.bf16.mxu1 %v14141_v60  ;;  %v16577_v14 = vadd.f32 %v10790_v8, %v15185_v0  ;;  %v8369_v0 = vpack.c.bf16 %v16582_v48, %v16582_v48 }
0x2501   :  { %v13527_v15 = vpop.f32.mrb[75].mxu0  ;;  %13541 = vmatprep.mubr.msk.f32.mxu1 %vm14493_vm1, %v14494_v6  ;;  %13548 = vmatpush3.bf16.msra.mxu1 %v14141_v60 }
0x2502   :  { %13549 = vmatprep.subr.bf16.mxu1 %v14142_v7  ;;  %v8368_v53 = vpack.c.bf16 %v16572_v12, %v16577_v14 }
0x2504   :  { %13542 = vmatmul.mubr.msk.f32.gmra.mrb[70].mxu1 %vm396_vm3, %v16433_v43  ;;  %v99_v43 = vld [vmem:[%s17294_s9] sm:$0xff] }
0x2505   :  { %13544 = vmatprep.mubr.msk.f32.mxu1 %vm14493_vm1, %v14494_v6  ;;  %13550 = vmatpush3.bf16.msra.mxu1 %v14142_v7 }
0x2506   :  { %13563 = vmatprep.subr.bf16.mxu1 %v14143_v26 }
0x2508   :  { %13545 = vmatmul.mubr.msk.f32.gmra.mrb[72].mxu1 %vm396_vm3, %v16442_v40  ;;  %v100_v40 = vld [vmem:[%s17294_s9 + $0x8] sm:$0xff] }
0x2509   :  { %13551 = vmatprep.mubr.msk.bf16.mxu1 %vm120_vm0, %v8368_v53  ;;  %v16605_v56 = vpack.c.bf16 %v100_v40, %v99_v43 }
0x250c   :  { %13552 = vmatmul.mubr.msk.bf16.vlgmr.msra.gmra.mrb[76].mxu1 %vm120_vm0, %v8369_v0 }
0x250d   :  { %13564 = vmatpush3.bf16.msra.mxu1 %v14143_v26  ;;  %13567 = vmatprep.mubr.msk.bf16.mxu1 %vm120_vm0, %v8368_v53 }
0x250e   :  { %13565 = vmatprep.subr.bf16.mxu1 %v14144_v9 }
0x2511   :  { %13566 = vmatpush3.bf16.msra.mxu1 %v14144_v9 }
0x2512   :  { %13579 = vmatprep.subr.bf16.mxu1 %v14145_v62 }
0x2514   :  { %13568 = vmatmul.mubr.msk.bf16.vlgmr.msra.gmra.mrb[80].mxu1 %vm120_vm0, %v8369_v0 }
0x2515   :  { %13580 = vmatpush3.bf16.msra.mxu1 %v14145_v62  ;;  %13583 = vmatprep.mubr.msk.bf16.mxu1 %vm120_vm0, %v16605_v56 }
0x2516   :  { %13581 = vmatprep.subr.bf16.mxu1 %v14146_v45 }
0x2519   :  { %13582 = vmatpush3.bf16.msra.mxu1 %v14146_v45 }
0x251c   :  { %13584 = vmatmul.mubr.msk.bf16.vlgmr.msra.gmra.mrb[84].mxu1 %vm120_vm0, %v16616_v54 }
0x25bb   :  { %v8164_v27 = vpop.f32.mrb[62].mxu1 }
0x25bc   :  { %v8165_v29 = vadd.f32 %v11350_v61, %v8164_v27  ;;  %v13505_v25 = vpop.f32.mrb[63].mxu1 }
0x25be   :  { %v8181_v50 = vmul.f32 0.1, %v8165_v29  ;;  %vm8178_vm3 = vcmp.ge.f32.partialorder %v8165_v29, 0.0 }
0x25bf   :  { %v8169_v38 = vpop.f32.mrb[64].mxu1 }
0x25c0   :  { %v8170_v35 = vadd.f32 %v11350_v61, %v8169_v38  ;;  %v13508_v10 = vpop.f32.mrb[65].mxu1  ;;  %v8184_v47 = vsel %vm8178_vm3, %v8165_v29, %v8181_v50 }
0x25c2   :  { %vm8179_vm8 = vcmp.ge.f32.partialorder %v8170_v35, 0.0  ;;  %v8182_v20 = vmul.f32 0.1, %v8170_v35 }
0x25c3   :  { %v8174_v13 = vpop.f32.mrb[66].mxu1 }
0x25c4   :  { %v8185_v59 = vsel %vm8179_vm8, %v8170_v35, %v8182_v20  ;;  %v8175_v42 = vadd.f32 %v11350_v61, %v8174_v13  ;;  %v13511_v1 = vpop.f32.mrb[67].mxu1  ;;  %v16670_v20 = vld [vmem:[%s17323_s25 + $0x8] sm:$0xff]  ;;  %v16679_v13 = vld [vmem:[%s17323_s25 + $0x10] sm:$0xff]  ;;  %vm10534_vm8 = vcmask 0  }
0x25c5   :  { %v8366_v28 = vpack.c.bf16 %v8185_v59, %v8184_v47  ;;  %v16661_v47 = vld [vmem:[%s17323_s25] sm:$0xff]  ;;  %v16688_v59 = vld [vmem:[%s17323_s25 + $0x18] sm:$0xff]  ;;  %v16706_v1 = vld [vmem:[%s17323_s25 + $0x28] sm:$0xff] }
0x25c6   :  { %vm8180_vm9 = vcmp.ge.f32.partialorder %v8175_v42, 0.0  ;;  %v8183_v44 = vmul.f32 0.1, %v8175_v42 }
0x25c7   :  { %13559 = vmatprep.mubr.msk.bf16.mxu0 %vm120_vm0, %v8366_v28  ;;  %v16715_v28 = vld [vmem:[%s17323_s25 + $0x30] sm:$0xff] }
0x25c8   :  { %v8186_v16 = vsel %vm8180_vm9, %v8175_v42, %v8183_v44  ;;  %v16697_v42 = vld [vmem:[%s17323_s25 + $0x20] sm:$0xff] }
0x25c9   :  { %v8367_v19 = vpack.c.bf16 %v8186_v16, %v8186_v16  ;;  %v14151_v44 = vld [vmem:[%s17295_s10 + $0x200] sm:$0xff]   ;;  %v14152_v16 = vld [vmem:[%s17295_s10 + $0x208] sm:$0xff]  }
0x25ca   :  { %13614 = vmatprep.subr.bf16.mxu1 %v14151_v44 }
0x25cb   :  { %13560 = vmatmul.mubr.msk.bf16.vlgmr.msra.gmra.mrb[68].mxu0 %vm120_vm0, %v8367_v19  ;;  %13615 = vmatpush3.bf16.msra.mxu1 %v14151_v44  ;;  %v11144_v19 = vld [vmem:[%s17298_s13 + $0xa] ss:$0 sm:$0xff] }
0x25cc   :  { %13572 = vmatpush3.bf16.msra.mxu0 %v14149_v17  ;;  %13616 = vmatprep.subr.bf16.mxu1 %v14152_v16 }
0x25cd   :  { %13573 = vmatprep.subr.bf16.mxu0 %v14150_v37 }
0x25cf   :  { %13617 = vmatpush3.bf16.msra.mxu1 %v14152_v16 }
0x25d0   :  { %13574 = vmatpush3.bf16.msra.mxu0 %v14150_v37  ;;  %13970 = vmatprep.subr.bf16.mxu1 %v14495_v18  ;;  %v16735_v37 = vadd.f32 %v11144_v19, %v16090_v33  ;;  %v11385_v33 = vld [vmem:[%s17298_s13 + $0xf] ss:$0 sm:$0xff] }
0x25d1   :  { %13967 = vmatprep.subr.bf16.mxu0 %v14495_v18 }
0x25d3   :  { %v8334_v4 = vpop.f32.mrb[68].mxu1 }
0x25d4   :  { %v8335_v49 = vadd.f32 %v11364_v5, %v8334_v4  ;;  %v13540_v58 = vpop.f32.mrb[69].mxu1  ;;  %v16739_v4 = vadd.f32 %v11144_v19, %v16092_v36 }
0x25d6   :  { %v8351_v51 = vmul.f32 0.1, %v8335_v49  ;;  %vm8348_vm10 = vcmp.ge.f32.partialorder %v8335_v49, 0.0 }
0x25d7   :  { %v8339_v60 = vpop.f32.mrb[70].mxu1 }
0x25d8   :  { %v8340_v7 = vadd.f32 %v11364_v5, %v8339_v60  ;;  %v13543_v22 = vpop.f32.mrb[71].mxu1  ;;  %v8354_v8 = vsel %vm8348_vm10, %v8335_v49, %v8351_v51  ;;  %v10265_v49 = vand.u32 2147483647, %v16735_v37  ;;  %v10266_v60 = vand.u32 2147483647, %v16739_v4 }
0x25da   :  { %vm8349_vm11 = vcmp.ge.f32.partialorder %v8340_v7, 0.0  ;;  %v8352_v41 = vmul.f32 0.1, %v8340_v7  ;;  %v10268_v51 = vsub.f32 0.0, %v10265_v49  ;;  %v10269_v22 = vsub.f32 0.0, %v10266_v60 }
0x25db   :  { %v8344_v15 = vpop.f32.mrb[72].mxu1 }
0x25dc   :  { %v8355_v26 = vsel %vm8349_vm11, %v8340_v7, %v8352_v41  ;;  %v8345_v53 = vadd.f32 %v11364_v5, %v8344_v15  ;;  %v13546_v0 = vpop.f32.mrb[73].mxu1  ;;  %v10271_v41 = vmul.f32 1.442695, %v10268_v51 }
0x25dd   :  { %v8522_v9 = vpack.c.bf16 %v8355_v26, %v8354_v8 }
0x25de   :  { %vm8350_vm13 = vcmp.ge.f32.partialorder %v8345_v53, 0.0  ;;  %v8353_v62 = vmul.f32 0.1, %v8345_v53 }
0x25df   :  { %v16641_v43 = vpop.f32.mrb[76].mxu1  ;;  %13575 = vmatprep.mubr.msk.bf16.mxu0 %vm120_vm0, %v8522_v9 }
0x25e0   :  { %v8356_v40 = vsel %vm8350_vm13, %v8345_v53, %v8353_v62  ;;  %v16644_v45 = vpop.f32.mrb[77].mxu1 }
0x25e1   :  { %v8523_v11 = vpack.c.bf16 %v8356_v40, %v8356_v40  ;;  %v13554_v55 = vpop.f32.mrb[78].mxu1 }
0x25e2   :  { %v16646_v46 = vpop.f32.mrb[79].mxu1 }
0x25e3   :  { %13576 = vmatmul.mubr.msk.bf16.vlgmr.msra.gmra.mrb[76].mxu0 %vm120_vm0, %v8523_v11 }
0x25e4   :  { %13593 = vmatprep.mubr.msk.f32.mxu0 %vm14493_vm1, %v14494_v6 }
0x25e7   :  { %v16651_v17 = vpop.f32.mrb[80].mxu1 }
0x25e8   :  { %v16653_v61 = vpop.f32.mrb[81].mxu1 }
0x25e9   :  { %v13570_v27 = vpop.f32.mrb[82].mxu1 }
0x25ea   :  { %v16655_v29 = vpop.f32.mrb[83].mxu1 }
0x25ef   :  { %v13585_v25 = vpop.f32.mrb[84].mxu1 }
0x25f0   :  { %v8720_v50 = vpop.f32.mrb[85].mxu1 }
0x25f1   :  { %v13586_v38 = vpop.f32.mrb[86].mxu1 }
0x25f2   :  { %v8723_v35 = vpop.f32.mrb[87].mxu1 }
0x25f3   :  { %v13968_v10 = vpack.c.bf16 %v8723_v35, %v8720_v50 }
0x25f5   :  { %13969 = vmatpush3.bf16.msra.mxu0 %v13968_v10 }
0x25f6   :  { %13591 = vmatprep.subr.mxu0 %v14494_v6 }
0x25f9   :  { %13592 = vmatpush3.msra.mxu0 %v13585_v25 }
0x25fa   :  { %13594 = vmatmul.mubr.msk.f32.vlgmr.msra.gmra.mrb[80].mxu0 %vm182_vm2, %v16661_v47 }
0x25fb   :  { %13596 = vmatprep.mubr.msk.f32.mxu0 %vm14493_vm1, %v14494_v6 }
0x25fe   :  { %13597 = vmatmul.mubr.msk.f32.gmra.mrb[82].mxu0 %vm182_vm2, %v16670_v20 }
0x25ff   :  { %13599 = vmatprep.mubr.msk.f32.mxu0 %vm14493_vm1, %v14494_v6 }
0x2602   :  { %13600 = vmatmul.mubr.msk.f32.gmra.mrb[84].mxu0 %vm182_vm2, %v16679_v13 }
0x2603   :  { %13602 = vmatprep.mubr.msk.f32.mxu0 %vm14493_vm1, %v14494_v6 }
0x2606   :  { %13603 = vmatmul.mubr.msk.f32.gmra.mrb[86].mxu0 %vm182_vm2, %v16688_v59 }
0x2607   :  { %13605 = vmatprep.mubr.msk.f32.mxu0 %vm14493_vm1, %v14494_v6 }
0x260a   :  { %13606 = vmatmul.mubr.msk.f32.gmra.mrb[88].mxu0 %vm182_vm2, %v16697_v42 }
0x260b   :  { %13608 = vmatprep.mubr.msk.f32.mxu0 %vm14493_vm1, %v14494_v6 }
0x260e   :  { %13609 = vmatmul.mubr.msk.f32.gmra.mrb[90].mxu0 %vm182_vm2, %v16706_v1 }
0x260f   :  { %13611 = vmatprep.mubr.msk.f32.mxu0 %vm14493_vm1, %v14494_v6 }
0x2612   :  { %13612 = vmatmul.mubr.msk.f32.gmra.mrb[92].mxu0 %vm182_vm2, %v16715_v28 }
0x2613   :  { %13653 = vmatprep.mubr.msk.bf16.mxu0 %vm120_vm0, %v16605_v56  ;;  %v16732_v56 = vadd.f32 %v11144_v19, %v16088_v34  ;;  %v10273_v34 = vmul.f32 1.442695, %v10269_v22 }
0x2615   :  { %v10267_v5 = vand.u32 2147483647, %v16732_v56 }
0x2617   :  { %v10270_v58 = vsub.f32 0.0, %v10267_v5 }
0x2619   :  { %v10275_v7 = vmul.f32 1.442695, %v10270_v58 }
0x261b   :  { %14171 = vpow2.f32 %v10275_v7 }
0x261c   :  { %14173 = vpow2.f32 %v10271_v41 }
0x261d   :  { %14175 = vpow2.f32 %v10273_v34 }
0x2625   :  { %v14172_v27 = vpop.eup %14171 }
0x2626   :  { %v14174_v25 = vpop.eup %14173 }
0x2627   :  { %v14176_v50 = vpop.eup %14175  ;;  %v10277_v38 = vadd.f32 1.0, %v14174_v25 }
0x269e   :  { %v13561_v15 = vpop.f32.mrb[68].mxu0 }
0x269f   :  { %v8497_v8 = vadd.f32 %v13561_v15, %v16641_v43  ;;  %v8488_v36 = vpop.f32.mrb[69].mxu0 }
0x26a0   :  { %v8489_v26 = vadd.f32 %v8488_v36, %v16644_v45  ;;  %v13562_v53 = vpop.f32.mrb[70].mxu0 }
0x26a1   :  { %v16748_v0 = vadd.f32 %v11385_v33, %v8497_v8  ;;  %v8491_v9 = vpop.f32.mrb[71].mxu0 }
0x26a2   :  { %v16750_v62 = vadd.f32 %v11385_v33, %v8489_v26  ;;  %v8492_v40 = vadd.f32 %v8491_v9, %v16646_v46  ;;  %v10279_v46 = vadd.f32 1.0, %v14172_v27  ;;  %v10262_v26 = vmax.f32 %v16735_v37, 0.0  ;;  %v16785_v37 = vld [vmem:[%s17296_s11 + $0x1f] ss:$0 sm:$0xff] }
0x26a3   :  { %v10505_v11 = vadd.f32 %v16748_v0, %v16582_v48  ;;  %v10278_v48 = vadd.f32 1.0, %v14176_v50 }
0x26a4   :  { %v16755_v55 = vadd.f32 %v11385_v33, %v8492_v40  ;;  %v10503_v43 = vadd.f32 %v16750_v62, %v16577_v14  ;;  %14177 = vlog2.f32 %v10279_v46  ;;  %v11403_v14 = vld [vmem:[%s17298_s13 + $0x10] ss:$0 sm:$0xff] }
0x26a5   :  { %10508 = vst.msk [vmem:[#allocation2 + $0x10] sm:$0xff] %vm120_vm0, %v10505_v11  ;;  %14179 = vlog2.f32 %v10277_v38 }
0x26a6   :  { %v10504_v45 = vadd.f32 %v16755_v55, %v16572_v12  ;;  %10506 = vst.msk [vmem:[#allocation2] sm:$0xff] %vm120_vm0, %v10503_v43  ;;  %14181 = vlog2.f32 %v10278_v48 }
0x26a8   :  { %10507 = vst.msk [vmem:[#allocation2 + $0x8] sm:$0xff] %vm120_vm0, %v10504_v45  ;;  %v10263_v45 = vmax.f32 %v16739_v4, 0.0 }
0x26ae   :  { %v14178_v19 = vpop.eup %14177 }
0x26af   :  { %v14180_v51 = vpop.eup %14179  ;;  %v10285_v22 = vmul.f32 0.6931472, %v14178_v19 }
0x26b0   :  { %v10281_v33 = vmul.f32 0.6931472, %v14180_v51 }
0x26b2   :  { %v10286_v43 = vadd.f32 %v10281_v33, %v10262_v26 }
0x26b6   :  { %v13577_v35 = vpop.f32.mrb[76].mxu0 }
0x26b7   :  { %v8645_v12 = vadd.f32 %v13577_v35, %v16651_v17  ;;  %v8636_v10 = vpop.f32.mrb[77].mxu0  ;;  %v14182_v17 = vpop.eup %14181 }
0x26b8   :  { %v8637_v44 = vadd.f32 %v8636_v10, %v16653_v61  ;;  %v13578_v16 = vpop.f32.mrb[78].mxu0  ;;  %v10264_v61 = vmax.f32 %v16732_v56, 0.0  ;;  %v10283_v9 = vmul.f32 0.6931472, %v14182_v17  ;;  %v10289_v56 = vmul.f32 0.9, %v10286_v43 }
0x26b9   :  { %v16769_v5 = vadd.f32 %v11403_v14, %v8645_v12  ;;  %v8639_v49 = vpop.f32.mrb[79].mxu0 }
0x26ba   :  { %v16771_v58 = vadd.f32 %v11403_v14, %v8637_v44  ;;  %v8640_v60 = vadd.f32 %v8639_v49, %v16655_v29  ;;  %v10288_v29 = vadd.f32 %v10285_v22, %v10264_v61  ;;  %v10287_v46 = vadd.f32 %v10283_v9, %v10263_v45 }
0x26bb   :  { %v10091_v7 = vand.u32 2147483647, %v16769_v5  ;;  %v10292_v48 = vadd.f32 0.1, %v10289_v56  ;;  %v10088_v43 = vmax.f32 %v16769_v5, 0.0 }
0x26bc   :  { %v10089_v41 = vand.u32 2147483647, %v16771_v58  ;;  %v16776_v34 = vadd.f32 %v11403_v14, %v8640_v60  ;;  %v10291_v25 = vmul.f32 0.9, %v10288_v29  ;;  %v10290_v38 = vmul.f32 0.9, %v10287_v46 }
0x26bd   :  { %v10094_v15 = vsub.f32 0.0, %v10091_v7  ;;  %v10295_v49 = vmul.f32 1.442695, %v10292_v48  ;;  %v10086_v56 = vmax.f32 %v16771_v58, 0.0 }
0x26be   :  { %v10092_v8 = vsub.f32 0.0, %v10089_v41  ;;  %v10090_v36 = vand.u32 2147483647, %v16776_v34  ;;  %v10294_v50 = vadd.f32 0.1, %v10291_v25 }
0x26bf   :  { %v10099_v53 = vmul.f32 1.442695, %v10094_v15  ;;  %v10293_v10 = vadd.f32 0.1, %v10290_v38 }
0x26c0   :  { %v10095_v40 = vmul.f32 1.442695, %v10092_v8  ;;  %v10093_v11 = vsub.f32 0.0, %v10090_v36  ;;  %v10299_v12 = vmul.f32 1.442695, %v10294_v50 }
0x26c1   :  { %14183 = vpow2.f32 %v10099_v53  ;;  %v10297_v22 = vmul.f32 1.442695, %v10293_v10 }
0x26c2   :  { %14185 = vpow2.f32 %v10095_v40  ;;  %v10097_v27 = vmul.f32 1.442695, %v10093_v11 }
0x26c4   :  { %14187 = vpow2.f32 %v10097_v27 }
0x26cb   :  { %v14184_v35 = vpop.eup %14183 }
0x26cc   :  { %v14186_v14 = vpop.eup %14185  ;;  %v10103_v44 = vadd.f32 1.0, %v14184_v35 }
0x26cd   :  { %v10101_v4 = vadd.f32 1.0, %v14186_v14  ;;  %v8808_v16 = vpop.f32.mrb[80].mxu0 }
0x26ce   :  { %v14188_v19 = vpop.eup %14187  ;;  %14189 = vlog2.f32 %v10103_v44  ;;  %v8809_v60 = vadd.f32 %v16785_v37, %v8808_v16  ;;  %v13595_v51 = vpop.f32.mrb[81].mxu0 }
0x26cf   :  { %14191 = vlog2.f32 %v10101_v4  ;;  %v10102_v7 = vadd.f32 1.0, %v14188_v19 }
0x26d0   :  { %14193 = vpow2.f32 %v10299_v12  ;;  %v8849_v17 = vmul.f32 0.1, %v8809_v60  ;;  %vm8842_vm14 = vcmp.ge.f32.partialorder %v8809_v60, 0.0  ;;  %v10087_v12 = vmax.f32 %v16776_v34, 0.0 }
0x26d1   :  { %14195 = vlog2.f32 %v10102_v7  ;;  %v8813_v41 = vpop.f32.mrb[82].mxu0 }
0x26d2   :  { %14197 = vpow2.f32 %v10295_v49  ;;  %v8814_v15 = vadd.f32 %v16785_v37, %v8813_v41  ;;  %v13598_v61 = vpop.f32.mrb[83].mxu0  ;;  %v8856_v36 = vsel %vm8842_vm14, %v8809_v60, %v8849_v17 }
0x26d3   :  { %14199 = vpow2.f32 %v10297_v22 }
0x26d4   :  { %vm8843_vm15 = vcmp.ge.f32.partialorder %v8814_v15, 0.0  ;;  %v8850_v33 = vmul.f32 0.1, %v8814_v15 }
0x26d5   :  { %v8818_v8 = vpop.f32.mrb[84].mxu0 }
0x26d6   :  { %v8857_v26 = vsel %vm8843_vm15, %v8814_v15, %v8850_v33  ;;  %v8819_v53 = vadd.f32 %v16785_v37, %v8818_v8  ;;  %v13601_v29 = vpop.f32.mrb[85].mxu0 }
0x26d7   :  { %v8868_v9 = vpack.c.bf16 %v8857_v26, %v8856_v36 }
0x26d8   :  { %v14190_v40 = vpop.eup %14189  ;;  %v8851_v27 = vmul.f32 0.1, %v8819_v53  ;;  %vm8844_vm4 = vcmp.ge.f32.partialorder %v8819_v53, 0.0 }
0x26d9   :  { %v14192_v11 = vpop.eup %14191  ;;  %v10109_v45 = vmul.f32 0.6931472, %v14190_v40  ;;  %v8823_v25 = vpop.f32.mrb[86].mxu0  ;;  %13618 = vmatprep.mubr.msk.bf16.mxu1 %vm120_vm0, %v8868_v9 }
0x26da   :  { %v16792_v46 = vpop.eup %14193  ;;  %v10105_v50 = vmul.f32 0.6931472, %v14192_v11  ;;  %v8824_v38 = vadd.f32 %v16785_v37, %v8823_v25  ;;  %v13604_v48 = vpop.f32.mrb[87].mxu0  ;;  %v8858_v19 = vsel %vm8844_vm4, %v8819_v53, %v8851_v27 }
0x26db   :  { %v14196_v35 = vpop.eup %14195  ;;  %v10112_v14 = vadd.f32 %v10109_v45, %v10088_v43  ;;  %v10321_v34 = vmul.f32 2.0, %v16792_v46 }
0x26dc   :  { %v16797_v10 = vpop.eup %14197  ;;  %v10110_v5 = vadd.f32 %v10105_v50, %v10086_v56  ;;  %v10107_v44 = vmul.f32 0.6931472, %v14196_v35  ;;  %vm8845_vm5 = vcmp.ge.f32.partialorder %v8824_v38, 0.0  ;;  %v8852_v4 = vmul.f32 0.1, %v8824_v38 }
0x26dd   :  { %v10115_v16 = vmul.f32 0.9, %v10112_v14  ;;  %v8828_v49 = vpop.f32.mrb[88].mxu0  ;;  %v16799_v60 = vpop.eup %14199  ;;  %v10319_v61 = vmul.f32 2.0, %v16797_v10  ;;  %v10324_v45 = vmul.f32 %v16792_v46, %v10321_v34  ;;  %v11126_v50 = vld [vmem:[%s17298_s13 + $0x9] ss:$0 sm:$0xff] }
0x26de   :  { %v10113_v58 = vmul.f32 0.9, %v10110_v5  ;;  %v10111_v51 = vadd.f32 %v10107_v44, %v10087_v12  ;;  %v8859_v7 = vsel %vm8845_vm5, %v8824_v38, %v8852_v4  ;;  %v8829_v22 = vadd.f32 %v16785_v37, %v8828_v49  ;;  %v13607_v41 = vpop.f32.mrb[89].mxu0 }
0x26df   :  { %v10118_v17 = vadd.f32 0.1, %v10115_v16  ;;  %v8869_v15 = vpack.c.bf16 %v8859_v7, %v8858_v19  ;;  %v10320_v29 = vmul.f32 2.0, %v16799_v60  ;;  %v10322_v27 = vmul.f32 %v16797_v10, %v10319_v61 }
0x26e0   :  { %v10116_v33 = vadd.f32 0.1, %v10113_v58  ;;  %v10114_v8 = vmul.f32 0.9, %v10111_v51  ;;  %v8853_v26 = vmul.f32 0.1, %v8829_v22  ;;  %v5742_v4 = vadd.f32 %v11126_v50, %v16082_v2 }
0x26e1   :  { %v10123_v36 = vmul.f32 1.442695, %v10118_v17  ;;  %v8833_v53 = vpop.f32.mrb[90].mxu0  ;;  %13619 = vmatmul.mubr.msk.bf16.vlgmr.msra.gmra.mrb[88].mxu1 %vm120_vm0, %v8869_v15  ;;  %vm8846_vm6 = vcmp.ge.f32.partialorder %v8829_v22, 0.0  ;;  %v10323_v48 = vmul.f32 %v16799_v60, %v10320_v29  ;;  %v5740_v19 = vadd.f32 %v11126_v50, %v16084_v57 }
0x26e2   :  { %v10119_v9 = vmul.f32 1.442695, %v10116_v33  ;;  %v10117_v40 = vadd.f32 0.1, %v10114_v8  ;;  %v8834_v11 = vadd.f32 %v16785_v37, %v8833_v53  ;;  %v13610_v43 = vpop.f32.mrb[91].mxu0  ;;  %v8860_v35 = vsel %vm8846_vm6, %v8829_v22, %v8853_v26 }
0x26e3   :  { %14201 = vpow2.f32 %v10123_v36  ;;  %v10312_v58 = vsub.f32 %v16748_v0, %v5742_v4  ;;  %v5741_v51 = vadd.f32 %v11126_v50, %v16086_v3 }
0x26e4   :  { %14203 = vpow2.f32 %v10119_v9  ;;  %v10121_v25 = vmul.f32 1.442695, %v10117_v40  ;;  %vm8847_vm7 = vcmp.ge.f32.partialorder %v8834_v11, 0.0  ;;  %v8854_v56 = vmul.f32 0.1, %v8834_v11 }
0x26e5   :  { %v8838_v38 = vpop.f32.mrb[92].mxu0  ;;  %v10311_v2 = vsub.f32 %v16755_v55, %v5741_v51  ;;  %v10315_v57 = vmul.f32 %v10312_v58, %v10312_v58 }
0x26e6   :  { %14205 = vpow2.f32 %v10121_v25  ;;  %v8861_v14 = vsel %vm8847_vm7, %v8834_v11, %v8854_v56  ;;  %v8839_v12 = vadd.f32 %v16785_v37, %v8838_v38  ;;  %v13613_v5 = vpop.f32.mrb[93].mxu0  ;;  %v10310_v37 = vsub.f32 %v16750_v62, %v5740_v19 }
0x26e7   :  { %v8870_v44 = vpack.c.bf16 %v8861_v14, %v8860_v35  ;;  %14207 = vrcp.f32 %v10324_v45  ;;  %v10314_v36 = vmul.f32 %v10311_v2, %v10311_v2  ;;  %v10140_v5 = vmul.f32 %v16750_v62, %v16750_v62 }
0x26e8   :  { %vm8848_vm3 = vcmp.ge.f32.partialorder %v8839_v12, 0.0  ;;  %v8855_v16 = vmul.f32 0.1, %v8839_v12  ;;  %14209 = vrcp.f32 %v10322_v27  ;;  %v10313_v3 = vmul.f32 %v10310_v37, %v10310_v37 }
0x26e9   :  { %13622 = vmatprep.mubr.msk.bf16.mxu1 %vm120_vm0, %v8870_v44  ;;  %14211 = vrcp.f32 %v10323_v48 }
0x26ea   :  { %v8862_v49 = vsel %vm8848_vm3, %v8839_v12, %v8855_v16 }
0x26eb   :  { %v8871_v7 = vpack.c.bf16 %v8862_v49, %v8862_v49 }
0x26ed   :  { %v14202_v22 = vpop.eup %14201  ;;  %13623 = vmatmul.mubr.msk.bf16.gmra.mrb[92].mxu1 %vm120_vm0, %v8871_v7 }
0x26ee   :  { %v14204_v41 = vpop.eup %14203  ;;  %14213 = vrcp.f32 %v14202_v22  ;;  %v16822_v17 = vmul.f32 %v14202_v22, %v14202_v22  ;;  %13640 = vmatprep.mubr.msk.f32.mxu1 %vm14493_vm1, %v14494_v6 }
0x26ef   :  { %14215 = vrcp.f32 %v14204_v41  ;;  %v16826_v15 = vmul.f32 %v14204_v41, %v14204_v41 }
0x26f0   :  { %v14206_v34 = vpop.eup %14205  ;;  %v10318_v61 = vadd.f32 %v10315_v57, %v16822_v17 }
0x26f1   :  { %v14208_v33 = vpop.eup %14207  ;;  %14217 = vrcp.f32 %v14206_v34  ;;  %v16829_v8 = vmul.f32 %v14206_v34, %v14206_v34  ;;  %v10316_v26 = vadd.f32 %v10313_v3, %v16826_v15 }
0x26f2   :  { %v14210_v53 = vpop.eup %14209  ;;  %v10330_v29 = vmul.f32 %v14208_v33, %v10318_v61  ;;  %v10141_v61 = vmul.f32 %v16755_v55, %v16755_v55 }
0x26f3   :  { %v10317_v9 = vadd.f32 %v10314_v36, %v16829_v8  ;;  %v10326_v40 = vmul.f32 %v14210_v53, %v10316_v26  ;;  %v14212_v11 = vpop.eup %14211 }
0x26f5   :  { %v10328_v43 = vmul.f32 %v14212_v11, %v10317_v9 }
0x26f8   :  { %v16833_v45 = vpop.eup %14213 }
0x26f9   :  { %v16835_v27 = vpop.eup %14215  ;;  %v10130_v25 = vmul.f32 3.6036077, %v16833_v45  ;;  %v10303_v56 = vmul.f32 %v16833_v45, %v16792_v46  ;;  %v10142_v46 = vmul.f32 %v16748_v0, %v16748_v0 }
0x26fa   :  { %v10126_v50 = vmul.f32 3.6036077, %v16835_v27  ;;  %v10301_v48 = vmul.f32 %v16835_v27, %v16797_v10 }
0x26fb   :  { %v16841_v38 = vpop.eup %14217  ;;  %14219 = vlog2.f32 %v10130_v25  ;;  %v10145_v12 = vadd.f32 %v10142_v46, %v16822_v17  ;;  %v10144_v25 = vadd.f32 %v10141_v61, %v16829_v8 }
0x26fc   :  { %v10302_v35 = vmul.f32 %v16841_v38, %v16799_v60  ;;  %14221 = vlog2.f32 %v10303_v56  ;;  %v10128_v14 = vmul.f32 3.6036077, %v16841_v38  ;;  %v10143_v60 = vadd.f32 %v10140_v5, %v16826_v15 }
0x26fd   :  { %14223 = vlog2.f32 %v10126_v50  ;;  %v10149_v16 = vmul.f32 0.03850304, %v10145_v12 }
0x26fe   :  { %14225 = vlog2.f32 %v10302_v35  ;;  %v10147_v57 = vmul.f32 0.03850304, %v10143_v60 }
0x26ff   :  { %14227 = vlog2.f32 %v10301_v48  ;;  %v10148_v48 = vmul.f32 0.03850304, %v10144_v25 }
0x2700   :  { %14229 = vlog2.f32 %v10128_v14 }
0x2705   :  { %v14220_v44 = vpop.eup %14219 }
0x2706   :  { %v14222_v10 = vpop.eup %14221  ;;  %v10136_v4 = vmul.f32 0.6931472, %v14220_v44 }
0x2707   :  { %v14224_v19 = vpop.eup %14223  ;;  %v10309_v49 = vmul.f32 0.6931472, %v14222_v10 }
0x2708   :  { %v14226_v58 = vpop.eup %14225  ;;  %v10152_v51 = vadd.f32 %v10149_v16, %v10136_v4  ;;  %v10132_v7 = vmul.f32 0.6931472, %v14224_v19 }
0x2709   :  { %v14228_v37 = vpop.eup %14227  ;;  %v10307_v22 = vmul.f32 0.6931472, %v14226_v58  ;;  %v10333_v2 = vadd.f32 %v10330_v29, %v10309_v49 }
0x270a   :  { %v11539_v41 = vadd.f32 -0.5, %v10152_v51  ;;  %v10305_v3 = vmul.f32 0.6931472, %v14228_v37  ;;  %v10150_v26 = vadd.f32 %v10147_v57, %v10132_v7  ;;  %v14230_v9 = vpop.eup %14229 }
0x270b   :  { %v10332_v34 = vadd.f32 %v10328_v43, %v10307_v22  ;;  %v11545_v36 = vadd.f32 -0.5, %v10333_v2  ;;  %v10134_v43 = vmul.f32 0.6931472, %v14230_v9 }
0x270c   :  { %v10162_v33 = vsel %vm120_vm0, %v11539_v41, 0.0  ;;  %v10331_v53 = vadd.f32 %v10326_v40, %v10305_v3  ;;  %v11537_v50 = vadd.f32 -0.5, %v10150_v26 }
0x270d   :  { %10163 = vadd.xlane.f32.xlu0 %v10162_v33  ;;  %v11544_v11 = vadd.f32 -0.5, %v10332_v34  ;;  %v10343_v29 = vsel %vm120_vm0, %v11545_v36, 0.0  ;;  %v10151_v46 = vadd.f32 %v10148_v48, %v10134_v43  ;;  %v16875_v43 = vld [vmem:[%s17324_s7] sm:$0xff]  ;;  %v16884_v48 = vld [vmem:[%s17324_s7 + $0x8] sm:$0xff] }
0x270e   :  { %v10156_v35 = vsel %vm120_vm0, %v11537_v50, 0.0  ;;  %v11543_v14 = vadd.f32 -0.5, %v10331_v53 }
0x270f   :  { %v10340_v56 = vsel %vm120_vm0, %v11544_v11, 0.0  ;;  %v11538_v12 = vadd.f32 -0.5, %v10151_v46  ;;  %v14154_v46 = vld [vmem:[%s17297_s12 + $0x220] sm:$0xff]  }
0x2710   :  { %10341 = vadd.xlane.f32.xlu1 %v10340_v56  ;;  %v10337_v40 = vsel %vm120_vm0, %v11543_v14, 0.0  ;;  %v14153_v14 = vld [vmem:[%s17297_s12 + $0x230] sm:$0xff]  }
0x2711   :  { %10344 = vadd.xlane.f32.xlu0 %v10343_v29  ;;  %v10159_v5 = vsel %vm120_vm0, %v11538_v12, 0.0  ;;  %13649 = vmatprep.subr.bf16.mxu0 %v14153_v14  ;;  %v14156_v12 = vld [vmem:[%s17297_s12 + $0x228] sm:$0xff]  }
0x2712   :  { %13650 = vmatpush3.bf16.msra.mxu0 %v14153_v14 }
0x2715   :  { %10157 = vadd.xlane.f32.xlu0 %v10156_v35  ;;  %v16893_v35 = vld [vmem:[%s17324_s7 + $0x10] sm:$0xff] }
0x2719   :  { %10338 = vadd.xlane.f32.xlu0 %v10337_v40  ;;  %v14155_v40 = vld [vmem:[%s17297_s12 + $0x238] sm:$0xff]  }
0x271a   :  { %13651 = vmatprep.subr.bf16.mxu0 %v14155_v40 }
0x271b   :  { %13652 = vmatpush3.bf16.msra.mxu0 %v14155_v40 }
0x271d   :  { %10160 = vadd.xlane.f32.xlu0 %v10159_v5  ;;  %v11432_v5 = vld [vmem:[%s17296_s11 + $0x20] ss:$0 sm:$0xff] }
0x271e   :  { %13654 = vmatmul.mubr.msk.bf16.vlgmr.msra.gmra.mrb[96].mxu0 %vm120_vm0, %v16616_v54 }
0x279a   :  { %v10164_v44 = vpop.xlane.xlu0 %10163 }
0x279d   :  { %v10342_v16 = vpop.xlane.xlu1 %10341 }
0x279e   :  { %v10345_v10 = vpop.xlane.xlu0 %10344 }
0x27a2   :  { %v10158_v4 = vpop.xlane.xlu0 %10157 }
0x27a6   :  { %v10339_v60 = vpop.xlane.xlu0 %10338 }
0x27a7   :  { %v10346_v19 = vadd.f32 %v10342_v16, %v10339_v60 }
0x27a9   :  { %v10347_v49 = vadd.f32 %v10346_v19, %v10345_v10 }
0x27aa   :  { %v10161_v58 = vpop.xlane.xlu0 %10160 }
0x27ab   :  { %v10348_v51 = vrot.slane %v10347_v49, 4  ;;  %v10165_v7 = vadd.f32 %v10161_v58, %v10158_v4 }
0x27ad   :  { %v10349_v37 = vadd.f32 %v10348_v51, %v10347_v49  ;;  %v16863_v22 = vadd.f32 %v10165_v7, %v10164_v44 }
0x27af   :  { %v10350_v2 = vrot.slane %v10349_v37, 2 }
0x27b1   :  { %v10351_v41 = vadd.f32 %v10350_v2, %v10349_v37 }
0x27b3   :  { %v10352_v57 = vrot.slane %v10351_v41, 1 }
0x27b4   :  { %v13620_v3 = vpop.f32.mrb[88].mxu1 }
0x27b5   :  { %v8930_v34 = vpop.f32.mrb[89].mxu1  ;;  %v10353_v61 = vadd.f32 %v10352_v57, %v10351_v41 }
0x27b6   :  { %v13621_v33 = vpop.f32.mrb[90].mxu1 }
0x27b7   :  { %v13974_v36 = vpack.c.bf16 %v13621_v33, %v13620_v3  ;;  %v8933_v26 = vpop.f32.mrb[91].mxu1  ;;  %v16865_v53 = vmul.f32 0.041666668, %v10353_v61 }
0x27b8   :  { %v13971_v9 = vpack.c.bf16 %v8933_v26, %v8930_v34 }
0x27b9   :  { %10536 = vst.msk [vmem:[#allocation7] sm:$0x1] %vm10534_vm8, %v16865_v53 }
0x27ba   :  { %13972 = vmatpush3.bf16.msra.mxu1 %v13971_v9  ;;  %v14157_v9 = vld [vmem:[%s17295_s10 + $0x210] sm:$0xff]  }
0x27bb   :  { %13973 = vmatprep.subr.bf16.mxu1 %v14495_v18  ;;  %13665 = vmatprep.subr.bf16.mxu0 %v14157_v9 }
0x27bc   :  { %13666 = vmatpush3.bf16.msra.mxu0 %v14157_v9 }
0x27be   :  { %13975 = vmatpush3.bf16.msra.mxu1 %v13974_v36 }
0x27bf   :  { %13976 = vmatprep.subr.bf16.mxu1 %v14495_v18 }
0x27c0   :  { %v13624_v11 = vpop.f32.mrb[92].mxu1 }
0x27c1   :  { %v8946_v25 = vpop.f32.mrb[93].mxu1 }
0x27c2   :  { %v13625_v56 = vpop.f32.mrb[94].mxu1 }
0x27c3   :  { %v8949_v29 = vpop.f32.mrb[95].mxu1  ;;  %v11453_v56 = vld [vmem:[%s17298_s13 + $0x11] ss:$0 sm:$0xff] }
0x27c4   :  { %v13977_v50 = vpack.c.bf16 %v8949_v29, %v8946_v25 }
0x27c6   :  { %13978 = vmatpush3.bf16.msra.mxu1 %v13977_v50 }
0x27c7   :  { %13638 = vmatprep.subr.mxu1 %v14494_v6 }
0x27ca   :  { %13639 = vmatpush3.msra.mxu1 %v13624_v11  ;;  %v14158_v11 = vld [vmem:[%s17295_s10 + $0x218] sm:$0xff]  }
0x27cb   :  { %13641 = vmatmul.mubr.msk.f32.vlgmr.msra.gmra.mrb[74].mxu1 %vm2569_vm12, %v16875_v43  ;;  %13657 = vmatprep.subr.bf16.mxu1 %v14154_v46 }
0x27cc   :  { %13643 = vmatprep.mubr.msk.f32.mxu1 %vm14493_vm1, %v14494_v6  ;;  %13658 = vmatpush3.bf16.msra.mxu1 %v14154_v46 }
0x27cd   :  { %13659 = vmatprep.subr.bf16.mxu1 %v14156_v12  ;;  %13667 = vmatprep.subr.bf16.mxu0 %v14158_v11 }
0x27ce   :  { %13668 = vmatpush3.bf16.msra.mxu0 %v14158_v11 }
0x27cf   :  { %13644 = vmatmul.mubr.msk.f32.gmra.mrb[96].mxu1 %vm2569_vm12, %v16884_v48 }
0x27d0   :  { %13646 = vmatprep.mubr.msk.f32.mxu1 %vm14493_vm1, %v14494_v6  ;;  %13660 = vmatpush3.bf16.msra.mxu1 %v14156_v12 }
0x27d1   :  { %13979 = vmatprep.subr.bf16.mxu1 %v14495_v18 }
0x27d3   :  { %13647 = vmatmul.mubr.msk.f32.gmra.mrb[98].mxu1 %vm2569_vm12, %v16893_v35 }
0x27f1   :  { %v13655_v61 = vpop.f32.mrb[96].mxu0 }
0x27f2   :  { %v9114_v33 = vpop.f32.mrb[97].mxu0 }
0x27f3   :  { %v13656_v36 = vpop.f32.mrb[98].mxu0 }
0x27f4   :  { %v9117_v26 = vpop.f32.mrb[99].mxu0 }
0x289e   :  { %v9034_v44 = vpop.f32.mrb[74].mxu1 }
0x289f   :  { %v9035_v10 = vadd.f32 %v11432_v5, %v9034_v44  ;;  %v13642_v4 = vpop.f32.mrb[75].mxu1 }
0x28a1   :  { %v9051_v60 = vmul.f32 0.1, %v9035_v10  ;;  %vm9048_vm9 = vcmp.ge.f32.partialorder %v9035_v10, 0.0 }
0x28a2   :  { %v9039_v16 = vpop.f32.mrb[96].mxu1 }
0x28a3   :  { %v9040_v19 = vadd.f32 %v11432_v5, %v9039_v16  ;;  %v13645_v49 = vpop.f32.mrb[97].mxu1  ;;  %v9054_v7 = vsel %vm9048_vm9, %v9035_v10, %v9051_v60 }
0x28a5   :  { %vm9049_vm10 = vcmp.ge.f32.partialorder %v9040_v19, 0.0  ;;  %v9052_v58 = vmul.f32 0.1, %v9040_v19 }
0x28a6   :  { %v9044_v51 = vpop.f32.mrb[98].mxu1 }
0x28a7   :  { %v9055_v37 = vsel %vm9049_vm10, %v9040_v19, %v9052_v58  ;;  %v9045_v54 = vadd.f32 %v11432_v5, %v9044_v51  ;;  %v13648_v2 = vpop.f32.mrb[99].mxu1 }
0x28a8   :  { %v9066_v41 = vpack.c.bf16 %v9055_v37, %v9054_v7 }
0x28a9   :  { %vm9050_vm11 = vcmp.ge.f32.partialorder %v9045_v54, 0.0  ;;  %v9053_v57 = vmul.f32 0.1, %v9045_v54 }
0x28aa   :  { %13661 = vmatprep.mubr.msk.bf16.mxu1 %vm120_vm0, %v9066_v41 }
0x28ab   :  { %v9056_v3 = vsel %vm9050_vm11, %v9045_v54, %v9053_v57 }
0x28ac   :  { %v9067_v34 = vpack.c.bf16 %v9056_v3, %v9056_v3 }
0x28ae   :  { %13662 = vmatmul.mubr.msk.bf16.vlgmr.msra.gmra.mrb[100].mxu1 %vm120_vm0, %v9067_v34 }
0x28af   :  { %13679 = vmatprep.mubr.msk.f32.mxu1 %vm14493_vm1, %v14494_v6 }
0x2981   :  { %v13663_v25 = vpop.f32.mrb[100].mxu1 }
0x2982   :  { %v9189_v29 = vadd.f32 %v13663_v25, %v13655_v61  ;;  %v9180_v50 = vpop.f32.mrb[101].mxu1 }
0x2983   :  { %v9181_v14 = vadd.f32 %v9180_v50, %v9114_v33  ;;  %v13664_v46 = vpop.f32.mrb[102].mxu1 }
0x2984   :  { %v9204_v40 = vadd.f32 %v11453_v56, %v9189_v29  ;;  %v9183_v12 = vpop.f32.mrb[103].mxu1 }
0x2985   :  { %v9202_v5 = vadd.f32 %v11453_v56, %v9181_v14  ;;  %v9184_v44 = vadd.f32 %v9183_v12, %v9117_v26 }
0x2986   :  { %v9207_v4 = vmax.f32 %v9204_v40, 0.0 }
0x2987   :  { %v9203_v10 = vadd.f32 %v11453_v56, %v9184_v44  ;;  %v9205_v16 = vmax.f32 %v9202_v5, 0.0 }
0x2988   :  { %v9214_v49 = vpack.c.bf16 %v9207_v4, %v9207_v4 }
0x2989   :  { %v9206_v60 = vmax.f32 %v9203_v10, 0.0 }
0x298b   :  { %v9213_v19 = vpack.c.bf16 %v9206_v60, %v9205_v16  ;;  %v14164_v60 = vld [vmem:[%s17297_s12 + $0x258] sm:$0xff]  }
0x298d   :  { %13669 = vmatprep.mubr.msk.bf16.mxu0 %vm120_vm0, %v9213_v19 }
0x298e   :  { %13670 = vmatmul.mubr.msk.bf16.vlgmr.msra.gmra.mrb[100].mxu0 %vm120_vm0, %v9214_v49 }
0x2a61   :  { %v13671_v58 = vpop.f32.mrb[100].mxu0 }
0x2a62   :  { %v9267_v51 = vpop.f32.mrb[101].mxu0 }
0x2a63   :  { %v13672_v7 = vpop.f32.mrb[102].mxu0 }
0x2a64   :  { %v9270_v37 = vpop.f32.mrb[103].mxu0  ;;  %v14165_v7 = vld [vmem:[%s17297_s12 + $0x270] sm:$0xff]  }
0x2a65   :  { %v13980_v54 = vpack.c.bf16 %v9270_v37, %v9267_v51 }
0x2a67   :  { %13981 = vmatpush3.bf16.msra.mxu1 %v13980_v54 }
0x2a68   :  { %13677 = vmatprep.subr.mxu1 %v14494_v6 }
0x2a6b   :  { %13678 = vmatpush3.msra.mxu1 %v13671_v58 }
0x2a6c   :  { %13680 = vmatmul.mubr.msk.f32.vlgmr.msra.gmra.mrb[104].mxu1 %vm182_vm2, %v16661_v47  ;;  %v14159_v47 = vld [vmem:[%s17295_s10 + $0x220] sm:$0xff]  }
0x2a6d   :  { %13682 = vmatprep.mubr.msk.f32.mxu1 %vm14493_vm1, %v14494_v6  ;;  %13700 = vmatprep.subr.bf16.mxu0 %v14159_v47 }
0x2a6e   :  { %13701 = vmatpush3.bf16.msra.mxu0 %v14159_v47 }
0x2a70   :  { %13683 = vmatmul.mubr.msk.f32.gmra.mrb[106].mxu1 %vm182_vm2, %v16670_v20  ;;  %v14160_v20 = vld [vmem:[%s17295_s10 + $0x230] sm:$0xff]  }
0x2a71   :  { %13685 = vmatprep.mubr.msk.f32.mxu1 %vm14493_vm1, %v14494_v6  ;;  %13735 = vmatprep.subr.bf16.mxu1 %v14160_v20 }
0x2a72   :  { %13736 = vmatpush3.bf16.msra.mxu1 %v14160_v20 }
0x2a74   :  { %13686 = vmatmul.mubr.msk.f32.gmra.mrb[108].mxu1 %vm182_vm2, %v16679_v13  ;;  %v14161_v13 = vld [vmem:[%s17295_s10 + $0x228] sm:$0xff]  }
0x2a75   :  { %13688 = vmatprep.mubr.msk.f32.mxu1 %vm14493_vm1, %v14494_v6  ;;  %13702 = vmatprep.subr.bf16.mxu0 %v14161_v13 }
0x2a76   :  { %13703 = vmatpush3.bf16.msra.mxu0 %v14161_v13 }
0x2a77   :  { %13982 = vmatprep.subr.bf16.mxu0 %v14495_v18 }
0x2a78   :  { %13689 = vmatmul.mubr.msk.f32.gmra.mrb[110].mxu1 %vm182_vm2, %v16688_v59  ;;  %v14162_v59 = vld [vmem:[%s17295_s10 + $0x238] sm:$0xff]  }
0x2a79   :  { %13691 = vmatprep.mubr.msk.f32.mxu1 %vm14493_vm1, %v14494_v6  ;;  %13737 = vmatprep.subr.bf16.mxu1 %v14162_v59 }
0x2a7a   :  { %13738 = vmatpush3.bf16.msra.mxu1 %v14162_v59 }
0x2a7c   :  { %13692 = vmatmul.mubr.msk.f32.gmra.mrb[112].mxu1 %vm182_vm2, %v16697_v42  ;;  %v14163_v42 = vld [vmem:[%s17297_s12 + $0x250] sm:$0xff]  }
0x2a7d   :  { %13694 = vmatprep.mubr.msk.f32.mxu1 %vm14493_vm1, %v14494_v6  ;;  %13770 = vmatprep.subr.bf16.mxu1 %v14163_v42 }
0x2a80   :  { %13695 = vmatmul.mubr.msk.f32.gmra.mrb[114].mxu1 %vm182_vm2, %v16706_v1  ;;  %v11463_v1 = vld [vmem:[%s17296_s11 + $0x21] ss:$0 sm:$0xff] }
0x2a81   :  { %13697 = vmatprep.mubr.msk.f32.mxu1 %vm14493_vm1, %v14494_v6 }
0x2a84   :  { %13698 = vmatmul.mubr.msk.f32.gmra.mrb[116].mxu1 %vm182_vm2, %v16715_v28 }
0x2b3f   :  { %v9355_v28 = vpop.f32.mrb[104].mxu1 }
0x2b40   :  { %v9356_v2 = vadd.f32 %v11463_v1, %v9355_v28  ;;  %v13681_v41 = vpop.f32.mrb[105].mxu1  ;;  %v10996_v28 = vld [vmem:[%s17298_s13 + $0x6] ss:$0 sm:$0xff] }
0x2b42   :  { %v9396_v3 = vmul.f32 0.1, %v9356_v2  ;;  %vm9389_vm2 = vcmp.ge.f32.partialorder %v9356_v2, 0.0 }
0x2b43   :  { %v9360_v57 = vpop.f32.mrb[106].mxu1 }
0x2b44   :  { %v9361_v34 = vadd.f32 %v11463_v1, %v9360_v57  ;;  %v13684_v61 = vpop.f32.mrb[107].mxu1  ;;  %v9403_v26 = vsel %vm9389_vm2, %v9356_v2, %v9396_v3  ;;  %v16995_v57 = vadd.f32 %v10996_v28, %v15756_v31 }
0x2b45   :  { %v14166_v61 = vld [vmem:[%s17297_s12 + $0x278] sm:$0xff]  }
0x2b46   :  { %vm9390_vm13 = vcmp.ge.f32.partialorder %v9361_v34, 0.0  ;;  %v9397_v33 = vmul.f32 0.1, %v9361_v34 }
0x2b47   :  { %v9365_v36 = vpop.f32.mrb[108].mxu1 }
0x2b48   :  { %v9404_v9 = vsel %vm9390_vm13, %v9361_v34, %v9397_v33  ;;  %v9366_v11 = vadd.f32 %v11463_v1, %v9365_v36  ;;  %v13687_v25 = vpop.f32.mrb[109].mxu1 }
0x2b49   :  { %v9415_v56 = vpack.c.bf16 %v9404_v9, %v9403_v26 }
0x2b4a   :  { %v9398_v50 = vmul.f32 0.1, %v9366_v11  ;;  %vm9391_vm14 = vcmp.ge.f32.partialorder %v9366_v11, 0.0 }
0x2b4b   :  { %v9370_v29 = vpop.f32.mrb[110].mxu1  ;;  %13704 = vmatprep.mubr.msk.bf16.mxu0 %vm120_vm0, %v9415_v56  ;;  %13739 = vmatprep.mubr.msk.bf16.mxu1 %vm120_vm0, %v9415_v56 }
0x2b4c   :  { %v9371_v14 = vadd.f32 %v11463_v1, %v9370_v29  ;;  %v13690_v46 = vpop.f32.mrb[111].mxu1  ;;  %v9405_v5 = vsel %vm9391_vm14, %v9366_v11, %v9398_v50 }
0x2b4e   :  { %vm9392_vm15 = vcmp.ge.f32.partialorder %v9371_v14, 0.0  ;;  %v9399_v40 = vmul.f32 0.1, %v9371_v14 }
0x2b4f   :  { %v9375_v12 = vpop.f32.mrb[112].mxu1 }
0x2b50   :  { %v9406_v44 = vsel %vm9392_vm15, %v9371_v14, %v9399_v40  ;;  %v9376_v10 = vadd.f32 %v11463_v1, %v9375_v12  ;;  %v13693_v4 = vpop.f32.mrb[113].mxu1 }
0x2b51   :  { %v9416_v16 = vpack.c.bf16 %v9406_v44, %v9405_v5 }
0x2b52   :  { %v9400_v49 = vmul.f32 0.1, %v9376_v10  ;;  %vm9393_vm4 = vcmp.ge.f32.partialorder %v9376_v10, 0.0 }
0x2b53   :  { %v9380_v19 = vpop.f32.mrb[114].mxu1  ;;  %13705 = vmatmul.mubr.msk.bf16.vlgmr.msra.gmra.mrb[104].mxu0 %vm120_vm0, %v9416_v16  ;;  %13740 = vmatmul.mubr.msk.bf16.vlgmr.msra.gmra.mrb[120].mxu1 %vm120_vm0, %v9416_v16 }
0x2b54   :  { %v9381_v58 = vadd.f32 %v11463_v1, %v9380_v19  ;;  %v13696_v51 = vpop.f32.mrb[115].mxu1  ;;  %13771 = vmatpush3.bf16.msra.mxu1 %v14163_v42  ;;  %v9407_v47 = vsel %vm9393_vm4, %v9376_v10, %v9400_v49  ;;  %v16990_v42 = vadd.f32 %v10996_v28, %v15759_v21  ;;  %v17005_v21 = vadd.f32 %v10996_v28, %v15753_v32 }
0x2b55   :  { %13772 = vmatprep.subr.bf16.mxu1 %v14164_v60 }
0x2b56   :  { %vm9394_vm5 = vcmp.ge.f32.partialorder %v9381_v58, 0.0  ;;  %v9401_v37 = vmul.f32 0.1, %v9381_v58  ;;  %v9793_v34 = vpack.c.bf16 %v16990_v42, %v16995_v57  ;;  %v9794_v31 = vpack.c.bf16 %v17005_v21, %v17005_v21 }
0x2b57   :  { %v9385_v54 = vpop.f32.mrb[116].mxu1 }
0x2b58   :  { %v9408_v20 = vsel %vm9394_vm5, %v9381_v58, %v9401_v37  ;;  %v9386_v13 = vadd.f32 %v11463_v1, %v9385_v54  ;;  %13773 = vmatpush3.bf16.msra.mxu1 %v14164_v60  ;;  %v13699_v59 = vpop.f32.mrb[117].mxu1 }
0x2b59   :  { %v9417_v2 = vpack.c.bf16 %v9408_v20, %v9407_v47  ;;  %13786 = vmatprep.subr.bf16.mxu1 %v14165_v7 }
0x2b5a   :  { %vm9395_vm6 = vcmp.ge.f32.partialorder %v9386_v13, 0.0  ;;  %v9402_v41 = vmul.f32 0.1, %v9386_v13 }
0x2b5b   :  { %13708 = vmatprep.mubr.msk.bf16.mxu0 %vm120_vm0, %v9417_v2  ;;  %13743 = vmatprep.mubr.msk.bf16.mxu1 %vm120_vm0, %v9417_v2 }
0x2b5c   :  { %v9409_v1 = vsel %vm9395_vm6, %v9386_v13, %v9402_v41 }
0x2b5d   :  { %v9418_v3 = vpack.c.bf16 %v9409_v1, %v9409_v1 }
0x2b5f   :  { %13709 = vmatmul.mubr.msk.bf16.gmra.mrb[112].mxu0 %vm120_vm0, %v9418_v3  ;;  %13744 = vmatmul.mubr.msk.bf16.gmra.mrb[124].mxu1 %vm120_vm0, %v9418_v3 }
0x2b60   :  { %13774 = vmatprep.mubr.msk.bf16.mxu1 %vm120_vm0, %v9793_v34  ;;  %13726 = vmatprep.mubr.msk.f32.mxu0 %vm14493_vm1, %v14494_v6 }
0x2b67   :  { %13775 = vmatmul.mubr.msk.bf16.vlgmr.msra.gmra.mrb[128].mxu1 %vm120_vm0, %v9794_v31 }
0x2b68   :  { %13787 = vmatpush3.bf16.msra.mxu1 %v14165_v7  ;;  %13790 = vmatprep.mubr.msk.bf16.mxu1 %vm120_vm0, %v9793_v34 }
0x2b69   :  { %13788 = vmatprep.subr.bf16.mxu1 %v14166_v61 }
0x2b6c   :  { %13789 = vmatpush3.bf16.msra.mxu1 %v14166_v61 }
0x2b6f   :  { %13791 = vmatmul.mubr.msk.bf16.vlgmr.msra.gmra.mrb[136].mxu1 %vm120_vm0, %v9794_v31 }
0x2c26   :  { %v13706_v33 = vpop.f32.mrb[104].mxu0  ;;  %v13741_v36 = vpop.f32.mrb[120].mxu1 }
0x2c27   :  { %v9477_v32 = vpop.f32.mrb[105].mxu0  ;;  %v9655_v26 = vpop.f32.mrb[121].mxu1 }
0x2c28   :  { %v13707_v9 = vpop.f32.mrb[106].mxu0  ;;  %v13742_v11 = vpop.f32.mrb[122].mxu1 }
0x2c29   :  { %v13986_v25 = vpack.c.bf16 %v13707_v9, %v13706_v33  ;;  %v9480_v56 = vpop.f32.mrb[107].mxu0  ;;  %v13995_v29 = vpack.c.bf16 %v13742_v11, %v13741_v36  ;;  %v9658_v50 = vpop.f32.mrb[123].mxu1  ;;  %v11497_v11 = vld [vmem:[%s17296_s11 + $0x23] ss:$0 sm:$0xff] }
0x2c2a   :  { %v13983_v14 = vpack.c.bf16 %v9480_v56, %v9477_v32  ;;  %v13992_v46 = vpack.c.bf16 %v9658_v50, %v9655_v26  ;;  %v14170_v50 = vld [vmem:[%s17297_s12 + $0x268] sm:$0xff]  }
0x2c2c   :  { %13984 = vmatpush3.bf16.msra.mxu0 %v13983_v14 }
0x2c2d   :  { %13985 = vmatprep.subr.bf16.mxu0 %v14495_v18 }
0x2c30   :  { %13987 = vmatpush3.bf16.msra.mxu0 %v13986_v25 }
0x2c31   :  { %13988 = vmatprep.subr.bf16.mxu0 %v14495_v18 }
0x2c32   :  { %v13710_v40 = vpop.f32.mrb[112].mxu0  ;;  %v13745_v12 = vpop.f32.mrb[124].mxu1 }
0x2c33   :  { %v9493_v5 = vpop.f32.mrb[113].mxu0  ;;  %v9671_v44 = vpop.f32.mrb[125].mxu1 }
0x2c34   :  { %v13711_v10 = vpop.f32.mrb[114].mxu0  ;;  %v13746_v4 = vpop.f32.mrb[126].mxu1 }
0x2c35   :  { %v9496_v16 = vpop.f32.mrb[115].mxu0  ;;  %v9674_v60 = vpop.f32.mrb[127].mxu1 }
0x2c36   :  { %v13989_v19 = vpack.c.bf16 %v9496_v16, %v9493_v5  ;;  %v13998_v49 = vpack.c.bf16 %v9674_v60, %v9671_v44 }
0x2c38   :  { %13990 = vmatpush3.bf16.msra.mxu0 %v13989_v19 }
0x2c39   :  { %13724 = vmatprep.subr.mxu0 %v14494_v6 }
0x2c3a   :  { %v17018_v58 = vpop.f32.mrb[128].mxu1 }
0x2c3b   :  { %v17020_v51 = vpop.f32.mrb[129].mxu1 }
0x2c3c   :  { %13725 = vmatpush3.msra.mxu0 %v13710_v40  ;;  %v13777_v7 = vpop.f32.mrb[130].mxu1 }
0x2c3d   :  { %13727 = vmatmul.mubr.msk.f32.vlgmr.msra.gmra.mrb[94].mxu0 %vm2569_vm12, %v16875_v43  ;;  %13991 = vmatprep.subr.bf16.mxu0 %v14495_v18  ;;  %v17025_v37 = vpop.f32.mrb[131].mxu1 }
0x2c3e   :  { %13993 = vmatpush3.bf16.msra.mxu0 %v13992_v46  ;;  %13729 = vmatprep.mubr.msk.f32.mxu0 %vm14493_vm1, %v14494_v6 }
0x2c3f   :  { %13994 = vmatprep.subr.bf16.mxu0 %v14495_v18 }
0x2c41   :  { %13730 = vmatmul.mubr.msk.f32.gmra.mrb[108].mxu0 %vm2569_vm12, %v16884_v48 }
0x2c42   :  { %13996 = vmatpush3.bf16.msra.mxu0 %v13995_v29  ;;  %v17032_v54 = vpop.f32.mrb[136].mxu1  ;;  %13732 = vmatprep.mubr.msk.f32.mxu0 %vm14493_vm1, %v14494_v6 }
0x2c43   :  { %v17036_v47 = vpop.f32.mrb[137].mxu1  ;;  %13997 = vmatprep.subr.bf16.mxu0 %v14495_v18  ;;  %v14167_v18 = vld [vmem:[%s17297_s12 + $0x240] sm:$0xff]  }
0x2c44   :  { %v13793_v20 = vpop.f32.mrb[138].mxu1 }
0x2c45   :  { %13733 = vmatmul.mubr.msk.f32.gmra.mrb[116].mxu0 %vm2569_vm12, %v16893_v35  ;;  %v17041_v13 = vpop.f32.mrb[139].mxu1 }
0x2c46   :  { %13999 = vmatpush3.bf16.msra.mxu0 %v13998_v49  ;;  %13761 = vmatprep.mubr.msk.f32.mxu0 %vm14493_vm1, %v14494_v6 }
0x2c47   :  { %13759 = vmatprep.subr.mxu0 %v14494_v6 }
0x2c4a   :  { %13760 = vmatpush3.msra.mxu0 %v13745_v12 }
0x2c4b   :  { %13762 = vmatmul.mubr.msk.f32.vlgmr.msra.gmra.mrb[118].mxu0 %vm2569_vm12, %v16875_v43  ;;  %13778 = vmatprep.subr.bf16.mxu0 %v14167_v18  ;;  %v14168_v43 = vld [vmem:[%s17297_s12 + $0x248] sm:$0xff]  }
0x2c4c   :  { %13764 = vmatprep.mubr.msk.f32.mxu0 %vm14493_vm1, %v14494_v6  ;;  %13779 = vmatpush3.bf16.msra.mxu0 %v14167_v18 }
0x2c4d   :  { %13780 = vmatprep.subr.bf16.mxu0 %v14168_v43 }
0x2c4f   :  { %13765 = vmatmul.mubr.msk.f32.gmra.mrb[120].mxu0 %vm2569_vm12, %v16884_v48  ;;  %v14169_v48 = vld [vmem:[%s17297_s12 + $0x260] sm:$0xff]  }
0x2c50   :  { %13767 = vmatprep.mubr.msk.f32.mxu0 %vm14493_vm1, %v14494_v6  ;;  %13781 = vmatpush3.bf16.msra.mxu0 %v14168_v43  ;;  %v11482_v6 = vld [vmem:[%s17296_s11 + $0x22] ss:$0 sm:$0xff] }
0x2c51   :  { %13794 = vmatprep.subr.bf16.mxu0 %v14169_v48 }
0x2c53   :  { %13768 = vmatmul.mubr.msk.f32.gmra.mrb[122].mxu0 %vm2569_vm12, %v16893_v35 }
0x2d10   :  { %v9581_v35 = vpop.f32.mrb[94].mxu0 }
0x2d11   :  { %v9582_v59 = vadd.f32 %v11482_v6, %v9581_v35  ;;  %v13728_v28 = vpop.f32.mrb[95].mxu0 }
0x2d13   :  { %v9598_v41 = vmul.f32 0.1, %v9582_v59  ;;  %vm9595_vm1 = vcmp.ge.f32.partialorder %v9582_v59, 0.0 }
0x2d14   :  { %v9586_v2 = vpop.f32.mrb[108].mxu0 }
0x2d15   :  { %v9587_v1 = vadd.f32 %v11482_v6, %v9586_v2  ;;  %v13731_v3 = vpop.f32.mrb[109].mxu0  ;;  %v9601_v61 = vsel %vm9595_vm1, %v9582_v59, %v9598_v41 }
0x2d17   :  { %vm9596_vm12 = vcmp.ge.f32.partialorder %v9587_v1, 0.0  ;;  %v9599_v34 = vmul.f32 0.1, %v9587_v1 }
0x2d18   :  { %v9591_v31 = vpop.f32.mrb[116].mxu0 }
0x2d19   :  { %v9602_v33 = vsel %vm9596_vm12, %v9587_v1, %v9599_v34  ;;  %v9592_v36 = vadd.f32 %v11482_v6, %v9591_v31  ;;  %v13734_v32 = vpop.f32.mrb[117].mxu0 }
0x2d1a   :  { %v9791_v26 = vpack.c.bf16 %v9602_v33, %v9601_v61 }
0x2d1b   :  { %vm9597_vm7 = vcmp.ge.f32.partialorder %v9592_v36, 0.0  ;;  %v9600_v9 = vmul.f32 0.1, %v9592_v36 }
0x2d1c   :  { %13782 = vmatprep.mubr.msk.bf16.mxu0 %vm120_vm0, %v9791_v26 }
0x2d1d   :  { %v9603_v25 = vsel %vm9597_vm7, %v9592_v36, %v9600_v9 }
0x2d1e   :  { %v9792_v56 = vpack.c.bf16 %v9603_v25, %v9603_v25  ;;  %v9759_v29 = vpop.f32.mrb[118].mxu0 }
0x2d1f   :  { %v9760_v14 = vadd.f32 %v11497_v11, %v9759_v29  ;;  %v13763_v46 = vpop.f32.mrb[119].mxu0 }
0x2d20   :  { %13783 = vmatmul.mubr.msk.bf16.vlgmr.msra.gmra.mrb[124].mxu0 %vm120_vm0, %v9792_v56 }
0x2d21   :  { %13795 = vmatpush3.bf16.msra.mxu0 %v14169_v48  ;;  %v9776_v12 = vmul.f32 0.1, %v9760_v14  ;;  %vm9773_vm3 = vcmp.ge.f32.partialorder %v9760_v14, 0.0  ;;  %v11277_v48 = vld [vmem:[%s17298_s13 + $0xd] ss:$0 sm:$0xff] }
0x2d22   :  { %v9764_v40 = vpop.f32.mrb[120].mxu0  ;;  %13796 = vmatprep.subr.bf16.mxu0 %v14170_v50  ;;  %v17082_v6 = vadd.f32 %v11277_v48, %v16399_v52  ;;  %v17085_v35 = vadd.f32 %v11277_v48, %v16402_v30  ;;  %v17089_v28 = vadd.f32 %v11277_v48, %v16405_v23  ;;  %v11259_v30 = vld [vmem:[%s17298_s13 + $0xc] ss:$0 sm:$0xff]  ;;  %v11518_v23 = vld [vmem:[%s17298_s13 + $0x12] ss:$0 sm:$0xff] }
0x2d23   :  { %v9765_v5 = vadd.f32 %v11497_v11, %v9764_v40  ;;  %v13766_v44 = vpop.f32.mrb[121].mxu0  ;;  %v9779_v16 = vsel %vm9773_vm3, %v9760_v14, %v9776_v12  ;;  %v7151_v56 = vadd.f32 %v11259_v30, %v16390_v24  ;;  %v7149_v14 = vadd.f32 %v11259_v30, %v16393_v39 }
0x2d24   :  { %v10360_v59 = vand.u32 2147483647, %v17082_v6  ;;  %v10358_v2 = vand.u32 2147483647, %v17085_v35  ;;  %v10359_v1 = vand.u32 2147483647, %v17089_v28  ;;  %v7150_v44 = vadd.f32 %v11259_v30, %v16396_v63 }
0x2d25   :  { %vm9774_vm9 = vcmp.ge.f32.partialorder %v9765_v5, 0.0  ;;  %v9777_v10 = vmul.f32 0.1, %v9765_v5  ;;  %13797 = vmatpush3.bf16.msra.mxu0 %v14170_v50 }
0x2d26   :  { %v9769_v4 = vpop.f32.mrb[122].mxu0  ;;  %v10363_v41 = vsub.f32 0.0, %v10360_v59  ;;  %v10361_v3 = vsub.f32 0.0, %v10358_v2  ;;  %v10362_v31 = vsub.f32 0.0, %v10359_v1 }
0x2d27   :  { %v9780_v60 = vsel %vm9774_vm9, %v9765_v5, %v9777_v10  ;;  %v9770_v19 = vadd.f32 %v11497_v11, %v9769_v4  ;;  %v13769_v49 = vpop.f32.mrb[123].mxu0 }
0x2d28   :  { %v9947_v7 = vpack.c.bf16 %v9780_v60, %v9779_v16  ;;  %v10368_v34 = vmul.f32 1.442695, %v10363_v41  ;;  %v10364_v61 = vmul.f32 1.442695, %v10361_v3  ;;  %v10366_v52 = vmul.f32 1.442695, %v10362_v31 }
0x2d29   :  { %vm9775_vm10 = vcmp.ge.f32.partialorder %v9770_v19, 0.0  ;;  %v9778_v20 = vmul.f32 0.1, %v9770_v19 }
0x2d2a   :  { %13798 = vmatprep.mubr.msk.bf16.mxu0 %vm120_vm0, %v9947_v7  ;;  %14231 = vpow2.f32 %v10368_v34 }
0x2d2b   :  { %v9781_v18 = vsel %vm9775_vm10, %v9770_v19, %v9778_v20  ;;  %14233 = vpow2.f32 %v10364_v61 }
0x2d2c   :  { %v9948_v43 = vpack.c.bf16 %v9781_v18, %v9781_v18  ;;  %14235 = vpow2.f32 %v10366_v52 }
0x2d2e   :  { %13799 = vmatmul.mubr.msk.bf16.vlgmr.msra.gmra.mrb[128].mxu0 %vm120_vm0, %v9948_v43 }
0x2d34   :  { %v14232_v26 = vpop.eup %14231 }
0x2d35   :  { %v14234_v25 = vpop.eup %14233  ;;  %v10372_v12 = vadd.f32 1.0, %v14232_v26 }
0x2d36   :  { %v14236_v5 = vpop.eup %14235  ;;  %v10370_v24 = vadd.f32 1.0, %v14234_v25 }
0x2d37   :  { %14237 = vlog2.f32 %v10372_v12  ;;  %v10371_v16 = vadd.f32 1.0, %v14236_v5 }
0x2d38   :  { %14239 = vlog2.f32 %v10370_v24 }
0x2d39   :  { %14241 = vlog2.f32 %v10371_v16 }
0x2d41   :  { %v14238_v48 = vpop.eup %14237 }
0x2d42   :  { %v14240_v2 = vpop.eup %14239  ;;  %v10378_v34 = vmul.f32 0.6931472, %v14238_v48 }
0x2d43   :  { %v14242_v52 = vpop.eup %14241 }
0x2df3   :  { %v13784_v33 = vpop.f32.mrb[124].mxu0 }
0x2df4   :  { %v9922_v36 = vadd.f32 %v13784_v33, %v17018_v58  ;;  %v9913_v32 = vpop.f32.mrb[125].mxu0 }
0x2df5   :  { %v9914_v9 = vadd.f32 %v9913_v32, %v17020_v51  ;;  %v13785_v11 = vpop.f32.mrb[126].mxu0  ;;  %v10376_v32 = vmul.f32 0.6931472, %v14242_v52 }
0x2df6   :  { %v17102_v29 = vadd.f32 %v11518_v23, %v9922_v36  ;;  %v9916_v50 = vpop.f32.mrb[127].mxu0  ;;  %v10355_v36 = vmax.f32 %v17085_v35, 0.0  ;;  %v10356_v11 = vmax.f32 %v17089_v28, 0.0 }
0x2df7   :  { %v17105_v46 = vadd.f32 %v11518_v23, %v9914_v9  ;;  %v9917_v40 = vadd.f32 %v9916_v50, %v17025_v37 }
0x2df8   :  { %v17109_v58 = vsub.f32 %v17102_v29, %v7151_v56  ;;  %v10511_v51 = vadd.f32 %v17102_v29, %v17005_v21  ;;  %v10380_v56 = vadd.f32 %v10376_v32, %v10356_v11  ;;  %v10231_v11 = vmul.f32 %v17102_v29, %v17102_v29 }
0x2df9   :  { %v17114_v10 = vadd.f32 %v11518_v23, %v9917_v40  ;;  %v17117_v4 = vsub.f32 %v17105_v46, %v7149_v14  ;;  %v10509_v39 = vadd.f32 %v17105_v46, %v16995_v57  ;;  %v11536_v57 = vld [vmem:[%s17298_s13 + $0x13] ss:$0 sm:$0xff]  ;;  %s14496_s13 = smov [#allocation4]  }
0x2dfa   :  { %10514 = vst.msk [vmem:[#allocation4 + $0x10] sm:$0xff] %vm120_vm0, %v10511_v51  ;;  %v10383_v40 = vmul.f32 0.9, %v10380_v56  ;;  %s10558_s0 = sshll.u32 %s14496_s13, 4  ;;  %s10559_s0 = int_to_ptr.vmem [resolvable:$true] %s10558_s0 }
0x2dfb   :  { %v17123_v37 = vsub.f32 %v17114_v10, %v7150_v44  ;;  %v10510_v21 = vadd.f32 %v17114_v10, %v16990_v42  ;;  %10512 = vst.msk [vmem:[#allocation4] sm:$0xff] %vm120_vm0, %v10509_v39  ;;  %s14353_s6 = scalar_lea.vmem %s10559_s0, 384  ;;  %p14358_p1 = scmp.lt.s32.totalorder %s10559_s0, %s10559_s0 }
0x2dfc   :  { %v10386_v39 = vadd.f32 0.1, %v10383_v40  ;;  %v10229_v40 = vmul.f32 %v17105_v46, %v17105_v46  ;;  %p14354_p0 = scmp.ne.s32.totalorder %s10559_s0, %s14353_s6  ;;  %p14359_p2 = scmp.lt.s32.totalorder %s14353_s6, %s14353_s6 }
0x2dfd   :  { %10513 = vst.msk [vmem:[#allocation4 + $0x8] sm:$0xff] %vm120_vm0, %v10510_v21 }
0x2dfe   :  { %v10390_v28 = vmul.f32 1.442695, %v10386_v39  ;;  %p14360_p3 = por %p14359_p2, %p14358_p1 }
0x2e00   :  { %p14361_p4 = pnand %p14360_p3, %p14354_p0 }
0x2e01   :  { %v13800_v63 = vpop.f32.mrb[128].mxu0 }
0x2e02   :  { %v10070_v60 = vadd.f32 %v13800_v63, %v17032_v54  ;;  %v10061_v19 = vpop.f32.mrb[129].mxu0  ;;  %v10374_v54 = vmul.f32 0.6931472, %v14240_v2 }
0x2e03   :  { %v10062_v49 = vadd.f32 %v10061_v19, %v17036_v47  ;;  %v13801_v7 = vpop.f32.mrb[130].mxu0  ;;  %v10357_v47 = vmax.f32 %v17082_v6, 0.0 }
0x2e04   :  { %v10085_v20 = vadd.f32 %v11536_v57, %v10070_v60  ;;  %v10064_v18 = vpop.f32.mrb[131].mxu0  ;;  %v10379_v9 = vadd.f32 %v10374_v54, %v10355_v36 }
0x2e05   :  { %v10083_v42 = vadd.f32 %v11536_v57, %v10062_v49  ;;  %v10065_v43 = vadd.f32 %v10064_v18, %v17041_v13  ;;  %v10381_v13 = vadd.f32 %v10378_v34, %v10357_v47 }
0x2e06   :  { %v10180_v59 = vand.u32 2147483647, %v10085_v20  ;;  %v10382_v50 = vmul.f32 0.9, %v10379_v9  ;;  %v10177_v60 = vmax.f32 %v10085_v20, 0.0 }
0x2e07   :  { %v10178_v41 = vand.u32 2147483647, %v10083_v42  ;;  %v10084_v1 = vadd.f32 %v11536_v57, %v10065_v43  ;;  %v10384_v25 = vmul.f32 0.9, %v10381_v13  ;;  %v10175_v49 = vmax.f32 %v10083_v42, 0.0 }
0x2e08   :  { %v10183_v3 = vsub.f32 0.0, %v10180_v59  ;;  %v10385_v6 = vadd.f32 0.1, %v10382_v50  ;;  %v10406_v50 = vmul.f32 %v17117_v4, %v17117_v4 }
0x2e09   :  { %v10181_v31 = vsub.f32 0.0, %v10178_v41  ;;  %v10179_v61 = vand.u32 2147483647, %v10084_v1  ;;  %v10387_v14 = vadd.f32 0.1, %v10384_v25  ;;  %v10176_v2 = vmax.f32 %v10084_v1, 0.0 }
0x2e0a   :  { %v10188_v30 = vmul.f32 1.442695, %v10183_v3  ;;  %v10388_v16 = vmul.f32 1.442695, %v10385_v6  ;;  %v10459_v25 = vsub.f32 %v16748_v0, %v17102_v29 }
0x2e0b   :  { %v10184_v33 = vmul.f32 1.442695, %v10181_v31  ;;  %v10182_v23 = vsub.f32 0.0, %v10179_v61  ;;  %v10392_v24 = vmul.f32 1.442695, %v10387_v14  ;;  %v10408_v14 = vmul.f32 %v17109_v58, %v17109_v58 }
0x2e0c   :  { %14243 = vpow2.f32 %v10188_v30 }
0x2e0d   :  { %14245 = vpow2.f32 %v10184_v33  ;;  %v10186_v26 = vmul.f32 1.442695, %v10182_v23 }
0x2e0f   :  { %14247 = vpow2.f32 %v10186_v26 }
0x2e16   :  { %v14244_v12 = vpop.eup %14243 }
0x2e17   :  { %v14246_v51 = vpop.eup %14245  ;;  %v10192_v5 = vadd.f32 1.0, %v14244_v12  ;;  %v10230_v12 = vmul.f32 %v17114_v10, %v17114_v10 }
0x2e18   :  { %v10190_v44 = vadd.f32 1.0, %v14246_v51 }
0x2e19   :  { %v14248_v35 = vpop.eup %14247  ;;  %14249 = vlog2.f32 %v10192_v5 }
0x2e1a   :  { %14251 = vlog2.f32 %v10190_v44  ;;  %v10191_v21 = vadd.f32 1.0, %v14248_v35 }
0x2e1c   :  { %14253 = vlog2.f32 %v10191_v21 }
0x2e1d   :  { %14255 = vpow2.f32 %v10392_v24 }
0x2e1e   :  { %14257 = vpow2.f32 %v10388_v16 }
0x2e1f   :  { %14259 = vpow2.f32 %v10390_v28 }
0x2e23   :  { %v14250_v63 = vpop.eup %14249 }
0x2e24   :  { %v14252_v57 = vpop.eup %14251  ;;  %v10198_v19 = vmul.f32 0.6931472, %v14250_v63 }
0x2e25   :  { %v10194_v7 = vmul.f32 0.6931472, %v14252_v57 }
0x2e26   :  { %v14254_v18 = vpop.eup %14253  ;;  %v10201_v43 = vadd.f32 %v10198_v19, %v10177_v60  ;;  %v10407_v60 = vmul.f32 %v17123_v37, %v17123_v37  ;;  %v10457_v19 = vsub.f32 %v16750_v62, %v17105_v46 }
0x2e27   :  { %v17138_v48 = vpop.eup %14255  ;;  %v10199_v59 = vadd.f32 %v10194_v7, %v10175_v49  ;;  %v10196_v41 = vmul.f32 0.6931472, %v14254_v18 }
0x2e28   :  { %v17140_v3 = vpop.eup %14257  ;;  %v10204_v34 = vmul.f32 0.9, %v10201_v43  ;;  %v10414_v54 = vmul.f32 2.0, %v17138_v48  ;;  %v10460_v37 = vmul.f32 %v10457_v19, %v10457_v19 }
0x2e29   :  { %v10202_v31 = vmul.f32 0.9, %v10199_v59  ;;  %v10200_v61 = vadd.f32 %v10196_v41, %v10176_v2  ;;  %v17143_v30 = vpop.eup %14259  ;;  %v10412_v47 = vmul.f32 2.0, %v17140_v3 }
0x2e2a   :  { %v10207_v52 = vadd.f32 0.1, %v10204_v34  ;;  %v10417_v1 = vmul.f32 %v17138_v48, %v10414_v54  ;;  %v10413_v13 = vmul.f32 2.0, %v17143_v30 }
0x2e2b   :  { %v10205_v20 = vadd.f32 0.1, %v10202_v31  ;;  %v10203_v42 = vmul.f32 0.9, %v10200_v61  ;;  %v10415_v26 = vmul.f32 %v17140_v3, %v10412_v47  ;;  %v10462_v31 = vmul.f32 %v10459_v25, %v10459_v25 }
0x2e2c   :  { %v10212_v33 = vmul.f32 1.442695, %v10207_v52  ;;  %v10416_v9 = vmul.f32 %v17143_v30, %v10413_v13 }
0x2e2d   :  { %v10208_v23 = vmul.f32 1.442695, %v10205_v20  ;;  %v10206_v36 = vadd.f32 0.1, %v10203_v42 }
0x2e2e   :  { %14261 = vpow2.f32 %v10212_v33  ;;  %v10465_v33 = vadd.f32 %v10462_v31, %v16822_v17 }
0x2e2f   :  { %14263 = vpow2.f32 %v10208_v23  ;;  %v10210_v32 = vmul.f32 1.442695, %v10206_v36  ;;  %v10463_v36 = vadd.f32 %v10460_v37, %v16826_v15 }
0x2e31   :  { %14265 = vpow2.f32 %v10210_v32 }
0x2e32   :  { %14267 = vrcp.f32 %v10417_v1 }
0x2e33   :  { %14269 = vrcp.f32 %v10415_v26 }
0x2e34   :  { %14271 = vrcp.f32 %v10416_v9 }
0x2e38   :  { %v14262_v56 = vpop.eup %14261 }
0x2e39   :  { %v14264_v6 = vpop.eup %14263  ;;  %14273 = vrcp.f32 %v14262_v56  ;;  %v10228_v51 = vmul.f32 %v14262_v56, %v14262_v56  ;;  %v10450_v5 = vmul.f32 %v14262_v56, %v16833_v45  ;;  %v10468_v44 = vmul.f32 2.0, %v14262_v56 }
0x2e3a   :  { %v10448_v0 = vmul.f32 %v14264_v6, %v16835_v27  ;;  %v10466_v29 = vmul.f32 2.0, %v14264_v6  ;;  %14275 = vrcp.f32 %v14264_v6  ;;  %v10226_v4 = vmul.f32 %v14264_v6, %v14264_v6 }
0x2e3b   :  { %v14266_v35 = vpop.eup %14265  ;;  %v17164_v24 = vadd.f32 %v10231_v11, %v10228_v51  ;;  %v10411_v58 = vadd.f32 %v10408_v14, %v10228_v51  ;;  %14277 = vlog2.f32 %v10450_v5  ;;  %v10471_v39 = vmul.f32 %v14262_v56, %v10468_v44 }
0x2e3c   :  { %v14268_v16 = vpop.eup %14267  ;;  %14279 = vlog2.f32 %v10448_v0  ;;  %v10469_v21 = vmul.f32 %v14264_v6, %v10466_v29  ;;  %v10409_v28 = vadd.f32 %v10406_v50, %v10226_v4  ;;  %v17166_v63 = vadd.f32 %v10229_v40, %v10226_v4 }
0x2e3d   :  { %v14270_v57 = vpop.eup %14269  ;;  %v17168_v45 = vmul.f32 %v14268_v16, %v10411_v58  ;;  %14281 = vrcp.f32 %v10471_v39  ;;  %v10227_v27 = vmul.f32 %v14266_v35, %v14266_v35  ;;  %v10449_v7 = vmul.f32 %v14266_v35, %v16841_v38 }
0x2e3e   :  { %14283 = vrcp.f32 %v10469_v21  ;;  %v10419_v49 = vmul.f32 %v14270_v57, %v10409_v28  ;;  %v10467_v59 = vmul.f32 2.0, %v14266_v35  ;;  %v14272_v2 = vpop.eup %14271  ;;  %v10458_v38 = vsub.f32 %v16755_v55, %v17114_v10 }
0x2e3f   :  { %14285 = vrcp.f32 %v14266_v35  ;;  %v17175_v18 = vadd.f32 %v10230_v12, %v10227_v27  ;;  %v10410_v43 = vadd.f32 %v10407_v60, %v10227_v27  ;;  %v10237_v0 = vmul.f32 0.03850304, %v17164_v24 }
0x2e40   :  { %14287 = vlog2.f32 %v10449_v7  ;;  %v10470_v34 = vmul.f32 %v14266_v35, %v10467_v59  ;;  %v10235_v16 = vmul.f32 0.03850304, %v17166_v63 }
0x2e41   :  { %v17177_v41 = vmul.f32 %v14272_v2, %v10410_v43  ;;  %v10236_v59 = vmul.f32 0.03850304, %v17175_v18 }
0x2e42   :  { %14289 = vrcp.f32 %v10470_v34 }
0x2e43   :  { %v14274_v61 = vpop.eup %14273 }
0x2e44   :  { %v14276_v52 = vpop.eup %14275  ;;  %v10219_v62 = vmul.f32 3.6036077, %v14274_v61  ;;  %v10396_v46 = vmul.f32 %v14274_v61, %v17138_v48  ;;  %v10461_v48 = vmul.f32 %v10458_v38, %v10458_v38 }
0x2e45   :  { %v14278_v54 = vpop.eup %14277  ;;  %v10394_v20 = vmul.f32 %v14276_v52, %v17140_v3  ;;  %v10215_v42 = vmul.f32 3.6036077, %v14276_v52 }
0x2e46   :  { %v14280_v47 = vpop.eup %14279  ;;  %14291 = vlog2.f32 %v10219_v62  ;;  %v10456_v13 = vmul.f32 0.6931472, %v14278_v54  ;;  %v10464_v17 = vadd.f32 %v10461_v48, %v16829_v8 }
0x2e47   :  { %v14282_v23 = vpop.eup %14281  ;;  %14293 = vlog2.f32 %v10394_v20  ;;  %v10452_v9 = vmul.f32 0.6931472, %v14280_v47 }
0x2e48   :  { %v14284_v1 = vpop.eup %14283  ;;  %14295 = vlog2.f32 %v10396_v46  ;;  %v10477_v32 = vmul.f32 %v14282_v23, %v10465_v33 }
0x2e49   :  { %v14286_v26 = vpop.eup %14285  ;;  %v10473_v55 = vmul.f32 %v14284_v1, %v10463_v36  ;;  %14297 = vlog2.f32 %v10215_v42 }
0x2e4a   :  { %v10480_v10 = vadd.f32 %v10477_v32, %v10456_v13  ;;  %v10217_v3 = vmul.f32 3.6036077, %v14286_v26  ;;  %v10395_v11 = vmul.f32 %v14286_v26, %v17143_v30  ;;  %v14288_v25 = vpop.eup %14287 }
0x2e4b   :  { %v10478_v56 = vadd.f32 %v10473_v55, %v10452_v9  ;;  %v10454_v14 = vmul.f32 0.6931472, %v14288_v25 }
0x2e4c   :  { %14299 = vlog2.f32 %v10217_v3  ;;  %v14290_v15 = vpop.eup %14289 }
0x2e4d   :  { %v11549_v50 = vadd.f32 -0.5, %v10478_v56  ;;  %14301 = vlog2.f32 %v10395_v11  ;;  %v10475_v40 = vmul.f32 %v14290_v15, %v10464_v17 }
0x2e4f   :  { %v10484_v12 = vsel %vm120_vm0, %v11549_v50, 0.0  ;;  %v10479_v51 = vadd.f32 %v10475_v40, %v10454_v14 }
0x2e50   :  { %v14292_v6 = vpop.eup %14291  ;;  %10485 = vadd.xlane.f32.xlu0 %v10484_v12 }
0x2e51   :  { %v14294_v5 = vpop.eup %14293  ;;  %v10225_v44 = vmul.f32 0.6931472, %v14292_v6  ;;  %v11550_v54 = vadd.f32 -0.5, %v10479_v51 }
0x2e52   :  { %v14296_v30 = vpop.eup %14295  ;;  %v10398_v29 = vmul.f32 0.6931472, %v14294_v5 }
0x2e53   :  { %v14298_v4 = vpop.eup %14297  ;;  %v10240_v35 = vadd.f32 %v10237_v0, %v10225_v44  ;;  %v10402_v58 = vmul.f32 0.6931472, %v14296_v30 }
0x2e54   :  { %v10424_v8 = vadd.f32 %v10419_v49, %v10398_v29  ;;  %v10221_v39 = vmul.f32 0.6931472, %v14298_v4  ;;  %v11551_v49 = vadd.f32 -0.5, %v10480_v10 }
0x2e55   :  { %v11542_v21 = vadd.f32 -0.5, %v10240_v35  ;;  %v10426_v28 = vadd.f32 %v17168_v45, %v10402_v58 }
0x2e56   :  { %v14300_v57 = vpop.eup %14299  ;;  %v11546_v27 = vadd.f32 -0.5, %v10424_v8  ;;  %v10238_v60 = vadd.f32 %v10235_v16, %v10221_v39  ;;  %v10490_v37 = vsel %vm120_vm0, %v11551_v49, 0.0 }
0x2e57   :  { %v14302_v19 = vpop.eup %14301  ;;  %v10250_v7 = vsel %vm120_vm0, %v11542_v21, 0.0  ;;  %v11548_v43 = vadd.f32 -0.5, %v10426_v28  ;;  %v10223_v24 = vmul.f32 0.6931472, %v14300_v57 }
0x2e58   :  { %10251 = vadd.xlane.f32.xlu1 %v10250_v7  ;;  %v10430_v2 = vsel %vm120_vm0, %v11546_v27, 0.0  ;;  %v10400_v34 = vmul.f32 0.6931472, %v14302_v19  ;;  %v11540_v61 = vadd.f32 -0.5, %v10238_v60 }
0x2e59   :  { %10431 = vadd.xlane.f32.xlu0 %v10430_v2  ;;  %v10239_v63 = vadd.f32 %v10236_v59, %v10223_v24  ;;  %v10436_v45 = vsel %vm120_vm0, %v11548_v43, 0.0 }
0x2e5a   :  { %v10425_v31 = vadd.f32 %v17177_v41, %v10400_v34  ;;  %v10244_v52 = vsel %vm120_vm0, %v11540_v61, 0.0  ;;  %v10487_v41 = vsel %vm120_vm0, %v11550_v54, 0.0 }
0x2e5b   :  { %v11541_v62 = vadd.f32 -0.5, %v10239_v63 }
0x2e5c   :  { %10437 = vadd.xlane.f32.xlu1 %v10436_v45  ;;  %v11547_v46 = vadd.f32 -0.5, %v10425_v31 }
0x2e5d   :  { %10491 = vadd.xlane.f32.xlu0 %v10490_v37  ;;  %v10247_v18 = vsel %vm120_vm0, %v11541_v62, 0.0 }
0x2e5e   :  { %v10433_v38 = vsel %vm120_vm0, %v11547_v46, 0.0 }
0x2e60   :  { %10245 = vadd.xlane.f32.xlu1 %v10244_v52 }
0x2e64   :  { %10248 = vadd.xlane.f32.xlu1 %v10247_v18 }
0x2e68   :  { %10434 = vadd.xlane.f32.xlu1 %v10433_v38 }
0x2e6c   :  { %10488 = vadd.xlane.f32.xlu1 %v10487_v41 }
0x2e6d   :  { %14364 = shalt.err (!%p14361_p4)
}
0x2e6e   :  { %s14365_s5 = scalar_lea.hbm %s17301_s16, 384 }
0x2e6f   :  { %p14366_p5 = scmp.ne.s32.totalorder %s17301_s16, %s14365_s5  ;;  %p14369_p6 = scmp.lt.u32.totalorder %s14365_s5, %s17301_s16 }
0x2e71   :  { %p14371_p7 = pnand %p14369_p6, %p14366_p5 }
0x2e73   :  { %14374 = shalt.err (!%p14371_p7)
}
0x2e74   :  { %s14498_s15 = smov 128   ;;  %s14499_s8 = smov 8  }
0x2e75   :  { %10564 = dma.vmem_to_hbm [thread:$0]  %s10559_s0, 384, %s17301_s16, [#allocation5], %s14498_s15, %s14498_s15, %s14499_s8  }
0x2e76   :  { %s14375_s25 = scalar_lea.vmem %s10584_s30, 16  ;;  %s14379_s11 = scalar_lea.vmem %s10584_s30, 32 }
0x2e77   :  { %p14376_p8 = scmp.ne.s32.totalorder %s10584_s30, %s14375_s25  ;;  %p14380_p9 = scmp.lt.s32.totalorder %s10584_s30, %s10584_s30 }
0x2e78   :  { %p14381_p10 = scmp.lt.s32.totalorder %s14379_s11, %s14375_s25 }
0x2e7a   :  { %p14382_p11 = por %p14381_p10, %p14380_p9 }
0x2e7c   :  { %p14383_p12 = pnand %p14382_p11, %p14376_p8 }
0x2e7e   :  { %14386 = shalt.err (!%p14383_p12)
}
0x2e7f   :  { %s14387_s7 = scalar_lea.hbm %s17304_s19, 16 }
0x2e80   :  { %p14388_p13 = scmp.ne.s32.totalorder %s17304_s19, %s14387_s7  ;;  %p14391_p0 = scmp.lt.u32.totalorder %s14387_s7, %s17304_s19 }
0x2e82   :  { %p14393_p1 = pnand %p14391_p0, %p14388_p13 }
0x2e84   :  { %14396 = shalt.err (!%p14393_p1)
}
0x2e85   :  { %10586 = dma.vmem_to_hbm [thread:$0]  %s10584_s30, 16, %s17304_s19, [#allocation8]  }
0x2e86   :  { %s14500_s0 = smov [#allocation2]  }
0x2e87   :  { %s10544_s4 = sshll.u32 %s14500_s0, 4  ;;  %s10545_s4 = int_to_ptr.vmem [resolvable:$true] %s10544_s4 }
0x2e88   :  { %s14397_s6 = scalar_lea.vmem %s10545_s4, 384  ;;  %p14402_p3 = scmp.lt.s32.totalorder %s10545_s4, %s10545_s4 }
0x2e89   :  { %p14398_p2 = scmp.ne.s32.totalorder %s10545_s4, %s14397_s6  ;;  %p14403_p4 = scmp.lt.s32.totalorder %s14397_s6, %s14397_s6 }
0x2e8b   :  { %p14404_p5 = por %p14403_p4, %p14402_p3 }
0x2e8d   :  { %p14405_p6 = pnand %p14404_p5, %p14398_p2 }
0x2e8f   :  { %14408 = shalt.err (!%p14405_p6)
}
0x2e90   :  { %s14409_s5 = scalar_lea.hbm %s17299_s14, 384 }
0x2e91   :  { %p14410_p7 = scmp.ne.s32.totalorder %s17299_s14, %s14409_s5  ;;  %p14413_p8 = scmp.lt.u32.totalorder %s14409_s5, %s17299_s14 }
0x2e93   :  { %p14415_p9 = pnand %p14413_p8, %p14410_p7 }
0x2e95   :  { %14418 = shalt.err (!%p14415_p9)
}
0x2e96   :  { %10550 = dma.vmem_to_hbm [thread:$0]  %s10545_s4, 384, %s17299_s14, [#allocation3], %s14498_s15, %s14498_s15, %s14499_s8   ;;  %v10167_v33 = vrot.slane %v16863_v22, 4 }
0x2e97   :  { %s14501_s14 = smov [#allocation9]   ;;  %s14502_s8 = smov [#allocation10]  }
0x2e98   :  { %v10168_v1 = vadd.f32 %v10167_v33, %v16863_v22  ;;  %s10593_s15 = sshll.u32 %s14501_s14, 4  ;;  %s10603_s2 = sshll.u32 %s14502_s8, 4  ;;  %s10594_s15 = int_to_ptr.vmem [resolvable:$true] %s10593_s15  ;;  %s10604_s2 = int_to_ptr.vmem [resolvable:$true] %s10603_s2 }
0x2e99   :  { %s14419_s26 = scalar_lea.vmem %s10594_s15, 16  ;;  %s14423_s25 = scalar_lea.vmem %s10594_s15, 32 }
0x2e9a   :  { %v10169_v9 = vrot.slane %v10168_v1, 2  ;;  %p14420_p10 = scmp.ne.s32.totalorder %s10594_s15, %s14419_s26  ;;  %p14424_p11 = scmp.lt.s32.totalorder %s10594_s15, %s10594_s15 }
0x2e9b   :  { %p14425_p12 = scmp.lt.s32.totalorder %s14423_s25, %s14419_s26 }
0x2e9c   :  { %v10170_v56 = vadd.f32 %v10169_v9, %v10168_v1 }
0x2e9d   :  { %p14426_p13 = por %p14425_p12, %p14424_p11 }
0x2e9e   :  { %v10171_v51 = vrot.slane %v10170_v56, 1 }
0x2e9f   :  { %p14427_p0 = pnand %p14426_p13, %p14420_p10 }
0x2ea0   :  { %v10172_v4 = vadd.f32 %v10171_v51, %v10170_v56 }
0x2ea2   :  { %v10174_v21 = vmul.f32 0.041666668, %v10172_v4 }
0x2edd   :  { %v10486_v23 = vpop.xlane.xlu0 %10485 }
0x2ee5   :  { %v10252_v20 = vpop.xlane.xlu1 %10251 }
0x2ee6   :  { %v10432_v48 = vpop.xlane.xlu0 %10431 }
0x2ee9   :  { %v10438_v42 = vpop.xlane.xlu1 %10437 }
0x2eea   :  { %v10492_v14 = vpop.xlane.xlu0 %10491 }
0x2eed   :  { %v10246_v47 = vpop.xlane.xlu1 %10245 }
0x2ef1   :  { %v10249_v36 = vpop.xlane.xlu1 %10248 }
0x2ef2   :  { %v10253_v13 = vadd.f32 %v10249_v36, %v10246_v47 }
0x2ef4   :  { %v10254_v32 = vadd.f32 %v10253_v13, %v10252_v20 }
0x2ef5   :  { %v10435_v26 = vpop.xlane.xlu1 %10434 }
0x2ef6   :  { %v10255_v55 = vrot.slane %v10254_v32, 4  ;;  %v10439_v10 = vadd.f32 %v10435_v26, %v10432_v48 }
0x2ef8   :  { %v10256_v3 = vadd.f32 %v10255_v55, %v10254_v32  ;;  %v10440_v11 = vadd.f32 %v10439_v10, %v10438_v42 }
0x2ef9   :  { %v10489_v25 = vpop.xlane.xlu1 %10488 }
0x2efa   :  { %v10257_v17 = vrot.slane %v10256_v3, 2  ;;  %v10441_v15 = vrot.slane %v10440_v11, 4  ;;  %v10493_v50 = vadd.f32 %v10489_v25, %v10486_v23 }
0x2efc   :  { %v10258_v40 = vadd.f32 %v10257_v17, %v10256_v3  ;;  %v10442_v12 = vadd.f32 %v10441_v15, %v10440_v11  ;;  %v10494_v6 = vadd.f32 %v10493_v50, %v10492_v14 }
0x2efe   :  { %v10259_v22 = vrot.slane %v10258_v40, 1  ;;  %v10443_v5 = vrot.slane %v10442_v12, 2  ;;  %v10495_v44 = vrot.slane %v10494_v6, 4 }
0x2f00   :  { %v10260_v0 = vadd.f32 %v10259_v22, %v10258_v40  ;;  %v10444_v30 = vadd.f32 %v10443_v5, %v10442_v12  ;;  %v10496_v29 = vadd.f32 %v10495_v44, %v10494_v6 }
0x2f02   :  { %v10445_v35 = vrot.slane %v10444_v30, 1  ;;  %v10497_v58 = vrot.slane %v10496_v29, 2  ;;  %v10261_v8 = vmul.f32 0.041666668, %v10260_v0 }
0x2f04   :  { %v10498_v39 = vadd.f32 %v10497_v58, %v10496_v29  ;;  %v10446_v16 = vadd.f32 %v10445_v35, %v10444_v30  ;;  %v10527_v19 = vadd.f32 %v10261_v8, %v10174_v21 }
0x2f06   :  { %v10499_v28 = vrot.slane %v10498_v39, 1  ;;  %v10447_v57 = vmul.f32 0.041666668, %v10446_v16 }
0x2f08   :  { %v10500_v27 = vadd.f32 %v10499_v28, %v10498_v39  ;;  %v10529_v60 = vadd.f32 %v10447_v57, %v16865_v53  ;;  %10537 = vst.msk [vmem:[#allocation9] sm:$0x1] %vm10534_vm8, %v10447_v57 }
0x2f09   :  { %14430 = shalt.err (!%p14427_p0)
}
0x2f0a   :  { %s14431_s27 = scalar_lea.hbm %s17305_s20, 16 }
0x2f0b   :  { %p14432_p1 = scmp.ne.s32.totalorder %s17305_s20, %s14431_s27  ;;  %p14435_p2 = scmp.lt.u32.totalorder %s14431_s27, %s17305_s20 }
0x2f0d   :  { %p14437_p3 = pnand %p14435_p2, %p14432_p1 }
0x2f0f   :  { %14440 = shalt.err (!%p14437_p3)
}
0x2f10   :  { %10596 = dma.vmem_to_hbm [thread:$0]  %s10594_s15, 16, %s17305_s20, [#allocation8]   ;;  %v10530_v53 = vmul.f32 0.1, %v10529_v60  ;;  %v10501_v7 = vmul.f32 0.041666668, %v10500_v27 }
0x2f11   :  { %v10528_v24 = vmul.f32 0.1, %v10527_v19  ;;  %s14503_s13 = smov [#allocation6]   ;;  %s14441_s4 = scalar_lea.vmem %s10604_s2, 16 }
0x2f12   :  { %v10502_v43 = vsub.f32 0.0, %v10501_v7  ;;  %s10573_s0 = sshll.u32 %s14503_s13, 4  ;;  %p14442_p4 = scmp.ne.s32.totalorder %s10604_s2, %s14441_s4  ;;  %s10574_s0 = int_to_ptr.vmem [resolvable:$true] %s10573_s0 }
0x2f13   :  { %v10531_v59 = vadd.f32 %v10530_v53, %v10528_v24  ;;  %s14445_s6 = scalar_lea.vmem %s10604_s2, 32  ;;  %p14446_p5 = scmp.lt.s32.totalorder %s10604_s2, %s10604_s2 }
0x2f14   :  { %v10532_v2 = vmul.f32 0.1, %v10502_v43  ;;  %10538 = vst.msk [vmem:[#allocation10] sm:$0x1] %vm10534_vm8, %v10502_v43  ;;  %p14447_p6 = scmp.lt.s32.totalorder %s14445_s6, %s14441_s4 }
0x2f16   :  { %p14448_p7 = por %p14447_p6, %p14446_p5 }
0x2f18   :  { %p14449_p8 = pnand %p14448_p7, %p14442_p4 }
0x2f1a   :  { %14452 = shalt.err (!%p14449_p8)
}
0x2f1b   :  { %s14453_s17 = scalar_lea.hbm %s17306_s21, 16 }
0x2f1c   :  { %p14454_p9 = scmp.ne.s32.totalorder %s17306_s21, %s14453_s17  ;;  %p14457_p10 = scmp.lt.u32.totalorder %s14453_s17, %s17306_s21 }
0x2f1e   :  { %p14459_p11 = pnand %p14457_p10, %p14454_p9 }
0x2f20   :  { %14462 = shalt.err (!%p14459_p11)
}
0x2f21   :  { %10606 = dma.vmem_to_hbm [thread:$0]  %s10604_s2, 16, %s17306_s21, [#allocation11]   ;;  %v10533_v49 = vsub.f32 %v10531_v59, %v10532_v2 }
0x2f22   :  { %s14463_s24 = scalar_lea.vmem %s10574_s0, 16  ;;  %s14467_s14 = scalar_lea.vmem %s10574_s0, 32 }
0x2f23   :  { %10535 = vst.msk [vmem:[#allocation6] sm:$0x1] %vm10534_vm8, %v10533_v49  ;;  %p14464_p12 = scmp.ne.s32.totalorder %s10574_s0, %s14463_s24  ;;  %p14468_p13 = scmp.lt.s32.totalorder %s10574_s0, %s10574_s0 }
0x2f24   :  { %p14469_p0 = scmp.lt.s32.totalorder %s14467_s14, %s14463_s24 }
0x2f26   :  { %p14470_p1 = por %p14469_p0, %p14468_p13 }
0x2f28   :  { %p14471_p2 = pnand %p14470_p1, %p14464_p12 }
0x2f2a   :  { %14474 = shalt.err (!%p14471_p2)
}
0x2f2b   :  { %s14475_s26 = scalar_lea.hbm %s17303_s18, 16 }
0x2f2c   :  { %p14476_p3 = scmp.ne.s32.totalorder %s17303_s18, %s14475_s26  ;;  %p14479_p4 = scmp.lt.u32.totalorder %s14475_s26, %s17303_s18 }
0x2f2e   :  { %p14481_p5 = pnand %p14479_p4, %p14476_p3 }
0x2f30   :  { %14484 = shalt.err (!%p14481_p5)
}
0x2f31   :  { %10576 = dma.vmem_to_hbm [thread:$0]  %s10574_s0, 16, %s17303_s18, [#allocation5]  }
0x2f32   :  { %14485 = dma.done.wait [#allocation3], 384  }
0x2f33   :  { %14486 = vsyncadd [#allocation3], 4294966912 }
0x2f34   :  { %14487 = dma.done.wait [#allocation5], 400  }
0x2f35   :  { %14488 = vsyncadd [#allocation5], 4294966896 }
0x2f36   :  { %14489 = dma.done.wait [#allocation8], 32  }
0x2f37   :  { %14490 = vsyncadd [#allocation8], 4294967264 }
0x2f38   :  { %14491 = dma.done.wait [#allocation11], 16  }
0x2f39   :  { %14492 = vsyncadd [#allocation11], 4294967280 }
0x2f3a   :  { %10629 = vsyncpa [#allocation3], 1 }
0x2f3b   :  { %10630 = vsyncpa [#allocation5], 1 }
0x2f3c   :  { %10631 = vsyncpa [#allocation8], 1 }
0x2f3d   :  { %10632 = vsyncpa [#allocation11], 1 }

</bundles_post_ra>
